<compile_context>
chip_gen: v5e
topology: v5e:2x2
jax: 0.10.0
libtpu: 0.0.40
codegen_flags: <defaults>
</compile_context>

<pallas_src>
import functools

import jax
import jax.numpy as jnp
from jax import lax
from jax.experimental import pallas as pl
from jax.experimental.pallas import tpu as pltpu


# ---------------------------------------------------------------------------
# Kernel
# ---------------------------------------------------------------------------
def _make_kernel(hp):
    """hp = hidden size padded to a multiple of 8 (10 -> 16)."""
    R_WX, R_WZ, R_WHH = 0, 8, 16
    R_BI, R_BH, R_B1, R_BHEAD = 16 + hp, 17 + hp, 18 + hp, 19 + hp
    R_W1, R_WHEAD = 24 + hp, 24 + 2 * hp

    def kernel(xz_ref, w_ref, out_ref):
        # xz_ref: (T+1, B_tile, 8)  rows 0..T-1 = x_t (p cols real), row T = z
        # w_ref : (24 + 3*hp, 128)  packed, every block 8-row aligned
        # out_ref: (B_tile, 128)    lane 0 = mean, lane 1 = var, rest 0
        T = xz_ref.shape[0] - 1
        bt = xz_ref.shape[1]

        # 8-row-aligned static slices of the resident weight slab.
        wx = w_ref[R_WX:R_WX + 8, :]                 # (8, 128)   x -> gates
        wz = w_ref[R_WZ:R_WZ + 8, :]                 # (8, 128)   z -> gates
        whh = w_ref[R_WHH:R_WHH + hp, :]             # (hp, 128)  h -> gates
        bias_i = w_ref[R_BI:R_BI + 1, :]             # (1, 128)   [bir+bhr|biz+bhz|bin]
        bias_h = w_ref[R_BH:R_BH + 1, :]             # (1, 128)   [0|0|bhn]
        b1 = w_ref[R_B1:R_B1 + 1, 0:hp]              # (1, hp)
        bhead = w_ref[R_BHEAD:R_BHEAD + 1, :]        # (1, 128)   [bm, blv, 0...]
        w1 = w_ref[R_W1:R_W1 + hp, 0:hp]             # (hp, hp)
        whead = w_ref[R_WHEAD:R_WHEAD + hp, :]       # (hp, 128)  [Wm, Wlv, 0...]

        # z is constant over time: one hoisted matmul, biases folded in.
        z8 = xz_ref[T]                               # (bt, 8)
        gi_z = jnp.dot(z8, wz, preferred_element_type=jnp.float32) + bias_i

        # Recurrent loop, fully unrolled; batch rides in the matmul M dim.
        h = jnp.zeros((bt, hp), jnp.float32)
        for t in range(T):
            x8 = xz_ref[t]                           # (bt, 8), free leading index
            gi = jnp.dot(x8, wx, preferred_element_type=jnp.float32) + gi_z
            gh = jnp.dot(h, whh, preferred_element_type=jnp.float32) + bias_h
            # r and z gates are lane-adjacent: one fused sigmoid (one EUP push).
            s = jax.nn.sigmoid(gi[:, 0:2 * hp] + gh[:, 0:2 * hp])
            r, zg = s[:, 0:hp], s[:, hp:2 * hp]
            n = jnp.tanh(gi[:, 2 * hp:3 * hp] + r * gh[:, 2 * hp:3 * hp])
            h = n + zg * (h - n)                     # == (1-z)*n + z*h

        # MLP head; whead is 128-lane wide -> output is already lane-dense.
        h1 = jnp.maximum(
            jnp.dot(h, w1, preferred_element_type=jnp.float32) + b1, 0.0)
        out = jnp.dot(h1, whead, preferred_element_type=jnp.float32) + bhead
        # lane 0 = mean, lane 1 = log_var; matrix_exp of a 1x1 matrix == exp.
        col = lax.broadcasted_iota(jnp.int32, out.shape, 1)
        out_ref[...] = jnp.where(col == 1, jnp.exp(out), out)

    return kernel


# ---------------------------------------------------------------------------
# Parameters
# ---------------------------------------------------------------------------
def init_params(key, p=2, hidden_dim=10, latent_dim=4):
    H = hidden_dim
    k = jax.random.split(key, 11)
    s = 1.0 / jnp.sqrt(jnp.float32(H))
    u = lambda kk, shape: jax.random.uniform(kk, shape, jnp.float32, -s, s)
    return {
        # GRU (gate order r, z, n); stored transposed (gate, K, H).
        "wih_x": u(k[0], (3, p, H)),
        "wih_z": u(k[1], (3, latent_dim, H)),
        "whh":  u(k[2], (3, H, H)),
        "bih":  u(k[3], (3, 1, H)),
        "bhh":  u(k[4], (3, 1, H)),
        # MLP: input_mlp (H->H), mean_mlp (H->1), log_var_mlp (H->1)
        "w1":   u(k[5], (H, H)),
        "b1":   u(k[6], (1, H)),
        "wm":   u(k[7], (H, 1)),
        "bm":   u(k[8], (1, 1)),
        "wlv":  u(k[9], (H, 1)),
        "blv":  u(k[10], (1, 1)),
    }


def pack_params(params):
    """Pack all parameters into one (24 + 3*hp, 128) f32 slab.

    Every logical block starts on an 8-row (sublane-tile) boundary; the hidden
    dim is padded to hp (mult. of 8) and gate g occupies lanes [g*hp, g*hp+H).
    Row map (hp=16): 0..7 Wx | 8..15 Wz | 16..31 Whh | 32..39 biases
    (32 bias_i, 33 bias_h, 34 b1, 35 bhead) | 40..55 W1 | 56..71 Whead.
    Zero padding keeps the extra hidden columns exactly zero through the
    recurrence, so results are bit-for-bit the H=10 computation.
    """
    H = params["whh"].shape[-1]
    hp = ((H + 7) // 8) * 8
    p_ = params["wih_x"].shape[1]
    lat = params["wih_z"].shape[1]
    assert 3 * hp <= 128 and p_ <= 8 and lat <= 8
    rows = 24 + 3 * hp
    R_WX, R_WZ, R_WHH = 0, 8, 16
    R_BI, R_BH, R_B1, R_BHEAD = 16 + hp, 17 + hp, 18 + hp, 19 + hp
    R_W1, R_WHEAD = 24 + hp, 24 + 2 * hp

    W = jnp.zeros((rows, 128), jnp.float32)
    for g in range(3):
        c = g * hp
        W = W.at[R_WX:R_WX + p_, c:c + H].set(params["wih_x"][g])
        W = W.at[R_WZ:R_WZ + lat, c:c + H].set(params["wih_z"][g])
        W = W.at[R_WHH:R_WHH + H, c:c + H].set(params["whh"][g])
        if g < 2:  # r, z: input+hidden biases can be pre-combined
            W = W.at[R_BI, c:c + H].set((params["bih"][g] + params["bhh"][g])[0])
        else:      # n: b_in only; b_hn stays inside the r* term
            W = W.at[R_BI, c:c + H].set(params["bih"][g][0])
    W = W.at[R_BH, 2 * hp:2 * hp + H].set(params["bhh"][2][0])
    W = W.at[R_B1, 0:H].set(params["b1"][0])
    W = W.at[R_BHEAD, 0].set(params["bm"][0, 0])
    W = W.at[R_BHEAD, 1].set(params["blv"][0, 0])
    W = W.at[R_W1:R_W1 + H, 0:H].set(params["w1"])
    W = W.at[R_WHEAD:R_WHEAD + H, 0].set(params["wm"][:, 0])
    W = W.at[R_WHEAD:R_WHEAD + H, 1].set(params["wlv"][:, 0])
    return W


# ---------------------------------------------------------------------------
# Wrappers
# ---------------------------------------------------------------------------
def generative_model_x_forward_batched(w_packed, x_old_b, z_b, *, batch_tile=128):
    """x_old_b: (B, T, p), z_b: (B, latent). Returns (None, mean(B,1), var(B,1))."""
    B, T, p_ = x_old_b.shape
    lat = z_b.shape[-1]
    rows = w_packed.shape[0]
    hp = (rows - 24) // 3

    n_blk = -(-B // batch_tile)
    Bp = n_blk * batch_tile

    # One packed input: x in rows 0..T-1, z in row T; features padded to 8 so
    # the kernel's K dim matches the 8-row weight blocks with no slicing.
    xz = jnp.zeros((T + 1, Bp, 8), jnp.float32)
    xz = xz.at[:T, :B, :p_].set(jnp.swapaxes(x_old_b.astype(jnp.float32), 0, 1))
    xz = xz.at[T, :B, :lat].set(z_b.astype(jnp.float32).reshape(B, lat))

    out = pl.pallas_call(
        _make_kernel(hp),
        out_shape=jax.ShapeDtypeStruct((Bp, 128), jnp.float32),
        grid=(n_blk,),
        in_specs=[
            pl.BlockSpec((T + 1, batch_tile, 8), lambda b: (0, b, 0)),
            pl.BlockSpec((rows, 128), lambda b: (0, 0)),   # weights resident
        ],
        out_specs=pl.BlockSpec((batch_tile, 128), lambda b: (b, 0)),
        compiler_params=pltpu.CompilerParams(
            dimension_semantics=("parallel",),   # shard batch blocks over TCs
            vmem_limit_bytes=32 * 1024 * 1024,   # block footprint ~1.3 MiB
        ),
    )(xz, w_packed.astype(jnp.float32))

    return None, out[:B, 0:1], out[:B, 1:2]


def generative_model_x_forward(w_packed, x_old, z, *, batch_tile=128):
    """Original-module signature: x_old (T, p), z (1, latent) -> (None, (1,1), (1,1))."""
    _, mean, var = generative_model_x_forward_batched(
        w_packed, x_old[None], z.reshape(1, -1), batch_tile=batch_tile)
    return None, mean, var
    # TODO(synk): the MLP.reparametrization sampling path is unused by
    # forward (samples is None); GRU dropout is a no-op for a single layer.


# ---------------------------------------------------------------------------
# Pure-JAX reference of the PyTorch forward
# ---------------------------------------------------------------------------
def reference_forward(params, x_old, z):
    hi = jax.lax.Precision.HIGHEST
    dot = functools.partial(jnp.dot, precision=hi)
    T = x_old.shape[0]
    H = params["whh"].shape[-1]
    zz = z.reshape(1, -1).astype(jnp.float32)
    h = jnp.zeros((1, H), jnp.float32)
    for t in range(T):
        x_t = x_old[t:t + 1].astype(jnp.float32)
        gi = [dot(x_t, params["wih_x"][g]) + dot(zz, params["wih_z"][g])
              + params["bih"][g] for g in range(3)]
        gh = [dot(h, params["whh"][g]) + params["bhh"][g] for g in range(3)]
        r = jax.nn.sigmoid(gi[0] + gh[0])
        zg = jax.nn.sigmoid(gi[1] + gh[1])
        n = jnp.tanh(gi[2] + r * gh[2])
        h = (1.0 - zg) * n + zg * h
    h1 = jnp.maximum(dot(h, params["w1"]) + params["b1"], 0.0)
    mean = dot(h1, params["wm"]) + params["bm"]
    var = jnp.exp(dot(h1, params["wlv"]) + params["blv"])
    return mean, var


# ---------------------------------------------------------------------------
if __name__ == "__main__":
    key = jax.random.PRNGKey(0)
    kp, kx, kz = jax.random.split(key, 3)

    p, hidden_dim, latent_dim = 2, 10, 4
    T = 8          # n_repetitions (= x_old.shape[0])
    B = 256        # samples per kernel call (2 batch blocks of 128)

    params = init_params(kp, p=p, hidden_dim=hidden_dim, latent_dim=latent_dim)
    w_packed = pack_params(params)

    x_b = jax.random.normal(kx, (B, T, p), jnp.float32)
    z_b = jax.random.normal(kz, (B, latent_dim), jnp.float32)

    fwd = jax.jit(generative_model_x_forward_batched)
    _, mean, var = fwd(w_packed, x_b, z_b)
    jax.block_until_ready((mean, var))

    rmean, rvar = jax.vmap(lambda xo, zz: reference_forward(params, xo, zz))(x_b, z_b)
    rmean = rmean.reshape(B, 1)
    rvar = rvar.reshape(B, 1)

    assert mean.shape == (B, 1) and var.shape == (B, 1)
    assert bool(jnp.all(jnp.isfinite(mean))) and bool(jnp.all(jnp.isfinite(var)))
    assert jnp.allclose(mean, rmean, atol=1e-3, rtol=1e-3), (
        float(jnp.max(jnp.abs(mean - rmean))))
    assert jnp.allclose(var, rvar, atol=1e-3, rtol=1e-3), (
        float(jnp.max(jnp.abs(var - rvar))))

    # Original single-sample API (semantics of GenerativeModelX.forward).
    _, m1, v1 = generative_model_x_forward(w_packed, x_b[0], z_b[0:1])
    jax.block_until_ready((m1, v1))
    assert m1.shape == (1, 1) and v1.shape == (1, 1)
    assert jnp.allclose(m1, rmean[0:1], atol=1e-3, rtol=1e-3)
    assert jnp.allclose(v1, rvar[0:1], atol=1e-3, rtol=1e-3)

    print("KERNEL_OK")
</pallas_src>

<mosaic_0001>
module attributes {stable_mosaic.version = 11 : i64} {
  func.func @kernel(%arg0: i32, %arg1: memref<9x128x8xf32, #tpu.memory_space<vmem>>, %arg2: memref<72x128xf32, #tpu.memory_space<vmem>>, %arg3: memref<128x128xf32, #tpu.memory_space<vmem>>) attributes {dimension_semantics = [#tpu.dimension_semantics<parallel>], iteration_bounds = array<i64: 2>, scalar_prefetch = 0 : i64, scratch_operands = 0 : i64, tpu.core_type = #tpu.core_type<tc>, window_params = [{transform_indices = @transform_0, window_bounds = array<i64: 9, 128, 8>}, {pipeline_mode = #tpu.pipeline_mode<synchronous>, transform_indices = @transform_1, window_bounds = array<i64: 72, 128>}, {transform_indices = @transform_2, window_bounds = array<i64: 128, 128>}]} {
    %c0 = arith.constant 0 : index
    %c0_0 = arith.constant 0 : index
    %0 = vector.load %arg2[%c0, %c0_0] : memref<72x128xf32, #tpu.memory_space<vmem>>, vector<8x128xf32>
    %c8 = arith.constant 8 : index
    %c0_1 = arith.constant 0 : index
    %1 = vector.load %arg2[%c8, %c0_1] : memref<72x128xf32, #tpu.memory_space<vmem>>, vector<8x128xf32>
    %c16 = arith.constant 16 : index
    %c0_2 = arith.constant 0 : index
    %2 = vector.load %arg2[%c16, %c0_2] : memref<72x128xf32, #tpu.memory_space<vmem>>, vector<16x128xf32>
    %c32 = arith.constant 32 : index
    %c0_3 = arith.constant 0 : index
    %3 = vector.load %arg2[%c32, %c0_3] : memref<72x128xf32, #tpu.memory_space<vmem>>, vector<1x128xf32>
    %c33 = arith.constant 33 : index
    %c0_4 = arith.constant 0 : index
    %4 = vector.load %arg2[%c33, %c0_4] : memref<72x128xf32, #tpu.memory_space<vmem>>, vector<1x128xf32>
    %c34 = arith.constant 34 : index
    %c0_5 = arith.constant 0 : index
    %5 = vector.load %arg2[%c34, %c0_5] : memref<72x128xf32, #tpu.memory_space<vmem>>, vector<1x16xf32>
    %c35 = arith.constant 35 : index
    %c0_6 = arith.constant 0 : index
    %6 = vector.load %arg2[%c35, %c0_6] : memref<72x128xf32, #tpu.memory_space<vmem>>, vector<1x128xf32>
    %c40 = arith.constant 40 : index
    %c0_7 = arith.constant 0 : index
    %7 = vector.load %arg2[%c40, %c0_7] : memref<72x128xf32, #tpu.memory_space<vmem>>, vector<16x16xf32>
    %c56 = arith.constant 56 : index
    %c0_8 = arith.constant 0 : index
    %8 = vector.load %arg2[%c56, %c0_8] : memref<72x128xf32, #tpu.memory_space<vmem>>, vector<16x128xf32>
    %c8_9 = arith.constant 8 : index
    %c0_10 = arith.constant 0 : index
    %c0_11 = arith.constant 0 : index
    %9 = vector.load %arg1[%c8_9, %c0_10, %c0_11] : memref<9x128x8xf32, #tpu.memory_space<vmem>>, vector<1x128x8xf32>
    %10 = vector.shape_cast %9 : vector<1x128x8xf32> to vector<128x8xf32>
    %cst = arith.constant dense<0.000000e+00> : vector<128x128xf32>
    %11 = tpu.matmul %10, %1, %cst {dimension_numbers = #tpu.dot_dimension_numbers<[1], [0], [0], [1], [0, 0, 1, 1], [], []>} : vector<128x8xf32>, vector<8x128xf32>, vector<128x128xf32> -> vector<128x128xf32>
    %12 = vector.broadcast %3 : vector<1x128xf32> to vector<128x128xf32>
    %13 = arith.addf %11, %12 : vector<128x128xf32>
    %cst_12 = arith.constant 0.000000e+00 : f32
    %14 = vector.broadcast %cst_12 : f32 to vector<128x16xf32>
    %c0_13 = arith.constant 0 : index
    %c0_14 = arith.constant 0 : index
    %c0_15 = arith.constant 0 : index
    %15 = vector.load %arg1[%c0_13, %c0_14, %c0_15] : memref<9x128x8xf32, #tpu.memory_space<vmem>>, vector<1x128x8xf32>
    %16 = vector.shape_cast %15 : vector<1x128x8xf32> to vector<128x8xf32>
    %cst_16 = arith.constant dense<0.000000e+00> : vector<128x128xf32>
    %17 = tpu.matmul %16, %0, %cst_16 {dimension_numbers = #tpu.dot_dimension_numbers<[1], [0], [0], [1], [0, 0, 1, 1], [], []>} : vector<128x8xf32>, vector<8x128xf32>, vector<128x128xf32> -> vector<128x128xf32>
    %18 = arith.addf %17, %13 : vector<128x128xf32>
    %cst_17 = arith.constant dense<0.000000e+00> : vector<128x128xf32>
    %19 = tpu.matmul %14, %2, %cst_17 {dimension_numbers = #tpu.dot_dimension_numbers<[1], [0], [0], [1], [0, 0, 1, 1], [], []>} : vector<128x16xf32>, vector<16x128xf32>, vector<128x128xf32> -> vector<128x128xf32>
    %20 = vector.broadcast %4 : vector<1x128xf32> to vector<128x128xf32>
    %21 = arith.addf %19, %20 : vector<128x128xf32>
    %22 = vector.extract_strided_slice %18 {offsets = [0, 0], sizes = [128, 32], strides = [1, 1]} : vector<128x128xf32> to vector<128x32xf32>
    %23 = vector.extract_strided_slice %21 {offsets = [0, 0], sizes = [128, 32], strides = [1, 1]} : vector<128x128xf32> to vector<128x32xf32>
    %24 = arith.addf %22, %23 : vector<128x32xf32>
    %25 = arith.negf %24 : vector<128x32xf32>
    %26 = math.exp %25 : vector<128x32xf32>
    %cst_18 = arith.constant 1.000000e+00 : f32
    %27 = vector.broadcast %cst_18 : f32 to vector<128x32xf32>
    %28 = arith.addf %27, %26 : vector<128x32xf32>
    %29 = arith.divf %27, %28 : vector<128x32xf32>
    %30 = vector.extract_strided_slice %29 {offsets = [0, 0], sizes = [128, 16], strides = [1, 1]} : vector<128x32xf32> to vector<128x16xf32>
    %31 = vector.extract_strided_slice %29 {offsets = [0, 16], sizes = [128, 16], strides = [1, 1]} : vector<128x32xf32> to vector<128x16xf32>
    %32 = vector.extract_strided_slice %18 {offsets = [0, 32], sizes = [128, 16], strides = [1, 1]} : vector<128x128xf32> to vector<128x16xf32>
    %33 = vector.extract_strided_slice %21 {offsets = [0, 32], sizes = [128, 16], strides = [1, 1]} : vector<128x128xf32> to vector<128x16xf32>
    %34 = arith.mulf %30, %33 : vector<128x16xf32>
    %35 = arith.addf %32, %34 : vector<128x16xf32>
    %36 = math.tanh %35 : vector<128x16xf32>
    %37 = arith.subf %14, %36 : vector<128x16xf32>
    %38 = arith.mulf %31, %37 : vector<128x16xf32>
    %39 = arith.addf %36, %38 : vector<128x16xf32>
    %c1 = arith.constant 1 : index
    %c0_19 = arith.constant 0 : index
    %c0_20 = arith.constant 0 : index
    %40 = vector.load %arg1[%c1, %c0_19, %c0_20] : memref<9x128x8xf32, #tpu.memory_space<vmem>>, vector<1x128x8xf32>
    %41 = vector.shape_cast %40 : vector<1x128x8xf32> to vector<128x8xf32>
    %cst_21 = arith.constant dense<0.000000e+00> : vector<128x128xf32>
    %42 = tpu.matmul %41, %0, %cst_21 {dimension_numbers = #tpu.dot_dimension_numbers<[1], [0], [0], [1], [0, 0, 1, 1], [], []>} : vector<128x8xf32>, vector<8x128xf32>, vector<128x128xf32> -> vector<128x128xf32>
    %43 = arith.addf %42, %13 : vector<128x128xf32>
    %cst_22 = arith.constant dense<0.000000e+00> : vector<128x128xf32>
    %44 = tpu.matmul %39, %2, %cst_22 {dimension_numbers = #tpu.dot_dimension_numbers<[1], [0], [0], [1], [0, 0, 1, 1], [], []>} : vector<128x16xf32>, vector<16x128xf32>, vector<128x128xf32> -> vector<128x128xf32>
    %45 = vector.broadcast %4 : vector<1x128xf32> to vector<128x128xf32>
    %46 = arith.addf %44, %45 : vector<128x128xf32>
    %47 = vector.extract_strided_slice %43 {offsets = [0, 0], sizes = [128, 32], strides = [1, 1]} : vector<128x128xf32> to vector<128x32xf32>
    %48 = vector.extract_strided_slice %46 {offsets = [0, 0], sizes = [128, 32], strides = [1, 1]} : vector<128x128xf32> to vector<128x32xf32>
    %49 = arith.addf %47, %48 : vector<128x32xf32>
    %50 = arith.negf %49 : vector<128x32xf32>
    %51 = math.exp %50 : vector<128x32xf32>
    %cst_23 = arith.constant 1.000000e+00 : f32
    %52 = vector.broadcast %cst_23 : f32 to vector<128x32xf32>
    %53 = arith.addf %52, %51 : vector<128x32xf32>
    %54 = arith.divf %52, %53 : vector<128x32xf32>
    %55 = vector.extract_strided_slice %54 {offsets = [0, 0], sizes = [128, 16], strides = [1, 1]} : vector<128x32xf32> to vector<128x16xf32>
    %56 = vector.extract_strided_slice %54 {offsets = [0, 16], sizes = [128, 16], strides = [1, 1]} : vector<128x32xf32> to vector<128x16xf32>
    %57 = vector.extract_strided_slice %43 {offsets = [0, 32], sizes = [128, 16], strides = [1, 1]} : vector<128x128xf32> to vector<128x16xf32>
    %58 = vector.extract_strided_slice %46 {offsets = [0, 32], sizes = [128, 16], strides = [1, 1]} : vector<128x128xf32> to vector<128x16xf32>
    %59 = arith.mulf %55, %58 : vector<128x16xf32>
    %60 = arith.addf %57, %59 : vector<128x16xf32>
    %61 = math.tanh %60 : vector<128x16xf32>
    %62 = arith.subf %39, %61 : vector<128x16xf32>
    %63 = arith.mulf %56, %62 : vector<128x16xf32>
    %64 = arith.addf %61, %63 : vector<128x16xf32>
    %c2 = arith.constant 2 : index
    %c0_24 = arith.constant 0 : index
    %c0_25 = arith.constant 0 : index
    %65 = vector.load %arg1[%c2, %c0_24, %c0_25] : memref<9x128x8xf32, #tpu.memory_space<vmem>>, vector<1x128x8xf32>
    %66 = vector.shape_cast %65 : vector<1x128x8xf32> to vector<128x8xf32>
    %cst_26 = arith.constant dense<0.000000e+00> : vector<128x128xf32>
    %67 = tpu.matmul %66, %0, %cst_26 {dimension_numbers = #tpu.dot_dimension_numbers<[1], [0], [0], [1], [0, 0, 1, 1], [], []>} : vector<128x8xf32>, vector<8x128xf32>, vector<128x128xf32> -> vector<128x128xf32>
    %68 = arith.addf %67, %13 : vector<128x128xf32>
    %cst_27 = arith.constant dense<0.000000e+00> : vector<128x128xf32>
    %69 = tpu.matmul %64, %2, %cst_27 {dimension_numbers = #tpu.dot_dimension_numbers<[1], [0], [0], [1], [0, 0, 1, 1], [], []>} : vector<128x16xf32>, vector<16x128xf32>, vector<128x128xf32> -> vector<128x128xf32>
    %70 = vector.broadcast %4 : vector<1x128xf32> to vector<128x128xf32>
    %71 = arith.addf %69, %70 : vector<128x128xf32>
    %72 = vector.extract_strided_slice %68 {offsets = [0, 0], sizes = [128, 32], strides = [1, 1]} : vector<128x128xf32> to vector<128x32xf32>
    %73 = vector.extract_strided_slice %71 {offsets = [0, 0], sizes = [128, 32], strides = [1, 1]} : vector<128x128xf32> to vector<128x32xf32>
    %74 = arith.addf %72, %73 : vector<128x32xf32>
    %75 = arith.negf %74 : vector<128x32xf32>
    %76 = math.exp %75 : vector<128x32xf32>
    %cst_28 = arith.constant 1.000000e+00 : f32
    %77 = vector.broadcast %cst_28 : f32 to vector<128x32xf32>
    %78 = arith.addf %77, %76 : vector<128x32xf32>
    %79 = arith.divf %77, %78 : vector<128x32xf32>
    %80 = vector.extract_strided_slice %79 {offsets = [0, 0], sizes = [128, 16], strides = [1, 1]} : vector<128x32xf32> to vector<128x16xf32>
    %81 = vector.extract_strided_slice %79 {offsets = [0, 16], sizes = [128, 16], strides = [1, 1]} : vector<128x32xf32> to vector<128x16xf32>
    %82 = vector.extract_strided_slice %68 {offsets = [0, 32], sizes = [128, 16], strides = [1, 1]} : vector<128x128xf32> to vector<128x16xf32>
    %83 = vector.extract_strided_slice %71 {offsets = [0, 32], sizes = [128, 16], strides = [1, 1]} : vector<128x128xf32> to vector<128x16xf32>
    %84 = arith.mulf %80, %83 : vector<128x16xf32>
    %85 = arith.addf %82, %84 : vector<128x16xf32>
    %86 = math.tanh %85 : vector<128x16xf32>
    %87 = arith.subf %64, %86 : vector<128x16xf32>
    %88 = arith.mulf %81, %87 : vector<128x16xf32>
    %89 = arith.addf %86, %88 : vector<128x16xf32>
    %c3 = arith.constant 3 : index
    %c0_29 = arith.constant 0 : index
    %c0_30 = arith.constant 0 : index
    %90 = vector.load %arg1[%c3, %c0_29, %c0_30] : memref<9x128x8xf32, #tpu.memory_space<vmem>>, vector<1x128x8xf32>
    %91 = vector.shape_cast %90 : vector<1x128x8xf32> to vector<128x8xf32>
    %cst_31 = arith.constant dense<0.000000e+00> : vector<128x128xf32>
    %92 = tpu.matmul %91, %0, %cst_31 {dimension_numbers = #tpu.dot_dimension_numbers<[1], [0], [0], [1], [0, 0, 1, 1], [], []>} : vector<128x8xf32>, vector<8x128xf32>, vector<128x128xf32> -> vector<128x128xf32>
    %93 = arith.addf %92, %13 : vector<128x128xf32>
    %cst_32 = arith.constant dense<0.000000e+00> : vector<128x128xf32>
    %94 = tpu.matmul %89, %2, %cst_32 {dimension_numbers = #tpu.dot_dimension_numbers<[1], [0], [0], [1], [0, 0, 1, 1], [], []>} : vector<128x16xf32>, vector<16x128xf32>, vector<128x128xf32> -> vector<128x128xf32>
    %95 = vector.broadcast %4 : vector<1x128xf32> to vector<128x128xf32>
    %96 = arith.addf %94, %95 : vector<128x128xf32>
    %97 = vector.extract_strided_slice %93 {offsets = [0, 0], sizes = [128, 32], strides = [1, 1]} : vector<128x128xf32> to vector<128x32xf32>
    %98 = vector.extract_strided_slice %96 {offsets = [0, 0], sizes = [128, 32], strides = [1, 1]} : vector<128x128xf32> to vector<128x32xf32>
    %99 = arith.addf %97, %98 : vector<128x32xf32>
    %100 = arith.negf %99 : vector<128x32xf32>
    %101 = math.exp %100 : vector<128x32xf32>
    %cst_33 = arith.constant 1.000000e+00 : f32
    %102 = vector.broadcast %cst_33 : f32 to vector<128x32xf32>
    %103 = arith.addf %102, %101 : vector<128x32xf32>
    %104 = arith.divf %102, %103 : vector<128x32xf32>
    %105 = vector.extract_strided_slice %104 {offsets = [0, 0], sizes = [128, 16], strides = [1, 1]} : vector<128x32xf32> to vector<128x16xf32>
    %106 = vector.extract_strided_slice %104 {offsets = [0, 16], sizes = [128, 16], strides = [1, 1]} : vector<128x32xf32> to vector<128x16xf32>
    %107 = vector.extract_strided_slice %93 {offsets = [0, 32], sizes = [128, 16], strides = [1, 1]} : vector<128x128xf32> to vector<128x16xf32>
    %108 = vector.extract_strided_slice %96 {offsets = [0, 32], sizes = [128, 16], strides = [1, 1]} : vector<128x128xf32> to vector<128x16xf32>
    %109 = arith.mulf %105, %108 : vector<128x16xf32>
    %110 = arith.addf %107, %109 : vector<128x16xf32>
    %111 = math.tanh %110 : vector<128x16xf32>
    %112 = arith.subf %89, %111 : vector<128x16xf32>
    %113 = arith.mulf %106, %112 : vector<128x16xf32>
    %114 = arith.addf %111, %113 : vector<128x16xf32>
    %c4 = arith.constant 4 : index
    %c0_34 = arith.constant 0 : index
    %c0_35 = arith.constant 0 : index
    %115 = vector.load %arg1[%c4, %c0_34, %c0_35] : memref<9x128x8xf32, #tpu.memory_space<vmem>>, vector<1x128x8xf32>
    %116 = vector.shape_cast %115 : vector<1x128x8xf32> to vector<128x8xf32>
    %cst_36 = arith.constant dense<0.000000e+00> : vector<128x128xf32>
    %117 = tpu.matmul %116, %0, %cst_36 {dimension_numbers = #tpu.dot_dimension_numbers<[1], [0], [0], [1], [0, 0, 1, 1], [], []>} : vector<128x8xf32>, vector<8x128xf32>, vector<128x128xf32> -> vector<128x128xf32>
    %118 = arith.addf %117, %13 : vector<128x128xf32>
    %cst_37 = arith.constant dense<0.000000e+00> : vector<128x128xf32>
    %119 = tpu.matmul %114, %2, %cst_37 {dimension_numbers = #tpu.dot_dimension_numbers<[1], [0], [0], [1], [0, 0, 1, 1], [], []>} : vector<128x16xf32>, vector<16x128xf32>, vector<128x128xf32> -> vector<128x128xf32>
    %120 = vector.broadcast %4 : vector<1x128xf32> to vector<128x128xf32>
    %121 = arith.addf %119, %120 : vector<128x128xf32>
    %122 = vector.extract_strided_slice %118 {offsets = [0, 0], sizes = [128, 32], strides = [1, 1]} : vector<128x128xf32> to vector<128x32xf32>
    %123 = vector.extract_strided_slice %121 {offsets = [0, 0], sizes = [128, 32], strides = [1, 1]} : vector<128x128xf32> to vector<128x32xf32>
    %124 = arith.addf %122, %123 : vector<128x32xf32>
    %125 = arith.negf %124 : vector<128x32xf32>
    %126 = math.exp %125 : vector<128x32xf32>
    %cst_38 = arith.constant 1.000000e+00 : f32
    %127 = vector.broadcast %cst_38 : f32 to vector<128x32xf32>
    %128 = arith.addf %127, %126 : vector<128x32xf32>
    %129 = arith.divf %127, %128 : vector<128x32xf32>
    %130 = vector.extract_strided_slice %129 {offsets = [0, 0], sizes = [128, 16], strides = [1, 1]} : vector<128x32xf32> to vector<128x16xf32>
    %131 = vector.extract_strided_slice %129 {offsets = [0, 16], sizes = [128, 16], strides = [1, 1]} : vector<128x32xf32> to vector<128x16xf32>
    %132 = vector.extract_strided_slice %118 {offsets = [0, 32], sizes = [128, 16], strides = [1, 1]} : vector<128x128xf32> to vector<128x16xf32>
    %133 = vector.extract_strided_slice %121 {offsets = [0, 32], sizes = [128, 16], strides = [1, 1]} : vector<128x128xf32> to vector<128x16xf32>
    %134 = arith.mulf %130, %133 : vector<128x16xf32>
    %135 = arith.addf %132, %134 : vector<128x16xf32>
    %136 = math.tanh %135 : vector<128x16xf32>
    %137 = arith.subf %114, %136 : vector<128x16xf32>
    %138 = arith.mulf %131, %137 : vector<128x16xf32>
    %139 = arith.addf %136, %138 : vector<128x16xf32>
    %c5 = arith.constant 5 : index
    %c0_39 = arith.constant 0 : index
    %c0_40 = arith.constant 0 : index
    %140 = vector.load %arg1[%c5, %c0_39, %c0_40] : memref<9x128x8xf32, #tpu.memory_space<vmem>>, vector<1x128x8xf32>
    %141 = vector.shape_cast %140 : vector<1x128x8xf32> to vector<128x8xf32>
    %cst_41 = arith.constant dense<0.000000e+00> : vector<128x128xf32>
    %142 = tpu.matmul %141, %0, %cst_41 {dimension_numbers = #tpu.dot_dimension_numbers<[1], [0], [0], [1], [0, 0, 1, 1], [], []>} : vector<128x8xf32>, vector<8x128xf32>, vector<128x128xf32> -> vector<128x128xf32>
    %143 = arith.addf %142, %13 : vector<128x128xf32>
    %cst_42 = arith.constant dense<0.000000e+00> : vector<128x128xf32>
    %144 = tpu.matmul %139, %2, %cst_42 {dimension_numbers = #tpu.dot_dimension_numbers<[1], [0], [0], [1], [0, 0, 1, 1], [], []>} : vector<128x16xf32>, vector<16x128xf32>, vector<128x128xf32> -> vector<128x128xf32>
    %145 = vector.broadcast %4 : vector<1x128xf32> to vector<128x128xf32>
    %146 = arith.addf %144, %145 : vector<128x128xf32>
    %147 = vector.extract_strided_slice %143 {offsets = [0, 0], sizes = [128, 32], strides = [1, 1]} : vector<128x128xf32> to vector<128x32xf32>
    %148 = vector.extract_strided_slice %146 {offsets = [0, 0], sizes = [128, 32], strides = [1, 1]} : vector<128x128xf32> to vector<128x32xf32>
    %149 = arith.addf %147, %148 : vector<128x32xf32>
    %150 = arith.negf %149 : vector<128x32xf32>
    %151 = math.exp %150 : vector<128x32xf32>
    %cst_43 = arith.constant 1.000000e+00 : f32
    %152 = vector.broadcast %cst_43 : f32 to vector<128x32xf32>
    %153 = arith.addf %152, %151 : vector<128x32xf32>
    %154 = arith.divf %152, %153 : vector<128x32xf32>
    %155 = vector.extract_strided_slice %154 {offsets = [0, 0], sizes = [128, 16], strides = [1, 1]} : vector<128x32xf32> to vector<128x16xf32>
    %156 = vector.extract_strided_slice %154 {offsets = [0, 16], sizes = [128, 16], strides = [1, 1]} : vector<128x32xf32> to vector<128x16xf32>
    %157 = vector.extract_strided_slice %143 {offsets = [0, 32], sizes = [128, 16], strides = [1, 1]} : vector<128x128xf32> to vector<128x16xf32>
    %158 = vector.extract_strided_slice %146 {offsets = [0, 32], sizes = [128, 16], strides = [1, 1]} : vector<128x128xf32> to vector<128x16xf32>
    %159 = arith.mulf %155, %158 : vector<128x16xf32>
    %160 = arith.addf %157, %159 : vector<128x16xf32>
    %161 = math.tanh %160 : vector<128x16xf32>
    %162 = arith.subf %139, %161 : vector<128x16xf32>
    %163 = arith.mulf %156, %162 : vector<128x16xf32>
    %164 = arith.addf %161, %163 : vector<128x16xf32>
    %c6 = arith.constant 6 : index
    %c0_44 = arith.constant 0 : index
    %c0_45 = arith.constant 0 : index
    %165 = vector.load %arg1[%c6, %c0_44, %c0_45] : memref<9x128x8xf32, #tpu.memory_space<vmem>>, vector<1x128x8xf32>
    %166 = vector.shape_cast %165 : vector<1x128x8xf32> to vector<128x8xf32>
    %cst_46 = arith.constant dense<0.000000e+00> : vector<128x128xf32>
    %167 = tpu.matmul %166, %0, %cst_46 {dimension_numbers = #tpu.dot_dimension_numbers<[1], [0], [0], [1], [0, 0, 1, 1], [], []>} : vector<128x8xf32>, vector<8x128xf32>, vector<128x128xf32> -> vector<128x128xf32>
    %168 = arith.addf %167, %13 : vector<128x128xf32>
    %cst_47 = arith.constant dense<0.000000e+00> : vector<128x128xf32>
    %169 = tpu.matmul %164, %2, %cst_47 {dimension_numbers = #tpu.dot_dimension_numbers<[1], [0], [0], [1], [0, 0, 1, 1], [], []>} : vector<128x16xf32>, vector<16x128xf32>, vector<128x128xf32> -> vector<128x128xf32>
    %170 = vector.broadcast %4 : vector<1x128xf32> to vector<128x128xf32>
    %171 = arith.addf %169, %170 : vector<128x128xf32>
    %172 = vector.extract_strided_slice %168 {offsets = [0, 0], sizes = [128, 32], strides = [1, 1]} : vector<128x128xf32> to vector<128x32xf32>
    %173 = vector.extract_strided_slice %171 {offsets = [0, 0], sizes = [128, 32], strides = [1, 1]} : vector<128x128xf32> to vector<128x32xf32>
    %174 = arith.addf %172, %173 : vector<128x32xf32>
    %175 = arith.negf %174 : vector<128x32xf32>
    %176 = math.exp %175 : vector<128x32xf32>
    %cst_48 = arith.constant 1.000000e+00 : f32
    %177 = vector.broadcast %cst_48 : f32 to vector<128x32xf32>
    %178 = arith.addf %177, %176 : vector<128x32xf32>
    %179 = arith.divf %177, %178 : vector<128x32xf32>
    %180 = vector.extract_strided_slice %179 {offsets = [0, 0], sizes = [128, 16], strides = [1, 1]} : vector<128x32xf32> to vector<128x16xf32>
    %181 = vector.extract_strided_slice %179 {offsets = [0, 16], sizes = [128, 16], strides = [1, 1]} : vector<128x32xf32> to vector<128x16xf32>
    %182 = vector.extract_strided_slice %168 {offsets = [0, 32], sizes = [128, 16], strides = [1, 1]} : vector<128x128xf32> to vector<128x16xf32>
    %183 = vector.extract_strided_slice %171 {offsets = [0, 32], sizes = [128, 16], strides = [1, 1]} : vector<128x128xf32> to vector<128x16xf32>
    %184 = arith.mulf %180, %183 : vector<128x16xf32>
    %185 = arith.addf %182, %184 : vector<128x16xf32>
    %186 = math.tanh %185 : vector<128x16xf32>
    %187 = arith.subf %164, %186 : vector<128x16xf32>
    %188 = arith.mulf %181, %187 : vector<128x16xf32>
    %189 = arith.addf %186, %188 : vector<128x16xf32>
    %c7 = arith.constant 7 : index
    %c0_49 = arith.constant 0 : index
    %c0_50 = arith.constant 0 : index
    %190 = vector.load %arg1[%c7, %c0_49, %c0_50] : memref<9x128x8xf32, #tpu.memory_space<vmem>>, vector<1x128x8xf32>
    %191 = vector.shape_cast %190 : vector<1x128x8xf32> to vector<128x8xf32>
    %cst_51 = arith.constant dense<0.000000e+00> : vector<128x128xf32>
    %192 = tpu.matmul %191, %0, %cst_51 {dimension_numbers = #tpu.dot_dimension_numbers<[1], [0], [0], [1], [0, 0, 1, 1], [], []>} : vector<128x8xf32>, vector<8x128xf32>, vector<128x128xf32> -> vector<128x128xf32>
    %193 = arith.addf %192, %13 : vector<128x128xf32>
    %cst_52 = arith.constant dense<0.000000e+00> : vector<128x128xf32>
    %194 = tpu.matmul %189, %2, %cst_52 {dimension_numbers = #tpu.dot_dimension_numbers<[1], [0], [0], [1], [0, 0, 1, 1], [], []>} : vector<128x16xf32>, vector<16x128xf32>, vector<128x128xf32> -> vector<128x128xf32>
    %195 = vector.broadcast %4 : vector<1x128xf32> to vector<128x128xf32>
    %196 = arith.addf %194, %195 : vector<128x128xf32>
    %197 = vector.extract_strided_slice %193 {offsets = [0, 0], sizes = [128, 32], strides = [1, 1]} : vector<128x128xf32> to vector<128x32xf32>
    %198 = vector.extract_strided_slice %196 {offsets = [0, 0], sizes = [128, 32], strides = [1, 1]} : vector<128x128xf32> to vector<128x32xf32>
    %199 = arith.addf %197, %198 : vector<128x32xf32>
    %200 = arith.negf %199 : vector<128x32xf32>
    %201 = math.exp %200 : vector<128x32xf32>
    %cst_53 = arith.constant 1.000000e+00 : f32
    %202 = vector.broadcast %cst_53 : f32 to vector<128x32xf32>
    %203 = arith.addf %202, %201 : vector<128x32xf32>
    %204 = arith.divf %202, %203 : vector<128x32xf32>
    %205 = vector.extract_strided_slice %204 {offsets = [0, 0], sizes = [128, 16], strides = [1, 1]} : vector<128x32xf32> to vector<128x16xf32>
    %206 = vector.extract_strided_slice %204 {offsets = [0, 16], sizes = [128, 16], strides = [1, 1]} : vector<128x32xf32> to vector<128x16xf32>
    %207 = vector.extract_strided_slice %193 {offsets = [0, 32], sizes = [128, 16], strides = [1, 1]} : vector<128x128xf32> to vector<128x16xf32>
    %208 = vector.extract_strided_slice %196 {offsets = [0, 32], sizes = [128, 16], strides = [1, 1]} : vector<128x128xf32> to vector<128x16xf32>
    %209 = arith.mulf %205, %208 : vector<128x16xf32>
    %210 = arith.addf %207, %209 : vector<128x16xf32>
    %211 = math.tanh %210 : vector<128x16xf32>
    %212 = arith.subf %189, %211 : vector<128x16xf32>
    %213 = arith.mulf %206, %212 : vector<128x16xf32>
    %214 = arith.addf %211, %213 : vector<128x16xf32>
    %cst_54 = arith.constant dense<0.000000e+00> : vector<128x16xf32>
    %215 = tpu.matmul %214, %7, %cst_54 {dimension_numbers = #tpu.dot_dimension_numbers<[1], [0], [0], [1], [0, 0, 1, 1], [], []>} : vector<128x16xf32>, vector<16x16xf32>, vector<128x16xf32> -> vector<128x16xf32>
    %216 = vector.broadcast %5 : vector<1x16xf32> to vector<128x16xf32>
    %217 = arith.addf %215, %216 : vector<128x16xf32>
    %cst_55 = arith.constant 0.000000e+00 : f32
    %218 = vector.broadcast %cst_55 : f32 to vector<128x16xf32>
    %219 = arith.maximumf %217, %218 : vector<128x16xf32>
    %cst_56 = arith.constant dense<0.000000e+00> : vector<128x128xf32>
    %220 = tpu.matmul %219, %8, %cst_56 {dimension_numbers = #tpu.dot_dimension_numbers<[1], [0], [0], [1], [0, 0, 1, 1], [], []>} : vector<128x16xf32>, vector<16x128xf32>, vector<128x128xf32> -> vector<128x128xf32>
    %221 = vector.broadcast %6 : vector<1x128xf32> to vector<128x128xf32>
    %222 = arith.addf %220, %221 : vector<128x128xf32>
    %223 = tpu.iota {dimensions = array<i32: 1>} : vector<128x128xi32>
    %c1_i32 = arith.constant 1 : i32
    %224 = vector.broadcast %c1_i32 : i32 to vector<128x128xi32>
    %225 = arith.cmpi eq, %223, %224 : vector<128x128xi32>
    %226 = math.exp %222 : vector<128x128xf32>
    %227 = arith.select %225, %226, %222 : vector<128x128xi1>, vector<128x128xf32>
    %c0_57 = arith.constant 0 : index
    %c0_58 = arith.constant 0 : index
    %228 = vector.load %arg3[%c0_57, %c0_58] : memref<128x128xf32, #tpu.memory_space<vmem>>, vector<128x128xf32>
    tpu.vector_store %arg3[%c0_57, %c0_58], %227 {strides = array<i32>} : memref<128x128xf32, #tpu.memory_space<vmem>>, vector<128x128xf32>,
    return
  }
  func.func @transform_0(%arg0: i32) -> (i32, i32, i32) {
    %c0_i32 = arith.constant 0 : i32
    %c0_i32_0 = arith.constant 0 : i32
    %c0_i32_1 = arith.constant 0 : i32
    return %c0_i32, %arg0, %c0_i32_0 : i32, i32, i32
  }
  func.func @transform_1(%arg0: i32) -> (i32, i32) {
    %c0_i32 = arith.constant 0 : i32
    %c0_i32_0 = arith.constant 0 : i32
    %c0_i32_1 = arith.constant 0 : i32
    return %c0_i32, %c0_i32_0 : i32, i32
  }
  func.func @transform_2(%arg0: i32) -> (i32, i32) {
    %c0_i32 = arith.constant 0 : i32
    %c0_i32_0 = arith.constant 0 : i32
    return %arg0, %c0_i32 : i32, i32
  }
}

</mosaic_0001>

<bundles_post_ra>
// kernel: generative_model_x_forward_batched.1
= control target key start
LH: loop header
LB: loop body
LE: loop exit
PB: predicated region body
PF: predicated region fallthrough
CT: control target
= control target key end

     0   :  { %s10254_s9 = smov 0   ;;  %s10256_s10 = smov 0   ;;  %s15596_s0 = inlined_call_operand.vmem [shape: f32[9,256,8], index: 0, kind: input, shape index: {}]   ;;  %s15597_s1 = inlined_call_operand.vmem [shape: f32[72,128], index: 1, kind: input, shape index: {}]   ;;  %s15598_s2 = inlined_call_operand.vmem [shape: f32[256,128], index: 2, kind: output, shape index: {}]  }
   0x1   :  { %s10258_s11 = smov 0  }
   0x2 LB: > { %s8803_s12 = sadd.s32 4294967295, %s10232_s11   ;;  %s10271_s13 = sadd.s32 1, %s10232_s11   ;;  %s10232_s11 = sphi %s10258_s11, %s15872_s11   ;;  %s10228_s10 = sphi %s10256_s10, %s15871_s10   ;;  %s10224_s9 = sphi %s10254_s9, %s15870_s9  }
   0x3   : > { %s16_s14 = ssub.s32 %s10232_s11, %s10271_s13  ;;  %s19_s15 = sadd.s32 1, %s10228_s10 }
   0x4   : > { %p17_p0 = scmp.eq.s32.totalorder %s16_s14, 0  ;;  %p26_p1 = scmp.ne.s32.totalorder %s10228_s10, %s10224_s9 }
   0x5   : > { %p27_p2 = scmp.eq.s32.totalorder %s10232_s11, 0  ;;  %p8806_p4 = scmp.ge.s32.totalorder %s10232_s11, 2 }
   0x6   : > { %s10280_s16 = scalar_select %p17_p0, %s10228_s10, %s19_s15  }
   0x7   : > { %p28_p3 = por %p27_p2, %p26_p1  ;;  %102 = sbr.rel (%p8806_p4) target bundleno = 160 (0xa0), region = 20 }
   0xc   : > { %105 = sbr.rel (!%p28_p3) target bundleno = 160 (0xa0), region = 24  ;;  %s107_s17 = sand.u32 (%p28_p3), 1, %s10228_s10  }
   0xd   : > { %s9358_s18 = sshll.u32 (%p28_p3), %s10232_s11, 7  ;;  %s9362_s19 = smul.u32 (%p28_p3), 1152, %s107_s17 }
   0xe   : > { %s10288_s22 = scalar_lea.vmem (%p28_p3), %s15596_s0, %s9358_s18 }
   0xf   : > { %v427_v0 = vld [vmem:[%s10288_s22] sm:$0xff] (%p28_p3)  ;;  %v429_v1 = vld [vmem:[%s10288_s22 + $0x8] sm:$0xff] (%p28_p3)  ;;  %v431_v2 = vld [vmem:[%s10288_s22 + $0x10] sm:$0xff] (%p28_p3)  ;;  %s10293_s23 = scalar_lea.vmem (%p28_p3), [#allocation2], %s9362_s19 }
  0x10   : > { %428 = vst [vmem:[%s10293_s23] sm:$0xff] (%p28_p3), %v427_v0  ;;  %v433_v3 = vld [vmem:[%s10288_s22 + $0x18] sm:$0xff] (%p28_p3)  ;;  %v435_v4 = vld [vmem:[%s10288_s22 + $0x20] sm:$0xff] (%p28_p3)  ;;  %v437_v5 = vld [vmem:[%s10288_s22 + $0x28] sm:$0xff] (%p28_p3) }
  0x11   : > { %430 = vst [vmem:[%s10293_s23 + $0x8] sm:$0xff] %v429_v1  ;;  %v439_v6 = vld [vmem:[%s10288_s22 + $0x30] sm:$0xff]  ;;  %v441_v7 = vld [vmem:[%s10288_s22 + $0x38] sm:$0xff]  ;;  %v443_v8 = vld [vmem:[%s10288_s22 + $0x40] sm:$0xff] }
  0x12   : > { %432 = vst [vmem:[%s10293_s23 + $0x10] sm:$0xff] %v431_v2  ;;  %v445_v9 = vld [vmem:[%s10288_s22 + $0x48] sm:$0xff]  ;;  %v447_v10 = vld [vmem:[%s10288_s22 + $0x50] sm:$0xff]  ;;  %v449_v11 = vld [vmem:[%s10288_s22 + $0x58] sm:$0xff] }
  0x13   : > { %434 = vst [vmem:[%s10293_s23 + $0x18] sm:$0xff] %v433_v3  ;;  %v451_v12 = vld [vmem:[%s10288_s22 + $0x60] sm:$0xff]  ;;  %v453_v13 = vld [vmem:[%s10288_s22 + $0x68] sm:$0xff]  ;;  %v455_v14 = vld [vmem:[%s10288_s22 + $0x70] sm:$0xff] }
  0x14   : > { %436 = vst [vmem:[%s10293_s23 + $0x20] sm:$0xff] %v435_v4  ;;  %v457_v15 = vld [vmem:[%s10288_s22 + $0x78] sm:$0xff]  ;;  %v459_v16 = vld [vmem:[%s10288_s22 + $0x100] sm:$0xff]  ;;  %v461_v17 = vld [vmem:[%s10288_s22 + $0x108] sm:$0xff] }
  0x15   : > { %438 = vst [vmem:[%s10293_s23 + $0x28] sm:$0xff] %v437_v5  ;;  %v463_v18 = vld [vmem:[%s10288_s22 + $0x110] sm:$0xff]  ;;  %v465_v19 = vld [vmem:[%s10288_s22 + $0x118] sm:$0xff]  ;;  %v467_v20 = vld [vmem:[%s10288_s22 + $0x120] sm:$0xff] }
  0x16   : > { %440 = vst [vmem:[%s10293_s23 + $0x30] sm:$0xff] %v439_v6  ;;  %v469_v21 = vld [vmem:[%s10288_s22 + $0x128] sm:$0xff]  ;;  %v471_v22 = vld [vmem:[%s10288_s22 + $0x130] sm:$0xff]  ;;  %v473_v23 = vld [vmem:[%s10288_s22 + $0x138] sm:$0xff] }
  0x17   : > { %442 = vst [vmem:[%s10293_s23 + $0x38] sm:$0xff] %v441_v7  ;;  %v475_v24 = vld [vmem:[%s10288_s22 + $0x140] sm:$0xff]  ;;  %v477_v25 = vld [vmem:[%s10288_s22 + $0x148] sm:$0xff]  ;;  %v479_v26 = vld [vmem:[%s10288_s22 + $0x150] sm:$0xff] }
  0x18   : > { %444 = vst [vmem:[%s10293_s23 + $0x40] sm:$0xff] %v443_v8  ;;  %v481_v27 = vld [vmem:[%s10288_s22 + $0x158] sm:$0xff]  ;;  %v483_v28 = vld [vmem:[%s10288_s22 + $0x160] sm:$0xff]  ;;  %v485_v29 = vld [vmem:[%s10288_s22 + $0x168] sm:$0xff] }
  0x19   : > { %446 = vst [vmem:[%s10293_s23 + $0x48] sm:$0xff] %v445_v9  ;;  %v487_v30 = vld [vmem:[%s10288_s22 + $0x170] sm:$0xff]  ;;  %v489_v31 = vld [vmem:[%s10288_s22 + $0x178] sm:$0xff]  ;;  %v491_v32 = vld [vmem:[%s10288_s22 + $0x200] sm:$0xff] }
  0x1a   : > { %448 = vst [vmem:[%s10293_s23 + $0x50] sm:$0xff] %v447_v10  ;;  %v493_v33 = vld [vmem:[%s10288_s22 + $0x208] sm:$0xff]  ;;  %v495_v34 = vld [vmem:[%s10288_s22 + $0x210] sm:$0xff]  ;;  %v497_v35 = vld [vmem:[%s10288_s22 + $0x218] sm:$0xff] }
  0x1b   : > { %450 = vst [vmem:[%s10293_s23 + $0x58] sm:$0xff] %v449_v11  ;;  %v499_v36 = vld [vmem:[%s10288_s22 + $0x220] sm:$0xff]  ;;  %v501_v37 = vld [vmem:[%s10288_s22 + $0x228] sm:$0xff]  ;;  %v503_v38 = vld [vmem:[%s10288_s22 + $0x230] sm:$0xff] }
  0x1c   : > { %452 = vst [vmem:[%s10293_s23 + $0x60] sm:$0xff] %v451_v12  ;;  %v505_v39 = vld [vmem:[%s10288_s22 + $0x238] sm:$0xff]  ;;  %v507_v40 = vld [vmem:[%s10288_s22 + $0x240] sm:$0xff]  ;;  %v509_v41 = vld [vmem:[%s10288_s22 + $0x248] sm:$0xff] }
  0x1d   : > { %454 = vst [vmem:[%s10293_s23 + $0x68] sm:$0xff] %v453_v13  ;;  %v511_v42 = vld [vmem:[%s10288_s22 + $0x250] sm:$0xff]  ;;  %v513_v43 = vld [vmem:[%s10288_s22 + $0x258] sm:$0xff]  ;;  %v515_v44 = vld [vmem:[%s10288_s22 + $0x260] sm:$0xff] }
  0x1e   : > { %456 = vst [vmem:[%s10293_s23 + $0x70] sm:$0xff] %v455_v14  ;;  %v517_v45 = vld [vmem:[%s10288_s22 + $0x268] sm:$0xff]  ;;  %v519_v46 = vld [vmem:[%s10288_s22 + $0x270] sm:$0xff]  ;;  %v521_v47 = vld [vmem:[%s10288_s22 + $0x278] sm:$0xff] }
  0x1f   : > { %458 = vst [vmem:[%s10293_s23 + $0x78] sm:$0xff] %v457_v15  ;;  %v523_v48 = vld [vmem:[%s10288_s22 + $0x300] sm:$0xff]  ;;  %v525_v49 = vld [vmem:[%s10288_s22 + $0x308] sm:$0xff]  ;;  %v527_v50 = vld [vmem:[%s10288_s22 + $0x310] sm:$0xff] }
  0x20   : > { %460 = vst [vmem:[%s10293_s23 + $0x80] sm:$0xff] %v459_v16  ;;  %v529_v51 = vld [vmem:[%s10288_s22 + $0x318] sm:$0xff]  ;;  %v531_v52 = vld [vmem:[%s10288_s22 + $0x320] sm:$0xff]  ;;  %v533_v53 = vld [vmem:[%s10288_s22 + $0x328] sm:$0xff] }
  0x21   : > { %462 = vst [vmem:[%s10293_s23 + $0x88] sm:$0xff] %v461_v17  ;;  %v535_v54 = vld [vmem:[%s10288_s22 + $0x330] sm:$0xff]  ;;  %v537_v55 = vld [vmem:[%s10288_s22 + $0x338] sm:$0xff]  ;;  %v539_v56 = vld [vmem:[%s10288_s22 + $0x340] sm:$0xff] }
  0x22   : > { %464 = vst [vmem:[%s10293_s23 + $0x90] sm:$0xff] %v463_v18  ;;  %v541_v57 = vld [vmem:[%s10288_s22 + $0x348] sm:$0xff]  ;;  %v543_v58 = vld [vmem:[%s10288_s22 + $0x350] sm:$0xff]  ;;  %v545_v59 = vld [vmem:[%s10288_s22 + $0x358] sm:$0xff] }
  0x23   : > { %466 = vst [vmem:[%s10293_s23 + $0x98] sm:$0xff] %v465_v19  ;;  %v547_v60 = vld [vmem:[%s10288_s22 + $0x360] sm:$0xff]  ;;  %v549_v61 = vld [vmem:[%s10288_s22 + $0x368] sm:$0xff]  ;;  %v551_v62 = vld [vmem:[%s10288_s22 + $0x370] sm:$0xff] }
  0x24   : > { %468 = vst [vmem:[%s10293_s23 + $0xa0] sm:$0xff] %v467_v20  ;;  %v553_v63 = vld [vmem:[%s10288_s22 + $0x378] sm:$0xff]  ;;  %v555_v0 = vld [vmem:[%s10288_s22 + $0x400] sm:$0xff]  ;;  %v557_v1 = vld [vmem:[%s10288_s22 + $0x408] sm:$0xff] }
  0x25   : > { %470 = vst [vmem:[%s10293_s23 + $0xa8] sm:$0xff] %v469_v21  ;;  %v559_v2 = vld [vmem:[%s10288_s22 + $0x410] sm:$0xff]  ;;  %v561_v3 = vld [vmem:[%s10288_s22 + $0x418] sm:$0xff]  ;;  %v563_v4 = vld [vmem:[%s10288_s22 + $0x420] sm:$0xff] }
  0x26   : > { %472 = vst [vmem:[%s10293_s23 + $0xb0] sm:$0xff] %v471_v22  ;;  %v565_v5 = vld [vmem:[%s10288_s22 + $0x428] sm:$0xff]  ;;  %v567_v6 = vld [vmem:[%s10288_s22 + $0x430] sm:$0xff]  ;;  %v569_v7 = vld [vmem:[%s10288_s22 + $0x438] sm:$0xff] }
  0x27   : > { %474 = vst [vmem:[%s10293_s23 + $0xb8] sm:$0xff] %v473_v23  ;;  %v571_v8 = vld [vmem:[%s10288_s22 + $0x440] sm:$0xff]  ;;  %v573_v9 = vld [vmem:[%s10288_s22 + $0x448] sm:$0xff]  ;;  %v575_v10 = vld [vmem:[%s10288_s22 + $0x450] sm:$0xff] }
  0x28   : > { %476 = vst [vmem:[%s10293_s23 + $0xc0] sm:$0xff] %v475_v24  ;;  %v577_v11 = vld [vmem:[%s10288_s22 + $0x458] sm:$0xff]  ;;  %v579_v12 = vld [vmem:[%s10288_s22 + $0x460] sm:$0xff]  ;;  %v581_v13 = vld [vmem:[%s10288_s22 + $0x468] sm:$0xff] }
  0x29   : > { %478 = vst [vmem:[%s10293_s23 + $0xc8] sm:$0xff] %v477_v25  ;;  %v583_v14 = vld [vmem:[%s10288_s22 + $0x470] sm:$0xff]  ;;  %v585_v15 = vld [vmem:[%s10288_s22 + $0x478] sm:$0xff]  ;;  %v587_v16 = vld [vmem:[%s10288_s22 + $0x500] sm:$0xff] }
  0x2a   : > { %480 = vst [vmem:[%s10293_s23 + $0xd0] sm:$0xff] %v479_v26  ;;  %v589_v17 = vld [vmem:[%s10288_s22 + $0x508] sm:$0xff]  ;;  %v591_v18 = vld [vmem:[%s10288_s22 + $0x510] sm:$0xff]  ;;  %v593_v19 = vld [vmem:[%s10288_s22 + $0x518] sm:$0xff] }
  0x2b   : > { %482 = vst [vmem:[%s10293_s23 + $0xd8] sm:$0xff] %v481_v27  ;;  %v595_v20 = vld [vmem:[%s10288_s22 + $0x520] sm:$0xff]  ;;  %v597_v21 = vld [vmem:[%s10288_s22 + $0x528] sm:$0xff]  ;;  %v599_v22 = vld [vmem:[%s10288_s22 + $0x530] sm:$0xff] }
  0x2c   : > { %484 = vst [vmem:[%s10293_s23 + $0xe0] sm:$0xff] %v483_v28  ;;  %v601_v23 = vld [vmem:[%s10288_s22 + $0x538] sm:$0xff]  ;;  %v603_v24 = vld [vmem:[%s10288_s22 + $0x540] sm:$0xff]  ;;  %v605_v25 = vld [vmem:[%s10288_s22 + $0x548] sm:$0xff] }
  0x2d   : > { %486 = vst [vmem:[%s10293_s23 + $0xe8] sm:$0xff] %v485_v29  ;;  %v607_v26 = vld [vmem:[%s10288_s22 + $0x550] sm:$0xff]  ;;  %v609_v27 = vld [vmem:[%s10288_s22 + $0x558] sm:$0xff]  ;;  %v611_v28 = vld [vmem:[%s10288_s22 + $0x560] sm:$0xff] }
  0x2e   : > { %488 = vst [vmem:[%s10293_s23 + $0xf0] sm:$0xff] %v487_v30  ;;  %v613_v29 = vld [vmem:[%s10288_s22 + $0x568] sm:$0xff]  ;;  %v615_v30 = vld [vmem:[%s10288_s22 + $0x570] sm:$0xff] }
  0x2f   : > { %490 = vst [vmem:[%s10293_s23 + $0xf8] sm:$0xff] %v489_v31  ;;  %v617_v31 = vld [vmem:[%s10288_s22 + $0x578] sm:$0xff] }
  0x30   : > { %492 = vst [vmem:[%s10293_s23 + $0x100] sm:$0xff] %v491_v32  ;;  %v619_v32 = vld [vmem:[%s10288_s22 + $0x600] sm:$0xff] }
  0x31   : > { %494 = vst [vmem:[%s10293_s23 + $0x108] sm:$0xff] %v493_v33  ;;  %v621_v33 = vld [vmem:[%s10288_s22 + $0x608] sm:$0xff] }
  0x32   : > { %496 = vst [vmem:[%s10293_s23 + $0x110] sm:$0xff] %v495_v34  ;;  %v623_v34 = vld [vmem:[%s10288_s22 + $0x610] sm:$0xff] }
  0x33   : > { %498 = vst [vmem:[%s10293_s23 + $0x118] sm:$0xff] %v497_v35  ;;  %v625_v35 = vld [vmem:[%s10288_s22 + $0x618] sm:$0xff] }
  0x34   : > { %500 = vst [vmem:[%s10293_s23 + $0x120] sm:$0xff] %v499_v36  ;;  %v627_v36 = vld [vmem:[%s10288_s22 + $0x620] sm:$0xff] }
  0x35   : > { %502 = vst [vmem:[%s10293_s23 + $0x128] sm:$0xff] %v501_v37  ;;  %v629_v37 = vld [vmem:[%s10288_s22 + $0x628] sm:$0xff] }
  0x36   : > { %504 = vst [vmem:[%s10293_s23 + $0x130] sm:$0xff] %v503_v38  ;;  %v631_v38 = vld [vmem:[%s10288_s22 + $0x630] sm:$0xff] }
  0x37   : > { %506 = vst [vmem:[%s10293_s23 + $0x138] sm:$0xff] %v505_v39  ;;  %v633_v39 = vld [vmem:[%s10288_s22 + $0x638] sm:$0xff] }
  0x38   : > { %508 = vst [vmem:[%s10293_s23 + $0x140] sm:$0xff] %v507_v40  ;;  %v635_v40 = vld [vmem:[%s10288_s22 + $0x640] sm:$0xff] }
  0x39   : > { %510 = vst [vmem:[%s10293_s23 + $0x148] sm:$0xff] %v509_v41  ;;  %v637_v41 = vld [vmem:[%s10288_s22 + $0x648] sm:$0xff] }
  0x3a   : > { %512 = vst [vmem:[%s10293_s23 + $0x150] sm:$0xff] %v511_v42  ;;  %v639_v42 = vld [vmem:[%s10288_s22 + $0x650] sm:$0xff] }
  0x3b   : > { %514 = vst [vmem:[%s10293_s23 + $0x158] sm:$0xff] %v513_v43  ;;  %v641_v43 = vld [vmem:[%s10288_s22 + $0x658] sm:$0xff] }
  0x3c   : > { %516 = vst [vmem:[%s10293_s23 + $0x160] sm:$0xff] %v515_v44  ;;  %v643_v44 = vld [vmem:[%s10288_s22 + $0x660] sm:$0xff] }
  0x3d   : > { %518 = vst [vmem:[%s10293_s23 + $0x168] sm:$0xff] %v517_v45  ;;  %v645_v45 = vld [vmem:[%s10288_s22 + $0x668] sm:$0xff] }
  0x3e   : > { %520 = vst [vmem:[%s10293_s23 + $0x170] sm:$0xff] %v519_v46  ;;  %v647_v46 = vld [vmem:[%s10288_s22 + $0x670] sm:$0xff] }
  0x3f   : > { %522 = vst [vmem:[%s10293_s23 + $0x178] sm:$0xff] %v521_v47  ;;  %v649_v47 = vld [vmem:[%s10288_s22 + $0x678] sm:$0xff] }
  0x40   : > { %524 = vst [vmem:[%s10293_s23 + $0x180] sm:$0xff] %v523_v48  ;;  %v651_v48 = vld [vmem:[%s10288_s22 + $0x700] sm:$0xff] }
  0x41   : > { %526 = vst [vmem:[%s10293_s23 + $0x188] sm:$0xff] %v525_v49  ;;  %v653_v49 = vld [vmem:[%s10288_s22 + $0x708] sm:$0xff] }
  0x42   : > { %528 = vst [vmem:[%s10293_s23 + $0x190] sm:$0xff] %v527_v50  ;;  %v655_v50 = vld [vmem:[%s10288_s22 + $0x710] sm:$0xff] }
  0x43   : > { %530 = vst [vmem:[%s10293_s23 + $0x198] sm:$0xff] %v529_v51  ;;  %v657_v51 = vld [vmem:[%s10288_s22 + $0x718] sm:$0xff] }
  0x44   : > { %532 = vst [vmem:[%s10293_s23 + $0x1a0] sm:$0xff] %v531_v52  ;;  %v659_v52 = vld [vmem:[%s10288_s22 + $0x720] sm:$0xff] }
  0x45   : > { %534 = vst [vmem:[%s10293_s23 + $0x1a8] sm:$0xff] %v533_v53  ;;  %v661_v53 = vld [vmem:[%s10288_s22 + $0x728] sm:$0xff] }
  0x46   : > { %536 = vst [vmem:[%s10293_s23 + $0x1b0] sm:$0xff] %v535_v54  ;;  %v663_v54 = vld [vmem:[%s10288_s22 + $0x730] sm:$0xff] }
  0x47   : > { %538 = vst [vmem:[%s10293_s23 + $0x1b8] sm:$0xff] %v537_v55  ;;  %v665_v55 = vld [vmem:[%s10288_s22 + $0x738] sm:$0xff] }
  0x48   : > { %540 = vst [vmem:[%s10293_s23 + $0x1c0] sm:$0xff] %v539_v56  ;;  %v667_v56 = vld [vmem:[%s10288_s22 + $0x740] sm:$0xff] }
  0x49   : > { %542 = vst [vmem:[%s10293_s23 + $0x1c8] sm:$0xff] %v541_v57  ;;  %v669_v57 = vld [vmem:[%s10288_s22 + $0x748] sm:$0xff] }
  0x4a   : > { %544 = vst [vmem:[%s10293_s23 + $0x1d0] sm:$0xff] %v543_v58  ;;  %v671_v58 = vld [vmem:[%s10288_s22 + $0x750] sm:$0xff] }
  0x4b   : > { %546 = vst [vmem:[%s10293_s23 + $0x1d8] sm:$0xff] %v545_v59  ;;  %v673_v59 = vld [vmem:[%s10288_s22 + $0x758] sm:$0xff] }
  0x4c   : > { %548 = vst [vmem:[%s10293_s23 + $0x1e0] sm:$0xff] %v547_v60  ;;  %v675_v60 = vld [vmem:[%s10288_s22 + $0x760] sm:$0xff] }
  0x4d   : > { %550 = vst [vmem:[%s10293_s23 + $0x1e8] sm:$0xff] %v549_v61  ;;  %v677_v61 = vld [vmem:[%s10288_s22 + $0x768] sm:$0xff] }
  0x4e   : > { %552 = vst [vmem:[%s10293_s23 + $0x1f0] sm:$0xff] %v551_v62  ;;  %v679_v62 = vld [vmem:[%s10288_s22 + $0x770] sm:$0xff] }
  0x4f   : > { %554 = vst [vmem:[%s10293_s23 + $0x1f8] sm:$0xff] %v553_v63  ;;  %v681_v63 = vld [vmem:[%s10288_s22 + $0x778] sm:$0xff] }
  0x50   : > { %556 = vst [vmem:[%s10293_s23 + $0x200] sm:$0xff] %v555_v0  ;;  %v683_v0 = vld [vmem:[%s10288_s22 + $0x800] sm:$0xff] }
  0x51   : > { %558 = vst [vmem:[%s10293_s23 + $0x208] sm:$0xff] %v557_v1  ;;  %v685_v1 = vld [vmem:[%s10288_s22 + $0x808] sm:$0xff] }
  0x52   : > { %560 = vst [vmem:[%s10293_s23 + $0x210] sm:$0xff] %v559_v2  ;;  %v687_v2 = vld [vmem:[%s10288_s22 + $0x810] sm:$0xff] }
  0x53   : > { %562 = vst [vmem:[%s10293_s23 + $0x218] sm:$0xff] %v561_v3  ;;  %v689_v3 = vld [vmem:[%s10288_s22 + $0x818] sm:$0xff] }
  0x54   : > { %564 = vst [vmem:[%s10293_s23 + $0x220] sm:$0xff] %v563_v4  ;;  %v691_v4 = vld [vmem:[%s10288_s22 + $0x820] sm:$0xff] }
  0x55   : > { %566 = vst [vmem:[%s10293_s23 + $0x228] sm:$0xff] %v565_v5  ;;  %v693_v5 = vld [vmem:[%s10288_s22 + $0x828] sm:$0xff] }
  0x56   : > { %568 = vst [vmem:[%s10293_s23 + $0x230] sm:$0xff] %v567_v6  ;;  %v695_v6 = vld [vmem:[%s10288_s22 + $0x830] sm:$0xff] }
  0x57   : > { %570 = vst [vmem:[%s10293_s23 + $0x238] sm:$0xff] %v569_v7  ;;  %v697_v7 = vld [vmem:[%s10288_s22 + $0x838] sm:$0xff] }
  0x58   : > { %572 = vst [vmem:[%s10293_s23 + $0x240] sm:$0xff] %v571_v8  ;;  %v699_v8 = vld [vmem:[%s10288_s22 + $0x840] sm:$0xff] }
  0x59   : > { %574 = vst [vmem:[%s10293_s23 + $0x248] sm:$0xff] %v573_v9  ;;  %v701_v9 = vld [vmem:[%s10288_s22 + $0x848] sm:$0xff] }
  0x5a   : > { %576 = vst [vmem:[%s10293_s23 + $0x250] sm:$0xff] %v575_v10  ;;  %v703_v10 = vld [vmem:[%s10288_s22 + $0x850] sm:$0xff] }
  0x5b   : > { %578 = vst [vmem:[%s10293_s23 + $0x258] sm:$0xff] %v577_v11  ;;  %v705_v11 = vld [vmem:[%s10288_s22 + $0x858] sm:$0xff] }
  0x5c   : > { %580 = vst [vmem:[%s10293_s23 + $0x260] sm:$0xff] %v579_v12  ;;  %v707_v12 = vld [vmem:[%s10288_s22 + $0x860] sm:$0xff] }
  0x5d   : > { %582 = vst [vmem:[%s10293_s23 + $0x268] sm:$0xff] %v581_v13  ;;  %v709_v13 = vld [vmem:[%s10288_s22 + $0x868] sm:$0xff] }
  0x5e   : > { %584 = vst [vmem:[%s10293_s23 + $0x270] sm:$0xff] %v583_v14  ;;  %v711_v14 = vld [vmem:[%s10288_s22 + $0x870] sm:$0xff] }
  0x5f   : > { %586 = vst [vmem:[%s10293_s23 + $0x278] sm:$0xff] %v585_v15  ;;  %v713_v15 = vld [vmem:[%s10288_s22 + $0x878] sm:$0xff] }
  0x60   : > { %588 = vst [vmem:[%s10293_s23 + $0x280] sm:$0xff] %v587_v16 }
  0x61   : > { %590 = vst [vmem:[%s10293_s23 + $0x288] sm:$0xff] %v589_v17 }
  0x62   : > { %592 = vst [vmem:[%s10293_s23 + $0x290] sm:$0xff] %v591_v18 }
  0x63   : > { %594 = vst [vmem:[%s10293_s23 + $0x298] sm:$0xff] %v593_v19 }
  0x64   : > { %596 = vst [vmem:[%s10293_s23 + $0x2a0] sm:$0xff] %v595_v20 }
  0x65   : > { %598 = vst [vmem:[%s10293_s23 + $0x2a8] sm:$0xff] %v597_v21 }
  0x66   : > { %600 = vst [vmem:[%s10293_s23 + $0x2b0] sm:$0xff] %v599_v22 }
  0x67   : > { %602 = vst [vmem:[%s10293_s23 + $0x2b8] sm:$0xff] %v601_v23 }
  0x68   : > { %604 = vst [vmem:[%s10293_s23 + $0x2c0] sm:$0xff] %v603_v24 }
  0x69   : > { %606 = vst [vmem:[%s10293_s23 + $0x2c8] sm:$0xff] %v605_v25 }
  0x6a   : > { %608 = vst [vmem:[%s10293_s23 + $0x2d0] sm:$0xff] %v607_v26 }
  0x6b   : > { %610 = vst [vmem:[%s10293_s23 + $0x2d8] sm:$0xff] %v609_v27 }
  0x6c   : > { %612 = vst [vmem:[%s10293_s23 + $0x2e0] sm:$0xff] %v611_v28 }
  0x6d   : > { %614 = vst [vmem:[%s10293_s23 + $0x2e8] sm:$0xff] %v613_v29 }
  0x6e   : > { %616 = vst [vmem:[%s10293_s23 + $0x2f0] sm:$0xff] %v615_v30 }
  0x6f   : > { %618 = vst [vmem:[%s10293_s23 + $0x2f8] sm:$0xff] %v617_v31 }
  0x70   : > { %620 = vst [vmem:[%s10293_s23 + $0x300] sm:$0xff] %v619_v32 }
  0x71   : > { %622 = vst [vmem:[%s10293_s23 + $0x308] sm:$0xff] %v621_v33 }
  0x72   : > { %624 = vst [vmem:[%s10293_s23 + $0x310] sm:$0xff] %v623_v34 }
  0x73   : > { %626 = vst [vmem:[%s10293_s23 + $0x318] sm:$0xff] %v625_v35 }
  0x74   : > { %628 = vst [vmem:[%s10293_s23 + $0x320] sm:$0xff] %v627_v36 }
  0x75   : > { %630 = vst [vmem:[%s10293_s23 + $0x328] sm:$0xff] %v629_v37 }
  0x76   : > { %632 = vst [vmem:[%s10293_s23 + $0x330] sm:$0xff] %v631_v38 }
  0x77   : > { %634 = vst [vmem:[%s10293_s23 + $0x338] sm:$0xff] %v633_v39 }
  0x78   : > { %636 = vst [vmem:[%s10293_s23 + $0x340] sm:$0xff] %v635_v40 }
  0x79   : > { %638 = vst [vmem:[%s10293_s23 + $0x348] sm:$0xff] %v637_v41 }
  0x7a   : > { %640 = vst [vmem:[%s10293_s23 + $0x350] sm:$0xff] %v639_v42 }
  0x7b   : > { %642 = vst [vmem:[%s10293_s23 + $0x358] sm:$0xff] %v641_v43 }
  0x7c   : > { %644 = vst [vmem:[%s10293_s23 + $0x360] sm:$0xff] %v643_v44 }
  0x7d   : > { %646 = vst [vmem:[%s10293_s23 + $0x368] sm:$0xff] %v645_v45 }
  0x7e   : > { %648 = vst [vmem:[%s10293_s23 + $0x370] sm:$0xff] %v647_v46 }
  0x7f   : > { %650 = vst [vmem:[%s10293_s23 + $0x378] sm:$0xff] %v649_v47 }
  0x80   : > { %652 = vst [vmem:[%s10293_s23 + $0x380] sm:$0xff] %v651_v48 }
  0x81   : > { %654 = vst [vmem:[%s10293_s23 + $0x388] sm:$0xff] %v653_v49 }
  0x82   : > { %656 = vst [vmem:[%s10293_s23 + $0x390] sm:$0xff] %v655_v50 }
  0x83   : > { %658 = vst [vmem:[%s10293_s23 + $0x398] sm:$0xff] %v657_v51 }
  0x84   : > { %660 = vst [vmem:[%s10293_s23 + $0x3a0] sm:$0xff] %v659_v52 }
  0x85   : > { %662 = vst [vmem:[%s10293_s23 + $0x3a8] sm:$0xff] %v661_v53 }
  0x86   : > { %664 = vst [vmem:[%s10293_s23 + $0x3b0] sm:$0xff] %v663_v54 }
  0x87   : > { %666 = vst [vmem:[%s10293_s23 + $0x3b8] sm:$0xff] %v665_v55 }
  0x88   : > { %668 = vst [vmem:[%s10293_s23 + $0x3c0] sm:$0xff] %v667_v56 }
  0x89   : > { %670 = vst [vmem:[%s10293_s23 + $0x3c8] sm:$0xff] %v669_v57 }
  0x8a   : > { %672 = vst [vmem:[%s10293_s23 + $0x3d0] sm:$0xff] %v671_v58 }
  0x8b   : > { %674 = vst [vmem:[%s10293_s23 + $0x3d8] sm:$0xff] %v673_v59 }
  0x8c   : > { %676 = vst [vmem:[%s10293_s23 + $0x3e0] sm:$0xff] %v675_v60 }
  0x8d   : > { %678 = vst [vmem:[%s10293_s23 + $0x3e8] sm:$0xff] %v677_v61 }
  0x8e   : > { %680 = vst [vmem:[%s10293_s23 + $0x3f0] sm:$0xff] %v679_v62 }
  0x8f   : > { %682 = vst [vmem:[%s10293_s23 + $0x3f8] sm:$0xff] %v681_v63 }
  0x90   : > { %684 = vst [vmem:[%s10293_s23 + $0x400] sm:$0xff] %v683_v0 }
  0x91   : > { %686 = vst [vmem:[%s10293_s23 + $0x408] sm:$0xff] %v685_v1 }
  0x92   : > { %688 = vst [vmem:[%s10293_s23 + $0x410] sm:$0xff] %v687_v2 }
  0x93   : > { %690 = vst [vmem:[%s10293_s23 + $0x418] sm:$0xff] %v689_v3 }
  0x94   : > { %692 = vst [vmem:[%s10293_s23 + $0x420] sm:$0xff] %v691_v4 }
  0x95   : > { %694 = vst [vmem:[%s10293_s23 + $0x428] sm:$0xff] %v693_v5 }
  0x96   : > { %696 = vst [vmem:[%s10293_s23 + $0x430] sm:$0xff] %v695_v6 }
  0x97   : > { %698 = vst [vmem:[%s10293_s23 + $0x438] sm:$0xff] %v697_v7 }
  0x98   : > { %700 = vst [vmem:[%s10293_s23 + $0x440] sm:$0xff] %v699_v8 }
  0x99   : > { %702 = vst [vmem:[%s10293_s23 + $0x448] sm:$0xff] %v701_v9 }
  0x9a   : > { %704 = vst [vmem:[%s10293_s23 + $0x450] sm:$0xff] %v703_v10 }
  0x9b   : > { %706 = vst [vmem:[%s10293_s23 + $0x458] sm:$0xff] %v705_v11 }
  0x9c   : > { %708 = vst [vmem:[%s10293_s23 + $0x460] sm:$0xff] %v707_v12 }
  0x9d   : > { %710 = vst [vmem:[%s10293_s23 + $0x468] sm:$0xff] %v709_v13 }
  0x9e   : > { %712 = vst [vmem:[%s10293_s23 + $0x470] sm:$0xff] %v711_v14 }
  0x9f   : > { %714 = vst [vmem:[%s10293_s23 + $0x478] sm:$0xff] %v713_v15 }
  0xa0 PF: > { %p8809_p5 = scmp.ge.s32.totalorder %s10232_s11, 1  ;;  %p719_p6 = scmp.lt.s32.totalorder %s10232_s11, 3 }
  0xa2   : > { %p720_p7 = pnand %p8809_p5, %p719_p6 }
  0xa4   : > { %723 = sbr.rel (%p720_p7) target bundleno = 6487 (0x1957), region = 62 }
  0xa9   : > { %v755_v16 = vld [vmem:[%s15597_s1 + $0x8] sm:$0xff]  ;;  %v10588_v17 = vld [vmem:[%s15597_s1] sm:$0xff]  ;;  %s726_s28 = sand.u32 1, %s10224_s9   ;;  %vm784_vm0 = vcmask 64512   ;;  %v757_v21 = vld [vmem:[%s15597_s1 + $0x18] sm:$0xff]  ;;  %v10234_v49 = vmov 0.0  }
  0xaa   : > { %9359 = vmatpush.msra.mxu2 %v755_v16  ;;  %977 = vmatpush.msra.mxu1 %v10588_v17  ;;  %s9363_s29 = smul.u32 1152, %s726_s28  ;;  %v756_v28 = vld [vmem:[%s15597_s1 + $0x10] sm:$0xff]  ;;  %s10235_s9 = smov 96  }
  0xab   : > { %9361 = vmatpush.msra.mxu3 %v10588_v17  ;;  %848 = vmatpush.msra.mxu0 %v755_v16  ;;  %s10236_s17 = smov 32   ;;  %s10237_s18 = smov 112  }
  0xac   : > { %9360 = vmatpush.msrb.mxu2 %v10588_v17  ;;  %2796 = vmatpush.msrb.mxu1 %v10588_v17  ;;  %s10595_s30 = scalar_lea.vmem [#allocation2], %s9363_s29  ;;  %s10238_s19 = smov 16  }
  0xad   : > { %v8824_v18 = vld [vmem:[%s10595_s30 + $0x460] sm:$0xff]  ;;  %1993 = vmatpush.msrb.mxu0 %v757_v21  ;;  %v8825_v22 = vld [vmem:[%s10595_s30 + $0x468] sm:$0xff]  ;;  %2940 = vmatpush.msrb.mxu3 %v757_v21  ;;  %v8826_v25 = vld [vmem:[%s10595_s30 + $0x470] sm:$0xff] }
  0xae   : > { %v898_v19 = vld [vmem:[%s10595_s30] sm:$0xff]  ;;  %8840 = vmatmul.msk.f32.vlgmr.msra.gmra.mxu2 %vm784_vm0, %v8824_v18  ;;  %v899_v23 = vld [vmem:[%s10595_s30 + $0x8] sm:$0xff]  ;;  %v900_v26 = vld [vmem:[%s10595_s30 + $0x10] sm:$0xff] }
  0xaf   : > { %v8880_v20 = vld [vmem:[%s10595_s30 + $0xa0] sm:$0xff]  ;;  %8844 = vmatmul.msk.f32.vlgmr.msra.gmra.mxu1 %vm784_vm0, %v898_v19  ;;  %1046 = vmatpush.msra.mxu2 %v757_v21  ;;  %v8881_v24 = vld [vmem:[%s10595_s30 + $0xa8] sm:$0xff]  ;;  %v8882_v27 = vld [vmem:[%s10595_s30 + $0xb0] sm:$0xff] }
  0xb0   : > { %8896 = vmatmul.msk.f32.vlgmr.msra.gmra.mxu3 %vm784_vm0, %v8880_v20  ;;  %4690 = vmatpush.msra.mxu1 %v10588_v17  ;;  %v8827_v29 = vld [vmem:[%s10595_s30 + $0x478] sm:$0xff]  ;;  %v902_v32 = vld [vmem:[%s10595_s30 + $0x20] sm:$0xff]  ;;  %v903_v36 = vld [vmem:[%s10595_s30 + $0x28] sm:$0xff] }
  0xb1   : > { %1047 = vmatpush.msra.mxu2 %v756_v28  ;;  %1994 = vmatpush.msrb.mxu0 %v756_v28  ;;  %v901_v30 = vld [vmem:[%s10595_s30 + $0x18] sm:$0xff]  ;;  %v910_v33 = vld [vmem:[%s10595_s30 + $0x60] sm:$0xff]  ;;  %v911_v37 = vld [vmem:[%s10595_s30 + $0x68] sm:$0xff] }
  0xb2   : > { %2941 = vmatpush.msrb.mxu3 %v756_v28  ;;  %v8883_v31 = vld [vmem:[%s10595_s30 + $0xb8] sm:$0xff]  ;;  %v8884_v34 = vld [vmem:[%s10595_s30 + $0xc0] sm:$0xff]  ;;  %v8885_v38 = vld [vmem:[%s10595_s30 + $0xc8] sm:$0xff] }
  0xb3   : > { %v8812_v35 = vld [vmem:[%s10595_s30 + $0x400] sm:$0xff]  ;;  %v8813_v39 = vld [vmem:[%s10595_s30 + $0x408] sm:$0xff]  ;;  %v904_v40 = vld [vmem:[%s10595_s30 + $0x30] sm:$0xff] }
  0xb4   : > { %4834 = vmatpush.msra.mxu3 %v757_v21  ;;  %8828 = vmatmul.msk.f32.vlgmr.msra.gmra.mxu0 %vm784_vm0, %v8812_v35  ;;  %v912_v41 = vld [vmem:[%s10595_s30 + $0x70] sm:$0xff]  ;;  %v905_v44 = vld [vmem:[%s10595_s30 + $0x38] sm:$0xff]  ;;  %v906_v47 = vld [vmem:[%s10595_s30 + $0x40] sm:$0xff] }
  0xb5   : > { %3887 = vmatpush.msra.mxu0 %v757_v21  ;;  %v8886_v42 = vld [vmem:[%s10595_s30 + $0xd0] sm:$0xff]  ;;  %v913_v45 = vld [vmem:[%s10595_s30 + $0x78] sm:$0xff]  ;;  %v8888_v48 = vld [vmem:[%s10595_s30 + $0xe0] sm:$0xff] }
  0xb6   : > { %8841 = vmatmul.msk.f32.gmra.mxu2 %vm784_vm0, %v8825_v22  ;;  %4835 = vmatpush.msra.mxu3 %v756_v28  ;;  %v8814_v43 = vld [vmem:[%s10595_s30 + $0x410] sm:$0xff]  ;;  %v8887_v46 = vld [vmem:[%s10595_s30 + $0xd8] sm:$0xff]  ;;  %v907_v50 = vld [vmem:[%s10595_s30 + $0x48] sm:$0xff] }
  0xb7   : > { %8845 = vmatmul.msk.f32.gmra.mxu1 %vm784_vm0, %v899_v23  ;;  %3888 = vmatpush.msra.mxu0 %v756_v28  ;;  %v8889_v51 = vld [vmem:[%s10595_s30 + $0xe8] sm:$0xff]  ;;  %v908_v52 = vld [vmem:[%s10595_s30 + $0x50] sm:$0xff]  ;;  %v8815_v54 = vld [vmem:[%s10595_s30 + $0x418] sm:$0xff] }
  0xb8   : > { %8897 = vmatmul.msk.f32.gmra.mxu3 %vm784_vm0, %v8881_v24  ;;  %v8890_v53 = vld [vmem:[%s10595_s30 + $0xf0] sm:$0xff]  ;;  %v909_v55 = vld [vmem:[%s10595_s30 + $0x58] sm:$0xff]  ;;  %v8940_v57 = vld [vmem:[%s10595_s30 + $0x100] sm:$0xff] }
  0xb9   : > { %v8891_v56 = vld [vmem:[%s10595_s30 + $0xf8] sm:$0xff]  ;;  %v8941_v58 = vld [vmem:[%s10595_s30 + $0x108] sm:$0xff]  ;;  %v8942_v59 = vld [vmem:[%s10595_s30 + $0x110] sm:$0xff] }
  0xba   : > { %v8943_v60 = vld [vmem:[%s10595_s30 + $0x118] sm:$0xff]  ;;  %v8816_v61 = vld [vmem:[%s10595_s30 + $0x420] sm:$0xff]  ;;  %v8817_v0 = vld [vmem:[%s10595_s30 + $0x428] sm:$0xff] }
  0xbb   : > { %v8944_v63 = vld [vmem:[%s10595_s30 + $0x120] sm:$0xff]  ;;  %v8945_v3 = vld [vmem:[%s10595_s30 + $0x128] sm:$0xff]  ;;  %v8818_v5 = vld [vmem:[%s10595_s30 + $0x430] sm:$0xff] }
  0xbc   : > { %8829 = vmatmul.msk.f32.gmra.mxu0 %vm784_vm0, %v8813_v39  ;;  %v8946_v7 = vld [vmem:[%s10595_s30 + $0x130] sm:$0xff]  ;;  %v8819_v9 = vld [vmem:[%s10595_s30 + $0x438] sm:$0xff]  ;;  %v8948_v13 = vld [vmem:[%s10595_s30 + $0x140] sm:$0xff] }
  0xbd   : > { %v8947_v10 = vld [vmem:[%s10595_s30 + $0x138] sm:$0xff]  ;;  %v8949_v16 = vld [vmem:[%s10595_s30 + $0x148] sm:$0xff]  ;;  %v8950_v20 = vld [vmem:[%s10595_s30 + $0x150] sm:$0xff] }
  0xbe   : > { %8842 = vmatmul.msk.f32.gmra.mxu2 %vm784_vm0, %v8826_v25  ;;  %v8820_v22 = vld [vmem:[%s10595_s30 + $0x440] sm:$0xff]  ;;  %v8951_v24 = vld [vmem:[%s10595_s30 + $0x158] sm:$0xff]  ;;  %v8954_v39 = vld [vmem:[%s10595_s30 + $0x170] sm:$0xff] }
  0xbf   : > { %8846 = vmatmul.msk.f32.gmra.mxu1 %vm784_vm0, %v900_v26  ;;  %v8876_v26 = vld [vmem:[%s10595_s30 + $0x80] sm:$0xff] }
  0xc0   : > { %8898 = vmatmul.msk.f32.gmra.mxu3 %vm784_vm0, %v8882_v27  ;;  %v8952_v27 = vld [vmem:[%s10595_s30 + $0x160] sm:$0xff] }
  0xc4   : > { %8830 = vmatmul.msk.f32.gmra.mxu0 %vm784_vm0, %v8814_v43  ;;  %v8879_v43 = vld [vmem:[%s10595_s30 + $0x98] sm:$0xff] }
  0xc6   : > { %8843 = vmatmul.msk.f32.gmra.mxu2 %vm784_vm0, %v8827_v29  ;;  %v10768_v29 = vld [vmem:[%s15597_s1 + $0x21] ss:$0 sm:$0xff] }
  0xc7   : > { %8847 = vmatmul.msk.f32.gmra.mxu1 %vm784_vm0, %v901_v30 }
  0xc8   : > { %8899 = vmatmul.msk.f32.gmra.mxu3 %vm784_vm0, %v8883_v31 }
  0xcc   : > { %8831 = vmatmul.msk.f32.gmra.mxu0 %vm784_vm0, %v8815_v54  ;;  %v9069_v54 = vld [vmem:[%s10595_s30 + $0x208] sm:$0xff] }
  0xce   : > { %8856 = vmatmul.msk.f32.vlgmr.msrb.gmra.mxu2 %vm784_vm0, %v910_v33  ;;  %v8953_v33 = vld [vmem:[%s10595_s30 + $0x168] sm:$0xff] }
  0xcf   : > { %8848 = vmatmul.msk.f32.gmra.mxu1 %vm784_vm0, %v902_v32  ;;  %1849 = vmatpush.msrb.mxu2 %v10588_v17  ;;  %v8877_v32 = vld [vmem:[%s10595_s30 + $0x88] sm:$0xff] }
  0xd0   : > { %8900 = vmatmul.msk.f32.gmra.mxu3 %vm784_vm0, %v8884_v34 }
  0xd4   : > { %8832 = vmatmul.msk.f32.gmra.mxu0 %vm784_vm0, %v8816_v61 }
  0xd6   : > { %8857 = vmatmul.msk.f32.gmra.mxu2 %vm784_vm0, %v911_v37  ;;  %v8821_v37 = vld [vmem:[%s10595_s30 + $0x448] sm:$0xff] }
  0xd7   : > { %8849 = vmatmul.msk.f32.gmra.mxu1 %vm784_vm0, %v903_v36 }
  0xd8   : > { %8901 = vmatmul.msk.f32.gmra.mxu3 %vm784_vm0, %v8885_v38  ;;  %v8878_v38 = vld [vmem:[%s10595_s30 + $0x90] sm:$0xff] }
  0xdc   : > { %8833 = vmatmul.msk.f32.gmra.mxu0 %vm784_vm0, %v8817_v0  ;;  %v9007_v0 = vld [vmem:[%s10595_s30 + $0x198] sm:$0xff] }
  0xde   : > { %8858 = vmatmul.msk.f32.gmra.mxu2 %vm784_vm0, %v912_v41 }
  0xdf   : > { %8850 = vmatmul.msk.f32.gmra.mxu1 %vm784_vm0, %v904_v40 }
  0xe0   : > { %8902 = vmatmul.msk.f32.gmra.mxu3 %vm784_vm0, %v8886_v42 }
  0xe4   : > { %8834 = vmatmul.msk.f32.gmra.mxu0 %vm784_vm0, %v8818_v5  ;;  %v8823_v5 = vld [vmem:[%s10595_s30 + $0x458] sm:$0xff] }
  0xe6   : > { %8859 = vmatmul.msk.f32.gmra.mxu2 %vm784_vm0, %v913_v45 }
  0xe7   : > { %8851 = vmatmul.msk.f32.gmra.mxu1 %vm784_vm0, %v905_v44  ;;  %v8955_v44 = vld [vmem:[%s10595_s30 + $0x178] sm:$0xff] }
  0xe8   : > { %8903 = vmatmul.msk.f32.gmra.mxu3 %vm784_vm0, %v8887_v46 }
  0xec   : > { %8835 = vmatmul.msk.f32.gmra.mxu0 %vm784_vm0, %v8819_v9 }
  0xee   : > { %1048 = vmatmul.f32.vlgmr.msra.gmra.mxu2 %v10234_v49 }
  0xef   : > { %8852 = vmatmul.msk.f32.gmra.mxu1 %vm784_vm0, %v906_v47  ;;  %3743 = vmatpush.msra.mxu2 %v10588_v17  ;;  %v8822_v47 = vld [vmem:[%s10595_s30 + $0x450] sm:$0xff] }
  0xf0   : > { %8904 = vmatmul.msk.f32.gmra.mxu3 %vm784_vm0, %v8888_v48 }
  0xf4   : > { %8836 = vmatmul.msk.f32.gmra.mxu0 %vm784_vm0, %v8820_v22 }
  0xf6   : > { %1051 = vmatmul.f32.gmra.mxu2 %v10234_v49 }
  0xf7   : > { %8853 = vmatmul.msk.f32.gmra.mxu1 %vm784_vm0, %v907_v50  ;;  %v9068_v50 = vld [vmem:[%s10595_s30 + $0x200] sm:$0xff] }
  0xf8   : > { %8905 = vmatmul.msk.f32.gmra.mxu3 %vm784_vm0, %v8889_v51 }
  0xfc   : > { %8837 = vmatmul.msk.f32.gmra.mxu0 %vm784_vm0, %v8821_v37 }
  0xfe   : > { %1054 = vmatmul.f32.gmra.mxu2 %v10234_v49 }
  0xff   : > { %8854 = vmatmul.msk.f32.gmra.mxu1 %vm784_vm0, %v908_v52 }
 0x100   : > { %8906 = vmatmul.msk.f32.gmra.mxu3 %vm784_vm0, %v8890_v53  ;;  %v9005_v53 = vld [vmem:[%s10595_s30 + $0x188] sm:$0xff] }
 0x104   : > { %8838 = vmatmul.msk.f32.gmra.mxu0 %vm784_vm0, %v8822_v47 }
 0x106   : > { %1057 = vmatmul.f32.gmra.mxu2 %v10234_v49 }
 0x107   : > { %8855 = vmatmul.msk.f32.gmra.mxu1 %vm784_vm0, %v909_v55 }
 0x108   : > { %8907 = vmatmul.msk.f32.gmra.mxu3 %vm784_vm0, %v8891_v56 }
 0x10c   : > { %8839 = vmatmul.msk.f32.gmra.mxu0 %vm784_vm0, %v8823_v5 }
 0x10e   : > { %1060 = vmatmul.f32.gmra.mxu2 %v10234_v49 }
 0x10f   : > { %8956 = vmatmul.msk.f32.vlgmr.msrb.gmra.mxu1 %vm784_vm0, %v8940_v57  ;;  %v9006_v57 = vld [vmem:[%s10595_s30 + $0x190] sm:$0xff] }
 0x110   : > { %6584 = vmatpush.msrb.mxu1 %v10588_v17 }
 0x116   : > { %1063 = vmatmul.f32.gmra.mxu2 %v10234_v49 }
 0x117   : > { %8957 = vmatmul.msk.f32.gmra.mxu1 %vm784_vm0, %v8941_v58  ;;  %v9070_v58 = vld [vmem:[%s10595_s30 + $0x210] sm:$0xff] }
 0x11e   : > { %1066 = vmatmul.f32.gmra.mxu2 %v10234_v49 }
 0x11f   : > { %8958 = vmatmul.msk.f32.gmra.mxu1 %vm784_vm0, %v8942_v59 }
 0x126   : > { %1069 = vmatmul.f32.gmra.mxu2 %v10234_v49 }
 0x127   : > { %8959 = vmatmul.msk.f32.gmra.mxu1 %vm784_vm0, %v8943_v60 }
 0x12c   : > { %v10697_v62 = vpop.f32.mrf.mxu1 }
 0x12e   : > { %1072 = vmatmul.f32.gmra.mxu2 %v10234_v49 }
 0x12f   : > { %8960 = vmatmul.msk.f32.gmra.mxu1 %vm784_vm0, %v8944_v63 }
 0x131   : > { %v10704_v1 = vpop.f32.mrf.mxu2  ;;  %v850_v59 = vpop.f32.mrf.mxu0 }
 0x134   : > { %v10706_v2 = vpop.f32.mrf.mxu1 }
 0x136   : > { %1075 = vmatmul.f32.gmra.mxu2 %v10234_v49 }
 0x137   : > { %8961 = vmatmul.msk.f32.gmra.mxu1 %vm784_vm0, %v8945_v3  ;;  %v9071_v3 = vld [vmem:[%s10595_s30 + $0x218] sm:$0xff] }
 0x139   : > { %v10711_v4 = vpop.f32.mrf.mxu2 }
 0x13c   : > { %v10714_v6 = vpop.f32.mrf.mxu1 }
 0x13e   : > { %1078 = vmatmul.f32.gmra.mxu2 %v10234_v49 }
 0x13f   : > { %8962 = vmatmul.msk.f32.gmra.mxu1 %vm784_vm0, %v8946_v7  ;;  %v853_v7 = vpop.f32.mrf.mxu0 }
 0x141   : > { %v10720_v8 = vpop.f32.mrf.mxu2 }
 0x144   : > { %v10725_v11 = vpop.f32.mrf.mxu1 }
 0x146   : > { %1081 = vmatmul.f32.gmra.mxu2 %v10234_v49 }
 0x147   : > { %8963 = vmatmul.msk.f32.gmra.mxu1 %vm784_vm0, %v8947_v10 }
 0x149   : > { %v10729_v12 = vpop.f32.mrf.mxu2 }
 0x14c   : > { %v10734_v14 = vpop.f32.mrf.mxu1 }
 0x14e   : > { %1084 = vmatmul.f32.gmra.mxu2 %v10234_v49 }
 0x14f   : > { %8964 = vmatmul.msk.f32.gmra.mxu1 %vm784_vm0, %v8948_v13  ;;  %v10858_v13 = vld [vmem:[%s15597_s1 + $0x20] ss:$0 sm:$0xff] }
 0x150   : > { %v10863_v22 = vadd.f32 %v10858_v13, %v850_v59  ;;  %v10880_v37 = vadd.f32 %v10858_v13, %v853_v7 }
 0x151   : > { %v10736_v15 = vpop.f32.mrf.mxu2 }
 0x152   : > { %15640 = vst [vmem:[#allocation5_spill] sm:$0xff] %v10863_v22 }
 0x153   : > { %15642 = vst [vmem:[#allocation7_spill] sm:$0xff] %v10880_v37 }
 0x154   : > { %v10741_v18 = vpop.f32.mrf.mxu1 }
 0x156   : > { %1087 = vmatmul.f32.gmra.mxu2 %v10234_v49 }
 0x157   : > { %8965 = vmatmul.msk.f32.gmra.mxu1 %vm784_vm0, %v8949_v16  ;;  %v9008_v16 = vld [vmem:[%s10595_s30 + $0x1a0] sm:$0xff] }
 0x159   : > { %v10743_v19 = vpop.f32.mrf.mxu2 }
 0x15c   : > { %v10751_v23 = vpop.f32.mrf.mxu1 }
 0x15e   : > { %1090 = vmatmul.f32.gmra.mxu2 %v10234_v49 }
 0x15f   : > { %8966 = vmatmul.msk.f32.gmra.mxu1 %vm784_vm0, %v8950_v20  ;;  %v9072_v20 = vld [vmem:[%s10595_s30 + $0x220] sm:$0xff] }
 0x161   : > { %v10748_v21 = vpop.f32.mrf.mxu2 }
 0x164   : > { %v10761_v28 = vpop.f32.mrf.mxu1 }
 0x166   : > { %1093 = vmatmul.f32.gmra.mxu2 %v10234_v49  ;;  %v9004_v49 = vld [vmem:[%s10595_s30 + $0x180] sm:$0xff] }
 0x167   : > { %8967 = vmatmul.msk.f32.gmra.mxu1 %vm784_vm0, %v8951_v24  ;;  %v856_v24 = vpop.f32.mrf.mxu0 }
 0x169   : > { %v10757_v25 = vpop.f32.mrf.mxu2 }
 0x16c   : > { %v10780_v34 = vpop.f32.mrf.mxu1 }
 0x16e   : > { %8892 = vmatmul.msk.f32.vlgmr.msrb.gmra.mxu2 %vm784_vm0, %v8876_v26  ;;  %v10869_v26 = vadd.f32 %v10697_v62, %v10863_v22  ;;  %v10886_v62 = vadd.f32 %v10706_v2, %v10880_v37 }
 0x16f   : > { %8968 = vmatmul.msk.f32.gmra.mxu1 %vm784_vm0, %v8952_v27  ;;  %5637 = vmatpush.msrb.mxu2 %v10588_v17 }
 0x171   : > { %v1049_v30 = vpop.f32.mrf.mxu2 }
 0x172   : > { %v10772_v31 = vadd.f32 %v10768_v29, %v1049_v30 }
 0x174   : > { %1433 = vrot.lane.b32.xlu0 %v10772_v31, %s10235_s9  ;;  %v10793_v40 = vpop.f32.mrf.mxu1 }
 0x176   : > { %8893 = vmatmul.msk.f32.gmra.mxu2 %vm784_vm0, %v8877_v32  ;;  %v9009_v32 = vld [vmem:[%s10595_s30 + $0x1a8] sm:$0xff] }
 0x177   : > { %8969 = vmatmul.msk.f32.gmra.mxu1 %vm784_vm0, %v8953_v33  ;;  %v9073_v33 = vld [vmem:[%s10595_s30 + $0x228] sm:$0xff] }
 0x179   : > { %v1052_v35 = vpop.f32.mrf.mxu2 }
 0x17a   : > { %v10783_v36 = vadd.f32 %v10768_v29, %v1052_v35  ;;  %v1097_v35 = vadd.f32 %v10772_v31, %v10869_v26  ;;  %v9010_v31 = vld [vmem:[%s10595_s30 + $0x1b0] sm:$0xff] }
 0x17c   : > { %1435 = vrot.lane.b32.xlu0 %v10783_v36, %s10235_s9  ;;  %v10808_v48 = vpop.f32.mrf.mxu1 }
 0x17e   : > { %8894 = vmatmul.msk.f32.gmra.mxu2 %vm784_vm0, %v8878_v38  ;;  %v859_v38 = vpop.f32.mrf.mxu0 }
 0x17f   : > { %8970 = vmatmul.msk.f32.gmra.mxu1 %vm784_vm0, %v8954_v39  ;;  %v8860_v39 = vmul.f32 -1.442695, %v1097_v35 }
 0x181   : > { %v1055_v41 = vpop.f32.mrf.mxu2  ;;  %9397 = vpow2.f32 %v8860_v39 }
 0x182   : > { %v10796_v42 = vadd.f32 %v10768_v29, %v1055_v41 }
 0x184   : > { %1437 = vrot.lane.b32.xlu1 %v10796_v42, %s10235_s9  ;;  %v10825_v55 = vpop.f32.mrf.mxu1 }
 0x186   : > { %8895 = vmatmul.msk.f32.gmra.mxu2 %vm784_vm0, %v8879_v43  ;;  %v10891_v43 = vadd.f32 %v10858_v13, %v856_v24 }
 0x187   : > { %8971 = vmatmul.msk.f32.gmra.mxu1 %vm784_vm0, %v8955_v44  ;;  %v9074_v44 = vld [vmem:[%s10595_s30 + $0x230] sm:$0xff] }
 0x188   : > { %15643 = vst [vmem:[#allocation8_spill] sm:$0xff] %v10891_v43  ;;  %v10903_v2 = vadd.f32 %v10714_v6, %v10891_v43 }
 0x189   : > { %v1058_v45 = vpop.f32.mrf.mxu2 }
 0x18a   : > { %v10805_v46 = vadd.f32 %v10768_v29, %v1058_v45  ;;  %v1098_v45 = vadd.f32 %v10783_v36, %v10886_v62  ;;  %v9075_v36 = vld [vmem:[%s10595_s30 + $0x238] sm:$0xff] }
 0x18c   : > { %1439 = vrot.lane.b32.xlu1 %v10805_v46, %s10235_s9  ;;  %v10838_v60 = vpop.f32.mrf.mxu1 }
 0x18d   : > { %15638 = vst [vmem:[#allocation3_spill] sm:$0xff] %v10838_v60  ;;  %v9082_v60 = vld [vmem:[%s10595_s30 + $0x270] sm:$0xff] }
 0x18e   : > { %9020 = vmatmul.msk.f32.vlgmr.msra.gmra.mxu2 %vm784_vm0, %v9004_v49  ;;  %v862_v49 = vpop.f32.mrf.mxu0 }
 0x18f   : > { %9084 = vmatmul.msk.f32.vlgmr.msra.gmra.mxu1 %vm784_vm0, %v9068_v50  ;;  %7531 = vmatpush.msra.mxu2 %v10588_v17  ;;  %v8861_v50 = vmul.f32 -1.442695, %v1098_v45  ;;  %v9077_v45 = vld [vmem:[%s10595_s30 + $0x248] sm:$0xff] }
 0x191   : > { %v1061_v51 = vpop.f32.mrf.mxu2  ;;  %9399 = vpow2.f32 %v8861_v50 }
 0x192   : > { %v10819_v52 = vadd.f32 %v10768_v29, %v1061_v51 }
 0x194   : > { %1441 = vrot.lane.b32.xlu2 %v10819_v52, %s10235_s9  ;;  %v10851_v9 = vpop.f32.mrf.mxu1 }
 0x195   : > { %15639 = vst [vmem:[#allocation4_spill] sm:$0xff] %v10851_v9 }
 0x196   : > { %9021 = vmatmul.msk.f32.gmra.mxu2 %vm784_vm0, %v9005_v53  ;;  %v9398_v53 = vpop.eup %9397  ;;  %v865_v5 = vpop.f32.mrf.mxu0 }
 0x197   : > { %9085 = vmatmul.msk.f32.gmra.mxu1 %vm784_vm0, %v9069_v54  ;;  %v1099_v54 = vadd.f32 %v10796_v42, %v10903_v2  ;;  %v10917_v6 = vadd.f32 1.0, %v9398_v53  ;;  %v9400_v7 = vpop.eup %9399 }
 0x199   : > { %v1064_v56 = vpop.f32.mrf.mxu2  ;;  %v8862_v59 = vmul.f32 -1.442695, %v1099_v54  ;;  %9401 = vrcp.f32 %v10917_v6  ;;  %vm1182_vm2 = vweird.f32 %v10917_v6 }
 0x19a   : > { %v10830_v17 = vadd.f32 %v10768_v29, %v1064_v56  ;;  %v9011_v56 = vld [vmem:[%s10595_s30 + $0x1b8] sm:$0xff] }
 0x19b   : > { %9403 = vpow2.f32 %v8862_v59 }
 0x19c   : > { %1443 = vrot.lane.b32.xlu2 %v10830_v17, %s10235_s9  ;;  %v10873_v30 = vpop.f32.mrf.mxu1 }
 0x19d   : > { %15641 = vst [vmem:[#allocation6_spill] sm:$0xff] %v10873_v30 }
 0x19e   : > { %9022 = vmatmul.msk.f32.gmra.mxu2 %vm784_vm0, %v9006_v57  ;;  %v10912_v57 = vadd.f32 %v10858_v13, %v859_v38  ;;  %v868_v59 = vpop.f32.mrf.mxu0 }
 0x19f   : > { %9086 = vmatmul.msk.f32.gmra.mxu1 %vm784_vm0, %v9070_v58  ;;  %v10915_v58 = vadd.f32 %v10858_v13, %v862_v49 }
 0x1a0   : > { %15645 = vst [vmem:[#allocation10_spill] sm:$0xff] %v10912_v57  ;;  %v10925_v42 = vadd.f32 %v10725_v11, %v10912_v57  ;;  %v10939_v11 = vadd.f32 %v10858_v13, %v865_v5 }
 0x1a1   : > { %v1067_v61 = vpop.f32.mrf.mxu2  ;;  %15646 = vst [vmem:[#allocation11_spill] sm:$0xff] %v10915_v58 }
 0x1a2   : > { %v10841_v63 = vadd.f32 %v10768_v29, %v1067_v61  ;;  %v1100_v24 = vadd.f32 %v10805_v46, %v10925_v42  ;;  %15648 = vst [vmem:[#allocation13_spill] sm:$0xff] %v10939_v11 }
 0x1a4   : > { %1445 = vrot.lane.b32.xlu1 %v10841_v63, %s10235_s9  ;;  %v10897_v47 = vpop.f32.mrf.mxu1  ;;  %v8863_v35 = vmul.f32 -1.442695, %v1100_v24  ;;  %v9078_v24 = vld [vmem:[%s10595_s30 + $0x250] sm:$0xff] }
 0x1a5   : > { %15644 = vst [vmem:[#allocation9_spill] sm:$0xff] %v10897_v47 }
 0x1a6   : > { %9023 = vmatmul.msk.f32.gmra.mxu2 %vm784_vm0, %v9007_v0 }
 0x1a7   : > { %9087 = vmatmul.msk.f32.gmra.mxu1 %vm784_vm0, %v9071_v3  ;;  %v10931_v3 = vadd.f32 %v10734_v14, %v10915_v58  ;;  %v10943_v14 = vadd.f32 1.0, %v9400_v7 }
 0x1a9   : > { %v10853_v10 = vpop.f32.mrf.mxu2  ;;  %9405 = vrcp.f32 %v10943_v14  ;;  %vm1197_vm5 = vweird.f32 %v10943_v14 }
 0x1aa   : > { %9407 = vpow2.f32 %v8863_v35  ;;  %v10981_v35 = vadd.f32 %v10858_v13, %v868_v59 }
 0x1ac   : > { %v10921_v61 = vpop.f32.mrf.mxu1  ;;  %15651 = vst [vmem:[#allocation16_spill] sm:$0xff] %v10981_v35 }
 0x1ad   : > { %15647 = vst [vmem:[#allocation12_spill] sm:$0xff] %v10921_v61 }
 0x1ae   : > { %9024 = vmatmul.msk.f32.gmra.mxu2 %vm784_vm0, %v9008_v16  ;;  %v9012_v16 = vld [vmem:[%s10595_s30 + $0x1c0] sm:$0xff] }
 0x1af   : > { %9088 = vmatmul.msk.f32.gmra.mxu1 %vm784_vm0, %v9072_v20  ;;  %v9076_v20 = vld [vmem:[%s10595_s30 + $0x240] sm:$0xff] }
 0x1b1   : > { %v10871_v27 = vpop.f32.mrf.mxu2 }
 0x1b4   : > { %v10949_v39 = vpop.f32.mrf.mxu1 }
 0x1b5   : > { %15649 = vst [vmem:[#allocation14_spill] sm:$0xff] %v10949_v39 }
 0x1b6   : > { %9025 = vmatmul.msk.f32.gmra.mxu2 %vm784_vm0, %v9009_v32  ;;  %v1101_v32 = vadd.f32 %v10819_v52, %v10931_v3  ;;  %v9013_v52 = vld [vmem:[%s10595_s30 + $0x1c8] sm:$0xff] }
 0x1b7   : > { %9089 = vmatmul.msk.f32.gmra.mxu1 %vm784_vm0, %v9073_v33  ;;  %v10947_v33 = vpop.eup %9401 }
 0x1b8   : > { %v9404_v38 = vpop.eup %9403  ;;  %v8864_v46 = vmul.f32 -1.442695, %v1101_v32  ;;  %v1178_v49 = vmul.f32 %v10947_v33, %v10917_v6  ;;  %vm1183_vm1 = vweird.f32 %v10947_v33 }
 0x1b9   : > { %v10888_v41 = vpop.f32.mrf.mxu2  ;;  %v10962_v50 = vadd.f32 1.0, %v9404_v38  ;;  %v10968_v54 = vpop.eup %9405  ;;  %vm11003_vm3 = vmor %vm1182_vm2, %vm1183_vm1 }
 0x1ba   : > { %9409 = vpow2.f32 %v8864_v46  ;;  %v1193_v32 = vmul.f32 %v10968_v54, %v10943_v14  ;;  %vm1198_vm6 = vweird.f32 %v10968_v54 }
 0x1bb   : > { %9411 = vrcp.f32 %v10962_v50  ;;  %vm11038_vm7 = vmor %vm1197_vm5, %vm1198_vm6  ;;  %vm1212_vm9 = vweird.f32 %v10962_v50 }
 0x1be   : > { %9026 = vmatmul.msk.f32.gmra.mxu2 %vm784_vm0, %v9010_v31 }
 0x1bf   : > { %9090 = vmatmul.msk.f32.gmra.mxu1 %vm784_vm0, %v9074_v44  ;;  %v10955_v44 = vadd.f32 %v10741_v18, %v10939_v11  ;;  %v1179_v18 = vsub.f32 1.0, %v1178_v49  ;;  %v1194_v49 = vsub.f32 1.0, %v1193_v32 }
 0x1c1   : > { %v10905_v51 = vpop.f32.mrf.mxu2  ;;  %v1102_v53 = vadd.f32 %v10830_v17, %v10955_v44  ;;  %v1180_v17 = vmul.f32 %v10947_v33, %v1179_v18  ;;  %v1186_v18 = vand.u32 2147483647, %v10917_v6 }
 0x1c3   : > { %vm1187_vm4 = vcmp.eq.f32.partialorder %v1186_v18, 8.507059e+37  ;;  %v1201_v18 = vand.u32 2147483647, %v10943_v14 }
 0x1c5   : > { %vm1202_vm8 = vcmp.eq.f32.partialorder %v1201_v18, 8.507059e+37  ;;  %v11064_v18 = vadd.f32 %v10768_v29, %v10853_v10 }
 0x1c6   : > { %9027 = vmatmul.msk.f32.gmra.mxu2 %vm784_vm0, %v9011_v56  ;;  %v8865_v56 = vmul.f32 -1.442695, %v1102_v53  ;;  %v1188_v53 = vand.u32 2147483648, %v10917_v6 }
 0x1c7   : > { %9091 = vmatmul.msk.f32.gmra.mxu1 %vm784_vm0, %v9075_v36  ;;  %v9408_v36 = vpop.eup %9407 }
 0x1c8   : > { %v9410_v7 = vpop.eup %9409  ;;  %9413 = vpow2.f32 %v8865_v56  ;;  %v10983_v38 = vadd.f32 1.0, %v9408_v36  ;;  %v11001_v36 = vadd.f32 %v10751_v23, %v10981_v35 }
 0x1c9   : > { %v10927_v0 = vpop.f32.mrf.mxu2  ;;  %v10985_v46 = vpop.eup %9411 }
 0x1ca   : > { %v1208_v56 = vmul.f32 %v10985_v46, %v10962_v50  ;;  %9415 = vrcp.f32 %v10983_v38  ;;  %v1103_v47 = vadd.f32 %v10841_v63, %v11001_v36  ;;  %vm1213_vm10 = vweird.f32 %v10985_v46 }
 0x1cb   : > { %vm1214_vm11 = vmor %vm1212_vm9, %vm1213_vm10  ;;  %vm1227_vm13 = vweird.f32 %v10983_v38 }
 0x1cc   : > { %v1209_v39 = vsub.f32 1.0, %v1208_v56  ;;  %v8866_v59 = vmul.f32 -1.442695, %v1103_v47 }
 0x1ce   : > { %9028 = vmatmul.msk.f32.gmra.mxu2 %vm784_vm0, %v9012_v16  ;;  %v10973_v16 = vpop.f32.mrf.mxu1  ;;  %v1210_v56 = vmul.f32 %v10985_v46, %v1209_v39 }
 0x1cf   : > { %9092 = vmatmul.msk.f32.gmra.mxu1 %vm784_vm0, %v9076_v20  ;;  %15650 = vst [vmem:[#allocation15_spill] sm:$0xff] %v10973_v16  ;;  %v9014_v20 = vld [vmem:[%s10595_s30 + $0x1d0] sm:$0xff]  ;;  %v1189_v16 = vor.u32 1.1754944e-38, %v1188_v53 }
 0x1d0   : > { %v1211_v39 = vadd.f32 %v10985_v46, %v1210_v56 }
 0x1d1   : > { %v10951_v31 = vpop.f32.mrf.mxu2 }
 0x1d2   : > { %v1215_v10 = vsel %vm1214_vm11, %v10985_v46, %v1211_v39  ;;  %v11092_v46 = vadd.f32 %v10768_v29, %v10871_v27  ;;  %v1233_v39 = vand.u32 2147483648, %v10983_v38 }
 0x1d6   : > { %9029 = vmatmul.msk.f32.gmra.mxu2 %vm784_vm0, %v9013_v52  ;;  %v10989_v52 = vadd.f32 1.0, %v9410_v7  ;;  %v9414_v7 = vpop.eup %9413  ;;  %v11016_v23 = vpop.f32.mrf.mxu1 }
 0x1d7   : > { %9093 = vmatmul.msk.f32.gmra.mxu1 %vm784_vm0, %v9077_v45  ;;  %v1181_v45 = vadd.f32 %v10947_v33, %v1180_v17  ;;  %v1195_v17 = vmul.f32 %v10968_v54, %v1194_v49  ;;  %15654 = vst [vmem:[#allocation17_spill] sm:$0xff] %v11016_v23 }
 0x1d8   : > { %9417 = vrcp.f32 %v10989_v52  ;;  %vm1242_vm15 = vweird.f32 %v10989_v52 }
 0x1d9   : > { %v10971_v5 = vpop.f32.mrf.mxu2  ;;  %v1185_v6 = vsel %vm11003_vm3, %v10947_v33, %v1181_v45  ;;  %v11024_v33 = vadd.f32 1.0, %v9414_v7  ;;  %v11026_v45 = vpop.eup %9415  ;;  %v1196_v53 = vadd.f32 %v10968_v54, %v1195_v17 }
 0x1da   : > { %v11022_v61 = vsel %vm1187_vm4, %v1189_v16, %v1185_v6  ;;  %v1203_v16 = vand.u32 2147483648, %v10943_v14  ;;  %v1223_v7 = vmul.f32 %v11026_v45, %v10983_v38  ;;  %vm1228_vm14 = vweird.f32 %v11026_v45 }
 0x1db   : > { %9419 = vrcp.f32 %v11024_v33  ;;  %v1200_v6 = vsel %vm11038_vm7, %v10968_v54, %v1196_v53  ;;  %v1218_v54 = vand.u32 2147483648, %v10962_v50  ;;  %vm11111_vm2 = vmor %vm1227_vm13, %vm1228_vm14  ;;  %vm1257_vm6 = vweird.f32 %v11024_v33 }
 0x1dc   : > { %v1204_v47 = vor.u32 1.1754944e-38, %v1203_v16  ;;  %9421 = vpow2.f32 %v8866_v59  ;;  %v1224_v53 = vsub.f32 1.0, %v1223_v7 }
 0x1dd   : > { %v1219_v7 = vor.u32 1.1754944e-38, %v1218_v54  ;;  %v1248_v54 = vand.u32 2147483648, %v10989_v52 }
 0x1de   : > { %9030 = vmatmul.msk.f32.gmra.mxu2 %vm784_vm0, %v9014_v20  ;;  %v9015_v20 = vld [vmem:[%s10595_s30 + $0x1d8] sm:$0xff]  ;;  %v11032_v63 = vpop.eup %9417  ;;  %v11059_v23 = vsel %vm1202_vm8, %v1204_v47, %v1200_v6  ;;  %v11066_v16 = vpop.f32.mrf.mxu1  ;;  %v9017_v47 = vld [vmem:[%s10595_s30 + $0x1e8] sm:$0xff] }
 0x1df   : > { %9094 = vmatmul.msk.f32.gmra.mxu1 %vm784_vm0, %v9078_v24  ;;  %v9079_v24 = vld [vmem:[%s10595_s30 + $0x258] sm:$0xff]  ;;  %v1238_v14 = vmul.f32 %v11032_v63, %v10989_v52  ;;  %15657 = vst [vmem:[#allocation18_spill] sm:$0xff] %v11066_v16  ;;  %vm1243_vm1 = vweird.f32 %v11032_v63 }
 0x1e0   : > { %vm11117_vm3 = vmor %vm1242_vm15, %vm1243_vm1 }
 0x1e1   : > { %v11014_v32 = vpop.f32.mrf.mxu2  ;;  %v1239_v56 = vsub.f32 1.0, %v1238_v14 }
 0x1e3   : > { %v1240_v6 = vmul.f32 %v11032_v63, %v1239_v56 }
 0x1e5   : > { %v1241_v27 = vadd.f32 %v11032_v63, %v1240_v6  ;;  %v1249_v6 = vor.u32 1.1754944e-38, %v1248_v54 }
 0x1e6   : > { %9031 = vmatmul.msk.f32.gmra.mxu2 %vm784_vm0, %v9015_v20  ;;  %v1434_v30 = vpop.permute.xlu0 %1433  ;;  %v9016_v20 = vld [vmem:[%s10595_s30 + $0x1e0] sm:$0xff] }
 0x1e7   : > { %9095 = vmatmul.msk.f32.gmra.mxu1 %vm784_vm0, %v9079_v24  ;;  %v1481_v49 = vmul.f32 %v1434_v30, %v11022_v61  ;;  %v9080_v24 = vld [vmem:[%s10595_s30 + $0x260] sm:$0xff]  ;;  %v1216_v30 = vand.u32 2147483647, %v10962_v50 }
 0x1e9   : > { %1513 = vrot.lane.b32.xlu0 %v1481_v49, %s10236_s17  ;;  %v11055_v17 = vpop.f32.mrf.mxu2  ;;  %vm1217_vm12 = vcmp.eq.f32.partialorder %v1216_v30, 8.507059e+37 }
 0x1ea   : > { %v11086_v50 = vsel %vm1217_vm12, %v1219_v7, %v1215_v10  ;;  %v1246_v10 = vand.u32 2147483647, %v10989_v52  ;;  %v1234_v52 = vor.u32 1.1754944e-38, %v1233_v39 }
 0x1ec   : > { %vm1247_vm5 = vcmp.eq.f32.partialorder %v1246_v10, 8.507059e+37  ;;  %v1261_v10 = vand.u32 2147483647, %v11024_v33 }
 0x1ee   : > { %9032 = vmatmul.msk.f32.gmra.mxu2 %vm784_vm0, %v9016_v20  ;;  %v1436_v49 = vpop.permute.xlu0 %1435  ;;  %v11070_v20 = vpop.eup %9419  ;;  %vm1262_vm9 = vcmp.eq.f32.partialorder %v1261_v10, 8.507059e+37 }
 0x1ef   : > { %9096 = vmatmul.msk.f32.gmra.mxu1 %vm784_vm0, %v9080_v24  ;;  %v1482_v59 = vmul.f32 %v1436_v49, %v11059_v23  ;;  %v1225_v24 = vmul.f32 %v11026_v45, %v1224_v53  ;;  %v9422_v14 = vpop.eup %9421  ;;  %v9081_v49 = vld [vmem:[%s10595_s30 + $0x268] sm:$0xff]  ;;  %v1253_v16 = vmul.f32 %v11070_v20, %v11024_v33  ;;  %vm1258_vm7 = vweird.f32 %v11070_v20 }
 0x1f0   : > { %v11102_v30 = vadd.f32 1.0, %v9422_v14  ;;  %vm11161_vm8 = vmor %vm1257_vm6, %vm1258_vm7 }
 0x1f1   : > { %1515 = vrot.lane.b32.xlu2 %v1482_v59, %s10236_s17  ;;  %1447 = vrot.lane.b32.xlu0 %v11064_v18, %s10235_s9  ;;  %v1226_v56 = vadd.f32 %v11026_v45, %v1225_v24  ;;  %v1231_v59 = vand.u32 2147483647, %v10983_v38  ;;  %v1254_v7 = vsub.f32 1.0, %v1253_v16  ;;  %v11121_v14 = vpop.f32.mrf.mxu2  ;;  %v11123_v16 = vpop.f32.mrf.mxu1 }
 0x1f2   : > { %15662 = vst [vmem:[#allocation19_spill] sm:$0xff] %v11123_v16  ;;  %v1442_v38 = vpop.permute.xlu2 %1441  ;;  %9423 = vrcp.f32 %v11102_v30  ;;  %vm1272_vm10 = vweird.f32 %v11102_v30 }
 0x1f3   : > { %vm11128_vm4 = vcmp.eq.f32.partialorder %v1231_v59, 8.507059e+37  ;;  %v1255_v16 = vmul.f32 %v11070_v20, %v1254_v7  ;;  %v1230_v54 = vsel %vm11111_vm2, %v11026_v45, %v1226_v56  ;;  %v11144_v59 = vadd.f32 %v10768_v29, %v10888_v41 }
 0x1f4   : > { %v11155_v45 = vsel %vm11128_vm4, %v1234_v52, %v1230_v54  ;;  %v871_v54 = vpop.f32.mrf.mxu0 }
 0x1f5   : > { %v1256_v56 = vadd.f32 %v11070_v20, %v1255_v16 }
 0x1f6   : > { %9033 = vmatmul.msk.f32.gmra.mxu2 %vm784_vm0, %v9017_v47  ;;  %v1438_v53 = vpop.permute.xlu1 %1437 }
 0x1f7   : > { %9097 = vmatmul.msk.f32.gmra.mxu1 %vm784_vm0, %v9081_v49  ;;  %v1483_v9 = vmul.f32 %v1438_v53, %v11086_v50  ;;  %v1245_v53 = vsel %vm11117_vm3, %v11032_v63, %v1241_v27  ;;  %v1263_v63 = vand.u32 2147483648, %v11024_v33  ;;  %v1260_v33 = vsel %vm11161_vm8, %v11070_v20, %v1256_v56  ;;  %v9083_v49 = vld [vmem:[%s10595_s30 + $0x278] sm:$0xff] }
 0x1f8   : > { %v11148_v39 = vsel %vm1247_vm5, %v1249_v6, %v1245_v53  ;;  %v9424_v47 = vpop.eup %9423 }
 0x1f9   : > { %1517 = vrot.lane.b32.xlu1 %v1483_v9, %s10236_s17  ;;  %1449 = vrot.lane.b32.xlu2 %v11092_v46, %s10235_s9  ;;  %v9018_v9 = vld [vmem:[%s10595_s30 + $0x1f0] sm:$0xff]  ;;  %v1485_v41 = vmul.f32 %v1442_v38, %v11148_v39  ;;  %v11168_v6 = vpop.f32.mrf.mxu2  ;;  %v11171_v16 = vpop.f32.mrf.mxu1  ;;  %v9019_v38 = vld [vmem:[%s10595_s30 + $0x1f8] sm:$0xff]  ;;  %v1268_v52 = vmul.f32 %v9424_v47, %v11102_v30  ;;  %vm1273_vm11 = vweird.f32 %v9424_v47 }
 0x1fa   : > { %15667 = vst [vmem:[#allocation20_spill] sm:$0xff] %v11171_v16  ;;  %v1444_v53 = vpop.permute.xlu2 %1443  ;;  %vm1274_vm12 = vmor %vm1272_vm10, %vm1273_vm11 }
 0x1fc   : > { %v874_v24 = vpop.f32.mrf.mxu0 }
 0x1fe   : > { %9034 = vmatmul.msk.f32.gmra.mxu2 %vm784_vm0, %v9018_v9  ;;  %v1440_v27 = vpop.permute.xlu1 %1439  ;;  %v11181_v9 = vadd.f32 %v10768_v29, %v10927_v0  ;;  %v9132_v0 = vld [vmem:[%s10595_s30 + $0x280] sm:$0xff] }
 0x1ff   : > { %9098 = vmatmul.msk.f32.gmra.mxu1 %vm784_vm0, %v9082_v60  ;;  %v1484_v7 = vmul.f32 %v1440_v27, %v11155_v45  ;;  %v1264_v60 = vor.u32 1.1754944e-38, %v1263_v63  ;;  %v11185_v63 = vadd.f32 %v10768_v29, %v10905_v51  ;;  %v9196_v51 = vld [vmem:[%s10595_s30 + $0x300] sm:$0xff] }
 0x201   : > { %1451 = vrot.lane.b32.xlu1 %v11144_v59, %s10235_s9  ;;  %1521 = vrot.lane.b32.xlu2 %v1485_v41, %s10236_s17  ;;  %v11187_v27 = vsel %vm1262_vm9, %v1264_v60, %v1260_v33  ;;  %v1269_v41 = vsub.f32 1.0, %v1268_v52  ;;  %v11199_v10 = vpop.f32.mrf.mxu2  ;;  %v1278_v60 = vand.u32 2147483648, %v11102_v30  ;;  %v1086_v33 = vadd.f32 %v10768_v29, %v10951_v31 }
 0x202   : > { %1519 = vrot.lane.b32.xlu0 %v1484_v7, %s10236_s17  ;;  %v1486_v20 = vmul.f32 %v1444_v53, %v11187_v27  ;;  %15668 = vst [vmem:[#allocation21_spill] sm:$0xff] %v11199_v10  ;;  %v11201_v7 = vpop.f32.mrf.mxu1  ;;  %v9133_v53 = vld [vmem:[%s10595_s30 + $0x288] sm:$0xff] }
 0x203   : > { %v1270_v56 = vmul.f32 %v9424_v47, %v1269_v41  ;;  %15669 = vst [vmem:[#allocation22_spill] sm:$0xff] %v11201_v7  ;;  %v1279_v52 = vor.u32 1.1754944e-38, %v1278_v60 }
 0x206   : > { %9035 = vmatmul.msk.f32.gmra.mxu2 %vm784_vm0, %v9019_v38  ;;  %v1271_v38 = vadd.f32 %v9424_v47, %v1270_v56  ;;  %v11221_v56 = vadd.f32 %v10768_v29, %v10971_v5  ;;  %v11235_v5 = vadd.f32 %v10768_v29, %v11014_v32 }
 0x207   : > { %9099 = vmatmul.msk.f32.gmra.mxu1 %vm784_vm0, %v9083_v49  ;;  %v1276_v49 = vand.u32 2147483647, %v11102_v30 }
 0x208   : > { %v1275_v41 = vsel %vm1274_vm12, %v9424_v47, %v1271_v38  ;;  %v9134_v38 = vld [vmem:[%s10595_s30 + $0x290] sm:$0xff] }
 0x209   : > { %1523 = vrot.lane.b32.xlu1 %v1486_v20, %s10236_s17  ;;  %1455 = vrot.lane.b32.xlu2 %v11181_v9, %s10235_s9  ;;  %v9197_v20 = vld [vmem:[%s10595_s30 + $0x308] sm:$0xff]  ;;  %vm1277_vm13 = vcmp.eq.f32.partialorder %v1276_v49, 8.507059e+37  ;;  %v9198_v49 = vld [vmem:[%s10595_s30 + $0x310] sm:$0xff] }
 0x20a   : > { %1453 = vrot.lane.b32.xlu0 %v11185_v63, %s10235_s9  ;;  %v11217_v30 = vsel %vm1277_vm13, %v1279_v52, %v1275_v41  ;;  %v11223_v60 = vpop.f32.mrf.mxu1  ;;  %v9135_v41 = vld [vmem:[%s10595_s30 + $0x298] sm:$0xff] }
 0x20b   : > { %15670 = vst [vmem:[#allocation23_spill] sm:$0xff] %v11223_v60 }
 0x20e   : > { %9148 = vmatmul.msk.f32.vlgmr.msrb.gmra.mxu2 %vm784_vm0, %v9132_v0  ;;  %v877_v0 = vpop.f32.mrf.mxu0 }
 0x20f   : > { %9212 = vmatmul.msk.f32.vlgmr.msrb.gmra.mxu1 %vm784_vm0, %v9196_v51  ;;  %v11213_v51 = vpop.f32.mrf.mxu2 }
 0x211   : > { %1457 = vrot.lane.b32.xlu2 %v1086_v33, %s10235_s9 }
 0x216   : > { %9149 = vmatmul.msk.f32.gmra.mxu2 %vm784_vm0, %v9133_v53  ;;  %v1446_v31 = vpop.permute.xlu1 %1445  ;;  %v880_v53 = vpop.f32.mrf.mxu0 }
 0x217   : > { %9213 = vmatmul.msk.f32.gmra.mxu1 %vm784_vm0, %v9197_v20  ;;  %v1487_v47 = vmul.f32 %v1446_v31, %v11217_v30  ;;  %v11237_v52 = vpop.f32.mrf.mxu2  ;;  %v11239_v20 = vpop.f32.mrf.mxu1  ;;  %v9199_v31 = vld [vmem:[%s10595_s30 + $0x318] sm:$0xff] }
 0x218   : > { %15671 = vst [vmem:[#allocation24_spill] sm:$0xff] %v11237_v52 }
 0x219   : > { %1459 = vrot.lane.b32.xlu2 %v11221_v56, %s10235_s9  ;;  %1525 = vrot.lane.b32.xlu0 %v1487_v47, %s10236_s17  ;;  %15672 = vst [vmem:[#allocation25_spill] sm:$0xff] %v11239_v20  ;;  %v9200_v20 = vld [vmem:[%s10595_s30 + $0x320] sm:$0xff] }
 0x21e   : > { %9150 = vmatmul.msk.f32.gmra.mxu2 %vm784_vm0, %v9134_v38  ;;  %v883_v47 = vpop.f32.mrf.mxu0  ;;  %v11249_v38 = vadd.f32 %v10768_v29, %v11055_v17 }
 0x21f   : > { %9214 = vmatmul.msk.f32.gmra.mxu1 %vm784_vm0, %v9198_v49  ;;  %v11252_v32 = vadd.f32 %v10858_v13, %v883_v47  ;;  %v11255_v49 = vadd.f32 %v10858_v13, %v871_v54  ;;  %v11259_v52 = vpop.f32.mrf.mxu2 }
 0x220   : > { %15675 = vst [vmem:[#allocation28_spill] sm:$0xff] %v11259_v52  ;;  %v11280_v52 = vadd.f32 %v10858_v13, %v874_v24 }
 0x221   : > { %1461 = vrot.lane.b32.xlu2 %v11235_v5, %s10235_s9  ;;  %15673 = vst [vmem:[#allocation26_spill] sm:$0xff] %v11252_v32  ;;  %v11267_v29 = vadd.f32 %v10825_v55, %v11252_v32  ;;  %v11271_v17 = vadd.f32 %v10761_v28, %v11255_v49  ;;  %v11284_v55 = vadd.f32 %v10858_v13, %v10704_v1  ;;  %v9201_v28 = vld [vmem:[%s10595_s30 + $0x328] sm:$0xff] }
 0x222   : > { %15674 = vst [vmem:[#allocation27_spill] sm:$0xff] %v11255_v49  ;;  %v11300_v1 = vadd.f32 %v10780_v34, %v11280_v52 }
 0x223   : > { %v1108_v54 = vadd.f32 %v11181_v9, %v11267_v29  ;;  %v1104_v47 = vadd.f32 %v11064_v18, %v11271_v17  ;;  %15677 = vst [vmem:[#allocation30_spill] sm:$0xff] %v11280_v52  ;;  %v11292_v9 = vadd.f32 %v10736_v15, %v11284_v55 }
 0x224   : > { %15678 = vst [vmem:[#allocation31_spill] sm:$0xff] %v11284_v55  ;;  %v1105_v15 = vadd.f32 %v11092_v46, %v11300_v1  ;;  %v9205_v55 = vld [vmem:[%s10595_s30 + $0x348] sm:$0xff] }
 0x225   : > { %v8867_v18 = vmul.f32 -1.442695, %v1104_v47  ;;  %v1109_v24 = vadd.f32 %v1086_v33, %v11292_v9  ;;  %v9138_v47 = vld [vmem:[%s10595_s30 + $0x2b0] sm:$0xff] }
 0x226   : > { %9151 = vmatmul.msk.f32.gmra.mxu2 %vm784_vm0, %v9135_v41  ;;  %v11261_v41 = vpop.f32.mrf.mxu1  ;;  %v8868_v33 = vmul.f32 -1.442695, %v1105_v15 }
 0x227   : > { %9215 = vmatmul.msk.f32.gmra.mxu1 %vm784_vm0, %v9199_v31  ;;  %15676 = vst [vmem:[#allocation29_spill] sm:$0xff] %v11261_v41  ;;  %v9136_v31 = vld [vmem:[%s10595_s30 + $0x2a0] sm:$0xff]  ;;  %v9137_v41 = vld [vmem:[%s10595_s30 + $0x2a8] sm:$0xff] }
 0x229   : > { %1463 = vrot.lane.b32.xlu2 %v11249_v38, %s10235_s9 }
 0x22e   : > { %9152 = vmatmul.msk.f32.gmra.mxu2 %vm784_vm0, %v9136_v31  ;;  %v11288_v31 = vpop.f32.mrf.mxu2  ;;  %v11294_v60 = vpop.f32.mrf.mxu1 }
 0x22f   : > { %9216 = vmatmul.msk.f32.gmra.mxu1 %vm784_vm0, %v9200_v20  ;;  %15679 = vst [vmem:[#allocation32_spill] sm:$0xff] %v11288_v31  ;;  %v8871_v20 = vmul.f32 -1.442695, %v1108_v54  ;;  %v11304_v54 = vadd.f32 %v10858_v13, %v877_v0  ;;  %v8872_v31 = vmul.f32 -1.442695, %v1109_v24  ;;  %v11331_v24 = vadd.f32 %v10858_v13, %v880_v53 }
 0x230   : > { %15680 = vst [vmem:[#allocation33_spill] sm:$0xff] %v11294_v60  ;;  %v9202_v60 = vld [vmem:[%s10595_s30 + $0x330] sm:$0xff] }
 0x231   : > { %9425 = vpow2.f32 %v8871_v20  ;;  %15681 = vst [vmem:[#allocation34_spill] sm:$0xff] %v11304_v54  ;;  %v11320_v46 = vadd.f32 %v10793_v40, %v11304_v54  ;;  %v9206_v54 = vld [vmem:[%s10595_s30 + $0x350] sm:$0xff] }
 0x232   : > { %9427 = vpow2.f32 %v8867_v18  ;;  %15685 = vst [vmem:[#allocation38_spill] sm:$0xff] %v11331_v24 }
 0x233   : > { %9429 = vpow2.f32 %v8872_v31  ;;  %v1106_v40 = vadd.f32 %v11144_v59, %v11320_v46  ;;  %v11343_v31 = vadd.f32 %v10858_v13, %v10720_v8 }
 0x234   : > { %9431 = vpow2.f32 %v8868_v33 }
 0x235   : > { %15686 = vst [vmem:[#allocation39_spill] sm:$0xff] %v11343_v31  ;;  %v11352_v53 = vadd.f32 %v10748_v21, %v11343_v31  ;;  %v8869_v8 = vmul.f32 -1.442695, %v1106_v40  ;;  %v9140_v40 = vld [vmem:[%s10595_s30 + $0x2c0] sm:$0xff] }
 0x236   : > { %9153 = vmatmul.msk.f32.gmra.mxu2 %vm784_vm0, %v9137_v41  ;;  %v11312_v41 = vadd.f32 %v10858_v13, %v10711_v4  ;;  %v11314_v34 = vpop.f32.mrf.mxu2  ;;  %v11326_v4 = vpop.f32.mrf.mxu1 }
 0x237   : > { %9217 = vmatmul.msk.f32.gmra.mxu1 %vm784_vm0, %v9201_v28  ;;  %v9426_v28 = vpop.eup %9425  ;;  %15683 = vst [vmem:[#allocation36_spill] sm:$0xff] %v11314_v34 }
 0x238   : > { %15682 = vst [vmem:[#allocation35_spill] sm:$0xff] %v11312_v41  ;;  %v9428_v0 = vpop.eup %9427  ;;  %v11324_v20 = vadd.f32 %v10743_v19, %v11312_v41  ;;  %v9203_v19 = vld [vmem:[%s10595_s30 + $0x338] sm:$0xff]  ;;  %v9141_v41 = vld [vmem:[%s10595_s30 + $0x2c8] sm:$0xff] }
 0x239   : > { %15684 = vst [vmem:[#allocation37_spill] sm:$0xff] %v11326_v4  ;;  %v11335_v15 = vadd.f32 1.0, %v9428_v0  ;;  %v9430_v4 = vpop.eup %9429 }
 0x23a   : > { %v1110_v18 = vadd.f32 %v11221_v56, %v11324_v20  ;;  %v11348_v56 = vadd.f32 %v10808_v48, %v11331_v24  ;;  %v9432_v59 = vpop.eup %9431  ;;  %v1111_v48 = vadd.f32 %v11235_v5, %v11352_v53  ;;  %v9142_v24 = vld [vmem:[%s10595_s30 + $0x2d0] sm:$0xff] }
 0x23b   : > { %vm1287_vm1 = vweird.f32 %v11335_v15 }
 0x23c   : > { %v8873_v34 = vmul.f32 -1.442695, %v1110_v18  ;;  %v1107_v21 = vadd.f32 %v11185_v63, %v11348_v56  ;;  %v8874_v5 = vmul.f32 -1.442695, %v1111_v48 }
 0x23e   : > { %9154 = vmatmul.msk.f32.gmra.mxu2 %vm784_vm0, %v9138_v47  ;;  %v9139_v47 = vld [vmem:[%s10595_s30 + $0x2b8] sm:$0xff]  ;;  %v11361_v33 = vpop.f32.mrf.mxu2  ;;  %v11363_v0 = vpop.f32.mrf.mxu1 }
 0x23f   : > { %9218 = vmatmul.msk.f32.gmra.mxu1 %vm784_vm0, %v9202_v60  ;;  %v11333_v60 = vadd.f32 1.0, %v9426_v28  ;;  %v11357_v28 = vadd.f32 1.0, %v9430_v4  ;;  %15687 = vst [vmem:[#allocation40_spill] sm:$0xff] %v11361_v33  ;;  %v11373_v4 = vadd.f32 1.0, %v9432_v59 }
 0x240   : > { %15688 = vst [vmem:[#allocation41_spill] sm:$0xff] %v11363_v0  ;;  %v11380_v0 = vadd.f32 %v10858_v13, %v10729_v12 }
 0x241   : > { %9433 = vrcp.f32 %v11333_v60  ;;  %vm1347_vm14 = vweird.f32 %v11333_v60  ;;  %vm1362_vm7 = vweird.f32 %v11357_v28  ;;  %vm1302_vm9 = vweird.f32 %v11373_v4 }
 0x242   : > { %9435 = vrcp.f32 %v11335_v15  ;;  %15689 = vst [vmem:[#allocation42_spill] sm:$0xff] %v11380_v0  ;;  %v11391_v12 = vadd.f32 %v10757_v25, %v11380_v0 }
 0x243   : > { %9437 = vpow2.f32 %v8873_v34  ;;  %v8870_v34 = vmul.f32 -1.442695, %v1107_v21 }
 0x244   : > { %9439 = vpow2.f32 %v8869_v8 }
 0x245   : > { %9441 = vrcp.f32 %v11357_v28 }
 0x246   : > { %9155 = vmatmul.msk.f32.gmra.mxu2 %vm784_vm0, %v9139_v47  ;;  %9443 = vrcp.f32 %v11373_v4  ;;  %v11401_v7 = vpop.f32.mrf.mxu1 }
 0x247   : > { %9219 = vmatmul.msk.f32.gmra.mxu1 %vm784_vm0, %v9203_v19  ;;  %v11367_v18 = vpop.eup %9433  ;;  %v9204_v19 = vld [vmem:[%s10595_s30 + $0x340] sm:$0xff]  ;;  %9445 = vpow2.f32 %v8874_v5  ;;  %15691 = vst [vmem:[#allocation44_spill] sm:$0xff] %v11401_v7 }
 0x248   : > { %v11375_v16 = vpop.eup %9435  ;;  %v1343_v63 = vmul.f32 %v11367_v18, %v11333_v60  ;;  %9447 = vpow2.f32 %v8870_v34  ;;  %vm1348_vm15 = vweird.f32 %v11367_v18 }
 0x249   : > { %v9438_v8 = vpop.eup %9437  ;;  %v1283_v59 = vmul.f32 %v11375_v16, %v11335_v15  ;;  %vm1288_vm2 = vweird.f32 %v11375_v16  ;;  %vm11436_vm3 = vmor %vm1347_vm14, %vm1348_vm15 }
 0x24a   : > { %v9440_v48 = vpop.eup %9439  ;;  %v11395_v21 = vadd.f32 1.0, %v9438_v8  ;;  %v1344_v33 = vsub.f32 1.0, %v1343_v63  ;;  %vm11457_vm4 = vmor %vm1287_vm1, %vm1288_vm2 }
 0x24b   : > { %v11369_v47 = vpop.permute.xlu2 %1515  ;;  %v11393_v13 = vpop.eup %9441  ;;  %v1284_v25 = vsub.f32 1.0, %v1283_v59  ;;  %v11407_v0 = vadd.f32 1.0, %v9440_v48 }
 0x24c   : > { %v11409_v5 = vpop.eup %9443  ;;  %v1358_v34 = vmul.f32 %v11393_v13, %v11357_v28  ;;  %9449 = vrcp.f32 %v11395_v21  ;;  %v1345_v63 = vmul.f32 %v11367_v18, %v1344_v33  ;;  %vm1363_vm8 = vweird.f32 %v11393_v13 }
 0x24d   : > { %v9446_v8 = vpop.eup %9445  ;;  %v1285_v59 = vmul.f32 %v11375_v16, %v1284_v25  ;;  %9451 = vrcp.f32 %v11407_v0  ;;  %v1298_v48 = vmul.f32 %v11409_v5, %v11373_v4  ;;  %v1351_v25 = vand.u32 2147483647, %v11333_v60  ;;  %vm11504_vm11 = vmor %vm1362_vm7, %vm1363_vm8 }
 0x24e   : > { %9156 = vmatmul.msk.f32.gmra.mxu2 %vm784_vm0, %v9140_v40  ;;  %v1112_v40 = vadd.f32 %v11249_v38, %v11391_v12  ;;  %v9448_v7 = vpop.eup %9447  ;;  %v1359_v33 = vsub.f32 1.0, %v1358_v34  ;;  %v11450_v11 = vpop.f32.mrf.mxu1  ;;  %vm1303_vm10 = vweird.f32 %v11409_v5  ;;  %vm1317_vm15 = vweird.f32 %v11407_v0 }
 0x24f   : > { %9220 = vmatmul.msk.f32.gmra.mxu1 %vm784_vm0, %v9204_v19  ;;  %v11399_v19 = vpop.f32.mrf.mxu2  ;;  %15695 = vst [vmem:[#allocation46_spill] sm:$0xff] %v11450_v11  ;;  %vm1352_vm5 = vcmp.eq.f32.partialorder %v1351_v25, 8.507059e+37  ;;  %v9143_v25 = vld [vmem:[%s10595_s30 + $0x2d8] sm:$0xff]  ;;  %vm11514_vm12 = vmor %vm1302_vm9, %vm1303_vm10 }
 0x250   : > { %15690 = vst [vmem:[#allocation43_spill] sm:$0xff] %v11399_v19  ;;  %v8875_v38 = vmul.f32 -1.442695, %v1112_v40  ;;  %v1346_v40 = vadd.f32 %v11367_v18, %v1345_v63  ;;  %v11430_v19 = vadd.f32 1.0, %v9448_v7  ;;  %v1291_v7 = vand.u32 2147483647, %v11335_v15 }
 0x252   : > { %9453 = vpow2.f32 %v8875_v38  ;;  %v11441_v49 = vpop.eup %9449  ;;  %v1299_v38 = vsub.f32 1.0, %v1298_v48  ;;  %vm1292_vm6 = vcmp.eq.f32.partialorder %v1291_v7, 8.507059e+37  ;;  %v1306_v48 = vand.u32 2147483647, %v11373_v4 }
 0x253   : > { %v11403_v31 = vpop.permute.xlu2 %1449  ;;  %v11447_v35 = vpop.eup %9451  ;;  %vm1378_vm2 = vweird.f32 %v11441_v49  ;;  %vm1332_vm9 = vweird.f32 %v11430_v19 }
 0x254   : > { %v1300_v11 = vmul.f32 %v11409_v5, %v1299_v38  ;;  %v1313_v52 = vmul.f32 %v11447_v35, %v11407_v0  ;;  %vm1307_vm13 = vcmp.eq.f32.partialorder %v1306_v48, 8.507059e+37  ;;  %vm1318_vm1 = vweird.f32 %v11447_v35  ;;  %v9144_v48 = vld [vmem:[%s10595_s30 + $0x2e0] sm:$0xff] }
 0x256   : > { %9157 = vmatmul.msk.f32.gmra.mxu2 %vm784_vm0, %v9141_v41  ;;  %v11424_v41 = vadd.f32 1.0, %v9446_v8  ;;  %v1293_v8 = vand.u32 2147483648, %v11335_v15  ;;  %v1373_v15 = vmul.f32 %v11441_v49, %v11395_v21  ;;  %v1301_v7 = vadd.f32 %v11409_v5, %v1300_v11  ;;  %v11529_v43 = vpop.f32.mrf.mxu1 }
 0x257   : > { %9221 = vmatmul.msk.f32.gmra.mxu1 %vm784_vm0, %v9205_v55  ;;  %v1353_v55 = vand.u32 2147483648, %v11333_v60  ;;  %v11443_v34 = vpop.f32.mrf.mxu2  ;;  %v1286_v60 = vadd.f32 %v11375_v16, %v1285_v59  ;;  %v1350_v59 = vsel %vm11436_vm3, %v11367_v18, %v1346_v40  ;;  %v1368_v18 = vand.u32 2147483648, %v11357_v28  ;;  %15703 = vst [vmem:[#allocation48_spill] sm:$0xff] %v11529_v43  ;;  %vm11569_vm3 = vmor %vm1317_vm15, %vm1318_vm1 }
 0x258   : > { %15694 = vst [vmem:[#allocation45_spill] sm:$0xff] %v11443_v34  ;;  %9455 = vrcp.f32 %v11424_v41  ;;  %v1374_v38 = vsub.f32 1.0, %v1373_v15 }
 0x259   : > { %v1354_v10 = vor.u32 1.1754944e-38, %v1353_v55  ;;  %9457 = vrcp.f32 %v11430_v19  ;;  %v1294_v55 = vor.u32 1.1754944e-38, %v1293_v8  ;;  %v9207_v8 = vld [vmem:[%s10595_s30 + $0x358] sm:$0xff] }
 0x25b   : > { %v11432_v32 = vpop.permute.xlu2 %1521  ;;  %v1514_v63 = vpop.permute.xlu0 %1513 }
 0x25c   : > { %v1561_v58 = vadd.f32 %v1514_v63, %v10869_v26  ;;  %v1360_v26 = vmul.f32 %v11393_v13, %v1359_v33  ;;  %v9454_v63 = vpop.eup %9453 }
 0x25d   : > { %v11488_v40 = vadd.f32 1.0, %v9454_v63  ;;  %v1323_v63 = vand.u32 2147483648, %v11407_v0 }
 0x25e   : > { %9158 = vmatmul.msk.f32.gmra.mxu2 %vm784_vm0, %v9142_v24  ;;  %9459 = vtanh.f32 %v1561_v58  ;;  %v1562_v58 = vadd.f32 %v11369_v47, %v10886_v62  ;;  %v11478_v24 = vsel %vm1352_vm5, %v1354_v10, %v1350_v59  ;;  %v11486_v33 = vpop.eup %9455  ;;  %v1308_v62 = vand.u32 2147483648, %v11373_v4 }
 0x25f   : > { %9222 = vmatmul.msk.f32.gmra.mxu1 %vm784_vm0, %v9206_v54  ;;  %v1290_v54 = vsel %vm11457_vm4, %v11375_v16, %v1286_v60  ;;  %v1361_v16 = vadd.f32 %v11393_v13, %v1360_v26  ;;  %v11495_v60 = vpop.eup %9457  ;;  %v11520_v34 = vpop.f32.mrf.mxu2  ;;  %vm1377_vm4 = vweird.f32 %v11395_v21  ;;  %vm1393_vm8 = vweird.f32 %v11486_v33 }
 0x260   : > { %v11491_v47 = vsel %vm1292_vm6, %v1294_v55, %v1290_v54  ;;  %v1314_v55 = vsub.f32 1.0, %v1313_v52  ;;  %9461 = vtanh.f32 %v1562_v58  ;;  %15702 = vst [vmem:[#allocation47_spill] sm:$0xff] %v11520_v34  ;;  %v1369_v58 = vor.u32 1.1754944e-38, %v1368_v18  ;;  %vm11580_vm5 = vmor %vm1377_vm4, %vm1378_vm2 }
 0x261   : > { %v1365_v4 = vsel %vm11504_vm11, %v11393_v13, %v1361_v16  ;;  %9463 = vrcp.f32 %v11488_v40  ;;  %v1305_v13 = vsel %vm11514_vm12, %v11409_v5, %v1301_v7  ;;  %v1328_v18 = vmul.f32 %v11495_v60, %v11430_v19 }
 0x262   : > { %v1315_v16 = vmul.f32 %v11447_v35, %v1314_v55  ;;  %vm1333_vm10 = vweird.f32 %v11495_v60  ;;  %vm1392_vm11 = vweird.f32 %v11424_v41  ;;  %vm1407_vm2 = vweird.f32 %v11488_v40 }
 0x263   : > { %v1456_v10 = vpop.permute.xlu2 %1455  ;;  %v1448_v26 = vpop.permute.xlu0 %1447  ;;  %vm11628_vm12 = vmor %vm1332_vm9, %vm1333_vm10 }
 0x264   : > { %v1492_v59 = vmul.f32 %v1456_v10, %v11478_v24  ;;  %v11508_v54 = vpop.eup %9459  ;;  %v1488_v15 = vmul.f32 %v1448_v26, %v11491_v47  ;;  %v1366_v10 = vand.u32 2147483647, %v11357_v28  ;;  %v1309_v26 = vor.u32 1.1754944e-38, %v1308_v62 }
 0x265   : > { %v1593_v52 = vsub.f32 0.0, %v11508_v54  ;;  %v1375_v28 = vmul.f32 %v11441_v49, %v1374_v38  ;;  %v1383_v62 = vand.u32 2147483648, %v11395_v21 }
 0x266   : > { %9159 = vmatmul.msk.f32.gmra.mxu2 %vm784_vm0, %v9143_v25  ;;  %1535 = vrot.lane.b32.xlu2 %v1492_v59, %s10236_s17  ;;  %v1388_v25 = vmul.f32 %v11486_v33, %v11424_v41  ;;  %vm1367_vm14 = vcmp.eq.f32.partialorder %v1366_v10, 8.507059e+37  ;;  %v11549_v5 = vpop.eup %9461  ;;  %v11551_v38 = vsel %vm1307_vm13, %v1309_v26, %v1305_v13  ;;  %v9208_v59 = vld [vmem:[%s10595_s30 + $0x360] sm:$0xff]  ;;  %vm11636_vm13 = vmor %vm1392_vm11, %vm1393_vm8 }
 0x267   : > { %9223 = vmatmul.msk.f32.gmra.mxu1 %vm784_vm0, %v9207_v8  ;;  %1527 = vrot.lane.b32.xlu0 %v1488_v15, %s10236_s17  ;;  %v11544_v8 = vsel %vm1367_vm14, %v1369_v58, %v1365_v4  ;;  %v1376_v55 = vadd.f32 %v11441_v49, %v1375_v28  ;;  %v1321_v4 = vand.u32 2147483647, %v11407_v0  ;;  %v1329_v58 = vsub.f32 1.0, %v1328_v18  ;;  %v11560_v43 = vpop.eup %9463 }
 0x268   : > { %1625 = vrot.lane.b32.xlu1 %v1593_v52, %s10237_s18  ;;  %v1389_v11 = vsub.f32 1.0, %v1388_v25  ;;  %v1316_v52 = vadd.f32 %v11447_v35, %v1315_v16  ;;  %v1489_v26 = vmul.f32 %v11403_v31, %v11551_v38  ;;  %v1594_v31 = vsub.f32 0.0, %v11549_v5 }
 0x269   : > { %v1324_v0 = vor.u32 1.1754944e-38, %v1323_v63  ;;  %v1384_v16 = vor.u32 1.1754944e-38, %v1383_v62  ;;  %vm1322_vm6 = vcmp.eq.f32.partialorder %v1321_v4, 8.507059e+37  ;;  %v1403_v63 = vmul.f32 %v11560_v43, %v11488_v40 }
 0x26a   : > { %v1390_v18 = vmul.f32 %v11486_v33, %v1389_v11  ;;  %v9145_v11 = vld [vmem:[%s10595_s30 + $0x2e8] sm:$0xff]  ;;  %v1338_v28 = vand.u32 2147483648, %v11430_v19  ;;  %vm1408_vm1 = vweird.f32 %v11560_v43 }
 0x26b   : > { %v1518_v7 = vpop.permute.xlu1 %1517  ;;  %v1458_v10 = vpop.permute.xlu2 %1457 }
 0x26c   : > { %v1563_v15 = vadd.f32 %v1518_v7, %v10903_v2  ;;  %v1493_v13 = vmul.f32 %v1458_v10, %v11544_v8  ;;  %v1381_v2 = vand.u32 2147483647, %v11395_v21  ;;  %v1380_v21 = vsel %vm11580_vm5, %v11441_v49, %v1376_v55  ;;  %v11590_v7 = vpop.f32.mrf.mxu2  ;;  %v9209_v10 = vld [vmem:[%s10595_s30 + $0x368] sm:$0xff] }
 0x26d   : > { %15708 = vst [vmem:[#allocation49_spill] sm:$0xff] %v11590_v7 }
 0x26e   : > { %9465 = vtanh.f32 %v1563_v15  ;;  %9160 = vmatmul.msk.f32.gmra.mxu2 %vm784_vm0, %v9144_v48  ;;  %1537 = vrot.lane.b32.xlu2 %v1493_v13, %s10236_s17  ;;  %v1320_v48 = vsel %vm11569_vm3, %v11447_v35, %v1316_v52  ;;  %v11599_v15 = vpop.f32.mrf.mxu1  ;;  %vm1382_vm7 = vcmp.eq.f32.partialorder %v1381_v2, 8.507059e+37  ;;  %v1391_v35 = vadd.f32 %v11486_v33, %v1390_v18  ;;  %vm1409_vm3 = vmor %vm1407_vm2, %vm1408_vm1 }
 0x26f   : > { %9224 = vmatmul.msk.f32.gmra.mxu1 %vm784_vm0, %v9208_v59  ;;  %1529 = vrot.lane.b32.xlu0 %v1489_v26, %s10236_s17  ;;  %v1330_v59 = vmul.f32 %v11495_v60, %v1329_v58  ;;  %15709 = vst [vmem:[#allocation50_spill] sm:$0xff] %v11599_v15  ;;  %v11601_v49 = vsel %vm1382_vm7, %v1384_v16, %v1380_v21  ;;  %v1404_v2 = vsub.f32 1.0, %v1403_v63  ;;  %v1336_v21 = vand.u32 2147483647, %v11430_v19 }
 0x270   : > { %1627 = vrot.lane.b32.xlu1 %v1594_v31, %s10237_s18  ;;  %v11604_v62 = vsel %vm1322_vm6, %v1324_v0, %v1320_v48  ;;  %v1398_v16 = vand.u32 2147483648, %v11424_v41  ;;  %v1396_v48 = vand.u32 2147483647, %v11424_v41  ;;  %v1395_v19 = vsel %vm11636_vm13, %v11486_v33, %v1391_v35  ;;  %v9210_v33 = vld [vmem:[%s10595_s30 + $0x370] sm:$0xff] }
 0x271   : > { %v1331_v13 = vadd.f32 %v11495_v60, %v1330_v59  ;;  %v1339_v59 = vor.u32 1.1754944e-38, %v1338_v28  ;;  %v1565_v63 = vadd.f32 %v11432_v32, %v10931_v3  ;;  %vm1337_vm14 = vcmp.eq.f32.partialorder %v1336_v21, 8.507059e+37 }
 0x272   : > { %v1399_v41 = vor.u32 1.1754944e-38, %v1398_v16  ;;  %vm1397_vm15 = vcmp.eq.f32.partialorder %v1396_v48, 8.507059e+37  ;;  %v1411_v21 = vand.u32 2147483647, %v11488_v40  ;;  %v9147_v48 = vld [vmem:[%s10595_s30 + $0x2f8] sm:$0xff] }
 0x273   : > { %v1452_v55 = vpop.permute.xlu1 %1451  ;;  %v1460_v58 = vpop.permute.xlu2 %1459 }
 0x274   : > { %v11611_v52 = vpop.eup %9465  ;;  %v1490_v4 = vmul.f32 %v1452_v55, %v11604_v62  ;;  %v1520_v26 = vpop.permute.xlu0 %1519  ;;  %v1494_v31 = vmul.f32 %v1460_v58, %v11601_v49  ;;  %v1335_v55 = vsel %vm11628_vm12, %v11495_v60, %v1331_v13  ;;  %v11658_v28 = vsel %vm1397_vm15, %v1399_v41, %v1395_v19  ;;  %v9211_v19 = vld [vmem:[%s10595_s30 + $0x378] sm:$0xff] }
 0x275   : > { %v1564_v25 = vadd.f32 %v1520_v26, %v10925_v42  ;;  %v1595_v0 = vsub.f32 0.0, %v11611_v52  ;;  %v9146_v26 = vld [vmem:[%s10595_s30 + $0x2f0] sm:$0xff]  ;;  %v11660_v32 = vsel %vm1337_vm14, %v1339_v59, %v1335_v55  ;;  %vm1412_vm4 = vcmp.eq.f32.partialorder %v1411_v21, 8.507059e+37  ;;  %v9264_v21 = vld [vmem:[%s10595_s30 + $0x3a0] sm:$0xff] }
 0x276   : > { %9161 = vmatmul.msk.f32.gmra.mxu2 %vm784_vm0, %v9145_v11  ;;  %1539 = vrot.lane.b32.xlu2 %v1494_v31, %s10236_s17  ;;  %v1405_v11 = vmul.f32 %v11560_v43, %v1404_v2 }
 0x277   : > { %9225 = vmatmul.msk.f32.gmra.mxu1 %vm784_vm0, %v9209_v10  ;;  %9467 = vtanh.f32 %v1564_v25  ;;  %1531 = vrot.lane.b32.xlu0 %v1490_v4, %s10236_s17  ;;  %v11651_v10 = vpop.f32.mrf.mxu2  ;;  %v11653_v4 = vpop.f32.mrf.mxu1 }
 0x278   : > { %1629 = vrot.lane.b32.xlu1 %v1595_v0, %s10237_s18  ;;  %15714 = vst [vmem:[#allocation51_spill] sm:$0xff] %v11651_v10  ;;  %9469 = vtanh.f32 %v1565_v63  ;;  %v1406_v25 = vadd.f32 %v11560_v43, %v1405_v11  ;;  %v1413_v0 = vand.u32 2147483648, %v11488_v40  ;;  %v15740_v10 = vld [vmem:[#allocation26_spill] sm:$0xff] }
 0x279   : > { %15715 = vst [vmem:[#allocation52_spill] sm:$0xff] %v11653_v4 }
 0x27a   : > { %v1410_v16 = vsel %vm1409_vm3, %v11560_v43, %v1406_v25  ;;  %v1414_v18 = vor.u32 1.1754944e-38, %v1413_v0  ;;  %v9263_v0 = vld [vmem:[%s10595_s30 + $0x398] sm:$0xff] }
 0x27b   : > { %v1524_v58 = vpop.permute.xlu1 %1523  ;;  %v1462_v3 = vpop.permute.xlu2 %1461 }
 0x27c   : > { %v1566_v35 = vadd.f32 %v1524_v58, %v10955_v44  ;;  %v1454_v60 = vpop.permute.xlu0 %1453  ;;  %v1495_v2 = vmul.f32 %v1462_v3, %v11658_v28  ;;  %v11688_v55 = vsel %vm1412_vm4, %v1414_v18, %v1410_v16  ;;  %v9265_v18 = vld [vmem:[%s10595_s30 + $0x3a8] sm:$0xff] }
 0x27d   : > { %v11663_v13 = vpop.eup %9467  ;;  %v1491_v31 = vmul.f32 %v1454_v60, %v11660_v32  ;;  %v9261_v60 = vld [vmem:[%s10595_s30 + $0x388] sm:$0xff] }
 0x27e   : > { %9471 = vtanh.f32 %v1566_v35  ;;  %9162 = vmatmul.msk.f32.gmra.mxu2 %vm784_vm0, %v9146_v26  ;;  %v1596_v44 = vsub.f32 0.0, %v11663_v13  ;;  %1541 = vrot.lane.b32.xlu2 %v1495_v2, %s10236_s17  ;;  %v11680_v42 = vpop.eup %9469 }
 0x27f   : > { %9226 = vmatmul.msk.f32.gmra.mxu1 %vm784_vm0, %v9210_v33  ;;  %1533 = vrot.lane.b32.xlu0 %v1491_v31, %s10236_s17  ;;  %v11686_v63 = vpop.f32.mrf.mxu2  ;;  %v11692_v43 = vpop.f32.mrf.mxu1  ;;  %v1597_v58 = vsub.f32 0.0, %v11680_v42  ;;  %v9260_v33 = vld [vmem:[%s10595_s30 + $0x380] sm:$0xff] }
 0x280   : > { %1631 = vrot.lane.b32.xlu1 %v1596_v44, %s10237_s18  ;;  %15716 = vst [vmem:[#allocation53_spill] sm:$0xff] %v11686_v63  ;;  %v15736_v63 = vld [vmem:[#allocation27_spill] sm:$0xff] }
 0x281   : > { %15717 = vst [vmem:[#allocation54_spill] sm:$0xff] %v11692_v43 }
 0x283   : > { %v1464_v40 = vpop.permute.xlu2 %1463 }
 0x284   : > { %v11684_v59 = vpop.eup %9471  ;;  %v1496_v11 = vmul.f32 %v1464_v40, %v11688_v55 }
 0x285   : > { %v1598_v41 = vsub.f32 0.0, %v11684_v59 }
 0x286   : > { %9163 = vmatmul.msk.f32.gmra.mxu2 %vm784_vm0, %v9147_v48  ;;  %1543 = vrot.lane.b32.xlu2 %v1496_v11, %s10236_s17  ;;  %v9267_v11 = vld [vmem:[%s10595_s30 + $0x3b8] sm:$0xff] }
 0x287   : > { %9227 = vmatmul.msk.f32.gmra.mxu1 %vm784_vm0, %v9211_v19  ;;  %1635 = vrot.lane.b32.xlu0 %v1598_v41, %s10237_s18  ;;  %v11702_v3 = vpop.f32.mrf.mxu2  ;;  %v9266_v19 = vld [vmem:[%s10595_s30 + $0x3b0] sm:$0xff] }
 0x288   : > { %1633 = vrot.lane.b32.xlu1 %v1597_v58, %s10237_s18  ;;  %15718 = vst [vmem:[#allocation55_spill] sm:$0xff] %v11702_v3  ;;  %v9268_v58 = vld [vmem:[%s10595_s30 + $0x3c0] sm:$0xff] }
 0x28b   : > { %v1526_v26 = vpop.permute.xlu0 %1525 }
 0x28c   : > { %v1567_v35 = vadd.f32 %v1526_v26, %v11001_v36  ;;  %v9262_v36 = vld [vmem:[%s10595_s30 + $0x390] sm:$0xff]  ;;  %v9269_v26 = vld [vmem:[%s10595_s30 + $0x3c8] sm:$0xff] }
 0x28e   : > { %9473 = vtanh.f32 %v1567_v35  ;;  %9276 = vmatmul.msk.f32.vlgmr.msra.gmra.mxu2 %vm784_vm0, %v9260_v33 }
 0x28f   : > { %v11711_v25 = vpop.f32.mrf.mxu2 }
 0x290   : > { %15719 = vst [vmem:[#allocation56_spill] sm:$0xff] %v11711_v25 }
 0x294   : > { %v11706_v2 = vpop.eup %9473 }
 0x295   : > { %v1599_v31 = vsub.f32 0.0, %v11706_v2 }
 0x296   : > { %9277 = vmatmul.msk.f32.gmra.mxu2 %vm784_vm0, %v9261_v60 }
 0x297   : > { %1637 = vrot.lane.b32.xlu0 %v1599_v31, %s10237_s18  ;;  %v11715_v44 = vpop.f32.mrf.mxu2 }
 0x298   : > { %15720 = vst [vmem:[#allocation57_spill] sm:$0xff] %v11715_v44 }
 0x29e   : > { %9278 = vmatmul.msk.f32.gmra.mxu2 %vm784_vm0, %v9262_v36 }
 0x29f   : > { %v11720_v16 = vpop.f32.mrf.mxu2 }
 0x2a0   : > { %15721 = vst [vmem:[#allocation58_spill] sm:$0xff] %v11720_v16 }
 0x2a6   : > { %9279 = vmatmul.msk.f32.gmra.mxu2 %vm784_vm0, %v9263_v0  ;;  %v9270_v0 = vld [vmem:[%s10595_s30 + $0x3d0] sm:$0xff] }
 0x2a7   : > { %v11724_v48 = vpop.f32.mrf.mxu2 }
 0x2a8   : > { %15722 = vst [vmem:[#allocation59_spill] sm:$0xff] %v11724_v48 }
 0x2ae   : > { %9280 = vmatmul.msk.f32.gmra.mxu2 %vm784_vm0, %v9264_v21 }
 0x2af   : > { %v11729_v40 = vpop.f32.mrf.mxu2 }
 0x2b0   : > { %15723 = vst [vmem:[#allocation60_spill] sm:$0xff] %v11729_v40 }
 0x2b6   : > { %9281 = vmatmul.msk.f32.gmra.mxu2 %vm784_vm0, %v9265_v18 }
 0x2b7   : > { %v11733_v41 = vpop.f32.mrf.mxu2 }
 0x2b8   : > { %15724 = vst [vmem:[#allocation61_spill] sm:$0xff] %v11733_v41 }
 0x2be   : > { %9282 = vmatmul.msk.f32.gmra.mxu2 %vm784_vm0, %v9266_v19 }
 0x2bf   : > { %v11738_v33 = vpop.f32.mrf.mxu2 }
 0x2c0   : > { %15725 = vst [vmem:[#allocation62_spill] sm:$0xff] %v11738_v33 }
 0x2c6   : > { %9283 = vmatmul.msk.f32.gmra.mxu2 %vm784_vm0, %v9267_v11 }
 0x2c7   : > { %v11745_v21 = vpop.f32.mrf.mxu2 }
 0x2c8   : > { %15726 = vst [vmem:[#allocation63_spill] sm:$0xff] %v11745_v21 }
 0x2ce   : > { %9284 = vmatmul.msk.f32.gmra.mxu2 %vm784_vm0, %v9268_v58 }
 0x2d6   : > { %9285 = vmatmul.msk.f32.gmra.mxu2 %vm784_vm0, %v9269_v26  ;;  %v9271_v26 = vld [vmem:[%s10595_s30 + $0x3d8] sm:$0xff] }
 0x2d9   : > { %v1528_v35 = vpop.permute.xlu0 %1527 }
 0x2da   : > { %v1568_v60 = vadd.f32 %v1528_v35, %v11271_v17  ;;  %v1626_v31 = vpop.permute.xlu1 %1625  ;;  %v11757_v35 = vpop.f32.mrf.mxu2 }
 0x2db   : > { %v1673_v36 = vmul.f32 %v1626_v31, %v11022_v61  ;;  %15727 = vst [vmem:[#allocation64_spill] sm:$0xff] %v11757_v35 }
 0x2dc   : > { %9475 = vtanh.f32 %v1568_v60 }
 0x2dd   : > { %1705 = vrot.lane.b32.xlu1 %v1673_v36, %s10238_s19 }
 0x2de   : > { %9286 = vmatmul.msk.f32.gmra.mxu2 %vm784_vm0, %v9270_v0 }
 0x2e1   : > { %v1530_v18 = vpop.permute.xlu0 %1529 }
 0x2e2   : > { %v1569_v19 = vadd.f32 %v1530_v18, %v11300_v1  ;;  %v1628_v11 = vpop.permute.xlu1 %1627  ;;  %v11749_v58 = vpop.eup %9475  ;;  %v9272_v18 = vld [vmem:[%s10595_s30 + $0x3e0] sm:$0xff] }
 0x2e3   : > { %v1674_v17 = vmul.f32 %v1628_v11, %v11059_v23  ;;  %v1600_v61 = vsub.f32 0.0, %v11749_v58  ;;  %v1536_v23 = vpop.permute.xlu2 %1535 }
 0x2e4   : > { %9477 = vtanh.f32 %v1569_v19 }
 0x2e5   : > { %1707 = vrot.lane.b32.xlu1 %v1674_v17, %s10238_s19  ;;  %1639 = vrot.lane.b32.xlu0 %v1600_v61, %s10237_s18 }
 0x2e6   : > { %9287 = vmatmul.msk.f32.gmra.mxu2 %vm784_vm0, %v9271_v26 }
 0x2e9   : > { %v1532_v60 = vpop.permute.xlu0 %1531 }
 0x2ea   : > { %v1570_v1 = vadd.f32 %v1532_v60, %v11320_v46  ;;  %v1630_v31 = vpop.permute.xlu1 %1629  ;;  %v11760_v36 = vpop.eup %9477 }
 0x2eb   : > { %v1675_v0 = vmul.f32 %v1630_v31, %v11086_v50  ;;  %v1601_v19 = vsub.f32 0.0, %v11760_v36  ;;  %v11770_v46 = vpop.f32.mrf.mxu2  ;;  %v1538_v31 = vpop.permute.xlu2 %1537 }
 0x2ec   : > { %9479 = vtanh.f32 %v1570_v1  ;;  %15728 = vst [vmem:[#allocation65_spill] sm:$0xff] %v11770_v46  ;;  %v9273_v1 = vld [vmem:[%s10595_s30 + $0x3e8] sm:$0xff] }
 0x2ed   : > { %1709 = vrot.lane.b32.xlu1 %v1675_v0, %s10238_s19  ;;  %1641 = vrot.lane.b32.xlu0 %v1601_v19, %s10237_s18  ;;  %v1572_v0 = vadd.f32 %v1536_v23, %v11267_v29  ;;  %v1573_v29 = vadd.f32 %v1538_v31, %v11292_v9 }
 0x2ee   : > { %9288 = vmatmul.msk.f32.gmra.mxu2 %vm784_vm0, %v9272_v18 }
 0x2f1   : > { %v1534_v11 = vpop.permute.xlu0 %1533 }
 0x2f2   : > { %v11768_v17 = vpop.eup %9479  ;;  %v1571_v26 = vadd.f32 %v1534_v11, %v11348_v56  ;;  %v1632_v61 = vpop.permute.xlu1 %1631 }
 0x2f3   : > { %v1676_v50 = vmul.f32 %v1632_v61, %v11155_v45  ;;  %v1602_v60 = vsub.f32 0.0, %v11768_v17  ;;  %v9274_v61 = vld [vmem:[%s10595_s30 + $0x3f0] sm:$0xff]  ;;  %v1540_v23 = vpop.permute.xlu2 %1539 }
 0x2f4   : > { %9481 = vtanh.f32 %v1571_v26 }
 0x2f5   : > { %1711 = vrot.lane.b32.xlu1 %v1676_v50, %s10238_s19  ;;  %1643 = vrot.lane.b32.xlu0 %v1602_v60, %s10237_s18  ;;  %9483 = vtanh.f32 %v1572_v0  ;;  %v11786_v50 = vpop.f32.mrf.mxu2  ;;  %v1574_v0 = vadd.f32 %v1540_v23, %v11324_v20 }
 0x2f6   : > { %9289 = vmatmul.msk.f32.gmra.mxu2 %vm784_vm0, %v9273_v1  ;;  %15729 = vst [vmem:[#allocation66_spill] sm:$0xff] %v11786_v50  ;;  %9485 = vtanh.f32 %v1573_v29 }
 0x2f7   : > { %9487 = vtanh.f32 %v1574_v0 }
 0x2f9   : > { %v1636_v18 = vpop.permute.xlu0 %1635 }
 0x2fa   : > { %v11780_v19 = vpop.eup %9481  ;;  %v1634_v45 = vpop.permute.xlu1 %1633  ;;  %v1678_v56 = vmul.f32 %v1636_v18, %v11187_v27  ;;  %v9275_v27 = vld [vmem:[%s10595_s30 + $0x3f8] sm:$0xff] }
 0x2fb   : > { %v1677_v11 = vmul.f32 %v1634_v45, %v11148_v39  ;;  %v1603_v26 = vsub.f32 0.0, %v11780_v19  ;;  %v11793_v60 = vpop.eup %9483  ;;  %v1542_v31 = vpop.permute.xlu2 %1541 }
 0x2fc   : > { %v1604_v39 = vsub.f32 0.0, %v11793_v60  ;;  %v11802_v9 = vpop.eup %9485 }
 0x2fd   : > { %1713 = vrot.lane.b32.xlu1 %v1677_v11, %s10238_s19  ;;  %1645 = vrot.lane.b32.xlu2 %v1603_v26, %s10237_s18  ;;  %v11798_v1 = vpop.f32.mrf.mxu2  ;;  %v1575_v11 = vadd.f32 %v1542_v31, %v11352_v53  ;;  %v11809_v26 = vpop.eup %9487 }
 0x2fe   : > { %1715 = vrot.lane.b32.xlu0 %v1678_v56, %s10238_s19  ;;  %9290 = vmatmul.msk.f32.gmra.mxu2 %vm784_vm0, %v9274_v61  ;;  %15730 = vst [vmem:[#allocation67_spill] sm:$0xff] %v11798_v1  ;;  %v1605_v56 = vsub.f32 0.0, %v11802_v9  ;;  %v1606_v61 = vsub.f32 0.0, %v11809_v26 }
 0x2ff   : > { %9489 = vtanh.f32 %v1575_v11 }
 0x303   : > { %v1544_v20 = vpop.permute.xlu2 %1543 }
 0x304   : > { %v1576_v29 = vadd.f32 %v1544_v20, %v11391_v12 }
 0x305   : > { %1647 = vrot.lane.b32.xlu2 %v1604_v39, %s10237_s18  ;;  %v11814_v23 = vpop.eup %9489 }
 0x306   : > { %9291 = vmatmul.msk.f32.gmra.mxu2 %vm784_vm0, %v9275_v27  ;;  %9491 = vtanh.f32 %v1576_v29  ;;  %vm1028_vm0 = vcmask 130048  }
 0x309   : > { %v1638_v18 = vpop.permute.xlu0 %1637 }
 0x30a   : > { %v1679_v45 = vmul.f32 %v1638_v18, %v11217_v30  ;;  %v1607_v30 = vsub.f32 0.0, %v11814_v23 }
 0x30c   : > { %1717 = vrot.lane.b32.xlu0 %v1679_v45, %s10238_s19  ;;  %v11818_v39 = vpop.eup %9491 }
 0x30d   : > { %1649 = vrot.lane.b32.xlu2 %v1605_v56, %s10237_s18  ;;  %v1608_v53 = vsub.f32 0.0, %v11818_v39 }
 0x315   : > { %1651 = vrot.lane.b32.xlu2 %v1606_v61, %s10237_s18 }
 0x31d   : > { %1653 = vrot.lane.b32.xlu2 %v1607_v30, %s10237_s18 }
 0x325   : > { %1655 = vrot.lane.b32.xlu2 %v1608_v53, %s10237_s18 }
 0x34f   : > { %v1706_v27 = vpop.permute.xlu1 %1705 }
 0x350   : > { %v11823_v0 = vadd.f32 %v11508_v54, %v1706_v27 }
 0x352   : > { %1915 = vrot.lane.b32.xlu1 %v11823_v0, %s10235_s9 }
 0x357   : > { %v1708_v12 = vpop.permute.xlu1 %1707  ;;  %v1646_v31 = vpop.permute.xlu2 %1645 }
 0x358   : > { %v11828_v18 = vadd.f32 %v11549_v5, %v1708_v12  ;;  %v1640_v45 = vpop.permute.xlu0 %1639  ;;  %v1683_v27 = vmul.f32 %v1646_v31, %v11660_v32 }
 0x359   : > { %v1680_v56 = vmul.f32 %v1640_v45, %v11491_v47 }
 0x35a   : > { %1917 = vrot.lane.b32.xlu1 %v11828_v18, %s10235_s9 }
 0x35b   : > { %1719 = vrot.lane.b32.xlu0 %v1680_v56, %s10238_s19 }
 0x35f   : > { %v1710_v11 = vpop.permute.xlu1 %1709  ;;  %v1648_v20 = vpop.permute.xlu2 %1647 }
 0x360   : > { %v11835_v54 = vadd.f32 %v11611_v52, %v1710_v11  ;;  %v1684_v61 = vmul.f32 %v1648_v20, %v11478_v24  ;;  %v1642_v29 = vpop.permute.xlu0 %1641 }
 0x361   : > { %v1681_v30 = vmul.f32 %v1642_v29, %v11551_v38 }
 0x362   : > { %1919 = vrot.lane.b32.xlu1 %v11835_v54, %s10235_s9  ;;  %1727 = vrot.lane.b32.xlu2 %v1684_v61, %s10238_s19 }
 0x363   : > { %1721 = vrot.lane.b32.xlu0 %v1681_v30, %s10238_s19 }
 0x367   : > { %v1712_v47 = vpop.permute.xlu1 %1711 }
 0x368   : > { %v11844_v5 = vadd.f32 %v11663_v13, %v1712_v47  ;;  %v1644_v53 = vpop.permute.xlu0 %1643 }
 0x369   : > { %v1682_v52 = vmul.f32 %v1644_v53, %v11604_v62  ;;  %v1650_v62 = vpop.permute.xlu2 %1649 }
 0x36a   : > { %1921 = vrot.lane.b32.xlu1 %v11844_v5, %s10235_s9 }
 0x36b   : > { %1723 = vrot.lane.b32.xlu0 %v1682_v52, %s10238_s19 }
 0x36f   : > { %v1714_v24 = vpop.permute.xlu1 %1713 }
 0x370   : > { %v11851_v38 = vadd.f32 %v11680_v42, %v1714_v24  ;;  %v1716_v13 = vpop.permute.xlu0 %1715  ;;  %v1685_v42 = vmul.f32 %v1650_v62, %v11544_v8  ;;  %v10198_v8 = vld [vmem:[%s15597_s1 + $0x10] sm:$0xff] }
 0x371   : > { %v11858_v12 = vadd.f32 %v11684_v59, %v1716_v13  ;;  %v1652_v32 = vpop.permute.xlu2 %1651 }
 0x372   : > { %1923 = vrot.lane.b32.xlu1 %v11851_v38, %s10235_s9  ;;  %v1686_v31 = vmul.f32 %v1652_v32, %v11601_v49 }
 0x373   : > { %1725 = vrot.lane.b32.xlu0 %v1683_v27, %s10238_s19 }
 0x379   : > { %v1654_v61 = vpop.permute.xlu2 %1653 }
 0x37a   : > { %1925 = vrot.lane.b32.xlu1 %v11858_v12, %s10235_s9  ;;  %v1687_v47 = vmul.f32 %v1654_v61, %v11658_v28 }
 0x37e   : > { %v1718_v45 = vpop.permute.xlu0 %1717 }
 0x37f   : > { %v11863_v56 = vadd.f32 %v11706_v2, %v1718_v45  ;;  %v10197_v2 = vld [vmem:[%s15597_s1 + $0x18] sm:$0xff] }
 0x381   : > { %1927 = vrot.lane.b32.xlu0 %v11863_v56, %s10235_s9 }
 0x382   : > { %1729 = vrot.lane.b32.xlu1 %v1685_v42, %s10238_s19 }
 0x389   : > { %1731 = vrot.lane.b32.xlu0 %v1686_v31, %s10238_s19 }
 0x3c4   : > { %v1916_v59 = vpop.permute.xlu1 %1915 }
 0x3c5   : > { %8908 = vmatmul.msk.f32.vlgmr.msrb.gmra.mxu0 %vm1028_vm0, %v1916_v59 }
 0x3c6   : > { %5781 = vmatpush.msrb.mxu0 %v10197_v2 }
 0x3c8   : > { %5782 = vmatpush.msrb.mxu0 %v10198_v8 }
 0x3cc   : > { %v1918_v11 = vpop.permute.xlu1 %1917 }
 0x3cd   : > { %v1720_v20 = vpop.permute.xlu0 %1719  ;;  %8909 = vmatmul.msk.f32.gmra.mxu0 %vm1028_vm0, %v1918_v11  ;;  %v11932_v11 = vld [vmem:[%s15597_s1 + $0x21] ss:$0 sm:$0xff] }
 0x3ce   : > { %v11880_v49 = vadd.f32 %v11749_v58, %v1720_v20  ;;  %v1656_v58 = vpop.permute.xlu2 %1655 }
 0x3cf   : > { %v1688_v27 = vmul.f32 %v1656_v58, %v11688_v55 }
 0x3d0   : > { %1929 = vrot.lane.b32.xlu2 %v11880_v49, %s10235_s9 }
 0x3d4   : > { %v1920_v29 = vpop.permute.xlu1 %1919 }
 0x3d5   : > { %v1722_v30 = vpop.permute.xlu0 %1721  ;;  %8910 = vmatmul.msk.f32.gmra.mxu0 %vm1028_vm0, %v1920_v29 }
 0x3d6   : > { %v11887_v53 = vadd.f32 %v11760_v36, %v1722_v30  ;;  %v1728_v28 = vpop.permute.xlu2 %1727 }
 0x3d7   : > { %v11902_v45 = vadd.f32 %v11793_v60, %v1728_v28 }
 0x3d8   : > { %1733 = vrot.lane.b32.xlu2 %v1687_v47, %s10238_s19  ;;  %1931 = vrot.lane.b32.xlu1 %v11887_v53, %s10235_s9 }
 0x3dc   : > { %v1922_v52 = vpop.permute.xlu1 %1921 }
 0x3dd   : > { %v1724_v24 = vpop.permute.xlu0 %1723  ;;  %8911 = vmatmul.msk.f32.gmra.mxu0 %vm1028_vm0, %v1922_v52 }
 0x3de   : > { %v11895_v13 = vadd.f32 %v11768_v17, %v1724_v24 }
 0x3e0   : > { %1735 = vrot.lane.b32.xlu1 %v1688_v27, %s10238_s19  ;;  %1933 = vrot.lane.b32.xlu0 %v11895_v13, %s10235_s9 }
 0x3e4   : > { %v1924_v36 = vpop.permute.xlu1 %1923 }
 0x3e5   : > { %v1726_v62 = vpop.permute.xlu0 %1725  ;;  %8912 = vmatmul.msk.f32.gmra.mxu0 %vm1028_vm0, %v1924_v36 }
 0x3e6   : > { %v11905_v42 = vadd.f32 %v11780_v19, %v1726_v62 }
 0x3e8   : > { %1937 = vrot.lane.b32.xlu0 %v11902_v45, %s10235_s9  ;;  %1935 = vrot.lane.b32.xlu2 %v11905_v42, %s10235_s9 }
 0x3ec   : > { %v1926_v55 = vpop.permute.xlu1 %1925 }
 0x3ed   : > { %8913 = vmatmul.msk.f32.gmra.mxu0 %vm1028_vm0, %v1926_v55 }
 0x3f3   : > { %v1928_v17 = vpop.permute.xlu0 %1927 }
 0x3f4   : > { %v1730_v32 = vpop.permute.xlu1 %1729 }
 0x3f5   : > { %v11913_v31 = vadd.f32 %v11802_v9, %v1730_v32  ;;  %8914 = vmatmul.msk.f32.gmra.mxu0 %vm1028_vm0, %v1928_v17  ;;  %v11956_v32 = vadd.f32 %v11121_v14, %v10863_v22 }
 0x3f7   : > { %1939 = vrot.lane.b32.xlu1 %v11913_v31, %s10235_s9 }
 0x3fb   : > { %v1732_v19 = vpop.permute.xlu0 %1731 }
 0x3fc   : > { %v11919_v60 = vadd.f32 %v11809_v26, %v1732_v19 }
 0x3fe   : > { %1941 = vrot.lane.b32.xlu2 %v11919_v60, %s10235_s9 }
 0x42a   : > { %v1930_v59 = vpop.permute.xlu2 %1929 }
 0x42b   : > { %8915 = vmatmul.msk.f32.gmra.mxu0 %vm1028_vm0, %v1930_v59 }
 0x432   : > { %v1734_v2 = vpop.permute.xlu2 %1733 }
 0x433   : > { %v11925_v8 = vadd.f32 %v11814_v23, %v1734_v2 }
 0x435   : > { %1943 = vrot.lane.b32.xlu0 %v11925_v8, %s10235_s9 }
 0x442   : > { %v1996_v9 = vpop.f32.mrf.mxu0  ;;  %v1936_v52 = vpop.permute.xlu2 %1935 }
 0x443   : > { %v1997_v26 = vadd.f32 %v11932_v11, %v1996_v9 }
 0x445   : > { %2380 = vrot.lane.b32.xlu2 %v1997_v26, %s10235_s9  ;;  %v2044_v59 = vadd.f32 %v1997_v26, %v11956_v32  ;;  %v11972_v26 = vadd.f32 %v11213_v51, %v10912_v57 }
 0x447   : > { %v8924_v2 = vmul.f32 -1.442695, %v2044_v59 }
 0x449   : > { %9493 = vpow2.f32 %v8924_v2 }
 0x44a   : > { %v1932_v20 = vpop.permute.xlu1 %1931  ;;  %v1999_v61 = vpop.f32.mrf.mxu0 }
 0x44b   : > { %v2000_v29 = vadd.f32 %v11932_v11, %v1999_v61  ;;  %8916 = vmatmul.msk.f32.gmra.mxu0 %vm1028_vm0, %v1932_v20 }
 0x44d   : > { %2382 = vrot.lane.b32.xlu0 %v2000_v29, %s10235_s9 }
 0x44f   : > { %v9494_v14 = vpop.eup %9493 }
 0x452   : > { %v1736_v23 = vpop.permute.xlu1 %1735  ;;  %v1934_v30 = vpop.permute.xlu0 %1933 }
 0x453   : > { %v11940_v47 = vadd.f32 %v11818_v39, %v1736_v23  ;;  %v2002_v58 = vpop.f32.mrf.mxu0  ;;  %8917 = vmatmul.msk.f32.gmra.mxu0 %vm1028_vm0, %v1934_v30  ;;  %v2108_v23 = vadd.f32 1.0, %v9494_v14 }
 0x454   : > { %v2003_v24 = vadd.f32 %v11932_v11, %v2002_v58 }
 0x455   : > { %1945 = vrot.lane.b32.xlu1 %v11940_v47, %s10235_s9  ;;  %9495 = vrcp.f32 %v2108_v23  ;;  %vm2129_vm6 = vweird.f32 %v2108_v23 }
 0x458   : > { %v1942_v9 = vpop.permute.xlu2 %1941 }
 0x45a   : > { %v1938_v39 = vpop.permute.xlu0 %1937 }
 0x45b   : > { %v2005_v27 = vpop.f32.mrf.mxu0  ;;  %8918 = vmatmul.msk.f32.gmra.mxu0 %vm1028_vm0, %v1936_v52  ;;  %v9496_v58 = vpop.eup %9495 }
 0x45c   : > { %v2006_v28 = vadd.f32 %v11932_v11, %v2005_v27  ;;  %v11977_v27 = vadd.f32 %v11168_v6, %v10880_v37  ;;  %vm2130_vm5 = vweird.f32 %v9496_v58  ;;  %v15732_v6 = vld [vmem:[#allocation21_spill] sm:$0xff] }
 0x45d   : > { %2384 = vrot.lane.b32.xlu1 %v2003_v24, %s10235_s9  ;;  %vm2131_vm7 = vmor %vm2129_vm6, %vm2130_vm5 }
 0x45e   : > { %2386 = vrot.lane.b32.xlu2 %v2006_v28, %s10235_s9  ;;  %v2047_v30 = vadd.f32 %v2006_v28, %v11972_v26  ;;  %v2133_v28 = vand.u32 2147483647, %v2108_v23 }
 0x460   : > { %v8927_v52 = vmul.f32 -1.442695, %v2047_v30  ;;  %v15731_v30 = vld [vmem:[#allocation8_spill] sm:$0xff]  ;;  %vm2134_vm8 = vcmp.eq.f32.partialorder %v2133_v28, 8.507059e+37 }
 0x461   : > { %v11982_v1 = vadd.f32 %v15732_v6, %v15731_v30  ;;  %v15733_v6 = vld [vmem:[#allocation11_spill] sm:$0xff] }
 0x462   : > { %9497 = vpow2.f32 %v8927_v52 }
 0x463   : > { %v2008_v36 = vpop.f32.mrf.mxu0  ;;  %8919 = vmatmul.msk.f32.gmra.mxu0 %vm1028_vm0, %v1938_v39  ;;  %v2125_v39 = vmul.f32 %v9496_v58, %v2108_v23 }
 0x464   : > { %v2009_v62 = vadd.f32 %v11932_v11, %v2008_v36  ;;  %v2045_v36 = vadd.f32 %v2000_v29, %v11977_v27 }
 0x466   : > { %2388 = vrot.lane.b32.xlu0 %v2009_v62, %s10235_s9 }
 0x468   : > { %v9498_v2 = vpop.eup %9497 }
 0x469   : > { %v1940_v55 = vpop.permute.xlu1 %1939 }
 0x46b   : > { %v2011_v17 = vpop.f32.mrf.mxu0  ;;  %8920 = vmatmul.msk.f32.gmra.mxu0 %vm1028_vm0, %v1940_v55  ;;  %v2126_v55 = vsub.f32 1.0, %v2125_v39  ;;  %v2046_v39 = vadd.f32 %v2003_v24, %v11982_v1 }
 0x46c   : > { %v11959_v19 = vadd.f32 %v11932_v11, %v2011_v17  ;;  %v8925_v17 = vmul.f32 -1.442695, %v2045_v36 }
 0x46d   : > { %v2127_v59 = vmul.f32 %v9496_v58, %v2126_v55  ;;  %v8926_v50 = vmul.f32 -1.442695, %v2046_v39 }
 0x46e   : > { %2390 = vrot.lane.b32.xlu1 %v11959_v19, %s10235_s9  ;;  %9499 = vpow2.f32 %v8925_v17 }
 0x46f   : > { %v2128_v51 = vadd.f32 %v9496_v58, %v2127_v59  ;;  %v1863_v59 = vpop.f32.mrf.mxu3 }
 0x471   : > { %v2132_v29 = vsel %vm2131_vm7, %v9496_v58, %v2128_v51  ;;  %v11993_v58 = vadd.f32 %v1863_v59, %v15733_v6 }
 0x473   : > { %v2014_v20 = vpop.f32.mrf.mxu0  ;;  %8921 = vmatmul.msk.f32.gmra.mxu0 %vm1028_vm0, %v1942_v9  ;;  %v2111_v9 = vadd.f32 1.0, %v9498_v2  ;;  %v2048_v24 = vadd.f32 %v2009_v62, %v11993_v58 }
 0x474   : > { %v11966_v61 = vadd.f32 %v11932_v11, %v2014_v20  ;;  %v2135_v20 = vand.u32 2147483648, %v2108_v23  ;;  %v9500_v14 = vpop.eup %9499 }
 0x475   : > { %9501 = vrcp.f32 %v2111_v9  ;;  %v11985_v36 = vadd.f32 1.0, %v9500_v14  ;;  %vm2174_vm10 = vweird.f32 %v2111_v9  ;;  %v2178_v35 = vand.u32 2147483647, %v2111_v9 }
 0x476   : > { %2392 = vrot.lane.b32.xlu0 %v11966_v61, %s10235_s9  ;;  %v2136_v52 = vor.u32 1.1754944e-38, %v2135_v20 }
 0x477   : > { %9503 = vrcp.f32 %v11985_v36  ;;  %v1866_v39 = vpop.f32.mrf.mxu3  ;;  %vm2179_vm12 = vcmp.eq.f32.partialorder %v2178_v35, 8.507059e+37  ;;  %vm2144_vm14 = vweird.f32 %v11985_v36 }
 0x478   : > { %v11987_v55 = vsel %vm2134_vm8, %v2136_v52, %v2132_v29  ;;  %9505 = vpow2.f32 %v8926_v50  ;;  %v15734_v50 = vld [vmem:[#allocation13_spill] sm:$0xff] }
 0x479   : > { %v12004_v46 = vadd.f32 %v1866_v39, %v15734_v50 }
 0x47b   : > { %v9502_v2 = vpop.eup %9501 }
 0x47c   : > { %v2170_v51 = vmul.f32 %v9502_v2, %v2111_v9  ;;  %vm2175_vm9 = vweird.f32 %v9502_v2 }
 0x47d   : > { %v9504_v14 = vpop.eup %9503  ;;  %vm2176_vm11 = vmor %vm2174_vm10, %vm2175_vm9 }
 0x47e   : > { %v2171_v52 = vsub.f32 1.0, %v2170_v51  ;;  %v9506_v59 = vpop.eup %9505  ;;  %vm2145_vm13 = vweird.f32 %v9504_v14 }
 0x47f   : > { %v12006_v21 = vadd.f32 1.0, %v9506_v59  ;;  %v1869_v41 = vpop.f32.mrf.mxu3  ;;  %vm2146_vm15 = vmor %vm2144_vm14, %vm2145_vm13 }
 0x480   : > { %v2172_v62 = vmul.f32 %v9502_v2, %v2171_v52  ;;  %v15735_v52 = vld [vmem:[#allocation16_spill] sm:$0xff] }
 0x481   : > { %v12012_v59 = vadd.f32 %v1869_v41, %v15735_v52  ;;  %v2150_v41 = vand.u32 2147483648, %v11985_v36  ;;  %vm2159_vm3 = vweird.f32 %v12006_v21 }
 0x482   : > { %v2173_v51 = vadd.f32 %v9502_v2, %v2172_v62 }
 0x487   : > { %v1872_v48 = vpop.f32.mrf.mxu3 }
 0x488   : > { %v12052_v25 = vadd.f32 %v1872_v48, %v15736_v63 }
 0x49f   : > { %v2381_v17 = vpop.permute.xlu2 %2380 }
 0x4a0   : > { %v2428_v23 = vmul.f32 %v2381_v17, %v11987_v55  ;;  %v8928_v17 = vmul.f32 -1.442695, %v2048_v24  ;;  %v2180_v24 = vand.u32 2147483648, %v2111_v9 }
 0x4a2   : > { %2460 = vrot.lane.b32.xlu2 %v2428_v23, %s10236_s17  ;;  %v2140_v23 = vmul.f32 %v9504_v14, %v11985_v36  ;;  %9507 = vpow2.f32 %v8928_v17  ;;  %v2177_v17 = vsel %vm2176_vm11, %v9502_v2, %v2173_v51  ;;  %v2181_v43 = vor.u32 1.1754944e-38, %v2180_v24 }
 0x4a3   : > { %9509 = vrcp.f32 %v12006_v21 }
 0x4a4   : > { %v12018_v62 = vsel %vm2179_vm12, %v2181_v43, %v2177_v17 }
 0x4a7   : > { %v1944_v20 = vpop.permute.xlu0 %1943 }
 0x4a8   : > { %v2017_v28 = vpop.f32.mrf.mxu0  ;;  %8922 = vmatmul.msk.f32.gmra.mxu0 %vm1028_vm0, %v1944_v20  ;;  %v2049_v20 = vadd.f32 %v11959_v19, %v12004_v46  ;;  %v9508_v40 = vpop.eup %9507  ;;  %v2050_v19 = vadd.f32 %v11966_v61, %v12012_v59  ;;  %v2151_v61 = vor.u32 1.1754944e-38, %v2150_v41 }
 0x4a9   : > { %v11998_v29 = vadd.f32 %v11932_v11, %v2017_v28  ;;  %v2141_v28 = vsub.f32 1.0, %v2140_v23  ;;  %v12016_v23 = vadd.f32 1.0, %v9508_v40  ;;  %v9510_v4 = vpop.eup %9509 }
 0x4aa   : > { %v8929_v33 = vmul.f32 -1.442695, %v2049_v20  ;;  %v8930_v2 = vmul.f32 -1.442695, %v2050_v19  ;;  %v2155_v40 = vmul.f32 %v9510_v4, %v12006_v21  ;;  %vm2160_vm2 = vweird.f32 %v9510_v4 }
 0x4ab   : > { %2394 = vrot.lane.b32.xlu2 %v11998_v29, %s10235_s9  ;;  %v2142_v39 = vmul.f32 %v9504_v14, %v2141_v28  ;;  %vm2161_vm4 = vmor %vm2159_vm3, %vm2160_vm2  ;;  %vm2189_vm7 = vweird.f32 %v12016_v23 }
 0x4ac   : > { %9511 = vpow2.f32 %v8929_v33  ;;  %v2148_v33 = vand.u32 2147483647, %v11985_v36  ;;  %v2156_v17 = vsub.f32 1.0, %v2155_v40  ;;  %v2165_v40 = vand.u32 2147483648, %v12006_v21 }
 0x4ad   : > { %v2143_v9 = vadd.f32 %v9504_v14, %v2142_v39  ;;  %9513 = vrcp.f32 %v12016_v23 }
 0x4ae   : > { %vm2149_vm1 = vcmp.eq.f32.partialorder %v2148_v33, 8.507059e+37  ;;  %9515 = vpow2.f32 %v8930_v2 }
 0x4af   : > { %v2147_v43 = vsel %vm2146_vm15, %v9504_v14, %v2143_v9  ;;  %v2157_v14 = vmul.f32 %v9510_v4, %v2156_v17  ;;  %v2166_v17 = vor.u32 1.1754944e-38, %v2165_v40  ;;  %v2051_v40 = vadd.f32 %v11998_v29, %v12052_v25 }
 0x4b0   : > { %v12027_v51 = vsel %vm2149_vm1, %v2151_v61, %v2147_v43 }
 0x4b1   : > { %v2158_v2 = vadd.f32 %v9510_v4, %v2157_v14  ;;  %v8931_v48 = vmul.f32 -1.442695, %v2051_v40 }
 0x4b2   : > { %v9512_v35 = vpop.eup %9511 }
 0x4b3   : > { %v12029_v39 = vadd.f32 1.0, %v9512_v35  ;;  %v9514_v19 = vpop.eup %9513 }
 0x4b4   : > { %v2185_v9 = vmul.f32 %v9514_v19, %v12016_v23  ;;  %vm2190_vm6 = vweird.f32 %v9514_v19 }
 0x4b5   : > { %9517 = vrcp.f32 %v12029_v39  ;;  %vm2191_vm8 = vmor %vm2189_vm7, %vm2190_vm6  ;;  %vm2204_vm11 = vweird.f32 %v12029_v39 }
 0x4b6   : > { %v2186_v35 = vsub.f32 1.0, %v2185_v9 }
 0x4b8   : > { %v2387_v20 = vpop.permute.xlu2 %2386  ;;  %v2187_v14 = vmul.f32 %v9514_v19, %v2186_v35 }
 0x4b9   : > { %v2431_v28 = vmul.f32 %v2387_v20, %v12018_v62  ;;  %v9516_v20 = vpop.eup %9515 }
 0x4ba   : > { %v12035_v41 = vadd.f32 1.0, %v9516_v20 }
 0x4bb   : > { %2466 = vrot.lane.b32.xlu2 %v2431_v28, %s10236_s17  ;;  %v9518_v61 = vpop.eup %9517 }
 0x4bc   : > { %9519 = vrcp.f32 %v12035_v41  ;;  %v2200_v20 = vmul.f32 %v9518_v61, %v12029_v39  ;;  %vm2205_vm10 = vweird.f32 %v9518_v61  ;;  %vm2219_vm15 = vweird.f32 %v12035_v41 }
 0x4bd   : > { %9521 = vpow2.f32 %v8931_v48  ;;  %vm2206_vm12 = vmor %vm2204_vm11, %vm2205_vm10 }
 0x4be   : > { %v2201_v16 = vsub.f32 1.0, %v2200_v20 }
 0x4bf   : > { %v2383_v24 = vpop.permute.xlu0 %2382 }
 0x4c0   : > { %v2429_v36 = vmul.f32 %v2383_v24, %v12027_v51  ;;  %v2163_v24 = vand.u32 2147483647, %v12006_v21  ;;  %v2188_v21 = vadd.f32 %v9514_v19, %v2187_v14 }
 0x4c2   : > { %2462 = vrot.lane.b32.xlu1 %v2429_v36, %s10236_s17  ;;  %v2162_v36 = vsel %vm2161_vm4, %v9510_v4, %v2158_v2  ;;  %vm2164_vm5 = vcmp.eq.f32.partialorder %v2163_v24, 8.507059e+37  ;;  %v9520_v44 = vpop.eup %9519  ;;  %v2195_v4 = vand.u32 2147483648, %v12016_v23  ;;  %v2193_v2 = vand.u32 2147483647, %v12016_v23 }
 0x4c3   : > { %v2192_v35 = vsel %vm2191_vm8, %v9514_v19, %v2188_v21  ;;  %v2202_v24 = vmul.f32 %v9518_v61, %v2201_v16  ;;  %v2210_v21 = vand.u32 2147483648, %v12029_v39  ;;  %vm2220_vm14 = vweird.f32 %v9520_v44 }
 0x4c4   : > { %vm2194_vm9 = vcmp.eq.f32.partialorder %v2193_v2, 8.507059e+37  ;;  %vm2221_vm1 = vmor %vm2219_vm15, %vm2220_vm14 }
 0x4c5   : > { %v2203_v19 = vadd.f32 %v9518_v61, %v2202_v24  ;;  %v2211_v40 = vor.u32 1.1754944e-38, %v2210_v21 }
 0x4c7   : > { %v1946_v28 = vpop.permute.xlu1 %1945 }
 0x4c8   : > { %v2020_v33 = vpop.f32.mrf.mxu0  ;;  %8923 = vmatmul.msk.f32.gmra.mxu0 %vm1028_vm0, %v1946_v28  ;;  %v12048_v28 = vsel %vm2164_vm5, %v2166_v17, %v2162_v36  ;;  %v2215_v36 = vmul.f32 %v9520_v44, %v12035_v41  ;;  %v2196_v17 = vor.u32 1.1754944e-38, %v2195_v4  ;;  %v2207_v4 = vsel %vm2206_vm12, %v9518_v61, %v2203_v19 }
 0x4c9   : > { %v12039_v43 = vadd.f32 %v11932_v11, %v2020_v33  ;;  %v2223_v61 = vand.u32 2147483647, %v12035_v41 }
 0x4ca   : > { %v2216_v16 = vsub.f32 1.0, %v2215_v36 }
 0x4cb   : > { %2396 = vrot.lane.b32.xlu1 %v12039_v43, %s10235_s9  ;;  %vm2224_vm2 = vcmp.eq.f32.partialorder %v2223_v61, 8.507059e+37 }
 0x4cc   : > { %v2217_v2 = vmul.f32 %v9520_v44, %v2216_v16 }
 0x4cf   : > { %v2385_v9 = vpop.permute.xlu1 %2384 }
 0x4d0   : > { %v2430_v33 = vmul.f32 %v2385_v9, %v12048_v28  ;;  %v2023_v15 = vpop.f32.mrf.mxu0  ;;  %v12064_v9 = vsel %vm2194_vm9, %v2196_v17, %v2192_v35 }
 0x4d1   : > { %v12062_v14 = vadd.f32 %v11932_v11, %v2023_v15  ;;  %v2208_v15 = vand.u32 2147483647, %v12029_v39  ;;  %v2225_v39 = vand.u32 2147483648, %v12035_v41 }
 0x4d2   : > { %2464 = vrot.lane.b32.xlu0 %v2430_v33, %s10236_s17 }
 0x4d3   : > { %vm2209_vm13 = vcmp.eq.f32.partialorder %v2208_v15, 8.507059e+37  ;;  %v2226_v16 = vor.u32 1.1754944e-38, %v2225_v39  ;;  %v1875_v39 = vpop.f32.mrf.mxu3 }
 0x4d4   : > { %v12078_v35 = vsel %vm2209_vm13, %v2211_v40, %v2207_v4 }
 0x4d8   : > { %v2026_v20 = vpop.f32.mrf.mxu0  ;;  %v2389_v33 = vpop.permute.xlu0 %2388 }
 0x4d9   : > { %v12067_v23 = vadd.f32 %v11932_v11, %v2026_v20  ;;  %v2432_v29 = vmul.f32 %v2389_v33, %v12064_v9  ;;  %v2218_v33 = vadd.f32 %v9520_v44, %v2217_v2 }
 0x4da   : > { %2398 = vrot.lane.b32.xlu0 %v12062_v14, %s10235_s9 }
 0x4db   : > { %2400 = vrot.lane.b32.xlu2 %v12067_v23, %s10235_s9  ;;  %2468 = vrot.lane.b32.xlu1 %v2432_v29, %s10236_s17  ;;  %v9522_v29 = vpop.eup %9521  ;;  %v2222_v19 = vsel %vm2221_vm1, %v9520_v44, %v2218_v33 }
 0x4dc   : > { %v2115_v48 = vadd.f32 1.0, %v9522_v29  ;;  %v12090_v15 = vsel %vm2224_vm2, %v2226_v16, %v2222_v19 }
 0x4de   : > { %9523 = vrcp.f32 %v2115_v48  ;;  %v2240_v16 = vand.u32 2147483648, %v2115_v48  ;;  %vm2234_vm4 = vweird.f32 %v2115_v48 }
 0x4e0   : > { %v2391_v24 = vpop.permute.xlu1 %2390  ;;  %v2029_v36 = vpop.f32.mrf.mxu0 }
 0x4e1   : > { %v2433_v17 = vmul.f32 %v2391_v24, %v12078_v35  ;;  %v12082_v20 = vadd.f32 %v11932_v11, %v2029_v36 }
 0x4e3   : > { %2470 = vrot.lane.b32.xlu0 %v2433_v17, %s10236_s17  ;;  %2402 = vrot.lane.b32.xlu1 %v12082_v20, %s10235_s9 }
 0x4e4   : > { %v9524_v24 = vpop.eup %9523 }
 0x4e5   : > { %v2230_v44 = vmul.f32 %v9524_v24, %v2115_v48  ;;  %vm2235_vm3 = vweird.f32 %v9524_v24 }
 0x4e6   : > { %vm2236_vm5 = vmor %vm2234_vm4, %vm2235_vm3 }
 0x4e7   : > { %v2231_v17 = vsub.f32 1.0, %v2230_v44 }
 0x4e8   : > { %v2032_v21 = vpop.f32.mrf.mxu0  ;;  %v2393_v4 = vpop.permute.xlu0 %2392 }
 0x4e9   : > { %v2033_v2 = vadd.f32 %v11932_v11, %v2032_v21  ;;  %v2434_v40 = vmul.f32 %v2393_v4, %v12090_v15  ;;  %v2232_v33 = vmul.f32 %v9524_v24, %v2231_v17  ;;  %v2238_v21 = vand.u32 2147483647, %v2115_v48  ;;  %v15737_v48 = vld [vmem:[#allocation30_spill] sm:$0xff] }
 0x4eb   : > { %2404 = vrot.lane.b32.xlu1 %v2033_v2, %s10235_s9  ;;  %2472 = vrot.lane.b32.xlu2 %v2434_v40, %s10236_s17  ;;  %v2233_v19 = vadd.f32 %v9524_v24, %v2232_v33  ;;  %v2241_v40 = vor.u32 1.1754944e-38, %v2240_v16  ;;  %vm2239_vm6 = vcmp.eq.f32.partialorder %v2238_v21, 8.507059e+37  ;;  %v1878_v33 = vpop.f32.mrf.mxu3  ;;  %v15738_v16 = vld [vmem:[#allocation34_spill] sm:$0xff] }
 0x4ec   : > { %v12117_v21 = vadd.f32 %v1878_v33, %v15738_v16 }
 0x4ed   : > { %v2237_v4 = vsel %vm2236_vm5, %v9524_v24, %v2233_v19 }
 0x4ee   : > { %v12104_v3 = vsel %vm2239_vm6, %v2241_v40, %v2237_v4 }
 0x4f0   : > { %v2035_v41 = vpop.f32.mrf.mxu0 }
 0x4f1   : > { %v12097_v36 = vadd.f32 %v11932_v11, %v2035_v41 }
 0x4f3   : > { %2406 = vrot.lane.b32.xlu1 %v12097_v36, %s10235_s9  ;;  %v1881_v19 = vpop.f32.mrf.mxu3 }
 0x4fb   : > { %v1884_v40 = vpop.f32.mrf.mxu3 }
 0x4fc   : > { %v2461_v29 = vpop.permute.xlu2 %2460 }
 0x4fd   : > { %v2508_v61 = vadd.f32 %v2461_v29, %v11956_v32  ;;  %v12112_v29 = vadd.f32 %v1875_v39, %v15737_v48  ;;  %v15742_v48 = vld [vmem:[#allocation35_spill] sm:$0xff] }
 0x4ff   : > { %9525 = vtanh.f32 %v2508_v61  ;;  %v2052_v24 = vadd.f32 %v12039_v43, %v12112_v29  ;;  %v12125_v43 = vadd.f32 %v1884_v40, %v15740_v10  ;;  %v15741_v40 = vld [vmem:[#allocation31_spill] sm:$0xff] }
 0x501   : > { %v8932_v61 = vmul.f32 -1.442695, %v2052_v24  ;;  %v2055_v33 = vadd.f32 %v12082_v20, %v12125_v43 }
 0x503   : > { %9527 = vpow2.f32 %v8932_v61  ;;  %v1887_v61 = vpop.f32.mrf.mxu3 }
 0x505   : > { %v12102_v41 = vpop.eup %9525  ;;  %v2395_v44 = vpop.permute.xlu2 %2394 }
 0x506   : > { %v2435_v17 = vmul.f32 %v2395_v44, %v12104_v3  ;;  %v2540_v32 = vsub.f32 %v11823_v0, %v12102_v41  ;;  %v2053_v0 = vadd.f32 %v12062_v14, %v12117_v21 }
 0x508   : > { %2474 = vrot.lane.b32.xlu2 %v2435_v17, %s10236_s17  ;;  %2572 = vrot.lane.b32.xlu0 %v2540_v32, %s10237_s18  ;;  %v8933_v17 = vmul.f32 -1.442695, %v2053_v0  ;;  %v15739_v32 = vld [vmem:[#allocation38_spill] sm:$0xff] }
 0x509   : > { %v9528_v4 = vpop.eup %9527  ;;  %v12122_v39 = vadd.f32 %v1881_v19, %v15739_v32  ;;  %v8935_v19 = vmul.f32 -1.442695, %v2055_v33 }
 0x50a   : > { %v2116_v44 = vadd.f32 1.0, %v9528_v4 }
 0x50b   : > { %v2054_v24 = vadd.f32 %v12067_v23, %v12122_v39 }
 0x50c   : > { %9529 = vrcp.f32 %v2116_v44  ;;  %vm2249_vm8 = vweird.f32 %v2116_v44 }
 0x50d   : > { %9531 = vpow2.f32 %v8933_v17  ;;  %v8934_v0 = vmul.f32 -1.442695, %v2054_v24  ;;  %v12137_v17 = vadd.f32 %v1887_v61, %v15741_v40 }
 0x50f   : > { %9533 = vpow2.f32 %v8934_v0  ;;  %v2056_v20 = vadd.f32 %v2033_v2, %v12137_v17 }
 0x510   : > { %9535 = vpow2.f32 %v8935_v19 }
 0x511   : > { %v8936_v24 = vmul.f32 -1.442695, %v2056_v20 }
 0x512   : > { %v9530_v4 = vpop.eup %9529 }
 0x513   : > { %v9532_v34 = vpop.eup %9531  ;;  %v2245_v32 = vmul.f32 %v9530_v4, %v2116_v44  ;;  %vm2250_vm7 = vweird.f32 %v9530_v4 }
 0x514   : > { %v12139_v23 = vadd.f32 1.0, %v9532_v34  ;;  %vm2251_vm9 = vmor %vm2249_vm8, %vm2250_vm7 }
 0x515   : > { %v2246_v10 = vsub.f32 1.0, %v2245_v32  ;;  %v9534_v16 = vpop.eup %9533 }
 0x516   : > { %9537 = vrcp.f32 %v12139_v23  ;;  %v9536_v33 = vpop.eup %9535  ;;  %v12146_v61 = vadd.f32 1.0, %v9534_v16  ;;  %v2253_v16 = vand.u32 2147483647, %v2116_v44  ;;  %vm2264_vm12 = vweird.f32 %v12139_v23 }
 0x517   : > { %v2247_v52 = vmul.f32 %v9530_v4, %v2246_v10  ;;  %9539 = vpow2.f32 %v8936_v24  ;;  %v12152_v32 = vadd.f32 1.0, %v9536_v33 }
 0x518   : > { %vm2254_vm10 = vcmp.eq.f32.partialorder %v2253_v16, 8.507059e+37  ;;  %vm2279_vm2 = vweird.f32 %v12146_v61 }
 0x519   : > { %v2248_v20 = vadd.f32 %v9530_v4, %v2247_v52  ;;  %vm2294_vm4 = vweird.f32 %v12152_v32 }
 0x51b   : > { %v2252_v33 = vsel %vm2251_vm9, %v9530_v4, %v2248_v20 }
 0x51c   : > { %v12150_v2 = vpop.eup %9537 }
 0x51d   : > { %v2260_v24 = vmul.f32 %v12150_v2, %v12139_v23  ;;  %vm2265_vm11 = vweird.f32 %v12150_v2 }
 0x51e   : > { %vm2266_vm13 = vmor %vm2264_vm12, %vm2265_vm11 }
 0x525   : > { %v2038_v7 = vpop.f32.mrf.mxu0 }
 0x526   : > { %v12132_v14 = vadd.f32 %v11932_v11, %v2038_v7  ;;  %v1890_v7 = vpop.f32.mrf.mxu3 }
 0x527   : > { %v12144_v63 = vadd.f32 %v1890_v7, %v15742_v48  ;;  %v2255_v7 = vand.u32 2147483648, %v2116_v44 }
 0x528   : > { %2408 = vrot.lane.b32.xlu1 %v12132_v14, %s10235_s9 }
 0x529   : > { %v2057_v34 = vadd.f32 %v12097_v36, %v12144_v63  ;;  %v9540_v36 = vpop.eup %9539  ;;  %v2256_v48 = vor.u32 1.1754944e-38, %v2255_v7 }
 0x52a   : > { %v12159_v40 = vadd.f32 1.0, %v9540_v36 }
 0x52b   : > { %v8937_v10 = vmul.f32 -1.442695, %v2057_v34 }
 0x52c   : > { %vm2309_vm9 = vweird.f32 %v12159_v40 }
 0x534   : > { %v2463_v0 = vpop.permute.xlu1 %2462 }
 0x535   : > { %v2509_v19 = vadd.f32 %v2463_v0, %v11977_v27  ;;  %v2261_v27 = vsub.f32 1.0, %v2260_v24  ;;  %v12163_v0 = vsel %vm2254_vm10, %v2256_v48, %v2252_v33 }
 0x537   : > { %9541 = vtanh.f32 %v2509_v19  ;;  %v2262_v4 = vmul.f32 %v12150_v2, %v2261_v27  ;;  %v2467_v27 = vpop.permute.xlu2 %2466 }
 0x538   : > { %9543 = vrcp.f32 %v12146_v61 }
 0x539   : > { %9545 = vrcp.f32 %v12152_v32 }
 0x53a   : > { %9547 = vpow2.f32 %v8937_v10 }
 0x53b   : > { %9549 = vrcp.f32 %v12159_v40 }
 0x53d   : > { %v12161_v52 = vpop.eup %9541  ;;  %v2397_v34 = vpop.permute.xlu1 %2396 }
 0x53e   : > { %v12165_v44 = vpop.eup %9543  ;;  %v2436_v19 = vmul.f32 %v2397_v34, %v12163_v0  ;;  %v2541_v50 = vsub.f32 %v11828_v18, %v12161_v52  ;;  %v2263_v18 = vadd.f32 %v12150_v2, %v2262_v4  ;;  %v2268_v4 = vand.u32 2147483647, %v12139_v23 }
 0x53f   : > { %v12170_v57 = vpop.eup %9545  ;;  %v2275_v48 = vmul.f32 %v12165_v44, %v12146_v61  ;;  %vm2280_vm15 = vweird.f32 %v12165_v44 }
 0x540   : > { %2476 = vrot.lane.b32.xlu2 %v2436_v19, %s10236_s17  ;;  %2574 = vrot.lane.b32.xlu0 %v2541_v50, %s10237_s18  ;;  %v9548_v20 = vpop.eup %9547  ;;  %v2290_v7 = vmul.f32 %v12170_v57, %v12152_v32  ;;  %v2270_v19 = vand.u32 2147483648, %v12139_v23  ;;  %vm2269_vm14 = vcmp.eq.f32.partialorder %v2268_v4, 8.507059e+37  ;;  %vm2295_vm1 = vweird.f32 %v12170_v57  ;;  %vm2281_vm3 = vmor %vm2279_vm2, %vm2280_vm15 }
 0x541   : > { %v12182_v16 = vadd.f32 1.0, %v9548_v20  ;;  %v2276_v24 = vsub.f32 1.0, %v2275_v48  ;;  %v12185_v33 = vpop.eup %9549  ;;  %v2511_v48 = vadd.f32 %v2467_v27, %v11972_v26  ;;  %v2285_v27 = vand.u32 2147483648, %v12146_v61  ;;  %vm2296_vm5 = vmor %vm2294_vm4, %vm2295_vm1 }
 0x542   : > { %v2291_v30 = vsub.f32 1.0, %v2290_v7  ;;  %v2305_v20 = vmul.f32 %v12185_v33, %v12159_v40  ;;  %vm2310_vm8 = vweird.f32 %v12185_v33 }
 0x543   : > { %vm2311_vm10 = vmor %vm2309_vm9, %vm2310_vm8 }
 0x544   : > { %v2465_v10 = vpop.permute.xlu0 %2464  ;;  %v2292_v7 = vmul.f32 %v12170_v57, %v2291_v30 }
 0x545   : > { %v2510_v36 = vadd.f32 %v2465_v10, %v11982_v1  ;;  %v2041_v50 = vpop.f32.mrf.mxu0  ;;  %v2267_v1 = vsel %vm2266_vm13, %v12150_v2, %v2263_v18  ;;  %v2271_v10 = vor.u32 1.1754944e-38, %v2270_v19  ;;  %vm2324_vm13 = vweird.f32 %v12182_v16 }
 0x546   : > { %v12188_v34 = vadd.f32 %v11932_v11, %v2041_v50  ;;  %v2277_v11 = vmul.f32 %v12165_v44, %v2276_v24  ;;  %v2306_v24 = vsub.f32 1.0, %v2305_v20  ;;  %v2293_v19 = vadd.f32 %v12170_v57, %v2292_v7 }
 0x547   : > { %9551 = vtanh.f32 %v2510_v36  ;;  %v12203_v23 = vsel %vm2269_vm14, %v2271_v10, %v2267_v1  ;;  %v2401_v1 = vpop.permute.xlu2 %2400  ;;  %v2286_v7 = vor.u32 1.1754944e-38, %v2285_v27 }
 0x548   : > { %2410 = vrot.lane.b32.xlu1 %v12188_v34, %s10235_s9  ;;  %9553 = vrcp.f32 %v12182_v16  ;;  %v2278_v2 = vadd.f32 %v12165_v44, %v2277_v11  ;;  %v2300_v11 = vand.u32 2147483648, %v12152_v32 }
 0x549   : > { %9555 = vtanh.f32 %v2511_v48  ;;  %v2283_v48 = vand.u32 2147483647, %v12146_v61  ;;  %v2307_v61 = vmul.f32 %v12185_v33, %v2306_v24 }
 0x54a   : > { %v2282_v20 = vsel %vm2281_vm3, %v12165_v44, %v2278_v2 }
 0x54b   : > { %vm2284_vm6 = vcmp.eq.f32.partialorder %v2283_v48, 8.507059e+37 }
 0x54c   : > { %v2399_v36 = vpop.permute.xlu0 %2398  ;;  %v12233_v37 = vsel %vm2284_vm6, %v2286_v7, %v2282_v20 }
 0x54d   : > { %v12205_v50 = vpop.eup %9551  ;;  %v2437_v26 = vmul.f32 %v2399_v36, %v12203_v23  ;;  %v2469_v18 = vpop.permute.xlu1 %2468  ;;  %v2297_v36 = vsel %vm2296_vm5, %v12170_v57, %v2293_v19  ;;  %v2308_v57 = vadd.f32 %v12185_v33, %v2307_v61 }
 0x54e   : > { %v2542_v30 = vsub.f32 %v11835_v54, %v12205_v50  ;;  %v12214_v4 = vpop.eup %9553  ;;  %v2298_v54 = vand.u32 2147483647, %v12152_v32  ;;  %v2512_v10 = vadd.f32 %v2469_v18, %v11993_v58  ;;  %v2438_v58 = vmul.f32 %v2401_v1, %v12233_v37 }
 0x54f   : > { %2478 = vrot.lane.b32.xlu2 %v2437_v26, %s10236_s17  ;;  %v2320_v26 = vmul.f32 %v12214_v4, %v12182_v16  ;;  %v12231_v6 = vpop.eup %9555  ;;  %v2473_v48 = vpop.permute.xlu2 %2472  ;;  %v2315_v1 = vand.u32 2147483648, %v12159_v40  ;;  %vm2325_vm12 = vweird.f32 %v12214_v4 }
 0x550   : > { %2576 = vrot.lane.b32.xlu0 %v2542_v30, %s10237_s18  ;;  %v2301_v30 = vor.u32 1.1754944e-38, %v2300_v11  ;;  %vm2299_vm7 = vcmp.eq.f32.partialorder %v2298_v54, 8.507059e+37  ;;  %9557 = vtanh.f32 %v2512_v10  ;;  %v2543_v27 = vsub.f32 %v11844_v5, %v12231_v6  ;;  %vm2326_vm14 = vmor %vm2324_vm13, %vm2325_vm12 }
 0x551   : > { %v2321_v19 = vsub.f32 1.0, %v2320_v26  ;;  %v2313_v11 = vand.u32 2147483647, %v12159_v40  ;;  %v2312_v5 = vsel %vm2311_vm10, %v12185_v33, %v2308_v57  ;;  %v2316_v10 = vor.u32 1.1754944e-38, %v2315_v1 }
 0x552   : > { %v12237_v32 = vsel %vm2299_vm7, %v2301_v30, %v2297_v36  ;;  %v2330_v30 = vand.u32 2147483648, %v12182_v16 }
 0x553   : > { %v2322_v54 = vmul.f32 %v12214_v4, %v2321_v19  ;;  %vm2314_vm11 = vcmp.eq.f32.partialorder %v2313_v11, 8.507059e+37 }
 0x554   : > { %v12257_v61 = vsel %vm2314_vm11, %v2316_v10, %v2312_v5  ;;  %v2331_v57 = vor.u32 1.1754944e-38, %v2330_v30 }
 0x555   : > { %v2403_v44 = vpop.permute.xlu1 %2402  ;;  %v2471_v2 = vpop.permute.xlu0 %2470  ;;  %v2323_v33 = vadd.f32 %v12214_v4, %v2322_v54 }
 0x556   : > { %v2439_v18 = vmul.f32 %v2403_v44, %v12237_v32  ;;  %v2513_v24 = vadd.f32 %v2471_v2, %v12004_v46  ;;  %v2514_v46 = vadd.f32 %v2473_v48, %v12012_v59  ;;  %v12255_v20 = vpop.eup %9557 }
 0x557   : > { %2480 = vrot.lane.b32.xlu2 %v2438_v58, %s10236_s17  ;;  %v2544_v59 = vsub.f32 %v11851_v38, %v12255_v20  ;;  %v2328_v58 = vand.u32 2147483647, %v12182_v16  ;;  %v2327_v38 = vsel %vm2326_vm14, %v12214_v4, %v2323_v33  ;;  %v15743_v16 = vld [vmem:[#allocation39_spill] sm:$0xff] }
 0x558   : > { %9559 = vtanh.f32 %v2513_v24  ;;  %2482 = vrot.lane.b32.xlu1 %v2439_v18, %s10236_s17  ;;  %2578 = vrot.lane.b32.xlu0 %v2543_v27, %s10237_s18  ;;  %v1893_v18 = vpop.f32.mrf.mxu3 }
 0x559   : > { %9561 = vtanh.f32 %v2514_v46  ;;  %vm2329_vm15 = vcmp.eq.f32.partialorder %v2328_v58, 8.507059e+37  ;;  %v12282_v48 = vadd.f32 %v1893_v18, %v15743_v16 }
 0x55a   : > { %v12278_v24 = vsel %vm2329_vm15, %v2331_v57, %v2327_v38 }
 0x55d   : > { %v2405_v7 = vpop.permute.xlu1 %2404 }
 0x55e   : > { %v12260_v36 = vpop.eup %9559  ;;  %v2440_v40 = vmul.f32 %v2405_v7, %v12257_v61 }
 0x55f   : > { %v2545_v26 = vsub.f32 %v11858_v12, %v12260_v36  ;;  %v12276_v12 = vpop.eup %9561 }
 0x560   : > { %2484 = vrot.lane.b32.xlu1 %v2440_v40, %s10236_s17  ;;  %2580 = vrot.lane.b32.xlu0 %v2544_v59, %s10237_s18  ;;  %v2546_v1 = vsub.f32 %v11863_v56, %v12276_v12  ;;  %v1896_v7 = vpop.f32.mrf.mxu3  ;;  %v15744_v40 = vld [vmem:[#allocation42_spill] sm:$0xff] }
 0x561   : > { %2582 = vrot.lane.b32.xlu2 %v2545_v26, %s10237_s18  ;;  %v12298_v59 = vadd.f32 %v1896_v7, %v15744_v40 }
 0x562   : > { %v2475_v44 = vpop.permute.xlu2 %2474 }
 0x563   : > { %v2515_v2 = vadd.f32 %v2475_v44, %v12052_v25  ;;  %v2058_v25 = vadd.f32 %v12132_v14, %v12282_v48 }
 0x565   : > { %v2407_v27 = vpop.permute.xlu1 %2406  ;;  %9563 = vtanh.f32 %v2515_v2  ;;  %v8938_v11 = vmul.f32 -1.442695, %v2058_v25 }
 0x566   : > { %v2441_v19 = vmul.f32 %v2407_v27, %v12278_v24 }
 0x567   : > { %9565 = vpow2.f32 %v8938_v11 }
 0x568   : > { %2486 = vrot.lane.b32.xlu1 %v2441_v19, %s10236_s17 }
 0x569   : > { %2584 = vrot.lane.b32.xlu2 %v2546_v1, %s10237_s18 }
 0x56b   : > { %v12290_v4 = vpop.eup %9563 }
 0x56c   : > { %v2547_v46 = vsub.f32 %v11880_v49, %v12290_v4  ;;  %v2059_v49 = vadd.f32 %v12188_v34, %v12298_v59 }
 0x56d   : > { %v9566_v5 = vpop.eup %9565 }
 0x56e   : > { %v2122_v54 = vadd.f32 1.0, %v9566_v5  ;;  %v8939_v30 = vmul.f32 -1.442695, %v2059_v49 }
 0x570   : > { %9567 = vrcp.f32 %v2122_v54  ;;  %v2345_v38 = vand.u32 2147483648, %v2122_v54  ;;  %vm2339_vm2 = vweird.f32 %v2122_v54 }
 0x571   : > { %2586 = vrot.lane.b32.xlu2 %v2547_v46, %s10237_s18  ;;  %9569 = vpow2.f32 %v8939_v30 }
 0x572   : > { %v2346_v18 = vor.u32 1.1754944e-38, %v2345_v38 }
 0x576   : > { %v9568_v14 = vpop.eup %9567 }
 0x577   : > { %v2335_v33 = vmul.f32 %v9568_v14, %v2122_v54  ;;  %vm2340_vm1 = vweird.f32 %v9568_v14  ;;  %v9570_v2 = vpop.eup %9569 }
 0x578   : > { %vm2341_vm3 = vmor %vm2339_vm2, %vm2340_vm1  ;;  %v2123_v27 = vadd.f32 1.0, %v9570_v2 }
 0x579   : > { %v2336_v26 = vsub.f32 1.0, %v2335_v33 }
 0x57a   : > { %v2573_v10 = vpop.permute.xlu0 %2572  ;;  %vm2354_vm6 = vweird.f32 %v2123_v27 }
 0x57b   : > { %v2620_v56 = vmul.f32 %v2573_v10, %v11987_v55  ;;  %v2337_v58 = vmul.f32 %v9568_v14, %v2336_v26  ;;  %v2343_v55 = vand.u32 2147483647, %v2122_v54 }
 0x57d   : > { %2652 = vrot.lane.b32.xlu0 %v2620_v56, %s10238_s19  ;;  %v2338_v44 = vadd.f32 %v9568_v14, %v2337_v58  ;;  %vm2344_vm4 = vcmp.eq.f32.partialorder %v2343_v55, 8.507059e+37 }
 0x57f   : > { %v2342_v57 = vsel %vm2341_vm3, %v9568_v14, %v2338_v44 }
 0x580   : > { %v12302_v19 = vsel %vm2344_vm4, %v2346_v18, %v2342_v57 }
 0x59a   : > { %v2409_v1 = vpop.permute.xlu1 %2408  ;;  %v2477_v25 = vpop.permute.xlu2 %2476 }
 0x59b   : > { %v2442_v34 = vmul.f32 %v2409_v1, %v12302_v19  ;;  %v2516_v11 = vadd.f32 %v2477_v25, %v12112_v29 }
 0x59d   : > { %9571 = vtanh.f32 %v2516_v11  ;;  %2488 = vrot.lane.b32.xlu1 %v2442_v34, %s10236_s17 }
 0x59e   : > { %9573 = vrcp.f32 %v2123_v27 }
 0x5a3   : > { %v12307_v46 = vpop.eup %9571 }
 0x5a4   : > { %v9574_v5 = vpop.eup %9573  ;;  %v2548_v54 = vsub.f32 %v11887_v53, %v12307_v46  ;;  %v2360_v53 = vand.u32 2147483648, %v2123_v27 }
 0x5a5   : > { %v2350_v10 = vmul.f32 %v9574_v5, %v2123_v27  ;;  %vm2355_vm5 = vweird.f32 %v9574_v5 }
 0x5a6   : > { %2588 = vrot.lane.b32.xlu2 %v2548_v54, %s10237_s18  ;;  %vm2356_vm7 = vmor %vm2354_vm6, %vm2355_vm5  ;;  %v2361_v2 = vor.u32 1.1754944e-38, %v2360_v53 }
 0x5a7   : > { %v2351_v7 = vsub.f32 1.0, %v2350_v10 }
 0x5a9   : > { %v2479_v56 = vpop.permute.xlu2 %2478  ;;  %v2352_v33 = vmul.f32 %v9574_v5, %v2351_v7 }
 0x5aa   : > { %v2517_v14 = vadd.f32 %v2479_v56, %v12117_v21  ;;  %v2358_v21 = vand.u32 2147483647, %v2123_v27 }
 0x5ab   : > { %v2353_v44 = vadd.f32 %v9574_v5, %v2352_v33 }
 0x5ac   : > { %9575 = vtanh.f32 %v2517_v14  ;;  %vm2359_vm8 = vcmp.eq.f32.partialorder %v2358_v21, 8.507059e+37 }
 0x5ad   : > { %v2357_v55 = vsel %vm2356_vm7, %v9574_v5, %v2353_v44 }
 0x5b1   : > { %v2481_v26 = vpop.permute.xlu2 %2480 }
 0x5b2   : > { %v12313_v29 = vpop.eup %9575  ;;  %v2575_v49 = vpop.permute.xlu0 %2574  ;;  %v2518_v38 = vadd.f32 %v2481_v26, %v12122_v39 }
 0x5b3   : > { %v2621_v30 = vmul.f32 %v2575_v49, %v12027_v51  ;;  %v2549_v58 = vsub.f32 %v11895_v13, %v12313_v29  ;;  %v12321_v51 = vsel %vm2359_vm8, %v2361_v2, %v2357_v55 }
 0x5b4   : > { %9577 = vtanh.f32 %v2518_v38 }
 0x5b5   : > { %2590 = vrot.lane.b32.xlu2 %v2549_v58, %s10237_s18  ;;  %2654 = vrot.lane.b32.xlu0 %v2621_v30, %s10238_s19 }
 0x5ba   : > { %v2411_v57 = vpop.permute.xlu1 %2410  ;;  %v12327_v27 = vpop.eup %9577 }
 0x5bb   : > { %v2443_v13 = vmul.f32 %v2411_v57, %v12321_v51  ;;  %v2583_v18 = vpop.permute.xlu2 %2582  ;;  %v2550_v11 = vsub.f32 %v11905_v42, %v12327_v27 }
 0x5bc   : > { %v2625_v1 = vmul.f32 %v2583_v18, %v12078_v35 }
 0x5bd   : > { %2490 = vrot.lane.b32.xlu1 %v2443_v13, %s10236_s17 }
 0x5be   : > { %2662 = vrot.lane.b32.xlu2 %v2625_v1, %s10238_s19 }
 0x5c2   : > { %v2577_v39 = vpop.permute.xlu0 %2576 }
 0x5c3   : > { %v2622_v25 = vmul.f32 %v2577_v39, %v12048_v28  ;;  %v2585_v34 = vpop.permute.xlu2 %2584 }
 0x5c4   : > { %v2626_v5 = vmul.f32 %v2585_v34, %v12090_v15 }
 0x5c5   : > { %2592 = vrot.lane.b32.xlu1 %v2550_v11, %s10237_s18  ;;  %2656 = vrot.lane.b32.xlu0 %v2622_v25, %s10238_s19 }
 0x5c6   : > { %2664 = vrot.lane.b32.xlu2 %v2626_v5, %s10238_s19 }
 0x5ca   : > { %v2483_v35 = vpop.permute.xlu1 %2482  ;;  %v2579_v54 = vpop.permute.xlu0 %2578 }
 0x5cb   : > { %v2519_v10 = vadd.f32 %v2483_v35, %v12125_v43  ;;  %v2623_v56 = vmul.f32 %v2579_v54, %v12018_v62  ;;  %v2587_v14 = vpop.permute.xlu2 %2586 }
 0x5cc   : > { %v2627_v28 = vmul.f32 %v2587_v14, %v12104_v3 }
 0x5cd   : > { %9579 = vtanh.f32 %v2519_v10  ;;  %2658 = vrot.lane.b32.xlu0 %v2623_v56, %s10238_s19 }
 0x5ce   : > { %2666 = vrot.lane.b32.xlu2 %v2627_v28, %s10238_s19 }
 0x5d2   : > { %v2485_v42 = vpop.permute.xlu1 %2484  ;;  %v2581_v15 = vpop.permute.xlu0 %2580 }
 0x5d3   : > { %v12341_v7 = vpop.eup %9579  ;;  %v2520_v33 = vadd.f32 %v2485_v42, %v12137_v17  ;;  %v2624_v49 = vmul.f32 %v2581_v15, %v12064_v9 }
 0x5d4   : > { %v2551_v43 = vsub.f32 %v11902_v45, %v12341_v7 }
 0x5d5   : > { %9581 = vtanh.f32 %v2520_v33  ;;  %2660 = vrot.lane.b32.xlu0 %v2624_v49, %s10238_s19 }
 0x5d6   : > { %2594 = vrot.lane.b32.xlu1 %v2551_v43, %s10237_s18 }
 0x5da   : > { %v2487_v3 = vpop.permute.xlu1 %2486 }
 0x5db   : > { %v12349_v62 = vpop.eup %9581  ;;  %v2521_v26 = vadd.f32 %v2487_v3, %v12144_v63 }
 0x5dc   : > { %v2552_v30 = vsub.f32 %v11913_v31, %v12349_v62 }
 0x5dd   : > { %9583 = vtanh.f32 %v2521_v26 }
 0x5de   : > { %2596 = vrot.lane.b32.xlu1 %v2552_v30, %s10237_s18 }
 0x5e3   : > { %v12355_v9 = vpop.eup %9583 }
 0x5e4   : > { %v2553_v45 = vsub.f32 %v11919_v60, %v12355_v9 }
 0x5e6   : > { %2598 = vrot.lane.b32.xlu1 %v2553_v45, %s10237_s18 }
 0x5ef   : > { %v2653_v17 = vpop.permute.xlu0 %2652 }
 0x5f0   : > { %v12361_v58 = vadd.f32 %v12102_v41, %v2653_v17 }
 0x5f2   : > { %2862 = vrot.lane.b32.xlu0 %v12361_v58, %s10235_s9 }
 0x600   : > { %v2589_v63 = vpop.permute.xlu2 %2588 }
 0x601   : > { %v2628_v31 = vmul.f32 %v2589_v63, %v12163_v0 }
 0x603   : > { %2668 = vrot.lane.b32.xlu2 %v2628_v31, %s10238_s19 }
 0x60f   : > { %v2489_v44 = vpop.permute.xlu1 %2488  ;;  %v2591_v53 = vpop.permute.xlu2 %2590 }
 0x610   : > { %v2522_v21 = vadd.f32 %v2489_v44, %v12282_v48  ;;  %v2629_v60 = vmul.f32 %v2591_v53, %v12203_v23 }
 0x612   : > { %9585 = vtanh.f32 %v2522_v21  ;;  %2670 = vrot.lane.b32.xlu2 %v2629_v60, %s10238_s19 }
 0x618   : > { %v12370_v38 = vpop.eup %9585  ;;  %v2663_v2 = vpop.permute.xlu2 %2662 }
 0x619   : > { %v2554_v41 = vsub.f32 %v11925_v8, %v12370_v38 }
 0x61b   : > { %2600 = vrot.lane.b32.xlu1 %v2554_v41, %s10237_s18 }
 0x627   : > { %v2655_v55 = vpop.permute.xlu0 %2654 }
 0x628   : > { %v12376_v0 = vadd.f32 %v12161_v52, %v2655_v55 }
 0x62a   : > { %2864 = vrot.lane.b32.xlu0 %v12376_v0, %s10235_s9 }
 0x62f   : > { %v2491_v48 = vpop.permute.xlu1 %2490 }
 0x630   : > { %v2523_v23 = vadd.f32 %v2491_v48, %v12298_v59  ;;  %v2665_v59 = vpop.permute.xlu2 %2664 }
 0x631   : > { %v12394_v25 = vadd.f32 %v12276_v12, %v2665_v59  ;;  %v12411_v12 = vadd.f32 %v12260_v36, %v2663_v2 }
 0x632   : > { %9587 = vtanh.f32 %v2523_v23 }
 0x637   : > { %v2593_v57 = vpop.permute.xlu1 %2592  ;;  %v2657_v13 = vpop.permute.xlu0 %2656 }
 0x638   : > { %v12381_v18 = vpop.eup %9587  ;;  %v2630_v8 = vmul.f32 %v2593_v57, %v12233_v37  ;;  %v12385_v1 = vadd.f32 %v12205_v50, %v2657_v13 }
 0x639   : > { %v2555_v52 = vsub.f32 %v11940_v47, %v12381_v18 }
 0x63a   : > { %2672 = vrot.lane.b32.xlu2 %v2630_v8, %s10238_s19  ;;  %2866 = vrot.lane.b32.xlu0 %v12385_v1, %s10235_s9 }
 0x63b   : > { %2602 = vrot.lane.b32.xlu1 %v2555_v52, %s10237_s18 }
 0x63f   : > { %v2659_v39 = vpop.permute.xlu0 %2658 }
 0x640   : > { %v12397_v37 = vadd.f32 %v12231_v6, %v2659_v39  ;;  %v2667_v6 = vpop.permute.xlu2 %2666 }
 0x641   : > { %v12414_v35 = vadd.f32 %v12290_v4, %v2667_v6 }
 0x642   : > { %2874 = vrot.lane.b32.xlu2 %v12394_v25, %s10235_s9  ;;  %2868 = vrot.lane.b32.xlu0 %v12397_v37, %s10235_s9 }
 0x647   : > { %v2661_v47 = vpop.permute.xlu0 %2660 }
 0x648   : > { %v12404_v50 = vadd.f32 %v12255_v20, %v2661_v47  ;;  %v2595_v34 = vpop.permute.xlu1 %2594 }
 0x649   : > { %v2631_v11 = vmul.f32 %v2595_v34, %v12237_v32 }
 0x64a   : > { %2870 = vrot.lane.b32.xlu0 %v12404_v50, %s10235_s9 }
 0x64b   : > { %2674 = vrot.lane.b32.xlu1 %v2631_v11, %s10238_s19 }
 0x650   : > { %v2597_v5 = vpop.permute.xlu1 %2596 }
 0x651   : > { %v2632_v32 = vmul.f32 %v2597_v5, %v12257_v61  ;;  %v10200_v61 = vld [vmem:[%s15597_s1 + $0x18] sm:$0xff] }
 0x652   : > { %2872 = vrot.lane.b32.xlu0 %v12411_v12, %s10235_s9 }
 0x653   : > { %2876 = vrot.lane.b32.xlu1 %v12414_v35, %s10235_s9 }
 0x658   : > { %v2599_v20 = vpop.permute.xlu1 %2598 }
 0x659   : > { %v2633_v54 = vmul.f32 %v2599_v20, %v12278_v24  ;;  %v10201_v24 = vld [vmem:[%s15597_s1 + $0x10] sm:$0xff] }
 0x65a   : > { %2676 = vrot.lane.b32.xlu0 %v2632_v32, %s10238_s19 }
 0x65b   : > { %2678 = vrot.lane.b32.xlu2 %v2633_v54, %s10238_s19 }
 0x65d   : > { %v2669_v36 = vpop.permute.xlu2 %2668 }
 0x65e   : > { %v12425_v10 = vadd.f32 %v12307_v46, %v2669_v36 }
 0x662   : > { %2878 = vrot.lane.b32.xlu0 %v12425_v10, %s10235_s9 }
 0x664   : > { %v2863_v4 = vpop.permute.xlu0 %2862 }
 0x665   : > { %8972 = vmatmul.msk.f32.vlgmr.msrb.gmra.mxu3 %vm1028_vm0, %v2863_v4 }
 0x666   : > { %6728 = vmatpush.msrb.mxu3 %v10200_v61 }
 0x668   : > { %6729 = vmatpush.msrb.mxu3 %v10201_v24  ;;  %v15746_v24 = vld [vmem:[#allocation7_spill] sm:$0xff] }
 0x66c   : > { %v2671_v56 = vpop.permute.xlu2 %2670 }
 0x66d   : > { %v12437_v46 = vadd.f32 %v12313_v29, %v2671_v56  ;;  %v15747_v56 = vld [vmem:[#allocation4_spill] sm:$0xff] }
 0x66f   : > { %2880 = vrot.lane.b32.xlu2 %v12437_v46, %s10235_s9 }
 0x68d   : > { %v2601_v14 = vpop.permute.xlu1 %2600 }
 0x68e   : > { %v2634_v28 = vmul.f32 %v2601_v14, %v12302_v19  ;;  %v12515_v14 = vadd.f32 %v15747_v56, %v15746_v24 }
 0x690   : > { %2680 = vrot.lane.b32.xlu1 %v2634_v28, %s10238_s19 }
 0x694   : > { %v2673_v42 = vpop.permute.xlu2 %2672 }
 0x695   : > { %v12444_v15 = vadd.f32 %v12327_v27, %v2673_v42 }
 0x698   : > { %2882 = vrot.lane.b32.xlu1 %v12444_v15, %s10235_s9 }
 0x69c   : > { %v2865_v33 = vpop.permute.xlu0 %2864  ;;  %v2875_v49 = vpop.permute.xlu2 %2874 }
 0x69d   : > { %8973 = vmatmul.msk.f32.gmra.mxu3 %vm1028_vm0, %v2865_v33 }
 0x6ac   : > { %v2867_v29 = vpop.permute.xlu0 %2866 }
 0x6ad   : > { %v2603_v43 = vpop.permute.xlu1 %2602  ;;  %8974 = vmatmul.msk.f32.gmra.mxu3 %vm1028_vm0, %v2867_v29 }
 0x6ae   : > { %v2635_v3 = vmul.f32 %v2603_v43, %v12321_v51 }
 0x6b0   : > { %2682 = vrot.lane.b32.xlu0 %v2635_v3, %s10238_s19 }
 0x6b4   : > { %v2869_v19 = vpop.permute.xlu0 %2868 }
 0x6b5   : > { %v2679_v26 = vpop.permute.xlu2 %2678  ;;  %8975 = vmatmul.msk.f32.gmra.mxu3 %vm1028_vm0, %v2869_v19 }
 0x6b6   : > { %v12454_v27 = vadd.f32 %v12355_v9, %v2679_v26 }
 0x6b8   : > { %2888 = vrot.lane.b32.xlu1 %v12454_v27, %s10235_s9 }
 0x6bc   : > { %v2871_v30 = vpop.permute.xlu0 %2870 }
 0x6bd   : > { %v2675_v45 = vpop.permute.xlu1 %2674  ;;  %8976 = vmatmul.msk.f32.gmra.mxu3 %vm1028_vm0, %v2871_v30 }
 0x6be   : > { %v12460_v17 = vadd.f32 %v12341_v7, %v2675_v45 }
 0x6c0   : > { %2884 = vrot.lane.b32.xlu2 %v12460_v17, %s10235_s9 }
 0x6c4   : > { %v2873_v51 = vpop.permute.xlu0 %2872 }
 0x6c5   : > { %8977 = vmatmul.msk.f32.gmra.mxu3 %vm1028_vm0, %v2873_v51  ;;  %v2877_v31 = vpop.permute.xlu1 %2876 }
 0x6c9   : > { %v2881_v44 = vpop.permute.xlu2 %2880 }
 0x6cc   : > { %v2677_v63 = vpop.permute.xlu0 %2676 }
 0x6cd   : > { %v12466_v9 = vadd.f32 %v12349_v62, %v2677_v63  ;;  %8978 = vmatmul.msk.f32.gmra.mxu3 %vm1028_vm0, %v2875_v49  ;;  %v12477_v62 = vld [vmem:[%s15597_s1 + $0x21] ss:$0 sm:$0xff] }
 0x6cf   : > { %2886 = vrot.lane.b32.xlu0 %v12466_v9, %s10235_s9 }
 0x6d4   : > { %v2879_v7 = vpop.permute.xlu0 %2878 }
 0x6d5   : > { %8979 = vmatmul.msk.f32.gmra.mxu3 %vm1028_vm0, %v2877_v31 }
 0x6dd   : > { %8980 = vmatmul.msk.f32.gmra.mxu3 %vm1028_vm0, %v2879_v7 }
 0x6e5   : > { %8981 = vmatmul.msk.f32.gmra.mxu3 %vm1028_vm0, %v2881_v44 }
 0x6e8   : > { %v2943_v53 = vpop.f32.mrf.mxu3 }
 0x6e9   : > { %v2944_v21 = vadd.f32 %v12477_v62, %v2943_v53 }
 0x6eb   : > { %3327 = vrot.lane.b32.xlu1 %v2944_v21, %s10235_s9 }
 0x702   : > { %v2681_v60 = vpop.permute.xlu1 %2680 }
 0x703   : > { %v12482_v41 = vadd.f32 %v12370_v38, %v2681_v60  ;;  %v15745_v38 = vld [vmem:[#allocation3_spill] sm:$0xff] }
 0x704   : > { %v12497_v8 = vadd.f32 %v15745_v38, %v10863_v22 }
 0x705   : > { %2890 = vrot.lane.b32.xlu2 %v12482_v41, %s10235_s9 }
 0x706   : > { %v2991_v52 = vadd.f32 %v2944_v21, %v12497_v8 }
 0x708   : > { %v8988_v59 = vmul.f32 -1.442695, %v2991_v52 }
 0x70a   : > { %v2883_v55 = vpop.permute.xlu1 %2882  ;;  %9589 = vpow2.f32 %v8988_v59 }
 0x70b   : > { %8982 = vmatmul.msk.f32.gmra.mxu3 %vm1028_vm0, %v2883_v55 }
 0x710   : > { %v9590_v11 = vpop.eup %9589 }
 0x711   : > { %v3055_v6 = vadd.f32 1.0, %v9590_v11  ;;  %v15751_v11 = vld [vmem:[#allocation6_spill] sm:$0xff] }
 0x713   : > { %9591 = vrcp.f32 %v3055_v6  ;;  %v3082_v26 = vand.u32 2147483648, %v3055_v6  ;;  %vm3076_vm10 = vweird.f32 %v3055_v6  ;;  %v3080_v30 = vand.u32 2147483647, %v3055_v6 }
 0x715   : > { %v3083_v63 = vor.u32 1.1754944e-38, %v3082_v26  ;;  %vm3081_vm12 = vcmp.eq.f32.partialorder %v3080_v30, 8.507059e+37 }
 0x719   : > { %v9592_v54 = vpop.eup %9591 }
 0x71a   : > { %v2885_v48 = vpop.permute.xlu2 %2884  ;;  %v3072_v28 = vmul.f32 %v9592_v54, %v3055_v6  ;;  %vm3077_vm9 = vweird.f32 %v9592_v54 }
 0x71b   : > { %8983 = vmatmul.msk.f32.gmra.mxu3 %vm1028_vm0, %v2885_v48  ;;  %vm3078_vm11 = vmor %vm3076_vm10, %vm3077_vm9 }
 0x71c   : > { %v3073_v33 = vsub.f32 1.0, %v3072_v28 }
 0x71e   : > { %v3074_v3 = vmul.f32 %v9592_v54, %v3073_v33 }
 0x720   : > { %v2946_v23 = vpop.f32.mrf.mxu3  ;;  %v3075_v19 = vadd.f32 %v9592_v54, %v3074_v3 }
 0x721   : > { %v2947_v2 = vadd.f32 %v12477_v62, %v2946_v23  ;;  %v15748_v23 = vld [vmem:[#allocation11_spill] sm:$0xff] }
 0x722   : > { %v2683_v57 = vpop.permute.xlu0 %2682  ;;  %v3079_v51 = vsel %vm3078_vm11, %v9592_v54, %v3075_v19 }
 0x723   : > { %v12490_v13 = vadd.f32 %v12381_v18, %v2683_v57  ;;  %3329 = vrot.lane.b32.xlu2 %v2947_v2, %s10235_s9  ;;  %v2992_v42 = vadd.f32 %v2947_v2, %v12515_v14  ;;  %v12526_v44 = vsel %vm3081_vm12, %v3083_v63, %v3079_v51  ;;  %v15749_v2 = vld [vmem:[#allocation12_spill] sm:$0xff] }
 0x724   : > { %v12538_v57 = vadd.f32 %v15749_v2, %v15748_v23  ;;  %v15756_v2 = vld [vmem:[#allocation16_spill] sm:$0xff] }
 0x725   : > { %2892 = vrot.lane.b32.xlu0 %v12490_v13, %s10235_s9  ;;  %v8989_v29 = vmul.f32 -1.442695, %v2992_v42  ;;  %v15752_v42 = vld [vmem:[#allocation10_spill] sm:$0xff] }
 0x727   : > { %9593 = vpow2.f32 %v8989_v29 }
 0x72a   : > { %v2889_v4 = vpop.permute.xlu1 %2888 }
 0x72d   : > { %v9594_v45 = vpop.eup %9593 }
 0x72e   : > { %v3056_v31 = vadd.f32 1.0, %v9594_v45 }
 0x730   : > { %v2949_v39 = vpop.f32.mrf.mxu3  ;;  %9595 = vrcp.f32 %v3056_v31  ;;  %vm3091_vm14 = vweird.f32 %v3056_v31  ;;  %v3095_v56 = vand.u32 2147483647, %v3056_v31 }
 0x731   : > { %v2950_v47 = vadd.f32 %v12477_v62, %v2949_v39 }
 0x732   : > { %vm3096_vm1 = vcmp.eq.f32.partialorder %v3095_v56, 8.507059e+37 }
 0x733   : > { %3331 = vrot.lane.b32.xlu0 %v2950_v47, %s10235_s9 }
 0x736   : > { %v9596_v48 = vpop.eup %9595 }
 0x737   : > { %v3087_v38 = vmul.f32 %v9596_v48, %v3056_v31  ;;  %vm3092_vm13 = vweird.f32 %v9596_v48 }
 0x738   : > { %v2952_v18 = vpop.f32.mrf.mxu3  ;;  %vm3093_vm15 = vmor %vm3091_vm14, %vm3092_vm13 }
 0x739   : > { %v12503_v34 = vadd.f32 %v12477_v62, %v2952_v18  ;;  %v3088_v59 = vsub.f32 1.0, %v3087_v38  ;;  %v15750_v18 = vld [vmem:[#allocation8_spill] sm:$0xff]  ;;  %v15757_v38 = vld [vmem:[#allocation15_spill] sm:$0xff] }
 0x73a   : > { %v12543_v6 = vadd.f32 %v15751_v11, %v15750_v18 }
 0x73b   : > { %3333 = vrot.lane.b32.xlu1 %v12503_v34, %s10235_s9 }
 0x740   : > { %v2955_v5 = vpop.f32.mrf.mxu3 }
 0x741   : > { %v2956_v32 = vadd.f32 %v12477_v62, %v2955_v5  ;;  %v2887_v20 = vpop.permute.xlu0 %2886  ;;  %v3089_v5 = vmul.f32 %v9596_v48, %v3088_v59 }
 0x742   : > { %8984 = vmatmul.msk.f32.gmra.mxu3 %vm1028_vm0, %v2887_v20  ;;  %v2993_v20 = vadd.f32 %v2950_v47, %v12543_v6 }
 0x743   : > { %3335 = vrot.lane.b32.xlu2 %v2956_v32, %s10235_s9  ;;  %v2995_v52 = vadd.f32 %v2956_v32, %v12538_v57  ;;  %v3090_v54 = vadd.f32 %v9596_v48, %v3089_v5  ;;  %v15753_v32 = vld [vmem:[#allocation9_spill] sm:$0xff] }
 0x744   : > { %v12548_v33 = vadd.f32 %v15753_v32, %v15752_v42 }
 0x745   : > { %v8992_v39 = vmul.f32 -1.442695, %v2995_v52  ;;  %v3094_v29 = vsel %vm3093_vm15, %v9596_v48, %v3090_v54  ;;  %v12567_v52 = vadd.f32 %v15757_v38, %v15756_v2  ;;  %v15767_v2 = vld [vmem:[#allocation20_spill] sm:$0xff] }
 0x746   : > { %v2994_v3 = vadd.f32 %v12503_v34, %v12548_v33  ;;  %v15754_v34 = vld [vmem:[#allocation13_spill] sm:$0xff] }
 0x747   : > { %9597 = vpow2.f32 %v8992_v39 }
 0x748   : > { %v2958_v36 = vpop.f32.mrf.mxu3  ;;  %v8991_v45 = vmul.f32 -1.442695, %v2994_v3 }
 0x749   : > { %v12511_v61 = vadd.f32 %v12477_v62, %v2958_v36  ;;  %v3097_v36 = vand.u32 2147483648, %v3056_v31 }
 0x74a   : > { %8985 = vmatmul.msk.f32.gmra.mxu3 %vm1028_vm0, %v2889_v4  ;;  %v8990_v4 = vmul.f32 -1.442695, %v2993_v20 }
 0x74b   : > { %3337 = vrot.lane.b32.xlu0 %v12511_v61, %s10235_s9 }
 0x74c   : > { %9599 = vpow2.f32 %v8990_v4 }
 0x74d   : > { %v9598_v28 = vpop.eup %9597 }
 0x74e   : > { %v3059_v47 = vadd.f32 1.0, %v9598_v28 }
 0x750   : > { %v2961_v49 = vpop.f32.mrf.mxu3  ;;  %9601 = vrcp.f32 %v3059_v47  ;;  %vm3136_vm3 = vweird.f32 %v3059_v47 }
 0x751   : > { %v12522_v43 = vadd.f32 %v12477_v62, %v2961_v49  ;;  %v3098_v49 = vor.u32 1.1754944e-38, %v3097_v36  ;;  %9603 = vpow2.f32 %v8991_v45 }
 0x752   : > { %v9600_v51 = vpop.eup %9599 }
 0x753   : > { %3339 = vrot.lane.b32.xlu2 %v12522_v43, %s10235_s9  ;;  %v12552_v26 = vsel %vm3096_vm1, %v3098_v49, %v3094_v29  ;;  %v3057_v31 = vadd.f32 1.0, %v9600_v51  ;;  %v2997_v11 = vadd.f32 %v12522_v43, %v12567_v52  ;;  %v3142_v43 = vand.u32 2147483648, %v3059_v47 }
 0x755   : > { %9605 = vrcp.f32 %v3057_v31  ;;  %v8994_v4 = vmul.f32 -1.442695, %v2997_v11  ;;  %v3143_v38 = vor.u32 1.1754944e-38, %v3142_v43  ;;  %vm3106_vm7 = vweird.f32 %v3057_v31 }
 0x758   : > { %v2964_v60 = vpop.f32.mrf.mxu3 }
 0x759   : > { %v12532_v55 = vadd.f32 %v12477_v62, %v2964_v60 }
 0x75d   : > { %v3328_v7 = vpop.permute.xlu1 %3327 }
 0x75e   : > { %v3375_v53 = vmul.f32 %v3328_v7, %v12526_v44 }
 0x75f   : > { %v2891_v21 = vpop.permute.xlu2 %2890 }
 0x760   : > { %8986 = vmatmul.msk.f32.gmra.mxu3 %vm1028_vm0, %v2891_v21  ;;  %3407 = vrot.lane.b32.xlu1 %v3375_v53, %s10236_s17  ;;  %v2967_v63 = vpop.f32.mrf.mxu3  ;;  %v9602_v53 = vpop.eup %9601  ;;  %v15755_v21 = vld [vmem:[#allocation14_spill] sm:$0xff] }
 0x761   : > { %v12557_v7 = vadd.f32 %v12477_v62, %v2967_v63  ;;  %v12563_v60 = vadd.f32 %v15755_v21, %v15754_v34  ;;  %v9604_v48 = vpop.eup %9603  ;;  %v3132_v59 = vmul.f32 %v9602_v53, %v3059_v47  ;;  %vm3137_vm2 = vweird.f32 %v9602_v53 }
 0x762   : > { %v12573_v5 = vadd.f32 1.0, %v9604_v48  ;;  %v9606_v54 = vpop.eup %9605  ;;  %vm3138_vm4 = vmor %vm3136_vm3, %vm3137_vm2 }
 0x763   : > { %v2996_v39 = vadd.f32 %v12511_v61, %v12563_v60  ;;  %v3133_v20 = vsub.f32 1.0, %v3132_v59  ;;  %v3102_v28 = vmul.f32 %v9606_v54, %v3057_v31  ;;  %vm3107_vm6 = vweird.f32 %v9606_v54 }
 0x764   : > { %9607 = vrcp.f32 %v12573_v5  ;;  %vm3108_vm8 = vmor %vm3106_vm7, %vm3107_vm6  ;;  %vm3121_vm11 = vweird.f32 %v12573_v5 }
 0x765   : > { %v8993_v36 = vmul.f32 -1.442695, %v2996_v39  ;;  %v3134_v56 = vmul.f32 %v9602_v53, %v3133_v20  ;;  %v3103_v61 = vsub.f32 1.0, %v3102_v28 }
 0x767   : > { %9609 = vpow2.f32 %v8993_v36  ;;  %v3135_v29 = vadd.f32 %v9602_v53, %v3134_v56  ;;  %v3104_v63 = vmul.f32 %v9606_v54, %v3103_v61  ;;  %v3112_v56 = vand.u32 2147483648, %v3057_v31 }
 0x768   : > { %3341 = vrot.lane.b32.xlu1 %v12532_v55, %s10235_s9  ;;  %v12576_v32 = vpop.f32.mrf.mxu3  ;;  %9611 = vpow2.f32 %v8994_v4 }
 0x769   : > { %v3139_v51 = vsel %vm3138_vm4, %v9602_v53, %v3135_v29  ;;  %v3110_v53 = vand.u32 2147483647, %v3057_v31 }
 0x76a   : > { %v9608_v49 = vpop.eup %9607 }
 0x76b   : > { %v3117_v21 = vmul.f32 %v9608_v49, %v12573_v5  ;;  %vm3111_vm9 = vcmp.eq.f32.partialorder %v3110_v53, 8.507059e+37  ;;  %vm3122_vm10 = vweird.f32 %v9608_v49 }
 0x76c   : > { %vm3123_vm12 = vmor %vm3121_vm11, %vm3122_vm10 }
 0x76d   : > { %v3118_v4 = vsub.f32 1.0, %v3117_v21  ;;  %v15758_v21 = vld [vmem:[#allocation27_spill] sm:$0xff] }
 0x76f   : > { %v3119_v29 = vmul.f32 %v9608_v49, %v3118_v4 }
 0x77d   : > { %v3330_v19 = vpop.permute.xlu2 %3329 }
 0x77e   : > { %v3376_v30 = vmul.f32 %v3330_v19, %v12552_v26  ;;  %v3140_v19 = vand.u32 2147483647, %v3059_v47  ;;  %v3105_v47 = vadd.f32 %v9606_v54, %v3104_v63  ;;  %v3120_v63 = vadd.f32 %v9608_v49, %v3119_v29 }
 0x780   : > { %3409 = vrot.lane.b32.xlu0 %v3376_v30, %s10236_s17  ;;  %v9610_v30 = vpop.eup %9609  ;;  %vm3141_vm5 = vcmp.eq.f32.partialorder %v3140_v19, 8.507059e+37  ;;  %v3109_v28 = vsel %vm3108_vm8, %v9606_v54, %v3105_v47  ;;  %v3127_v54 = vand.u32 2147483648, %v12573_v5  ;;  %v3124_v4 = vsel %vm3123_vm12, %v9608_v49, %v3120_v63 }
 0x781   : > { %v9612_v45 = vpop.eup %9611  ;;  %v12580_v59 = vadd.f32 1.0, %v9610_v30  ;;  %v12584_v20 = vsel %vm3141_vm5, %v3143_v38, %v3139_v51  ;;  %v15759_v38 = vld [vmem:[#allocation17_spill] sm:$0xff] }
 0x782   : > { %v12582_v39 = vadd.f32 1.0, %v9612_v45 }
 0x783   : > { %9613 = vrcp.f32 %v12580_v59  ;;  %vm3151_vm1 = vweird.f32 %v12580_v59 }
 0x784   : > { %9615 = vrcp.f32 %v12582_v39  ;;  %vm3166_vm2 = vweird.f32 %v12582_v39 }
 0x788   : > { %3343 = vrot.lane.b32.xlu0 %v12557_v7, %s10235_s9 }
 0x789   : > { %v9614_v30 = vpop.eup %9613 }
 0x78a   : > { %v9616_v31 = vpop.eup %9615  ;;  %v3147_v53 = vmul.f32 %v9614_v30, %v12580_v59  ;;  %vm3152_vm14 = vweird.f32 %v9614_v30 }
 0x78b   : > { %vm3167_vm15 = vweird.f32 %v9616_v31  ;;  %vm3153_vm3 = vmor %vm3151_vm1, %vm3152_vm14 }
 0x78c   : > { %vm3168_vm4 = vmor %vm3166_vm2, %vm3167_vm15 }
 0x78e   : > { %v2973_v48 = vpop.f32.mrf.mxu3 }
 0x797   : > { %v2893_v3 = vpop.permute.xlu0 %2892 }
 0x798   : > { %8987 = vmatmul.msk.f32.gmra.mxu3 %vm1028_vm0, %v2893_v3  ;;  %v3113_v3 = vor.u32 1.1754944e-38, %v3112_v56  ;;  %v3162_v56 = vmul.f32 %v9616_v31, %v12582_v39 }
 0x79a   : > { %v12590_v43 = vsel %vm3111_vm9, %v3113_v3, %v3109_v28  ;;  %v3128_v28 = vor.u32 1.1754944e-38, %v3127_v54 }
 0x79d   : > { %v3336_v11 = vpop.permute.xlu2 %3335 }
 0x79e   : > { %v3379_v36 = vmul.f32 %v3336_v11, %v12584_v20  ;;  %v2976_v61 = vpop.f32.mrf.mxu3  ;;  %v12598_v11 = vadd.f32 %v15759_v38, %v15758_v21  ;;  %v12621_v38 = vadd.f32 %v12477_v62, %v2973_v48  ;;  %v3155_v48 = vand.u32 2147483647, %v12580_v59 }
 0x79f   : > { %v12593_v45 = vadd.f32 %v12477_v62, %v2976_v61 }
 0x7a0   : > { %3415 = vrot.lane.b32.xlu0 %v3379_v36, %s10236_s17  ;;  %v3125_v36 = vand.u32 2147483647, %v12573_v5  ;;  %v2998_v47 = vadd.f32 %v12532_v55, %v12598_v11  ;;  %v3148_v55 = vsub.f32 1.0, %v3147_v53  ;;  %vm3156_vm6 = vcmp.eq.f32.partialorder %v3155_v48, 8.507059e+37 }
 0x7a2   : > { %vm3126_vm13 = vcmp.eq.f32.partialorder %v3125_v36, 8.507059e+37  ;;  %v8995_v29 = vmul.f32 -1.442695, %v2998_v47  ;;  %v3149_v63 = vmul.f32 %v9614_v30, %v3148_v55  ;;  %v3172_v47 = vand.u32 2147483648, %v12582_v39 }
 0x7a3   : > { %v12610_v3 = vsel %vm3126_vm13, %v3128_v28, %v3124_v4  ;;  %v3157_v4 = vand.u32 2147483648, %v12580_v59 }
 0x7a4   : > { %9617 = vpow2.f32 %v8995_v29 }
 0x7a5   : > { %v3332_v19 = vpop.permute.xlu0 %3331 }
 0x7a6   : > { %v3377_v51 = vmul.f32 %v3332_v19, %v12590_v43  ;;  %v12614_v19 = vadd.f32 %v12477_v62, %v12576_v32  ;;  %v3150_v32 = vadd.f32 %v9614_v30, %v3149_v63 }
 0x7a8   : > { %3349 = vrot.lane.b32.xlu0 %v12593_v45, %s10235_s9  ;;  %3411 = vrot.lane.b32.xlu2 %v3377_v51, %s10236_s17  ;;  %v3163_v51 = vsub.f32 1.0, %v3162_v56  ;;  %v3170_v56 = vand.u32 2147483647, %v12582_v39  ;;  %v3154_v29 = vsel %vm3153_vm3, %v9614_v30, %v3150_v32  ;;  %v15761_v32 = vld [vmem:[#allocation18_spill] sm:$0xff] }
 0x7aa   : > { %v3164_v49 = vmul.f32 %v9616_v31, %v3163_v51  ;;  %v9618_v36 = vpop.eup %9617  ;;  %v3158_v51 = vor.u32 1.1754944e-38, %v3157_v4  ;;  %vm3171_vm5 = vcmp.eq.f32.partialorder %v3170_v56, 8.507059e+37 }
 0x7ab   : > { %v3062_v53 = vadd.f32 1.0, %v9618_v36 }
 0x7ac   : > { %v3165_v54 = vadd.f32 %v9616_v31, %v3164_v49  ;;  %v12633_v49 = vsel %vm3156_vm6, %v3158_v51, %v3154_v29 }
 0x7ad   : > { %v3334_v61 = vpop.permute.xlu1 %3333  ;;  %9619 = vrcp.f32 %v3062_v53  ;;  %vm3181_vm8 = vweird.f32 %v3062_v53 }
 0x7ae   : > { %v3378_v5 = vmul.f32 %v3334_v61, %v12610_v3  ;;  %v3169_v28 = vsel %vm3168_vm4, %v9616_v31, %v3165_v54  ;;  %v3340_v61 = vpop.permute.xlu2 %3339  ;;  %v15760_v54 = vld [vmem:[#allocation30_spill] sm:$0xff] }
 0x7af   : > { %v12644_v36 = vadd.f32 %v15761_v32, %v15760_v54  ;;  %v15763_v32 = vld [vmem:[#allocation19_spill] sm:$0xff] }
 0x7b0   : > { %3413 = vrot.lane.b32.xlu1 %v3378_v5, %s10236_s17  ;;  %3345 = vrot.lane.b32.xlu2 %v12614_v19, %s10235_s9  ;;  %v3173_v5 = vor.u32 1.1754944e-38, %v3172_v47 }
 0x7b1   : > { %v2999_v4 = vadd.f32 %v12557_v7, %v12644_v36 }
 0x7b2   : > { %v12631_v55 = vsel %vm3171_vm5, %v3173_v5, %v3169_v28 }
 0x7b3   : > { %v3381_v63 = vmul.f32 %v3340_v61, %v12631_v55  ;;  %v9620_v59 = vpop.eup %9619  ;;  %v8996_v48 = vmul.f32 -1.442695, %v2999_v4 }
 0x7b4   : > { %v3177_v47 = vmul.f32 %v9620_v59, %v3062_v53  ;;  %vm3182_vm7 = vweird.f32 %v9620_v59 }
 0x7b5   : > { %9621 = vpow2.f32 %v8996_v48  ;;  %vm3183_vm9 = vmor %vm3181_vm8, %vm3182_vm7 }
 0x7b6   : > { %v3178_v56 = vsub.f32 1.0, %v3177_v47 }
 0x7b8   : > { %3347 = vrot.lane.b32.xlu1 %v12621_v38, %s10235_s9  ;;  %v3179_v29 = vmul.f32 %v9620_v59, %v3178_v56 }
 0x7ba   : > { %v3180_v51 = vadd.f32 %v9620_v59, %v3179_v29 }
 0x7bb   : > { %v9622_v7 = vpop.eup %9621 }
 0x7bc   : > { %v3184_v4 = vsel %vm3183_vm9, %v9620_v59, %v3180_v51 }
 0x7bd   : > { %v3338_v39 = vpop.permute.xlu0 %3337 }
 0x7be   : > { %v3380_v21 = vmul.f32 %v3338_v39, %v12633_v49  ;;  %v3187_v39 = vand.u32 2147483648, %v3062_v53 }
 0x7c0   : > { %3419 = vrot.lane.b32.xlu1 %v3381_v63, %s10236_s17  ;;  %3417 = vrot.lane.b32.xlu2 %v3380_v21, %s10236_s17  ;;  %v3185_v63 = vand.u32 2147483647, %v3062_v53  ;;  %v3188_v56 = vor.u32 1.1754944e-38, %v3187_v39 }
 0x7c2   : > { %vm3186_vm10 = vcmp.eq.f32.partialorder %v3185_v63, 8.507059e+37 }
 0x7c3   : > { %v12662_v29 = vsel %vm3186_vm10, %v3188_v56, %v3184_v4 }
 0x7c5   : > { %v2979_v30 = vpop.f32.mrf.mxu3 }
 0x7c6   : > { %v12640_v31 = vadd.f32 %v12477_v62, %v2979_v30  ;;  %v15762_v30 = vld [vmem:[#allocation34_spill] sm:$0xff] }
 0x7c7   : > { %v12658_v47 = vadd.f32 %v15763_v32, %v15762_v30 }
 0x7c8   : > { %3351 = vrot.lane.b32.xlu0 %v12640_v31, %s10235_s9 }
 0x7c9   : > { %v3000_v48 = vadd.f32 %v12614_v19, %v12658_v47 }
 0x7cd   : > { %v2982_v28 = vpop.f32.mrf.mxu3 }
 0x7ce   : > { %v12651_v21 = vadd.f32 %v12477_v62, %v2982_v28  ;;  %v3063_v28 = vadd.f32 1.0, %v9622_v7 }
 0x7d0   : > { %3353 = vrot.lane.b32.xlu0 %v12651_v21, %s10235_s9  ;;  %v3202_v54 = vand.u32 2147483648, %v3063_v28  ;;  %vm3196_vm12 = vweird.f32 %v3063_v28 }
 0x7d2   : > { %v3408_v61 = vpop.permute.xlu1 %3407  ;;  %v3203_v23 = vor.u32 1.1754944e-38, %v3202_v54 }
 0x7d3   : > { %v3455_v5 = vadd.f32 %v3408_v61, %v12497_v8 }
 0x7d5   : > { %9623 = vtanh.f32 %v3455_v5  ;;  %v8997_v5 = vmul.f32 -1.442695, %v3000_v48  ;;  %v15764_v48 = vld [vmem:[#allocation26_spill] sm:$0xff] }
 0x7d6   : > { %9625 = vrcp.f32 %v3063_v28 }
 0x7d7   : > { %9627 = vpow2.f32 %v8997_v5 }
 0x7da   : > { %v3342_v8 = vpop.permute.xlu1 %3341 }
 0x7db   : > { %v3382_v61 = vmul.f32 %v3342_v8, %v12662_v29  ;;  %v12665_v53 = vpop.eup %9623 }
 0x7dc   : > { %v3487_v32 = vsub.f32 %v12361_v58, %v12665_v53  ;;  %v9626_v59 = vpop.eup %9625  ;;  %v15765_v58 = vld [vmem:[#allocation22_spill] sm:$0xff] }
 0x7dd   : > { %3421 = vrot.lane.b32.xlu1 %v3382_v61, %s10236_s17  ;;  %v9628_v39 = vpop.eup %9627  ;;  %v3192_v63 = vmul.f32 %v9626_v59, %v3063_v28  ;;  %v12678_v8 = vadd.f32 %v15765_v58, %v15764_v48  ;;  %vm3197_vm11 = vweird.f32 %v9626_v59 }
 0x7de   : > { %3519 = vrot.lane.b32.xlu2 %v3487_v32, %s10237_s18  ;;  %v3064_v7 = vadd.f32 1.0, %v9628_v39  ;;  %v3200_v39 = vand.u32 2147483647, %v3063_v28  ;;  %vm3198_vm13 = vmor %vm3196_vm12, %vm3197_vm11 }
 0x7df   : > { %v3193_v4 = vsub.f32 1.0, %v3192_v63  ;;  %v3002_v61 = vadd.f32 %v12593_v45, %v12678_v8 }
 0x7e0   : > { %9629 = vrcp.f32 %v3064_v7  ;;  %vm3201_vm14 = vcmp.eq.f32.partialorder %v3200_v39, 8.507059e+37  ;;  %vm3211_vm1 = vweird.f32 %v3064_v7 }
 0x7e1   : > { %v3194_v56 = vmul.f32 %v9626_v59, %v3193_v4  ;;  %v8999_v63 = vmul.f32 -1.442695, %v3002_v61  ;;  %v15766_v4 = vld [vmem:[#allocation38_spill] sm:$0xff] }
 0x7e2   : > { %v12685_v34 = vadd.f32 %v15767_v2, %v15766_v4 }
 0x7e3   : > { %v2985_v19 = vpop.f32.mrf.mxu3 }
 0x7e4   : > { %v12672_v51 = vadd.f32 %v12477_v62, %v2985_v19  ;;  %v3195_v19 = vadd.f32 %v9626_v59, %v3194_v56  ;;  %v3001_v45 = vadd.f32 %v12621_v38, %v12685_v34 }
 0x7e6   : > { %3355 = vrot.lane.b32.xlu0 %v12672_v51, %s10235_s9  ;;  %v9630_v30 = vpop.eup %9629  ;;  %v3199_v58 = vsel %vm3198_vm13, %v9626_v59, %v3195_v19 }
 0x7e7   : > { %v3207_v48 = vmul.f32 %v9630_v30, %v3064_v7  ;;  %vm3212_vm15 = vweird.f32 %v9630_v30 }
 0x7e8   : > { %vm3213_vm2 = vmor %vm3211_vm1, %vm3212_vm15 }
 0x7e9   : > { %v3208_v61 = vsub.f32 1.0, %v3207_v48  ;;  %v3215_v48 = vand.u32 2147483647, %v3064_v7 }
 0x7eb   : > { %v3209_v54 = vmul.f32 %v9630_v30, %v3208_v61  ;;  %vm3216_vm3 = vcmp.eq.f32.partialorder %v3215_v48, 8.507059e+37 }
 0x7ed   : > { %v3210_v39 = vadd.f32 %v9630_v30, %v3209_v54 }
 0x7f2   : > { %v3410_v5 = vpop.permute.xlu0 %3409 }
 0x7f3   : > { %v3456_v32 = vadd.f32 %v3410_v5, %v12515_v14  ;;  %v12689_v14 = vsel %vm3201_vm14, %v3203_v23, %v3199_v58  ;;  %v15768_v58 = vld [vmem:[#allocation31_spill] sm:$0xff] }
 0x7f5   : > { %9631 = vtanh.f32 %v3456_v32  ;;  %v8998_v32 = vmul.f32 -1.442695, %v3001_v45  ;;  %v15769_v45 = vld [vmem:[#allocation23_spill] sm:$0xff] }
 0x7f6   : > { %9633 = vpow2.f32 %v8999_v63  ;;  %v3217_v63 = vand.u32 2147483648, %v3064_v7 }
 0x7f7   : > { %9635 = vpow2.f32 %v8998_v32 }
 0x7f8   : > { %v3218_v61 = vor.u32 1.1754944e-38, %v3217_v63 }
 0x7fa   : > { %v3344_v56 = vpop.permute.xlu0 %3343 }
 0x7fb   : > { %v12691_v5 = vpop.eup %9631  ;;  %v3383_v28 = vmul.f32 %v3344_v56, %v12689_v14  ;;  %v12701_v56 = vadd.f32 %v15769_v45, %v15768_v58 }
 0x7fc   : > { %v3488_v2 = vsub.f32 %v12376_v0, %v12691_v5  ;;  %v9634_v38 = vpop.eup %9633 }
 0x7fd   : > { %3423 = vrot.lane.b32.xlu1 %v3383_v28, %s10236_s17  ;;  %v3066_v23 = vadd.f32 1.0, %v9634_v38  ;;  %v9636_v0 = vpop.eup %9635  ;;  %v3214_v28 = vsel %vm3213_vm2, %v9630_v30, %v3210_v39  ;;  %v15771_v30 = vld [vmem:[#allocation25_spill] sm:$0xff] }
 0x7fe   : > { %3521 = vrot.lane.b32.xlu2 %v3488_v2, %s10237_s18  ;;  %v3003_v2 = vadd.f32 %v12640_v31, %v12701_v56  ;;  %v12707_v32 = vsel %vm3216_vm3, %v3218_v61, %v3214_v28  ;;  %v15770_v31 = vld [vmem:[#allocation35_spill] sm:$0xff] }
 0x7ff   : > { %v12719_v39 = vadd.f32 %v15771_v30, %v15770_v31  ;;  %v3247_v31 = vand.u32 2147483648, %v3066_v23  ;;  %vm3241_vm5 = vweird.f32 %v3066_v23 }
 0x800   : > { %v9000_v45 = vmul.f32 -1.442695, %v3003_v2 }
 0x801   : > { %v3004_v48 = vadd.f32 %v12651_v21, %v12719_v39  ;;  %v3245_v21 = vand.u32 2147483647, %v3066_v23 }
 0x802   : > { %v3412_v59 = vpop.permute.xlu2 %3411 }
 0x803   : > { %v3457_v19 = vadd.f32 %v3412_v59, %v12543_v6  ;;  %v12705_v6 = vadd.f32 1.0, %v9636_v0  ;;  %vm3246_vm7 = vcmp.eq.f32.partialorder %v3245_v21, 8.507059e+37 }
 0x805   : > { %9637 = vtanh.f32 %v3457_v19  ;;  %v3232_v22 = vand.u32 2147483648, %v12705_v6  ;;  %vm3226_vm9 = vweird.f32 %v12705_v6 }
 0x806   : > { %9639 = vrcp.f32 %v3066_v23 }
 0x807   : > { %9641 = vrcp.f32 %v12705_v6 }
 0x808   : > { %9643 = vpow2.f32 %v9000_v45 }
 0x80a   : > { %v3346_v54 = vpop.permute.xlu2 %3345 }
 0x80b   : > { %v12709_v38 = vpop.eup %9637  ;;  %v3384_v7 = vmul.f32 %v3346_v54, %v12707_v32 }
 0x80c   : > { %v3489_v59 = vsub.f32 %v12385_v1, %v12709_v38  ;;  %v9640_v19 = vpop.eup %9639  ;;  %v9001_v1 = vmul.f32 -1.442695, %v3004_v48 }
 0x80d   : > { %3425 = vrot.lane.b32.xlu1 %v3384_v7, %s10236_s17  ;;  %v3237_v63 = vmul.f32 %v9640_v19, %v3066_v23  ;;  %v9642_v0 = vpop.eup %9641  ;;  %vm3242_vm4 = vweird.f32 %v9640_v19 }
 0x80e   : > { %3523 = vrot.lane.b32.xlu2 %v3489_v59, %s10237_s18  ;;  %v9644_v61 = vpop.eup %9643  ;;  %v3222_v54 = vmul.f32 %v9642_v0, %v12705_v6  ;;  %9645 = vpow2.f32 %v9001_v1  ;;  %vm3243_vm6 = vmor %vm3241_vm5, %vm3242_vm4  ;;  %v3248_v1 = vor.u32 1.1754944e-38, %v3247_v31  ;;  %vm3227_vm8 = vweird.f32 %v9642_v0 }
 0x80f   : > { %v3238_v28 = vsub.f32 1.0, %v3237_v63  ;;  %v12724_v4 = vadd.f32 1.0, %v9644_v61  ;;  %v3230_v31 = vand.u32 2147483647, %v12705_v6  ;;  %vm3228_vm10 = vmor %vm3226_vm9, %vm3227_vm8 }
 0x810   : > { %v3223_v58 = vsub.f32 1.0, %v3222_v54 }
 0x811   : > { %v3239_v7 = vmul.f32 %v9640_v19, %v3238_v28  ;;  %9647 = vrcp.f32 %v12724_v4  ;;  %vm3231_vm11 = vcmp.eq.f32.partialorder %v3230_v31, 8.507059e+37  ;;  %vm3256_vm13 = vweird.f32 %v12724_v4 }
 0x812   : > { %v3416_v2 = vpop.permute.xlu0 %3415  ;;  %v3224_v48 = vmul.f32 %v9642_v0, %v3223_v58  ;;  %v15772_v58 = vld [vmem:[#allocation29_spill] sm:$0xff] }
 0x813   : > { %v3240_v30 = vadd.f32 %v9640_v19, %v3239_v7  ;;  %v3459_v21 = vadd.f32 %v3416_v2, %v12538_v57 }
 0x814   : > { %v9646_v63 = vpop.eup %9645  ;;  %v3225_v42 = vadd.f32 %v9642_v0, %v3224_v48 }
 0x815   : > { %v3244_v28 = vsel %vm3243_vm6, %v9640_v19, %v3240_v30  ;;  %v12732_v54 = vadd.f32 1.0, %v9646_v63  ;;  %v12741_v19 = vadd.f32 %v15772_v58, %v15743_v16 }
 0x816   : > { %v3229_v63 = vsel %vm3228_vm10, %v9642_v0, %v3225_v42 }
 0x817   : > { %v9648_v23 = vpop.eup %9647  ;;  %v3005_v30 = vadd.f32 %v12672_v51, %v12741_v19  ;;  %vm3271_vm2 = vweird.f32 %v12732_v54 }
 0x818   : > { %v3252_v48 = vmul.f32 %v9648_v23, %v12724_v4  ;;  %vm3257_vm12 = vweird.f32 %v9648_v23 }
 0x819   : > { %vm3258_vm14 = vmor %vm3256_vm13, %vm3257_vm12 }
 0x81a   : > { %v3350_v61 = vpop.permute.xlu0 %3349 }
 0x81b   : > { %v2988_v59 = vpop.f32.mrf.mxu3 }
 0x81c   : > { %v12727_v45 = vadd.f32 %v12477_v62, %v2988_v59  ;;  %v3418_v62 = vpop.permute.xlu2 %3417  ;;  %v12734_v59 = vsel %vm3246_vm7, %v3248_v1, %v3244_v28 }
 0x81d   : > { %v3386_v24 = vmul.f32 %v3350_v61, %v12734_v59  ;;  %v3253_v61 = vsub.f32 1.0, %v3252_v48 }
 0x81e   : > { %3357 = vrot.lane.b32.xlu0 %v12727_v45, %s10235_s9 }
 0x822   : > { %v3414_v7 = vpop.permute.xlu1 %3413 }
 0x823   : > { %v3458_v18 = vadd.f32 %v3414_v7, %v12548_v33  ;;  %v3460_v33 = vadd.f32 %v3418_v62, %v12563_v60  ;;  %v9002_v60 = vmul.f32 -1.442695, %v3005_v30  ;;  %v3262_v30 = vand.u32 2147483648, %v12724_v4 }
 0x825   : > { %9649 = vtanh.f32 %v3458_v18  ;;  %v3233_v18 = vor.u32 1.1754944e-38, %v3232_v22  ;;  %v3254_v22 = vmul.f32 %v9648_v23, %v3253_v61 }
 0x826   : > { %9651 = vrcp.f32 %v12732_v54  ;;  %3429 = vrot.lane.b32.xlu0 %v3386_v24, %s10236_s17 }
 0x827   : > { %9653 = vtanh.f32 %v3460_v33  ;;  %v12752_v6 = vsel %vm3231_vm11, %v3233_v18, %v3229_v63  ;;  %v3260_v63 = vand.u32 2147483647, %v12724_v4  ;;  %v3263_v18 = vor.u32 1.1754944e-38, %v3262_v30 }
 0x828   : > { %9655 = vtanh.f32 %v3459_v21 }
 0x829   : > { %9657 = vpow2.f32 %v9002_v60  ;;  %vm3261_vm15 = vcmp.eq.f32.partialorder %v3260_v63, 8.507059e+37 }
 0x82a   : > { %v3348_v28 = vpop.permute.xlu1 %3347 }
 0x82b   : > { %v12754_v1 = vpop.eup %9649  ;;  %v3385_v24 = vmul.f32 %v3348_v28, %v12752_v6 }
 0x82c   : > { %v9652_v7 = vpop.eup %9651  ;;  %v3490_v57 = vsub.f32 %v12397_v37, %v12754_v1  ;;  %v3255_v37 = vadd.f32 %v9648_v23, %v3254_v22  ;;  %v3277_v22 = vand.u32 2147483648, %v12732_v54 }
 0x82d   : > { %3427 = vrot.lane.b32.xlu1 %v3385_v24, %s10236_s17  ;;  %v3267_v42 = vmul.f32 %v9652_v7, %v12732_v54  ;;  %v12762_v51 = vpop.eup %9653  ;;  %vm3272_vm1 = vweird.f32 %v9652_v7 }
 0x82e   : > { %3525 = vrot.lane.b32.xlu2 %v3490_v57, %s10237_s18  ;;  %v12764_v0 = vpop.eup %9655  ;;  %v3492_v58 = vsub.f32 %v12411_v12, %v12762_v51  ;;  %vm3273_vm3 = vmor %vm3271_vm2, %vm3272_vm1 }
 0x82f   : > { %v3268_v31 = vsub.f32 1.0, %v3267_v42  ;;  %v3491_v33 = vsub.f32 %v12404_v50, %v12764_v0  ;;  %v9658_v21 = vpop.eup %9657  ;;  %v3275_v42 = vand.u32 2147483647, %v12732_v54 }
 0x830   : > { %v3069_v48 = vadd.f32 1.0, %v9658_v21 }
 0x831   : > { %v3269_v12 = vmul.f32 %v9652_v7, %v3268_v31  ;;  %vm3276_vm4 = vcmp.eq.f32.partialorder %v3275_v42, 8.507059e+37 }
 0x832   : > { %v3420_v2 = vpop.permute.xlu1 %3419  ;;  %vm3286_vm6 = vweird.f32 %v3069_v48 }
 0x833   : > { %v3461_v62 = vadd.f32 %v3420_v2, %v12567_v52  ;;  %v3259_v52 = vsel %vm3258_vm14, %v9648_v23, %v3255_v37  ;;  %v3270_v57 = vadd.f32 %v9652_v7, %v3269_v12 }
 0x834   : > { %v12776_v50 = vsel %vm3261_vm15, %v3263_v18, %v3259_v52  ;;  %v3290_v52 = vand.u32 2147483647, %v3069_v48 }
 0x835   : > { %9659 = vtanh.f32 %v3461_v62  ;;  %3529 = vrot.lane.b32.xlu1 %v3492_v58, %s10237_s18  ;;  %v3274_v2 = vsel %vm3273_vm3, %v9652_v7, %v3270_v57  ;;  %v3278_v62 = vor.u32 1.1754944e-38, %v3277_v22  ;;  %v3292_v7 = vand.u32 2147483648, %v3069_v48 }
 0x836   : > { %3527 = vrot.lane.b32.xlu2 %v3491_v33, %s10237_s18  ;;  %9661 = vrcp.f32 %v3069_v48  ;;  %vm3291_vm8 = vcmp.eq.f32.partialorder %v3290_v52, 8.507059e+37 }
 0x837   : > { %v12790_v58 = vsel %vm3276_vm4, %v3278_v62, %v3274_v2  ;;  %v3293_v18 = vor.u32 1.1754944e-38, %v3292_v7 }
 0x838   : > { %v3520_v28 = vpop.permute.xlu2 %3519 }
 0x839   : > { %v3567_v4 = vmul.f32 %v3520_v28, %v12526_v44 }
 0x83a   : > { %v3352_v60 = vpop.permute.xlu0 %3351 }
 0x83b   : > { %v12778_v24 = vpop.eup %9659  ;;  %v3387_v61 = vmul.f32 %v3352_v60, %v12776_v50 }
 0x83c   : > { %v3493_v23 = vsub.f32 %v12394_v25, %v12778_v24  ;;  %v9662_v44 = vpop.eup %9661 }
 0x83d   : > { %3431 = vrot.lane.b32.xlu0 %v3387_v61, %s10236_s17  ;;  %v3282_v31 = vmul.f32 %v9662_v44, %v3069_v48  ;;  %vm3287_vm5 = vweird.f32 %v9662_v44  ;;  %v15773_v48 = vld [vmem:[#allocation33_spill] sm:$0xff] }
 0x83e   : > { %3531 = vrot.lane.b32.xlu1 %v3493_v23, %s10237_s18  ;;  %3599 = vrot.lane.b32.xlu2 %v3567_v4, %s10238_s19  ;;  %vm3288_vm7 = vmor %vm3286_vm6, %vm3287_vm5  ;;  %v12808_v22 = vadd.f32 %v15773_v48, %v15744_v40 }
 0x83f   : > { %v3283_v33 = vsub.f32 1.0, %v3282_v31 }
 0x840   : > { %v3006_v42 = vadd.f32 %v12727_v45, %v12808_v22 }
 0x841   : > { %v3284_v30 = vmul.f32 %v9662_v44, %v3283_v33 }
 0x842   : > { %v3354_v25 = vpop.permute.xlu0 %3353  ;;  %v9003_v2 = vmul.f32 -1.442695, %v3006_v42 }
 0x843   : > { %v3388_v37 = vmul.f32 %v3354_v25, %v12790_v58  ;;  %v3285_v63 = vadd.f32 %v9662_v44, %v3284_v30 }
 0x845   : > { %3433 = vrot.lane.b32.xlu0 %v3388_v37, %s10236_s17  ;;  %v3289_v12 = vsel %vm3288_vm7, %v9662_v44, %v3285_v63 }
 0x846   : > { %v12797_v60 = vsel %vm3291_vm8, %v3293_v18, %v3289_v12 }
 0x84f   : > { %v3422_v54 = vpop.permute.xlu1 %3421 }
 0x850   : > { %v3462_v21 = vadd.f32 %v3422_v54, %v12598_v11 }
 0x852   : > { %9663 = vtanh.f32 %v3462_v21 }
 0x853   : > { %9665 = vpow2.f32 %v9003_v2 }
 0x858   : > { %v12795_v28 = vpop.eup %9663  ;;  %v3356_v61 = vpop.permute.xlu0 %3355 }
 0x859   : > { %v3522_v57 = vpop.permute.xlu2 %3521  ;;  %v3389_v4 = vmul.f32 %v3356_v61, %v12797_v60  ;;  %v3494_v23 = vsub.f32 %v12414_v35, %v12795_v28  ;;  %v9666_v35 = vpop.eup %9665 }
 0x85a   : > { %v3568_v11 = vmul.f32 %v3522_v57, %v12552_v26  ;;  %v3070_v25 = vadd.f32 1.0, %v9666_v35 }
 0x85b   : > { %3435 = vrot.lane.b32.xlu0 %v3389_v4, %s10236_s17  ;;  %3533 = vrot.lane.b32.xlu1 %v3494_v23, %s10237_s18 }
 0x85c   : > { %3601 = vrot.lane.b32.xlu2 %v3568_v11, %s10238_s19  ;;  %vm3301_vm10 = vweird.f32 %v3070_v25 }
 0x868   : > { %v3524_v62 = vpop.permute.xlu2 %3523 }
 0x869   : > { %v3569_v26 = vmul.f32 %v3524_v62, %v12590_v43 }
 0x86b   : > { %3603 = vrot.lane.b32.xlu2 %v3569_v26, %s10238_s19 }
 0x86f   : > { %v3424_v44 = vpop.permute.xlu1 %3423 }
 0x870   : > { %v3463_v37 = vadd.f32 %v3424_v44, %v12644_v36 }
 0x872   : > { %9667 = vtanh.f32 %v3463_v37 }
 0x873   : > { %9669 = vrcp.f32 %v3070_v25 }
 0x878   : > { %v12815_v31 = vpop.eup %9667 }
 0x879   : > { %v3495_v33 = vsub.f32 %v12425_v10, %v12815_v31  ;;  %v9670_v45 = vpop.eup %9669  ;;  %v3307_v10 = vand.u32 2147483648, %v3070_v25 }
 0x87a   : > { %v3297_v30 = vmul.f32 %v9670_v45, %v3070_v25  ;;  %vm3302_vm9 = vweird.f32 %v9670_v45 }
 0x87b   : > { %3535 = vrot.lane.b32.xlu1 %v3495_v33, %s10237_s18  ;;  %vm3303_vm11 = vmor %vm3301_vm10, %vm3302_vm9  ;;  %v3308_v57 = vor.u32 1.1754944e-38, %v3307_v10 }
 0x87c   : > { %v3298_v21 = vsub.f32 1.0, %v3297_v30 }
 0x87e   : > { %v3299_v63 = vmul.f32 %v9670_v45, %v3298_v21 }
 0x87f   : > { %v3426_v54 = vpop.permute.xlu1 %3425 }
 0x880   : > { %v3464_v43 = vadd.f32 %v3426_v54, %v12658_v47  ;;  %v3300_v18 = vadd.f32 %v9670_v45, %v3299_v63  ;;  %v3305_v47 = vand.u32 2147483647, %v3070_v25 }
 0x882   : > { %9671 = vtanh.f32 %v3464_v43  ;;  %v3304_v61 = vsel %vm3303_vm11, %v9670_v45, %v3300_v18  ;;  %vm3306_vm12 = vcmp.eq.f32.partialorder %v3305_v47, 8.507059e+37 }
 0x883   : > { %v12828_v11 = vsel %vm3306_vm12, %v3308_v57, %v3304_v61 }
 0x888   : > { %v12821_v7 = vpop.eup %9671  ;;  %v3526_v36 = vpop.permute.xlu2 %3525 }
 0x889   : > { %v3570_v52 = vmul.f32 %v3526_v36, %v12610_v3  ;;  %v3496_v12 = vsub.f32 %v12437_v46, %v12821_v7 }
 0x88b   : > { %3537 = vrot.lane.b32.xlu1 %v3496_v12, %s10237_s18  ;;  %3605 = vrot.lane.b32.xlu2 %v3570_v52, %s10238_s19 }
 0x890   : > { %v3528_v4 = vpop.permute.xlu2 %3527  ;;  %v3358_v3 = vpop.permute.xlu0 %3357 }
 0x891   : > { %v3571_v23 = vmul.f32 %v3528_v4, %v12584_v20  ;;  %v3390_v46 = vmul.f32 %v3358_v3, %v12828_v11 }
 0x893   : > { %3607 = vrot.lane.b32.xlu2 %v3571_v23, %s10238_s19  ;;  %3437 = vrot.lane.b32.xlu0 %v3390_v46, %s10236_s17 }
 0x898   : > { %v3600_v48 = vpop.permute.xlu2 %3599  ;;  %v3430_v26 = vpop.permute.xlu0 %3429 }
 0x899   : > { %v12835_v42 = vadd.f32 %v12665_v53, %v3600_v48  ;;  %v3466_v20 = vadd.f32 %v3430_v26, %v12678_v8 }
 0x89b   : > { %3809 = vrot.lane.b32.xlu2 %v12835_v42, %s10235_s9 }
 0x89f   : > { %v3428_v2 = vpop.permute.xlu1 %3427 }
 0x8a0   : > { %v3465_v62 = vadd.f32 %v3428_v2, %v12685_v34 }
 0x8a2   : > { %9673 = vtanh.f32 %v3465_v62 }
 0x8a3   : > { %9675 = vtanh.f32 %v3466_v20 }
 0x8a7   : > { %v3530_v35 = vpop.permute.xlu1 %3529 }
 0x8a8   : > { %v12841_v44 = vpop.eup %9673  ;;  %v3572_v25 = vmul.f32 %v3530_v35, %v12633_v49 }
 0x8a9   : > { %v3497_v53 = vsub.f32 %v12444_v15, %v12841_v44  ;;  %v12848_v37 = vpop.eup %9675 }
 0x8aa   : > { %3609 = vrot.lane.b32.xlu1 %v3572_v25, %s10238_s19  ;;  %v3498_v30 = vsub.f32 %v12460_v17, %v12848_v37 }
 0x8ab   : > { %3539 = vrot.lane.b32.xlu0 %v3497_v53, %s10237_s18 }
 0x8af   : > { %v3432_v34 = vpop.permute.xlu0 %3431 }
 0x8b0   : > { %v3467_v33 = vadd.f32 %v3432_v34, %v12701_v56  ;;  %v3532_v45 = vpop.permute.xlu1 %3531 }
 0x8b1   : > { %v3573_v8 = vmul.f32 %v3532_v45, %v12631_v55 }
 0x8b2   : > { %9677 = vtanh.f32 %v3467_v33 }
 0x8b3   : > { %3611 = vrot.lane.b32.xlu1 %v3573_v8, %s10238_s19  ;;  %3541 = vrot.lane.b32.xlu0 %v3498_v30, %s10237_s18 }
 0x8b6   : > { %v3602_v15 = vpop.permute.xlu2 %3601 }
 0x8b7   : > { %v12857_v49 = vadd.f32 %v12691_v5, %v3602_v15  ;;  %v3434_v54 = vpop.permute.xlu0 %3433 }
 0x8b8   : > { %v12859_v43 = vpop.eup %9677  ;;  %v3468_v56 = vadd.f32 %v3434_v54, %v12719_v39 }
 0x8b9   : > { %3811 = vrot.lane.b32.xlu2 %v12857_v49, %s10235_s9  ;;  %v3499_v17 = vsub.f32 %v12466_v9, %v12859_v43 }
 0x8ba   : > { %9679 = vtanh.f32 %v3468_v56 }
 0x8bb   : > { %3543 = vrot.lane.b32.xlu0 %v3499_v17, %s10237_s18 }
 0x8c0   : > { %v12867_v55 = vpop.eup %9679 }
 0x8c1   : > { %v3500_v5 = vsub.f32 %v12454_v27, %v12867_v55 }
 0x8c3   : > { %3545 = vrot.lane.b32.xlu0 %v3500_v5, %s10237_s18 }
 0x8c5   : > { %v3604_v21 = vpop.permute.xlu2 %3603 }
 0x8c6   : > { %v12873_v63 = vadd.f32 %v12709_v38, %v3604_v21 }
 0x8c8   : > { %3813 = vrot.lane.b32.xlu2 %v12873_v63, %s10235_s9 }
 0x8cd   : > { %v3436_v39 = vpop.permute.xlu0 %3435  ;;  %v3534_v36 = vpop.permute.xlu1 %3533 }
 0x8ce   : > { %v3469_v9 = vadd.f32 %v3436_v39, %v12741_v19  ;;  %v3574_v52 = vmul.f32 %v3534_v36, %v12662_v29 }
 0x8d0   : > { %9681 = vtanh.f32 %v3469_v9  ;;  %3613 = vrot.lane.b32.xlu1 %v3574_v52, %s10238_s19  ;;  %v12978_v9 = vld [vmem:[%s15597_s1 + $0x21] ss:$0 sm:$0xff] }
 0x8d6   : > { %v12880_v12 = vpop.eup %9681 }
 0x8d7   : > { %v3501_v27 = vsub.f32 %v12482_v41, %v12880_v12 }
 0x8d9   : > { %3547 = vrot.lane.b32.xlu0 %v3501_v27, %s10237_s18 }
 0x8e5   : > { %v3606_v38 = vpop.permute.xlu2 %3605 }
 0x8e6   : > { %v12886_v18 = vadd.f32 %v12754_v1, %v3606_v38  ;;  %v10203_v1 = vld [vmem:[%s15597_s1 + $0x18] sm:$0xff] }
 0x8e8   : > { %3815 = vrot.lane.b32.xlu2 %v12886_v18, %s10235_s9 }
 0x8ed   : > { %v3608_v19 = vpop.permute.xlu2 %3607  ;;  %v3536_v10 = vpop.permute.xlu1 %3535 }
 0x8ee   : > { %v12891_v29 = vadd.f32 %v12764_v0, %v3608_v19  ;;  %v3575_v47 = vmul.f32 %v3536_v10, %v12689_v14  ;;  %v10204_v0 = vld [vmem:[%s15597_s1 + $0x10] sm:$0xff] }
 0x8f0   : > { %3817 = vrot.lane.b32.xlu2 %v12891_v29, %s10235_s9  ;;  %3615 = vrot.lane.b32.xlu1 %v3575_v47, %s10238_s19 }
 0x8f5   : > { %v3810_v41 = vpop.permute.xlu2 %3809 }
 0x8f6   : > { %9036 = vmatmul.msk.f32.vlgmr.msra.gmra.mxu0 %vm1028_vm0, %v3810_v41 }
 0x8f7   : > { %7675 = vmatpush.msra.mxu0 %v10203_v1 }
 0x8f9   : > { %7676 = vmatpush.msra.mxu0 %v10204_v0 }
 0x8fd   : > { %v3538_v61 = vpop.permute.xlu1 %3537 }
 0x8fe   : > { %v3576_v14 = vmul.f32 %v3538_v61, %v12707_v32 }
 0x900   : > { %3617 = vrot.lane.b32.xlu1 %v3576_v14, %s10238_s19 }
 0x905   : > { %v3438_v57 = vpop.permute.xlu0 %3437 }
 0x906   : > { %v3470_v4 = vadd.f32 %v3438_v57, %v12808_v22 }
 0x908   : > { %9683 = vtanh.f32 %v3470_v4  ;;  %v15774_v4 = vld [vmem:[#allocation5_spill] sm:$0xff] }
 0x90e   : > { %v12907_v3 = vpop.eup %9683 }
 0x90f   : > { %v3502_v23 = vsub.f32 %v12490_v13, %v12907_v3 }
 0x911   : > { %3549 = vrot.lane.b32.xlu0 %v3502_v23, %s10237_s18  ;;  %v15775_v23 = vld [vmem:[#allocation24_spill] sm:$0xff] }
 0x913   : > { %v3812_v46 = vpop.permute.xlu2 %3811 }
 0x914   : > { %9037 = vmatmul.msk.f32.gmra.mxu0 %vm1028_vm0, %v3812_v46  ;;  %v13005_v46 = vadd.f32 %v15775_v23, %v15774_v4 }
 0x91c   : > { %v3610_v48 = vpop.permute.xlu1 %3609 }
 0x91d   : > { %v12914_v2 = vadd.f32 %v12762_v51, %v3610_v48  ;;  %v3540_v32 = vpop.permute.xlu0 %3539 }
 0x91e   : > { %v3577_v62 = vmul.f32 %v3540_v32, %v12752_v6 }
 0x91f   : > { %3819 = vrot.lane.b32.xlu2 %v12914_v2, %s10235_s9 }
 0x920   : > { %3619 = vrot.lane.b32.xlu1 %v3577_v62, %s10238_s19 }
 0x922   : > { %v3814_v22 = vpop.permute.xlu2 %3813 }
 0x923   : > { %9038 = vmatmul.msk.f32.gmra.mxu0 %vm1028_vm0, %v3814_v22 }
 0x925   : > { %v3612_v13 = vpop.permute.xlu1 %3611  ;;  %v3542_v26 = vpop.permute.xlu0 %3541 }
 0x926   : > { %v12922_v20 = vadd.f32 %v12778_v24, %v3612_v13  ;;  %v3578_v35 = vmul.f32 %v3542_v26, %v12734_v59 }
 0x928   : > { %3821 = vrot.lane.b32.xlu1 %v12922_v20, %s10235_s9  ;;  %3621 = vrot.lane.b32.xlu0 %v3578_v35, %s10238_s19  ;;  %v15776_v35 = vld [vmem:[#allocation7_spill] sm:$0xff] }
 0x92d   : > { %v3544_v6 = vpop.permute.xlu0 %3543 }
 0x92e   : > { %v3579_v51 = vmul.f32 %v3544_v6, %v12776_v50  ;;  %v15777_v6 = vld [vmem:[#allocation28_spill] sm:$0xff] }
 0x930   : > { %3623 = vrot.lane.b32.xlu2 %v3579_v51, %s10238_s19  ;;  %v13016_v51 = vadd.f32 %v15777_v6, %v15776_v35 }
 0x935   : > { %v3546_v25 = vpop.permute.xlu0 %3545 }
 0x936   : > { %v3580_v53 = vmul.f32 %v3546_v25, %v12790_v58  ;;  %v15778_v25 = vld [vmem:[#allocation10_spill] sm:$0xff] }
 0x938   : > { %3625 = vrot.lane.b32.xlu1 %v3580_v53, %s10238_s19  ;;  %v15779_v53 = vld [vmem:[#allocation36_spill] sm:$0xff] }
 0x942   : > { %v3816_v34 = vpop.permute.xlu2 %3815  ;;  %v3614_v24 = vpop.permute.xlu1 %3613 }
 0x943   : > { %v12933_v33 = vadd.f32 %v12795_v28, %v3614_v24  ;;  %9039 = vmatmul.msk.f32.gmra.mxu0 %vm1028_vm0, %v3816_v34  ;;  %v13020_v34 = vadd.f32 %v15779_v53, %v15778_v25 }
 0x945   : > { %3823 = vrot.lane.b32.xlu0 %v12933_v33, %s10235_s9 }
 0x94a   : > { %v3818_v59 = vpop.permute.xlu2 %3817 }
 0x94b   : > { %9040 = vmatmul.msk.f32.gmra.mxu0 %vm1028_vm0, %v3818_v59  ;;  %v3548_v50 = vpop.permute.xlu0 %3547 }
 0x94c   : > { %v3581_v45 = vmul.f32 %v3548_v50, %v12797_v60 }
 0x94e   : > { %3627 = vrot.lane.b32.xlu0 %v3581_v45, %s10238_s19 }
 0x962   : > { %v3616_v58 = vpop.permute.xlu1 %3615 }
 0x963   : > { %v12942_v8 = vadd.f32 %v12815_v31, %v3616_v58 }
 0x965   : > { %3825 = vrot.lane.b32.xlu2 %v12942_v8, %s10235_s9 }
 0x972   : > { %v3618_v28 = vpop.permute.xlu1 %3617 }
 0x973   : > { %v12947_v30 = vadd.f32 %v12821_v7, %v3618_v28 }
 0x975   : > { %3827 = vrot.lane.b32.xlu1 %v12947_v30, %s10235_s9 }
 0x979   : > { %v3820_v15 = vpop.permute.xlu2 %3819 }
 0x97a   : > { %9041 = vmatmul.msk.f32.gmra.mxu0 %vm1028_vm0, %v3820_v15  ;;  %v15780_v15 = vld [vmem:[#allocation8_spill] sm:$0xff] }
 0x983   : > { %v3550_v60 = vpop.permute.xlu0 %3549 }
 0x984   : > { %v3582_v54 = vmul.f32 %v3550_v60, %v12828_v11  ;;  %v15781_v60 = vld [vmem:[#allocation32_spill] sm:$0xff] }
 0x986   : > { %3629 = vrot.lane.b32.xlu2 %v3582_v54, %s10238_s19  ;;  %v13027_v54 = vadd.f32 %v15781_v60, %v15780_v15 }
 0x98a   : > { %v3624_v31 = vpop.permute.xlu2 %3623 }
 0x98b   : > { %v12955_v56 = vadd.f32 %v12859_v43, %v3624_v31  ;;  %v3890_v43 = vpop.f32.mrf.mxu0 }
 0x98e   : > { %3833 = vrot.lane.b32.xlu2 %v12955_v56, %s10235_s9 }
 0x992   : > { %v3620_v7 = vpop.permute.xlu1 %3619 }
 0x993   : > { %v12960_v17 = vadd.f32 %v12841_v44, %v3620_v7  ;;  %v3893_v44 = vpop.f32.mrf.mxu0 }
 0x994   : > { %v3894_v41 = vadd.f32 %v12978_v9, %v3893_v44 }
 0x995   : > { %3829 = vrot.lane.b32.xlu0 %v12960_v17, %s10235_s9 }
 0x996   : > { %v3939_v24 = vadd.f32 %v3894_v41, %v13016_v51 }
 0x998   : > { %v9053_v45 = vmul.f32 -1.442695, %v3939_v24 }
 0x99a   : > { %v3822_v5 = vpop.permute.xlu1 %3821  ;;  %v3622_v21 = vpop.permute.xlu0 %3621 }
 0x99b   : > { %v12965_v11 = vadd.f32 %v12848_v37, %v3622_v21  ;;  %9042 = vmatmul.msk.f32.gmra.mxu0 %vm1028_vm0, %v3822_v5  ;;  %v3891_v37 = vadd.f32 %v12978_v9, %v3890_v43 }
 0x99d   : > { %3831 = vrot.lane.b32.xlu1 %v12965_v11, %s10235_s9  ;;  %v3938_v48 = vadd.f32 %v3891_v37, %v13005_v46 }
 0x99f   : > { %v9052_v62 = vmul.f32 -1.442695, %v3938_v48 }
 0x9a0   : > { %v3896_v27 = vpop.f32.mrf.mxu0 }
 0x9a1   : > { %v3897_v57 = vadd.f32 %v12978_v9, %v3896_v27  ;;  %9685 = vpow2.f32 %v9052_v62  ;;  %v15783_v27 = vld [vmem:[#allocation40_spill] sm:$0xff] }
 0x9a3   : > { %v3940_v31 = vadd.f32 %v3897_v57, %v13027_v54 }
 0x9a5   : > { %v9054_v21 = vmul.f32 -1.442695, %v3940_v31 }
 0x9a7   : > { %v9686_v22 = vpop.eup %9685 }
 0x9a8   : > { %v4002_v13 = vadd.f32 1.0, %v9686_v22 }
 0x9aa   : > { %v3626_v39 = vpop.permute.xlu1 %3625  ;;  %9687 = vrcp.f32 %v4002_v13  ;;  %v4029_v23 = vand.u32 2147483648, %v4002_v13  ;;  %vm4023_vm14 = vweird.f32 %v4002_v13 }
 0x9ab   : > { %v12971_v36 = vadd.f32 %v12867_v55, %v3626_v39  ;;  %9689 = vpow2.f32 %v9053_v45 }
 0x9ac   : > { %v4030_v22 = vor.u32 1.1754944e-38, %v4029_v23 }
 0x9ad   : > { %3835 = vrot.lane.b32.xlu0 %v12971_v36, %s10235_s9 }
 0x9b0   : > { %v9688_v58 = vpop.eup %9687 }
 0x9b1   : > { %v4019_v7 = vmul.f32 %v9688_v58, %v4002_v13  ;;  %vm4024_vm13 = vweird.f32 %v9688_v58 }
 0x9b2   : > { %vm4025_vm15 = vmor %vm4023_vm14, %vm4024_vm13 }
 0x9b3   : > { %v4020_v39 = vsub.f32 1.0, %v4019_v7 }
 0x9b5   : > { %4274 = vrot.lane.b32.xlu0 %v3891_v37, %s10235_s9  ;;  %v9690_v37 = vpop.eup %9689 }
 0x9b7   : > { %v3824_v52 = vpop.permute.xlu0 %3823 }
 0x9b8   : > { %9043 = vmatmul.msk.f32.gmra.mxu0 %vm1028_vm0, %v3824_v52  ;;  %v15782_v52 = vld [vmem:[#allocation11_spill] sm:$0xff] }
 0x9bf   : > { %v3826_v38 = vpop.permute.xlu2 %3825 }
 0x9c0   : > { %v3899_v55 = vpop.f32.mrf.mxu0  ;;  %v3628_v19 = vpop.permute.xlu0 %3627  ;;  %9044 = vmatmul.msk.f32.gmra.mxu0 %vm1028_vm0, %v3826_v38  ;;  %v13036_v38 = vadd.f32 %v15783_v27, %v15782_v52 }
 0x9c1   : > { %v3900_v10 = vadd.f32 %v12978_v9, %v3899_v55  ;;  %v12986_v47 = vadd.f32 %v12880_v12, %v3628_v19 }
 0x9c3   : > { %4280 = vrot.lane.b32.xlu0 %v3900_v10, %s10235_s9  ;;  %3837 = vrot.lane.b32.xlu1 %v12986_v47, %s10235_s9  ;;  %v3941_v59 = vadd.f32 %v3900_v10, %v13020_v34  ;;  %v4021_v10 = vmul.f32 %v9688_v58, %v4020_v39 }
 0x9c5   : > { %v9055_v28 = vmul.f32 -1.442695, %v3941_v59 }
 0x9c7   : > { %9691 = vpow2.f32 %v9055_v28 }
 0x9c8   : > { %v3902_v1 = vpop.f32.mrf.mxu0  ;;  %9693 = vpow2.f32 %v9054_v21 }
 0x9c9   : > { %v3903_v0 = vadd.f32 %v12978_v9, %v3902_v1 }
 0x9cb   : > { %4276 = vrot.lane.b32.xlu1 %v3894_v41, %s10235_s9  ;;  %v3942_v19 = vadd.f32 %v3903_v0, %v13036_v38  ;;  %v13041_v41 = vadd.f32 1.0, %v9690_v37 }
 0x9cd   : > { %v9692_v55 = vpop.eup %9691  ;;  %9695 = vrcp.f32 %v13041_v41  ;;  %vm4038_vm4 = vweird.f32 %v13041_v41 }
 0x9ce   : > { %v13043_v1 = vadd.f32 1.0, %v9692_v55  ;;  %v9694_v48 = vpop.eup %9693 }
 0x9cf   : > { %v13048_v62 = vadd.f32 1.0, %v9694_v48  ;;  %v15784_v48 = vld [vmem:[#allocation13_spill] sm:$0xff] }
 0x9d0   : > { %9697 = vrcp.f32 %v13043_v1  ;;  %vm4068_vm5 = vweird.f32 %v13043_v1  ;;  %v4072_v23 = vand.u32 2147483647, %v13043_v1 }
 0x9d1   : > { %vm4053_vm11 = vweird.f32 %v13048_v62 }
 0x9d2   : > { %vm4073_vm9 = vcmp.eq.f32.partialorder %v4072_v23, 8.507059e+37 }
 0x9d3   : > { %4282 = vrot.lane.b32.xlu1 %v3903_v0, %s10235_s9 }
 0x9e0   : > { %v3630_v61 = vpop.permute.xlu2 %3629 }
 0x9e1   : > { %v12996_v14 = vadd.f32 %v12907_v3, %v3630_v61 }
 0x9e3   : > { %3839 = vrot.lane.b32.xlu2 %v12996_v14, %s10235_s9 }
 0x9e7   : > { %v3828_v12 = vpop.permute.xlu1 %3827 }
 0x9e8   : > { %9045 = vmatmul.msk.f32.gmra.mxu0 %vm1028_vm0, %v3828_v12  ;;  %v3834_v5 = vpop.permute.xlu2 %3833  ;;  %v9056_v12 = vmul.f32 -1.442695, %v3942_v19 }
 0x9ea   : > { %9699 = vpow2.f32 %v9056_v12  ;;  %v4074_v12 = vand.u32 2147483648, %v13043_v1 }
 0x9eb   : > { %4278 = vrot.lane.b32.xlu2 %v3897_v57, %s10235_s9  ;;  %v4022_v57 = vadd.f32 %v9688_v58, %v4021_v10  ;;  %9701 = vrcp.f32 %v13048_v62 }
 0x9ed   : > { %v4026_v0 = vsel %vm4025_vm15, %v9688_v58, %v4022_v57  ;;  %v4042_v57 = vand.u32 2147483647, %v13041_v41 }
 0x9ef   : > { %vm4043_vm8 = vcmp.eq.f32.partialorder %v4042_v57, 8.507059e+37 }
 0x9f7   : > { %v3905_v32 = vpop.f32.mrf.mxu0 }
 0x9f8   : > { %v13009_v3 = vadd.f32 %v12978_v9, %v3905_v32  ;;  %v4027_v32 = vand.u32 2147483647, %v4002_v13 }
 0x9fa   : > { %4284 = vrot.lane.b32.xlu2 %v13009_v3, %s10235_s9  ;;  %vm4028_vm1 = vcmp.eq.f32.partialorder %v4027_v32, 8.507059e+37  ;;  %v15785_v32 = vld [vmem:[#allocation43_spill] sm:$0xff] }
 0x9fb   : > { %v13050_v6 = vsel %vm4028_vm1, %v4030_v22, %v4026_v0  ;;  %v13077_v0 = vadd.f32 %v15785_v32, %v15784_v48 }
 0xa07   : > { %v3830_v26 = vpop.permute.xlu0 %3829 }
 0xa08   : > { %9046 = vmatmul.msk.f32.gmra.mxu0 %vm1028_vm0, %v3830_v26  ;;  %v9696_v26 = vpop.eup %9695 }
 0xa09   : > { %v9698_v24 = vpop.eup %9697  ;;  %v4034_v13 = vmul.f32 %v9696_v26, %v13041_v41  ;;  %vm4039_vm2 = vweird.f32 %v9696_v26 }
 0xa0a   : > { %v4064_v45 = vmul.f32 %v9698_v24, %v13043_v1  ;;  %vm4069_vm3 = vweird.f32 %v9698_v24  ;;  %vm4040_vm6 = vmor %vm4038_vm4, %vm4039_vm2 }
 0xa0b   : > { %v4035_v28 = vsub.f32 1.0, %v4034_v13  ;;  %vm13079_vm7 = vmor %vm4068_vm5, %vm4069_vm3  ;;  %v3943_v13 = vadd.f32 %v13009_v3, %v13077_v0  ;;  %v4059_v3 = vand.u32 2147483648, %v13048_v62 }
 0xa0c   : > { %v4065_v31 = vsub.f32 1.0, %v4064_v45  ;;  %v4075_v45 = vor.u32 1.1754944e-38, %v4074_v12 }
 0xa0d   : > { %v4036_v7 = vmul.f32 %v9696_v26, %v4035_v28  ;;  %v4060_v57 = vor.u32 1.1754944e-38, %v4059_v3 }
 0xa0e   : > { %v4066_v21 = vmul.f32 %v9698_v24, %v4065_v31 }
 0xa0f   : > { %v3832_v50 = vpop.permute.xlu1 %3831  ;;  %v4037_v37 = vadd.f32 %v9696_v26, %v4036_v7 }
 0xa10   : > { %9047 = vmatmul.msk.f32.gmra.mxu0 %vm1028_vm0, %v3832_v50  ;;  %v9700_v50 = vpop.eup %9699  ;;  %v4067_v19 = vadd.f32 %v9698_v24, %v4066_v21 }
 0xa11   : > { %v13057_v58 = vadd.f32 1.0, %v9700_v50  ;;  %v9702_v60 = vpop.eup %9701 }
 0xa12   : > { %v4071_v1 = vsel %vm13079_vm7, %v9698_v24, %v4067_v19  ;;  %vm4054_vm10 = vweird.f32 %v9702_v60 }
 0xa13   : > { %9703 = vrcp.f32 %v13057_v58  ;;  %vm4055_vm12 = vmor %vm4053_vm11, %vm4054_vm10  ;;  %vm4083_vm15 = vweird.f32 %v13057_v58 }
 0xa18   : > { %v3908_v43 = vpop.f32.mrf.mxu0  ;;  %9048 = vmatmul.msk.f32.gmra.mxu0 %vm1028_vm0, %v3834_v5  ;;  %v4049_v5 = vmul.f32 %v9702_v60, %v13048_v62 }
 0xa19   : > { %v13032_v44 = vadd.f32 %v12978_v9, %v3908_v43  ;;  %v13062_v55 = vpop.eup %9703 }
 0xa1a   : > { %v4050_v27 = vsub.f32 1.0, %v4049_v5  ;;  %vm4084_vm14 = vweird.f32 %v13062_v55 }
 0xa1b   : > { %4286 = vrot.lane.b32.xlu1 %v13032_v44, %s10235_s9  ;;  %vm4085_vm1 = vmor %vm4083_vm15, %vm4084_vm14 }
 0xa1f   : > { %v3836_v61 = vpop.permute.xlu0 %3835 }
 0xa20   : > { %9049 = vmatmul.msk.f32.gmra.mxu0 %vm1028_vm0, %v3836_v61  ;;  %v4044_v61 = vand.u32 2147483648, %v13041_v41  ;;  %v4079_v41 = vmul.f32 %v13062_v55, %v13057_v58 }
 0xa22   : > { %v4045_v50 = vor.u32 1.1754944e-38, %v4044_v61 }
 0xa27   : > { %v4275_v53 = vpop.permute.xlu0 %4274 }
 0xa28   : > { %v4322_v59 = vmul.f32 %v4275_v53, %v13050_v6  ;;  %v4041_v53 = vsel %vm4040_vm6, %v9696_v26, %v4037_v37  ;;  %v13091_v26 = vsel %vm4073_vm9, %v4075_v45, %v4071_v1  ;;  %v9057_v37 = vmul.f32 -1.442695, %v3943_v13 }
 0xa29   : > { %v13089_v7 = vsel %vm4043_vm8, %v4045_v50, %v4041_v53 }
 0xa2a   : > { %4354 = vrot.lane.b32.xlu0 %v4322_v59, %s10236_s17  ;;  %v4051_v59 = vmul.f32 %v9702_v60, %v4050_v27  ;;  %v4057_v27 = vand.u32 2147483647, %v13048_v62  ;;  %9705 = vpow2.f32 %v9057_v37  ;;  %v4089_v62 = vand.u32 2147483648, %v13057_v58 }
 0xa2c   : > { %v4052_v24 = vadd.f32 %v9702_v60, %v4051_v59  ;;  %vm4058_vm13 = vcmp.eq.f32.partialorder %v4057_v27, 8.507059e+37  ;;  %v4090_v50 = vor.u32 1.1754944e-38, %v4089_v62 }
 0xa2e   : > { %v4056_v19 = vsel %vm4055_vm12, %v9702_v60, %v4052_v24  ;;  %v4087_v60 = vand.u32 2147483647, %v13057_v58 }
 0xa2f   : > { %v13102_v23 = vsel %vm4058_vm13, %v4060_v57, %v4056_v19 }
 0xa30   : > { %vm4088_vm2 = vcmp.eq.f32.partialorder %v4087_v60, 8.507059e+37 }
 0xa35   : > { %v3838_v43 = vpop.permute.xlu1 %3837  ;;  %v3911_v39 = vpop.f32.mrf.mxu0 }
 0xa36   : > { %9050 = vmatmul.msk.f32.gmra.mxu0 %vm1028_vm0, %v3838_v43  ;;  %v13065_v10 = vadd.f32 %v12978_v9, %v3911_v39  ;;  %v4281_v28 = vpop.permute.xlu0 %4280  ;;  %v4080_v43 = vsub.f32 1.0, %v4079_v41  ;;  %v9706_v41 = vpop.eup %9705 }
 0xa37   : > { %v4325_v39 = vmul.f32 %v4281_v28, %v13091_v26  ;;  %v4007_v45 = vadd.f32 1.0, %v9706_v41 }
 0xa38   : > { %4288 = vrot.lane.b32.xlu0 %v13065_v10, %s10235_s9  ;;  %v4081_v61 = vmul.f32 %v13062_v55, %v4080_v43 }
 0xa39   : > { %9707 = vrcp.f32 %v4007_v45  ;;  %vm4098_vm4 = vweird.f32 %v4007_v45  ;;  %v4102_v57 = vand.u32 2147483647, %v4007_v45 }
 0xa3a   : > { %v4082_v59 = vadd.f32 %v13062_v55, %v4081_v61 }
 0xa3b   : > { %vm4103_vm6 = vcmp.eq.f32.partialorder %v4102_v57, 8.507059e+37 }
 0xa3c   : > { %v4086_v1 = vsel %vm4085_vm1, %v13062_v55, %v4082_v59 }
 0xa3d   : > { %v3840_v31 = vpop.permute.xlu2 %3839  ;;  %v4277_v5 = vpop.permute.xlu1 %4276  ;;  %v13114_v28 = vsel %vm4088_vm2, %v4090_v50, %v4086_v1  ;;  %v15790_v50 = vld [vmem:[#allocation27_spill] sm:$0xff] }
 0xa3e   : > { %v4323_v21 = vmul.f32 %v4277_v5, %v13089_v7  ;;  %9051 = vmatmul.msk.f32.gmra.mxu0 %vm1028_vm0, %v3840_v31  ;;  %v3914_v12 = vpop.f32.mrf.mxu0  ;;  %v15788_v5 = vld [vmem:[#allocation16_spill] sm:$0xff] }
 0xa3f   : > { %v3915_v22 = vadd.f32 %v12978_v9, %v3914_v12  ;;  %v9708_v58 = vpop.eup %9707  ;;  %v4104_v12 = vand.u32 2147483648, %v4007_v45 }
 0xa40   : > { %4356 = vrot.lane.b32.xlu2 %v4323_v21, %s10236_s17  ;;  %4360 = vrot.lane.b32.xlu0 %v4325_v39, %s10236_s17  ;;  %v15789_v21 = vld [vmem:[#allocation45_spill] sm:$0xff]  ;;  %v4094_v43 = vmul.f32 %v9708_v58, %v4007_v45  ;;  %vm4099_vm3 = vweird.f32 %v9708_v58 }
 0xa41   : > { %v13120_v24 = vadd.f32 %v15789_v21, %v15788_v5  ;;  %vm4100_vm5 = vmor %vm4098_vm4, %vm4099_vm3 }
 0xa42   : > { %v4095_v39 = vsub.f32 1.0, %v4094_v43 }
 0xa43   : > { %v3944_v55 = vadd.f32 %v13032_v44, %v13120_v24  ;;  %v4105_v44 = vor.u32 1.1754944e-38, %v4104_v12 }
 0xa44   : > { %v4096_v37 = vmul.f32 %v9708_v58, %v4095_v39  ;;  %v15793_v39 = vld [vmem:[#allocation49_spill] sm:$0xff] }
 0xa45   : > { %v4279_v32 = vpop.permute.xlu2 %4278  ;;  %v4283_v13 = vpop.permute.xlu1 %4282  ;;  %v9058_v3 = vmul.f32 -1.442695, %v3944_v55  ;;  %v15792_v55 = vld [vmem:[#allocation30_spill] sm:$0xff] }
 0xa46   : > { %v4324_v53 = vmul.f32 %v4279_v32, %v13102_v23  ;;  %v4326_v31 = vmul.f32 %v4283_v13, %v13114_v28  ;;  %v4097_v19 = vadd.f32 %v9708_v58, %v4096_v37  ;;  %v15791_v13 = vld [vmem:[#allocation47_spill] sm:$0xff] }
 0xa47   : > { %9709 = vpow2.f32 %v9058_v3  ;;  %v13135_v45 = vadd.f32 %v15791_v13, %v15790_v50  ;;  %v13141_v3 = vadd.f32 %v15793_v39, %v15792_v55  ;;  %v15795_v55 = vld [vmem:[#allocation51_spill] sm:$0xff] }
 0xa48   : > { %4358 = vrot.lane.b32.xlu1 %v4324_v53, %s10236_s17  ;;  %4290 = vrot.lane.b32.xlu2 %v3915_v22, %s10235_s9  ;;  %v4101_v53 = vsel %vm4100_vm5, %v9708_v58, %v4097_v19 }
 0xa49   : > { %v13129_v60 = vsel %vm4103_vm6, %v4105_v44, %v4101_v53  ;;  %v3946_v37 = vadd.f32 %v3915_v22, %v13141_v3 }
 0xa4b   : > { %v9060_v12 = vmul.f32 -1.442695, %v3946_v37 }
 0xa4d   : > { %v9710_v32 = vpop.eup %9709 }
 0xa4e   : > { %v4008_v62 = vadd.f32 1.0, %v9710_v32 }
 0xa50   : > { %4362 = vrot.lane.b32.xlu2 %v4326_v31, %s10236_s17  ;;  %9711 = vrcp.f32 %v4008_v62  ;;  %v3945_v31 = vadd.f32 %v13065_v10, %v13135_v45  ;;  %v4119_v53 = vand.u32 2147483648, %v4008_v62  ;;  %vm4113_vm8 = vweird.f32 %v4008_v62 }
 0xa51   : > { %v4117_v44 = vand.u32 2147483647, %v4008_v62 }
 0xa52   : > { %v9059_v21 = vmul.f32 -1.442695, %v3945_v31  ;;  %v4120_v22 = vor.u32 1.1754944e-38, %v4119_v53 }
 0xa53   : > { %vm4118_vm10 = vcmp.eq.f32.partialorder %v4117_v44, 8.507059e+37 }
 0xa54   : > { %v4285_v59 = vpop.permute.xlu2 %4284  ;;  %9713 = vpow2.f32 %v9059_v21 }
 0xa55   : > { %v4327_v41 = vmul.f32 %v4285_v59, %v13129_v60  ;;  %9715 = vpow2.f32 %v9060_v12 }
 0xa56   : > { %v9712_v1 = vpop.eup %9711 }
 0xa57   : > { %v4109_v58 = vmul.f32 %v9712_v1, %v4008_v62  ;;  %vm4114_vm7 = vweird.f32 %v9712_v1 }
 0xa58   : > { %vm4115_vm9 = vmor %vm4113_vm8, %vm4114_vm7 }
 0xa59   : > { %v4110_v43 = vsub.f32 1.0, %v4109_v58 }
 0xa5a   : > { %v9714_v10 = vpop.eup %9713 }
 0xa5b   : > { %v9716_v39 = vpop.eup %9715 }
 0xa5c   : > { %v4010_v62 = vadd.f32 1.0, %v9716_v39 }
 0xa5e   : > { %v4149_v5 = vand.u32 2147483648, %v4010_v62  ;;  %vm4143_vm1 = vweird.f32 %v4010_v62 }
 0xa65   : > { %v3917_v27 = vpop.f32.mrf.mxu0 }
 0xa66   : > { %v13125_v61 = vadd.f32 %v12978_v9, %v3917_v27  ;;  %v4111_v27 = vmul.f32 %v9712_v1, %v4110_v43 }
 0xa68   : > { %4292 = vrot.lane.b32.xlu1 %v13125_v61, %s10235_s9  ;;  %v4112_v32 = vadd.f32 %v9712_v1, %v4111_v27 }
 0xa6a   : > { %v4116_v59 = vsel %vm4115_vm9, %v9712_v1, %v4112_v32 }
 0xa6b   : > { %v13149_v13 = vsel %vm4118_vm10, %v4120_v22, %v4116_v59 }
 0xa70   : > { %4364 = vrot.lane.b32.xlu1 %v4327_v41, %s10236_s17  ;;  %v4009_v41 = vadd.f32 1.0, %v9714_v10 }
 0xa72   : > { %9717 = vrcp.f32 %v4009_v41  ;;  %vm4128_vm12 = vweird.f32 %v4009_v41 }
 0xa73   : > { %9719 = vrcp.f32 %v4010_v62 }
 0xa78   : > { %v9718_v1 = vpop.eup %9717 }
 0xa79   : > { %v9720_v53 = vpop.eup %9719  ;;  %vm4129_vm11 = vweird.f32 %v9718_v1 }
 0xa7a   : > { %vm4130_vm13 = vmor %vm4128_vm12, %vm4129_vm11  ;;  %vm4144_vm15 = vweird.f32 %v9720_v53 }
 0xa7b   : > { %vm4145_vm2 = vmor %vm4143_vm1, %vm4144_vm15 }
 0xa85   : > { %v3920_v19 = vpop.f32.mrf.mxu0 }
 0xa86   : > { %v13145_v57 = vadd.f32 %v12978_v9, %v3920_v19  ;;  %v4124_v19 = vmul.f32 %v9718_v1, %v4009_v41 }
 0xa88   : > { %4294 = vrot.lane.b32.xlu0 %v13145_v57, %s10235_s9  ;;  %v4125_v32 = vsub.f32 1.0, %v4124_v19 }
 0xa8d   : > { %v4287_v31 = vpop.permute.xlu1 %4286  ;;  %v3923_v58 = vpop.f32.mrf.mxu0 }
 0xa8e   : > { %v4328_v21 = vmul.f32 %v4287_v31, %v13149_v13  ;;  %v13153_v43 = vadd.f32 %v12978_v9, %v3923_v58  ;;  %v4139_v31 = vmul.f32 %v9720_v53, %v4010_v62  ;;  %v4126_v58 = vmul.f32 %v9718_v1, %v4125_v32 }
 0xa90   : > { %4296 = vrot.lane.b32.xlu2 %v13153_v43, %s10235_s9  ;;  %4366 = vrot.lane.b32.xlu0 %v4328_v21, %s10236_s17  ;;  %v4140_v39 = vsub.f32 1.0, %v4139_v31 }
 0xa92   : > { %v4141_v32 = vmul.f32 %v9720_v53, %v4140_v39  ;;  %v4147_v39 = vand.u32 2147483647, %v4010_v62 }
 0xa94   : > { %vm4148_vm3 = vcmp.eq.f32.partialorder %v4147_v39, 8.507059e+37 }
 0xa95   : > { %v3926_v37 = vpop.f32.mrf.mxu0 }
 0xa96   : > { %v13159_v27 = vadd.f32 %v12978_v9, %v3926_v37  ;;  %v4127_v37 = vadd.f32 %v9718_v1, %v4126_v58 }
 0xa98   : > { %4298 = vrot.lane.b32.xlu2 %v13159_v27, %s10235_s9 }
 0xa9a   : > { %v4357_v59 = vpop.permute.xlu2 %4356 }
 0xa9b   : > { %v4403_v21 = vadd.f32 %v4357_v59, %v13016_v51  ;;  %v4131_v51 = vsel %vm4130_vm13, %v9718_v1, %v4127_v37  ;;  %v4150_v37 = vor.u32 1.1754944e-38, %v4149_v5 }
 0xa9c   : > { %v4355_v12 = vpop.permute.xlu0 %4354 }
 0xa9d   : > { %v4402_v10 = vadd.f32 %v4355_v12, %v13005_v46  ;;  %v3929_v44 = vpop.f32.mrf.mxu0  ;;  %v4134_v46 = vand.u32 2147483648, %v4009_v41 }
 0xa9e   : > { %v13165_v22 = vadd.f32 %v12978_v9, %v3929_v44  ;;  %v4132_v44 = vand.u32 2147483647, %v4009_v41  ;;  %v4142_v41 = vadd.f32 %v9720_v53, %v4141_v32 }
 0xa9f   : > { %9721 = vtanh.f32 %v4402_v10  ;;  %v15794_v10 = vld [vmem:[#allocation34_spill] sm:$0xff]  ;;  %v4135_v31 = vor.u32 1.1754944e-38, %v4134_v46 }
 0xaa0   : > { %4300 = vrot.lane.b32.xlu2 %v13165_v22, %s10235_s9  ;;  %9723 = vtanh.f32 %v4403_v21  ;;  %v13176_v50 = vadd.f32 %v15795_v55, %v15794_v10  ;;  %vm4133_vm14 = vcmp.eq.f32.partialorder %v4132_v44, 8.507059e+37  ;;  %v4146_v1 = vsel %vm4145_vm2, %v9720_v53, %v4142_v41 }
 0xaa1   : > { %v13183_v21 = vsel %vm4133_vm14, %v4135_v31, %v4131_v51  ;;  %v15796_v51 = vld [vmem:[#allocation26_spill] sm:$0xff] }
 0xaa2   : > { %v3947_v59 = vadd.f32 %v13125_v61, %v13176_v50  ;;  %v4291_v46 = vpop.permute.xlu2 %4290 }
 0xaa4   : > { %v9061_v10 = vmul.f32 -1.442695, %v3947_v59  ;;  %v15797_v59 = vld [vmem:[#allocation55_spill] sm:$0xff] }
 0xaa5   : > { %v13170_v19 = vpop.eup %9721  ;;  %v13198_v31 = vadd.f32 %v15797_v59, %v15796_v51 }
 0xaa6   : > { %v4434_v12 = vsub.f32 %v12835_v42, %v13170_v19  ;;  %v13181_v58 = vpop.eup %9723  ;;  %9725 = vpow2.f32 %v9061_v10 }
 0xaa7   : > { %v4435_v61 = vsub.f32 %v12857_v49, %v13181_v58  ;;  %v3949_v5 = vadd.f32 %v13153_v43, %v13198_v31 }
 0xaa8   : > { %4466 = vrot.lane.b32.xlu1 %v4434_v12, %s10237_s18  ;;  %v13190_v12 = vsel %vm4148_vm3, %v4150_v37, %v4146_v1  ;;  %v15798_v1 = vld [vmem:[#allocation31_spill] sm:$0xff]  ;;  %v15799_v37 = vld [vmem:[#allocation56_spill] sm:$0xff] }
 0xaa9   : > { %v4330_v32 = vmul.f32 %v4291_v46, %v13190_v12  ;;  %v13213_v46 = vadd.f32 %v15799_v37, %v15798_v1 }
 0xaaa   : > { %v4289_v42 = vpop.permute.xlu0 %4288 }
 0xaab   : > { %v4329_v55 = vmul.f32 %v4289_v42, %v13183_v21 }
 0xaac   : > { %v9726_v49 = vpop.eup %9725 }
 0xaad   : > { %4368 = vrot.lane.b32.xlu0 %v4329_v55, %s10236_s17  ;;  %v4011_v53 = vadd.f32 1.0, %v9726_v49  ;;  %v9063_v55 = vmul.f32 -1.442695, %v3949_v5 }
 0xaaf   : > { %vm4158_vm5 = vweird.f32 %v4011_v53 }
 0xab0   : > { %4468 = vrot.lane.b32.xlu1 %v4435_v61, %s10237_s18 }
 0xab2   : > { %v4361_v39 = vpop.permute.xlu0 %4360 }
 0xab3   : > { %v3932_v44 = vpop.f32.mrf.mxu0  ;;  %v4405_v43 = vadd.f32 %v4361_v39, %v13020_v34  ;;  %v15802_v34 = vld [vmem:[#allocation35_spill] sm:$0xff] }
 0xab4   : > { %v13194_v62 = vadd.f32 %v12978_v9, %v3932_v44 }
 0xab5   : > { %4370 = vrot.lane.b32.xlu0 %v4330_v32, %s10236_s17  ;;  %v4363_v32 = vpop.permute.xlu2 %4362 }
 0xab6   : > { %4302 = vrot.lane.b32.xlu2 %v13194_v62, %s10235_s9 }
 0xaba   : > { %v4359_v10 = vpop.permute.xlu1 %4358 }
 0xabb   : > { %v4404_v42 = vadd.f32 %v4359_v10, %v13027_v54  ;;  %v3935_v41 = vpop.f32.mrf.mxu0  ;;  %v3950_v54 = vadd.f32 %v13159_v27, %v13213_v46  ;;  %v15800_v10 = vld [vmem:[#allocation38_spill] sm:$0xff]  ;;  %v4406_v27 = vadd.f32 %v4363_v32, %v13036_v38 }
 0xabc   : > { %v13207_v61 = vadd.f32 %v12978_v9, %v3935_v41 }
 0xabd   : > { %9727 = vtanh.f32 %v4404_v42  ;;  %v9064_v49 = vmul.f32 -1.442695, %v3950_v54  ;;  %v15801_v42 = vld [vmem:[#allocation53_spill] sm:$0xff] }
 0xabe   : > { %9729 = vrcp.f32 %v4011_v53  ;;  %4304 = vrot.lane.b32.xlu2 %v13207_v61, %s10235_s9  ;;  %v13224_v41 = vadd.f32 %v15801_v42, %v15800_v10 }
 0xabf   : > { %9731 = vpow2.f32 %v9063_v55  ;;  %v15803_v55 = vld [vmem:[#allocation57_spill] sm:$0xff] }
 0xac0   : > { %9733 = vtanh.f32 %v4405_v43  ;;  %v13229_v39 = vadd.f32 %v15803_v55, %v15802_v34  ;;  %v3948_v43 = vadd.f32 %v13145_v57, %v13224_v41 }
 0xac1   : > { %9735 = vpow2.f32 %v9064_v49 }
 0xac2   : > { %v3951_v54 = vadd.f32 %v13165_v22, %v13229_v39  ;;  %9737 = vtanh.f32 %v4406_v27  ;;  %v9062_v42 = vmul.f32 -1.442695, %v3948_v43  ;;  %v4162_v43 = vand.u32 2147483647, %v4011_v53 }
 0xac3   : > { %v13218_v44 = vpop.eup %9727 }
 0xac4   : > { %v9730_v9 = vpop.eup %9729  ;;  %v4436_v59 = vsub.f32 %v12873_v63, %v13218_v44  ;;  %v9065_v38 = vmul.f32 -1.442695, %v3951_v54  ;;  %vm4163_vm7 = vcmp.eq.f32.partialorder %v4162_v43, 8.507059e+37 }
 0xac5   : > { %v9732_v5 = vpop.eup %9731  ;;  %v4154_v37 = vmul.f32 %v9730_v9, %v4011_v53  ;;  %vm4159_vm4 = vweird.f32 %v9730_v9 }
 0xac6   : > { %4470 = vrot.lane.b32.xlu1 %v4436_v59, %s10237_s18  ;;  %v13234_v1 = vpop.eup %9733  ;;  %v13236_v63 = vadd.f32 1.0, %v9732_v5  ;;  %vm4160_vm6 = vmor %vm4158_vm5, %vm4159_vm4 }
 0xac7   : > { %v4155_v59 = vsub.f32 1.0, %v4154_v37  ;;  %v4437_v55 = vsub.f32 %v12886_v18, %v13234_v1  ;;  %v9736_v57 = vpop.eup %9735  ;;  %v4164_v18 = vand.u32 2147483648, %v4011_v53 }
 0xac8   : > { %9739 = vrcp.f32 %v13236_v63  ;;  %v13244_v5 = vpop.eup %9737  ;;  %v13246_v49 = vadd.f32 1.0, %v9736_v57  ;;  %vm4188_vm9 = vweird.f32 %v13236_v63 }
 0xac9   : > { %v4156_v32 = vmul.f32 %v9730_v9, %v4155_v59  ;;  %9741 = vpow2.f32 %v9062_v42  ;;  %v4438_v37 = vsub.f32 %v12891_v29, %v13244_v5 }
 0xaca   : > { %9743 = vpow2.f32 %v9065_v38  ;;  %v4165_v38 = vor.u32 1.1754944e-38, %v4164_v18  ;;  %vm4203_vm13 = vweird.f32 %v13246_v49 }
 0xacb   : > { %v4157_v27 = vadd.f32 %v9730_v9, %v4156_v32  ;;  %9745 = vrcp.f32 %v13246_v49 }
 0xace   : > { %4472 = vrot.lane.b32.xlu1 %v4437_v55, %s10237_s18  ;;  %v9740_v22 = vpop.eup %9739  ;;  %v4161_v55 = vsel %vm4160_vm6, %v9730_v9, %v4157_v27 }
 0xacf   : > { %v9742_v54 = vpop.eup %9741  ;;  %v4184_v59 = vmul.f32 %v9740_v22, %v13236_v63  ;;  %v13257_v29 = vsel %vm4163_vm7, %v4165_v38, %v4161_v55  ;;  %vm4189_vm8 = vweird.f32 %v9740_v22  ;;  %v15805_v55 = vld [vmem:[#allocation59_spill] sm:$0xff] }
 0xad0   : > { %v9744_v42 = vpop.eup %9743  ;;  %v13253_v57 = vadd.f32 1.0, %v9742_v54  ;;  %v13278_v38 = vadd.f32 %v15805_v55, %v15744_v40  ;;  %vm4190_vm10 = vmor %vm4188_vm9, %vm4189_vm8 }
 0xad1   : > { %v13255_v32 = vadd.f32 1.0, %v9744_v42  ;;  %v4185_v53 = vsub.f32 1.0, %v4184_v59  ;;  %v9746_v10 = vpop.eup %9745 }
 0xad2   : > { %9747 = vrcp.f32 %v13253_v57  ;;  %v4199_v18 = vmul.f32 %v9746_v10, %v13246_v49  ;;  %vm4204_vm12 = vweird.f32 %v9746_v10  ;;  %vm4173_vm3 = vweird.f32 %v13253_v57 }
 0xad3   : > { %9749 = vrcp.f32 %v13255_v32  ;;  %v4186_v9 = vmul.f32 %v9740_v22, %v4185_v53  ;;  %vm4205_vm14 = vmor %vm4203_vm13, %vm4204_vm12  ;;  %vm4218_vm4 = vweird.f32 %v13255_v32 }
 0xad4   : > { %v4200_v59 = vsub.f32 1.0, %v4199_v18 }
 0xad5   : > { %v4187_v43 = vadd.f32 %v9740_v22, %v4186_v9  ;;  %v3953_v9 = vadd.f32 %v13207_v61, %v13278_v38  ;;  %v4207_v61 = vand.u32 2147483647, %v13246_v49 }
 0xad6   : > { %4474 = vrot.lane.b32.xlu1 %v4438_v37, %s10237_s18  ;;  %v15804_v37 = vld [vmem:[#allocation58_spill] sm:$0xff] }
 0xad7   : > { %v13262_v48 = vadd.f32 %v15804_v37, %v15743_v16  ;;  %v4191_v53 = vsel %vm4190_vm10, %v9740_v22, %v4187_v43  ;;  %vm4208_vm15 = vcmp.eq.f32.partialorder %v4207_v61, 8.507059e+37 }
 0xad9   : > { %v3952_v27 = vadd.f32 %v13194_v62, %v13262_v48  ;;  %v4192_v62 = vand.u32 2147483647, %v13236_v63 }
 0xada   : > { %v4293_v34 = vpop.permute.xlu1 %4292 }
 0xadb   : > { %v4331_v51 = vmul.f32 %v4293_v34, %v13257_v29  ;;  %v13270_v34 = vpop.eup %9747  ;;  %v9066_v54 = vmul.f32 -1.442695, %v3952_v27  ;;  %v4201_v27 = vmul.f32 %v9746_v10, %v4200_v59  ;;  %vm4193_vm11 = vcmp.eq.f32.partialorder %v4192_v62, 8.507059e+37 }
 0xadc   : > { %v13272_v42 = vpop.eup %9749  ;;  %v4169_v37 = vmul.f32 %v13270_v34, %v13253_v57  ;;  %vm4174_vm1 = vweird.f32 %v13270_v34 }
 0xadd   : > { %4372 = vrot.lane.b32.xlu0 %v4331_v51, %s10236_s17  ;;  %v4194_v51 = vand.u32 2147483648, %v13236_v63  ;;  %9751 = vpow2.f32 %v9066_v54  ;;  %v4214_v18 = vmul.f32 %v13272_v42, %v13255_v32  ;;  %v9067_v63 = vmul.f32 -1.442695, %v3953_v9  ;;  %vm13312_vm5 = vmor %vm4173_vm3, %vm4174_vm1 }
 0xade   : > { %v4170_v40 = vsub.f32 1.0, %v4169_v37  ;;  %v4202_v43 = vadd.f32 %v9746_v10, %v4201_v27  ;;  %v4209_v54 = vand.u32 2147483648, %v13246_v49  ;;  %vm4219_vm2 = vweird.f32 %v13272_v42 }
 0xadf   : > { %v4195_v16 = vor.u32 1.1754944e-38, %v4194_v51  ;;  %v4215_v15 = vsub.f32 1.0, %v4214_v18  ;;  %9753 = vpow2.f32 %v9067_v63  ;;  %v4222_v18 = vand.u32 2147483647, %v13255_v32  ;;  %vm4220_vm6 = vmor %vm4218_vm4, %vm4219_vm2 }
 0xae0   : > { %v4171_v51 = vmul.f32 %v13270_v34, %v4170_v40  ;;  %v4224_v40 = vand.u32 2147483648, %v13255_v32 }
 0xae1   : > { %v13287_v55 = vsel %vm4193_vm11, %v4195_v16, %v4191_v53  ;;  %v4206_v16 = vsel %vm4205_vm14, %v9746_v10, %v4202_v43  ;;  %v4216_v59 = vmul.f32 %v13272_v42, %v4215_v15  ;;  %vm4223_vm7 = vcmp.eq.f32.partialorder %v4222_v18, 8.507059e+37 }
 0xae2   : > { %v4365_v9 = vpop.permute.xlu1 %4364  ;;  %v4172_v15 = vadd.f32 %v13270_v34, %v4171_v51 }
 0xae3   : > { %v9752_v25 = vpop.eup %9751  ;;  %v4217_v49 = vadd.f32 %v13272_v42, %v4216_v59  ;;  %v4407_v43 = vadd.f32 %v4365_v9, %v13077_v0  ;;  %v4225_v59 = vor.u32 1.1754944e-38, %v4224_v40 }
 0xae4   : > { %v13296_v62 = vadd.f32 1.0, %v9752_v25  ;;  %v4179_v25 = vand.u32 2147483648, %v13253_v57  ;;  %v4176_v61 = vsel %vm13312_vm5, %v13270_v34, %v4172_v15 }
 0xae5   : > { %v9754_v10 = vpop.eup %9753 }
 0xae6   : > { %9755 = vrcp.f32 %v13296_v62  ;;  %v4180_v51 = vor.u32 1.1754944e-38, %v4179_v25  ;;  %vm4233_vm10 = vweird.f32 %v13296_v62 }
 0xae7   : > { %9757 = vtanh.f32 %v4407_v43 }
 0xaea   : > { %v4297_v52 = vpop.permute.xlu2 %4296 }
 0xaeb   : > { %v4333_v22 = vmul.f32 %v4297_v52, %v13287_v55  ;;  %v4210_v52 = vor.u32 1.1754944e-38, %v4209_v54  ;;  %v4221_v54 = vsel %vm4220_vm6, %v13272_v42, %v4217_v49 }
 0xaec   : > { %v9756_v32 = vpop.eup %9755 }
 0xaed   : > { %4376 = vrot.lane.b32.xlu2 %v4333_v22, %s10236_s17  ;;  %v13298_v53 = vsel %vm4208_vm15, %v4210_v52, %v4206_v16  ;;  %v4177_v22 = vand.u32 2147483647, %v13253_v57  ;;  %v4017_v16 = vadd.f32 1.0, %v9754_v10  ;;  %v4229_v34 = vmul.f32 %v9756_v32, %v13296_v62 }
 0xaee   : > { %vm4234_vm9 = vweird.f32 %v9756_v32 }
 0xaef   : > { %vm4178_vm8 = vcmp.eq.f32.partialorder %v4177_v22, 8.507059e+37  ;;  %9759 = vrcp.f32 %v4017_v16  ;;  %v4230_v49 = vsub.f32 1.0, %v4229_v34  ;;  %vm4235_vm11 = vmor %vm4233_vm10, %vm4234_vm9  ;;  %vm4248_vm14 = vweird.f32 %v4017_v16 }
 0xaf0   : > { %v13324_v57 = vsel %vm4178_vm8, %v4180_v51, %v4176_v61 }
 0xaf1   : > { %v4231_v18 = vmul.f32 %v9756_v32, %v4230_v49  ;;  %v4254_v49 = vand.u32 2147483648, %v4017_v16 }
 0xaf2   : > { %v4299_v37 = vpop.permute.xlu2 %4298 }
 0xaf3   : > { %v4334_v27 = vmul.f32 %v4299_v37, %v13298_v53  ;;  %v13322_v37 = vsel %vm4223_vm7, %v4225_v59, %v4221_v54  ;;  %v4232_v22 = vadd.f32 %v9756_v32, %v4231_v18  ;;  %v4239_v54 = vand.u32 2147483648, %v13296_v62 }
 0xaf4   : > { %v4237_v59 = vand.u32 2147483647, %v13296_v62  ;;  %v4252_v62 = vand.u32 2147483647, %v4017_v16 }
 0xaf5   : > { %4378 = vrot.lane.b32.xlu2 %v4334_v27, %s10236_s17  ;;  %v13331_v27 = vpop.eup %9757 }
 0xaf6   : > { %v9760_v15 = vpop.eup %9759  ;;  %v4439_v10 = vsub.f32 %v12914_v2, %v13331_v27  ;;  %v4236_v2 = vsel %vm4235_vm11, %v9756_v32, %v4232_v22  ;;  %vm4238_vm12 = vcmp.eq.f32.partialorder %v4237_v59, 8.507059e+37  ;;  %v4255_v32 = vor.u32 1.1754944e-38, %v4254_v49 }
 0xaf7   : > { %v4244_v63 = vmul.f32 %v9760_v15, %v4017_v16  ;;  %vm4249_vm13 = vweird.f32 %v9760_v15  ;;  %vm4253_vm1 = vcmp.eq.f32.partialorder %v4252_v62, 8.507059e+37 }
 0xaf8   : > { %vm4250_vm15 = vmor %vm4248_vm14, %vm4249_vm13 }
 0xaf9   : > { %v4245_v43 = vsub.f32 1.0, %v4244_v63 }
 0xafa   : > { %v4301_v52 = vpop.permute.xlu2 %4300  ;;  %v4295_v0 = vpop.permute.xlu0 %4294 }
 0xafb   : > { %v4335_v9 = vmul.f32 %v4301_v52, %v13322_v37  ;;  %v4332_v42 = vmul.f32 %v4295_v0, %v13324_v57  ;;  %v4246_v51 = vmul.f32 %v9760_v15, %v4245_v43  ;;  %v4240_v52 = vor.u32 1.1754944e-38, %v4239_v54 }
 0xafd   : > { %4380 = vrot.lane.b32.xlu2 %v4335_v9, %s10236_s17  ;;  %4374 = vrot.lane.b32.xlu0 %v4332_v42, %s10236_s17  ;;  %v13345_v0 = vsel %vm4238_vm12, %v4240_v52, %v4236_v2  ;;  %v4247_v34 = vadd.f32 %v9760_v15, %v4246_v51 }
 0xb02   : > { %v4367_v40 = vpop.permute.xlu0 %4366 }
 0xb03   : > { %v4408_v25 = vadd.f32 %v4367_v40, %v13120_v24 }
 0xb05   : > { %9761 = vtanh.f32 %v4408_v25  ;;  %4476 = vrot.lane.b32.xlu0 %v4439_v10, %s10237_s18 }
 0xb0b   : > { %v13338_v61 = vpop.eup %9761 }
 0xb0c   : > { %v4440_v24 = vsub.f32 %v12922_v20, %v13338_v61  ;;  %v4251_v20 = vsel %vm4250_vm15, %v9760_v15, %v4247_v34 }
 0xb0d   : > { %v13349_v40 = vsel %vm4253_vm1, %v4255_v32, %v4251_v20 }
 0xb0e   : > { %4478 = vrot.lane.b32.xlu0 %v4440_v24, %s10237_s18 }
 0xb10   : > { %v4303_v9 = vpop.permute.xlu2 %4302 }
 0xb11   : > { %v4336_v42 = vmul.f32 %v4303_v9, %v13345_v0 }
 0xb13   : > { %4382 = vrot.lane.b32.xlu2 %v4336_v42, %s10236_s17 }
 0xb18   : > { %v4305_v25 = vpop.permute.xlu2 %4304 }
 0xb19   : > { %v4337_v10 = vmul.f32 %v4305_v25, %v13349_v40 }
 0xb1a   : > { %v4467_v18 = vpop.permute.xlu1 %4466 }
 0xb1b   : > { %v4514_v63 = vmul.f32 %v4467_v18, %v13050_v6  ;;  %4384 = vrot.lane.b32.xlu2 %v4337_v10, %s10236_s17 }
 0xb1d   : > { %4546 = vrot.lane.b32.xlu1 %v4514_v63, %s10238_s19 }
 0xb1f   : > { %v4369_v22 = vpop.permute.xlu0 %4368 }
 0xb20   : > { %v4409_v43 = vadd.f32 %v4369_v22, %v13135_v45 }
 0xb22   : > { %v4469_v16 = vpop.permute.xlu1 %4468  ;;  %9763 = vtanh.f32 %v4409_v43 }
 0xb23   : > { %v4515_v15 = vmul.f32 %v4469_v16, %v13089_v7 }
 0xb25   : > { %4548 = vrot.lane.b32.xlu1 %v4515_v15, %s10238_s19 }
 0xb27   : > { %v4371_v54 = vpop.permute.xlu0 %4370 }
 0xb28   : > { %v13358_v59 = vpop.eup %9763  ;;  %v4410_v24 = vadd.f32 %v4371_v54, %v13141_v3 }
 0xb29   : > { %v4441_v6 = vsub.f32 %v12933_v33, %v13358_v59 }
 0xb2a   : > { %9765 = vtanh.f32 %v4410_v24 }
 0xb2b   : > { %4480 = vrot.lane.b32.xlu0 %v4441_v6, %s10237_s18 }
 0xb30   : > { %v13364_v2 = vpop.eup %9765 }
 0xb31   : > { %v4442_v45 = vsub.f32 %v12942_v8, %v13364_v2 }
 0xb33   : > { %4482 = vrot.lane.b32.xlu0 %v4442_v45, %s10237_s18 }
 0xb38   : > { %v4471_v7 = vpop.permute.xlu1 %4470 }
 0xb39   : > { %v4516_v51 = vmul.f32 %v4471_v7, %v13102_v23 }
 0xb3b   : > { %4550 = vrot.lane.b32.xlu1 %v4516_v51, %s10238_s19 }
 0xb40   : > { %v4473_v52 = vpop.permute.xlu1 %4472 }
 0xb41   : > { %v4517_v3 = vmul.f32 %v4473_v52, %v13091_v26 }
 0xb43   : > { %4552 = vrot.lane.b32.xlu1 %v4517_v3, %s10238_s19 }
 0xb47   : > { %v4377_v49 = vpop.permute.xlu2 %4376 }
 0xb48   : > { %v4475_v33 = vpop.permute.xlu1 %4474 }
 0xb49   : > { %v4518_v9 = vmul.f32 %v4475_v33, %v13114_v28  ;;  %v4413_v28 = vadd.f32 %v4377_v49, %v13198_v31 }
 0xb4b   : > { %4554 = vrot.lane.b32.xlu1 %v4518_v9, %s10238_s19 }
 0xb4f   : > { %v4373_v42 = vpop.permute.xlu0 %4372  ;;  %v4379_v20 = vpop.permute.xlu2 %4378 }
 0xb50   : > { %v4411_v8 = vadd.f32 %v4373_v42, %v13176_v50 }
 0xb52   : > { %9767 = vtanh.f32 %v4411_v8 }
 0xb57   : > { %v4381_v18 = vpop.permute.xlu2 %4380 }
 0xb58   : > { %v13376_v34 = vpop.eup %9767 }
 0xb59   : > { %v4443_v23 = vsub.f32 %v12947_v30, %v13376_v34  ;;  %v4414_v30 = vadd.f32 %v4379_v20, %v13213_v46 }
 0xb5b   : > { %4484 = vrot.lane.b32.xlu0 %v4443_v23, %s10237_s18 }
 0xb6d   : > { %v4383_v43 = vpop.permute.xlu2 %4382 }
 0xb6f   : > { %v4375_v26 = vpop.permute.xlu0 %4374 }
 0xb70   : > { %v4412_v62 = vadd.f32 %v4375_v26, %v13224_v41 }
 0xb72   : > { %9769 = vtanh.f32 %v4412_v62 }
 0xb73   : > { %9771 = vtanh.f32 %v4413_v28 }
 0xb74   : > { %9773 = vtanh.f32 %v4414_v30 }
 0xb75   : > { %v4385_v54 = vpop.permute.xlu2 %4384 }
 0xb77   : > { %v4477_v32 = vpop.permute.xlu0 %4476 }
 0xb78   : > { %v13383_v25 = vpop.eup %9769  ;;  %v4519_v50 = vmul.f32 %v4477_v32, %v13129_v60 }
 0xb79   : > { %v4444_v10 = vsub.f32 %v12960_v17, %v13383_v25  ;;  %v13391_v41 = vpop.eup %9771  ;;  %v4415_v17 = vadd.f32 %v4381_v18, %v13229_v39 }
 0xb7a   : > { %4556 = vrot.lane.b32.xlu0 %v4519_v50, %s10238_s19  ;;  %v4445_v22 = vsub.f32 %v12965_v11, %v13391_v41  ;;  %v13399_v60 = vpop.eup %9773 }
 0xb7b   : > { %4486 = vrot.lane.b32.xlu2 %v4444_v10, %s10237_s18  ;;  %9775 = vtanh.f32 %v4415_v17  ;;  %v4446_v46 = vsub.f32 %v12955_v56, %v13399_v60  ;;  %v4417_v56 = vadd.f32 %v4385_v54, %v13278_v38 }
 0xb80   : > { %v4479_v31 = vpop.permute.xlu0 %4478 }
 0xb81   : > { %v4520_v63 = vmul.f32 %v4479_v31, %v13149_v13  ;;  %v4416_v13 = vadd.f32 %v4383_v43, %v13262_v48  ;;  %v13405_v16 = vpop.eup %9775 }
 0xb82   : > { %v4447_v39 = vsub.f32 %v12971_v36, %v13405_v16 }
 0xb83   : > { %4488 = vrot.lane.b32.xlu2 %v4445_v22, %s10237_s18  ;;  %4558 = vrot.lane.b32.xlu0 %v4520_v63, %s10238_s19  ;;  %9777 = vtanh.f32 %v4416_v13 }
 0xb84   : > { %9779 = vtanh.f32 %v4417_v56  ;;  %v13525_v56 = vld [vmem:[%s15597_s1 + $0x21] ss:$0 sm:$0xff] }
 0xb89   : > { %v13416_v24 = vpop.eup %9777 }
 0xb8a   : > { %v13426_v36 = vpop.eup %9779 }
 0xb8b   : > { %4490 = vrot.lane.b32.xlu2 %v4446_v46, %s10237_s18  ;;  %v4449_v7 = vsub.f32 %v12996_v14, %v13426_v36 }
 0xb8f   : > { %v4547_v11 = vpop.permute.xlu1 %4546 }
 0xb90   : > { %v13408_v15 = vadd.f32 %v13170_v19, %v4547_v11  ;;  %v4448_v19 = vsub.f32 %v12986_v47, %v13416_v24 }
 0xb92   : > { %4756 = vrot.lane.b32.xlu1 %v13408_v15, %s10235_s9 }
 0xb93   : > { %4492 = vrot.lane.b32.xlu2 %v4447_v39, %s10237_s18 }
 0xb97   : > { %v4549_v48 = vpop.permute.xlu1 %4548 }
 0xb98   : > { %v13419_v6 = vadd.f32 %v13181_v58, %v4549_v48 }
 0xb9a   : > { %4758 = vrot.lane.b32.xlu1 %v13419_v6, %s10235_s9 }
 0xb9b   : > { %4494 = vrot.lane.b32.xlu2 %v4448_v19, %s10237_s18 }
 0xb9d   : > { %v4481_v45 = vpop.permute.xlu0 %4480 }
 0xb9e   : > { %v4521_v38 = vmul.f32 %v4481_v45, %v13183_v21 }
 0xba0   : > { %4560 = vrot.lane.b32.xlu0 %v4521_v38, %s10238_s19 }
 0xba3   : > { %4496 = vrot.lane.b32.xlu2 %v4449_v7, %s10237_s18 }
 0xba5   : > { %v4483_v58 = vpop.permute.xlu0 %4482 }
 0xba6   : > { %v4522_v47 = vmul.f32 %v4483_v58, %v13190_v12 }
 0xba8   : > { %4562 = vrot.lane.b32.xlu0 %v4522_v47, %s10238_s19 }
 0xbad   : > { %v4551_v51 = vpop.permute.xlu1 %4550 }
 0xbae   : > { %v13436_v52 = vadd.f32 %v13218_v44, %v4551_v51 }
 0xbb0   : > { %4760 = vrot.lane.b32.xlu1 %v13436_v52, %s10235_s9 }
 0xbb5   : > { %v4553_v21 = vpop.permute.xlu1 %4552 }
 0xbb6   : > { %v13441_v3 = vadd.f32 %v13234_v1, %v4553_v21  ;;  %v15808_v21 = vld [vmem:[#allocation37_spill] sm:$0xff] }
 0xbb8   : > { %4762 = vrot.lane.b32.xlu1 %v13441_v3, %s10235_s9 }
 0xbbd   : > { %v4555_v14 = vpop.permute.xlu1 %4554 }
 0xbbe   : > { %v13446_v33 = vadd.f32 %v13244_v5, %v4555_v14  ;;  %v13543_v14 = vadd.f32 %v15808_v21, %v15774_v4 }
 0xbc0   : > { %4764 = vrot.lane.b32.xlu1 %v13446_v33, %s10235_s9 }
 0xbcd   : > { %v4485_v12 = vpop.permute.xlu0 %4484 }
 0xbce   : > { %v4523_v44 = vmul.f32 %v4485_v12, %v13257_v29 }
 0xbd0   : > { %4564 = vrot.lane.b32.xlu0 %v4523_v44, %s10238_s19 }
 0xbd5   : > { %v4487_v9 = vpop.permute.xlu2 %4486 }
 0xbd6   : > { %v4524_v42 = vmul.f32 %v4487_v9, %v13324_v57 }
 0xbd8   : > { %4566 = vrot.lane.b32.xlu0 %v4524_v42, %s10238_s19 }
 0xbdd   : > { %v4489_v1 = vpop.permute.xlu2 %4488 }
 0xbde   : > { %v4525_v8 = vmul.f32 %v4489_v1, %v13287_v55 }
 0xbe0   : > { %4568 = vrot.lane.b32.xlu2 %v4525_v8, %s10238_s19 }
 0xbe5   : > { %v4491_v29 = vpop.permute.xlu2 %4490 }
 0xbe6   : > { %v4526_v49 = vmul.f32 %v4491_v29, %v13298_v53 }
 0xbec   : > { %v4557_v5 = vpop.permute.xlu0 %4556 }
 0xbed   : > { %v13457_v23 = vadd.f32 %v13331_v27, %v4557_v5  ;;  %v4493_v55 = vpop.permute.xlu2 %4492 }
 0xbee   : > { %v4527_v62 = vmul.f32 %v4493_v55, %v13322_v37 }
 0xbef   : > { %4766 = vrot.lane.b32.xlu1 %v13457_v23, %s10235_s9 }
 0xbf5   : > { %v4559_v26 = vpop.permute.xlu0 %4558  ;;  %v4495_v20 = vpop.permute.xlu2 %4494 }
 0xbf6   : > { %v13463_v57 = vadd.f32 %v13338_v61, %v4559_v26  ;;  %v4528_v50 = vmul.f32 %v4495_v20, %v13345_v0  ;;  %v15809_v26 = vld [vmem:[#allocation41_spill] sm:$0xff]  ;;  %v15811_v20 = vld [vmem:[#allocation46_spill] sm:$0xff] }
 0xbf7   : > { %4570 = vrot.lane.b32.xlu1 %v4526_v49, %s10238_s19  ;;  %v13556_v55 = vadd.f32 %v15809_v26, %v15776_v35  ;;  %v15814_v26 = vld [vmem:[#allocation11_spill] sm:$0xff] }
 0xbf8   : > { %4768 = vrot.lane.b32.xlu0 %v13463_v57, %s10235_s9 }
 0xbfd   : > { %v4497_v10 = vpop.permute.xlu2 %4496 }
 0xc00   : > { %4572 = vrot.lane.b32.xlu0 %v4527_v62, %s10238_s19 }
 0xc04   : > { %v4757_v27 = vpop.permute.xlu1 %4756 }
 0xc05   : > { %9100 = vmatmul.msk.f32.vlgmr.msra.gmra.mxu3 %vm1028_vm0, %v4757_v27 }
 0xc0c   : > { %v4759_v28 = vpop.permute.xlu1 %4758 }
 0xc0d   : > { %9101 = vmatmul.msk.f32.gmra.mxu3 %vm1028_vm0, %v4759_v28 }
 0xc12   : > { %v4561_v53 = vpop.permute.xlu0 %4560 }
 0xc13   : > { %v13473_v61 = vadd.f32 %v13358_v59, %v4561_v53  ;;  %v4529_v59 = vmul.f32 %v4497_v10, %v13349_v40  ;;  %v15810_v53 = vld [vmem:[#allocation10_spill] sm:$0xff] }
 0xc15   : > { %4770 = vrot.lane.b32.xlu2 %v13473_v61, %s10235_s9 }
 0xc1a   : > { %v4563_v32 = vpop.permute.xlu0 %4562 }
 0xc1b   : > { %v13479_v37 = vadd.f32 %v13364_v2, %v4563_v32  ;;  %v13561_v32 = vadd.f32 %v15811_v20, %v15810_v53 }
 0xc1d   : > { %4574 = vrot.lane.b32.xlu2 %v4528_v50, %s10238_s19  ;;  %4772 = vrot.lane.b32.xlu1 %v13479_v37, %s10235_s9 }
 0xc22   : > { %v4761_v30 = vpop.permute.xlu1 %4760 }
 0xc23   : > { %9102 = vmatmul.msk.f32.gmra.mxu3 %vm1028_vm0, %v4761_v30 }
 0xc25   : > { %4576 = vrot.lane.b32.xlu1 %v4529_v59, %s10238_s19 }
 0xc2a   : > { %v4763_v18 = vpop.permute.xlu1 %4762 }
 0xc2b   : > { %9103 = vmatmul.msk.f32.gmra.mxu3 %vm1028_vm0, %v4763_v18 }
 0xc32   : > { %v4765_v0 = vpop.permute.xlu1 %4764 }
 0xc33   : > { %9104 = vmatmul.msk.f32.gmra.mxu3 %vm1028_vm0, %v4765_v0 }
 0xc3a   : > { %v4569_v63 = vpop.permute.xlu2 %4568 }
 0xc3b   : > { %v13495_v17 = vadd.f32 %v13391_v41, %v4569_v63 }
 0xc42   : > { %v4565_v2 = vpop.permute.xlu0 %4564 }
 0xc43   : > { %v13490_v31 = vadd.f32 %v13376_v34, %v4565_v2 }
 0xc45   : > { %4774 = vrot.lane.b32.xlu0 %v13490_v31, %s10235_s9 }
 0xc4a   : > { %v4567_v22 = vpop.permute.xlu0 %4566 }
 0xc4b   : > { %v13498_v40 = vadd.f32 %v13383_v25, %v4567_v22 }
 0xc4d   : > { %4778 = vrot.lane.b32.xlu0 %v13495_v17, %s10235_s9  ;;  %4776 = vrot.lane.b32.xlu2 %v13498_v40, %s10235_s9 }
 0xc61   : > { %v4767_v43 = vpop.permute.xlu1 %4766 }
 0xc62   : > { %9105 = vmatmul.msk.f32.gmra.mxu3 %vm1028_vm0, %v4767_v43 }
 0xc69   : > { %v4571_v34 = vpop.permute.xlu1 %4570 }
 0xc6a   : > { %v13506_v46 = vadd.f32 %v13399_v60, %v4571_v34  ;;  %v4769_v13 = vpop.permute.xlu0 %4768 }
 0xc6b   : > { %9106 = vmatmul.msk.f32.gmra.mxu3 %vm1028_vm0, %v4769_v13 }
 0xc6c   : > { %4780 = vrot.lane.b32.xlu1 %v13506_v46, %s10235_s9 }
 0xc6f   : > { %v4771_v25 = vpop.permute.xlu2 %4770 }
 0xc72   : > { %v4573_v41 = vpop.permute.xlu0 %4572 }
 0xc73   : > { %v13512_v11 = vadd.f32 %v13405_v16, %v4573_v41  ;;  %9107 = vmatmul.msk.f32.gmra.mxu3 %vm1028_vm0, %v4771_v25 }
 0xc75   : > { %4782 = vrot.lane.b32.xlu2 %v13512_v11, %s10235_s9 }
 0xc77   : > { %v4575_v54 = vpop.permute.xlu2 %4574 }
 0xc78   : > { %v13518_v60 = vadd.f32 %v13416_v24, %v4575_v54 }
 0xc7a   : > { %4784 = vrot.lane.b32.xlu0 %v13518_v60, %s10235_s9 }
 0xc88   : > { %v4837_v39 = vpop.f32.mrf.mxu3 }
 0xc89   : > { %v4838_v16 = vadd.f32 %v13525_v56, %v4837_v39 }
 0xc8b   : > { %5221 = vrot.lane.b32.xlu2 %v4838_v16, %s10235_s9 }
 0xc8f   : > { %v4773_v19 = vpop.permute.xlu1 %4772 }
 0xc90   : > { %v4840_v48 = vpop.f32.mrf.mxu3  ;;  %9108 = vmatmul.msk.f32.gmra.mxu3 %vm1028_vm0, %v4773_v19 }
 0xc91   : > { %v4841_v45 = vadd.f32 %v13525_v56, %v4840_v48 }
 0xc93   : > { %5223 = vrot.lane.b32.xlu0 %v4841_v45, %s10235_s9  ;;  %v4886_v27 = vadd.f32 %v4841_v45, %v13556_v55  ;;  %v15812_v45 = vld [vmem:[#allocation8_spill] sm:$0xff] }
 0xc95   : > { %v9117_v50 = vmul.f32 -1.442695, %v4886_v27 }
 0xc97   : > { %v4577_v24 = vpop.permute.xlu1 %4576 }
 0xc98   : > { %v13533_v38 = vadd.f32 %v13426_v36, %v4577_v24  ;;  %v4885_v36 = vadd.f32 %v4838_v16, %v13543_v14  ;;  %v15813_v24 = vld [vmem:[#allocation44_spill] sm:$0xff] }
 0xc9a   : > { %4786 = vrot.lane.b32.xlu1 %v13533_v38, %s10235_s9  ;;  %v9116_v9 = vmul.f32 -1.442695, %v4885_v36 }
 0xc9c   : > { %9781 = vpow2.f32 %v9116_v9 }
 0xca2   : > { %v9782_v8 = vpop.eup %9781 }
 0xca3   : > { %v4949_v5 = vadd.f32 1.0, %v9782_v8 }
 0xca5   : > { %9783 = vrcp.f32 %v4949_v5  ;;  %v4976_v63 = vand.u32 2147483648, %v4949_v5  ;;  %vm4970_vm3 = vweird.f32 %v4949_v5  ;;  %v4974_v22 = vand.u32 2147483647, %v4949_v5 }
 0xca6   : > { %v4843_v7 = vpop.f32.mrf.mxu3  ;;  %9785 = vpow2.f32 %v9117_v50 }
 0xca7   : > { %v4844_v58 = vadd.f32 %v13525_v56, %v4843_v7  ;;  %v4777_v1 = vpop.permute.xlu2 %4776  ;;  %v4977_v13 = vor.u32 1.1754944e-38, %v4976_v63  ;;  %vm4975_vm5 = vcmp.eq.f32.partialorder %v4974_v22, 8.507059e+37  ;;  %v13574_v7 = vadd.f32 %v15813_v24, %v15812_v45 }
 0xca9   : > { %5225 = vrot.lane.b32.xlu1 %v4844_v58, %s10235_s9 }
 0xcab   : > { %v9784_v49 = vpop.eup %9783 }
 0xcac   : > { %v4966_v62 = vmul.f32 %v9784_v49, %v4949_v5  ;;  %vm4971_vm2 = vweird.f32 %v9784_v49  ;;  %v9786_v43 = vpop.eup %9785 }
 0xcad   : > { %vm4972_vm4 = vmor %vm4970_vm3, %vm4971_vm2  ;;  %v4950_v25 = vadd.f32 1.0, %v9786_v43 }
 0xcae   : > { %v4846_v47 = vpop.f32.mrf.mxu3  ;;  %v4967_v28 = vsub.f32 1.0, %v4966_v62  ;;  %v15815_v62 = vld [vmem:[#allocation48_spill] sm:$0xff] }
 0xcaf   : > { %v4847_v51 = vadd.f32 %v13525_v56, %v4846_v47  ;;  %v4887_v47 = vadd.f32 %v4844_v58, %v13574_v7  ;;  %v13591_v27 = vadd.f32 %v15815_v62, %v15814_v26  ;;  %vm4985_vm7 = vweird.f32 %v4950_v25 }
 0xcb0   : > { %v4968_v30 = vmul.f32 %v9784_v49, %v4967_v28 }
 0xcb1   : > { %5227 = vrot.lane.b32.xlu2 %v4847_v51, %s10235_s9  ;;  %v4888_v10 = vadd.f32 %v4847_v51, %v13561_v32  ;;  %v9118_v36 = vmul.f32 -1.442695, %v4887_v47 }
 0xcb2   : > { %v4969_v2 = vadd.f32 %v9784_v49, %v4968_v30 }
 0xcb3   : > { %v9119_v18 = vmul.f32 -1.442695, %v4888_v10 }
 0xcb4   : > { %v4973_v34 = vsel %vm4972_vm4, %v9784_v49, %v4969_v2  ;;  %v4989_v2 = vand.u32 2147483647, %v4950_v25 }
 0xcb5   : > { %9787 = vpow2.f32 %v9119_v18  ;;  %v13565_v54 = vsel %vm4975_vm5, %v4977_v13, %v4973_v34 }
 0xcb6   : > { %v4849_v12 = vpop.f32.mrf.mxu3  ;;  %9789 = vrcp.f32 %v4950_v25  ;;  %vm4990_vm9 = vcmp.eq.f32.partialorder %v4989_v2, 8.507059e+37 }
 0xcb7   : > { %v13547_v44 = vadd.f32 %v13525_v56, %v4849_v12  ;;  %v4775_v42 = vpop.permute.xlu0 %4774 }
 0xcb8   : > { %9109 = vmatmul.msk.f32.gmra.mxu3 %vm1028_vm0, %v4775_v42 }
 0xcb9   : > { %5229 = vrot.lane.b32.xlu0 %v13547_v44, %s10235_s9  ;;  %v4889_v20 = vadd.f32 %v13547_v44, %v13591_v27 }
 0xcbb   : > { %v9788_v19 = vpop.eup %9787 }
 0xcbc   : > { %v4952_v51 = vadd.f32 1.0, %v9788_v19  ;;  %v9790_v9 = vpop.eup %9789 }
 0xcbd   : > { %vm4986_vm6 = vweird.f32 %v9790_v9 }
 0xcbe   : > { %9791 = vrcp.f32 %v4952_v51  ;;  %vm4987_vm8 = vmor %vm4985_vm7, %vm4986_vm6  ;;  %vm5015_vm11 = vweird.f32 %v4952_v51  ;;  %v5019_v19 = vand.u32 2147483647, %v4952_v51 }
 0xcbf   : > { %v4779_v29 = vpop.permute.xlu0 %4778  ;;  %9793 = vpow2.f32 %v9118_v36 }
 0xcc0   : > { %9110 = vmatmul.msk.f32.gmra.mxu3 %vm1028_vm0, %v4777_v1  ;;  %v4981_v1 = vmul.f32 %v9790_v9, %v4950_v25  ;;  %vm5020_vm13 = vcmp.eq.f32.partialorder %v5019_v19, 8.507059e+37 }
 0xcc4   : > { %v9792_v8 = vpop.eup %9791 }
 0xcc5   : > { %v9794_v49 = vpop.eup %9793  ;;  %v5011_v28 = vmul.f32 %v9792_v8, %v4952_v51  ;;  %vm5016_vm10 = vweird.f32 %v9792_v8 }
 0xcc6   : > { %v4951_v10 = vadd.f32 1.0, %v9794_v49  ;;  %vm5017_vm12 = vmor %vm5015_vm11, %vm5016_vm10 }
 0xcc7   : > { %v5012_v30 = vsub.f32 1.0, %v5011_v28 }
 0xcc8   : > { %9111 = vmatmul.msk.f32.gmra.mxu3 %vm1028_vm0, %v4779_v29  ;;  %v4982_v29 = vsub.f32 1.0, %v4981_v1  ;;  %9795 = vrcp.f32 %v4951_v10  ;;  %vm5000_vm15 = vweird.f32 %v4951_v10 }
 0xcc9   : > { %v5013_v63 = vmul.f32 %v9792_v8, %v5012_v30 }
 0xcca   : > { %v4983_v50 = vmul.f32 %v9790_v9, %v4982_v29 }
 0xccb   : > { %v5014_v34 = vadd.f32 %v9792_v8, %v5013_v63 }
 0xccc   : > { %v4984_v18 = vadd.f32 %v9790_v9, %v4983_v50  ;;  %v5004_v50 = vand.u32 2147483647, %v4951_v10 }
 0xcce   : > { %v4988_v22 = vsel %vm4987_vm8, %v9790_v9, %v4984_v18  ;;  %v9796_v13 = vpop.eup %9795  ;;  %vm5005_vm2 = vcmp.eq.f32.partialorder %v5004_v50, 8.507059e+37 }
 0xccf   : > { %v4783_v59 = vpop.permute.xlu2 %4782  ;;  %v4996_v47 = vmul.f32 %v9796_v13, %v4951_v10  ;;  %vm5001_vm14 = vweird.f32 %v9796_v13 }
 0xcd0   : > { %vm5002_vm1 = vmor %vm5000_vm15, %vm5001_vm14 }
 0xcde   : > { %v4781_v0 = vpop.permute.xlu1 %4780 }
 0xcdf   : > { %9112 = vmatmul.msk.f32.gmra.mxu3 %vm1028_vm0, %v4781_v0  ;;  %v4991_v0 = vand.u32 2147483648, %v4950_v25  ;;  %v5018_v25 = vsel %vm5017_vm12, %v9792_v8, %v5014_v34 }
 0xce1   : > { %v4992_v43 = vor.u32 1.1754944e-38, %v4991_v0 }
 0xce3   : > { %v13597_v44 = vsel %vm4990_vm9, %v4992_v43, %v4988_v22 }
 0xce5   : > { %v4852_v41 = vpop.f32.mrf.mxu3  ;;  %v5222_v39 = vpop.permute.xlu2 %5221 }
 0xce6   : > { %v13568_v16 = vadd.f32 %v13525_v56, %v4852_v41  ;;  %v5269_v48 = vmul.f32 %v5222_v39, %v13565_v54  ;;  %v5021_v39 = vand.u32 2147483648, %v4952_v51 }
 0xce7   : > { %9113 = vmatmul.msk.f32.gmra.mxu3 %vm1028_vm0, %v4783_v59  ;;  %v9120_v59 = vmul.f32 -1.442695, %v4889_v20  ;;  %v5006_v20 = vand.u32 2147483648, %v4951_v10 }
 0xce8   : > { %5231 = vrot.lane.b32.xlu1 %v13568_v16, %s10235_s9  ;;  %5301 = vrot.lane.b32.xlu2 %v5269_v48, %s10236_s17 }
 0xce9   : > { %9797 = vpow2.f32 %v9120_v59  ;;  %v5007_v18 = vor.u32 1.1754944e-38, %v5006_v20 }
 0xcec   : > { %v4785_v21 = vpop.permute.xlu0 %4784 }
 0xcee   : > { %v4855_v12 = vpop.f32.mrf.mxu3 }
 0xcef   : > { %v13581_v42 = vadd.f32 %v13525_v56, %v4855_v12  ;;  %9114 = vmatmul.msk.f32.gmra.mxu3 %vm1028_vm0, %v4785_v21  ;;  %v9798_v24 = vpop.eup %9797  ;;  %v5022_v21 = vor.u32 1.1754944e-38, %v5021_v39  ;;  %v15816_v39 = vld [vmem:[#allocation13_spill] sm:$0xff] }
 0xcf0   : > { %v4953_v36 = vadd.f32 1.0, %v9798_v24 }
 0xcf1   : > { %5233 = vrot.lane.b32.xlu0 %v13581_v42, %s10235_s9  ;;  %v13601_v12 = vsel %vm5020_vm13, %v5022_v21, %v5018_v25 }
 0xcf2   : > { %9799 = vrcp.f32 %v4953_v36  ;;  %v5036_v10 = vand.u32 2147483648, %v4953_v36  ;;  %vm5030_vm4 = vweird.f32 %v4953_v36 }
 0xcf4   : > { %v5037_v25 = vor.u32 1.1754944e-38, %v5036_v10 }
 0xcf6   : > { %v4858_v5 = vpop.f32.mrf.mxu3 }
 0xcf7   : > { %v13587_v58 = vadd.f32 %v13525_v56, %v4858_v5  ;;  %v4997_v5 = vsub.f32 1.0, %v4996_v47 }
 0xcf8   : > { %v9800_v8 = vpop.eup %9799 }
 0xcf9   : > { %5235 = vrot.lane.b32.xlu2 %v13587_v58, %s10235_s9  ;;  %v4998_v51 = vmul.f32 %v9796_v13, %v4997_v5  ;;  %v5026_v59 = vmul.f32 %v9800_v8, %v4953_v36  ;;  %vm5031_vm3 = vweird.f32 %v9800_v8  ;;  %v15819_v5 = vld [vmem:[#allocation52_spill] sm:$0xff] }
 0xcfa   : > { %vm5032_vm5 = vmor %vm5030_vm4, %vm5031_vm3 }
 0xcfb   : > { %v4999_v62 = vadd.f32 %v9796_v13, %v4998_v51  ;;  %v5027_v22 = vsub.f32 1.0, %v5026_v59 }
 0xcfd   : > { %v5003_v30 = vsel %vm5002_vm1, %v9796_v13, %v4999_v62  ;;  %v5028_v43 = vmul.f32 %v9800_v8, %v5027_v22  ;;  %v15820_v62 = vld [vmem:[#allocation27_spill] sm:$0xff] }
 0xcfe   : > { %v13611_v0 = vsel %vm5005_vm2, %v5007_v18, %v5003_v30 }
 0xcff   : > { %v5029_v34 = vadd.f32 %v9800_v8, %v5028_v43 }
 0xd01   : > { %v5033_v19 = vsel %vm5032_vm5, %v9800_v8, %v5029_v34  ;;  %v15821_v8 = vld [vmem:[#allocation54_spill] sm:$0xff] }
 0xd02   : > { %v13633_v20 = vadd.f32 %v15821_v8, %v15820_v62 }
 0xd04   : > { %v4892_v30 = vadd.f32 %v13587_v58, %v13633_v20 }
 0xd05   : > { %v5224_v41 = vpop.permute.xlu0 %5223 }
 0xd06   : > { %v5270_v48 = vmul.f32 %v5224_v41, %v13597_v44  ;;  %v5034_v41 = vand.u32 2147483647, %v4953_v36  ;;  %v15818_v36 = vld [vmem:[#allocation16_spill] sm:$0xff] }
 0xd08   : > { %5303 = vrot.lane.b32.xlu1 %v5270_v48, %s10236_s17  ;;  %v15817_v48 = vld [vmem:[#allocation50_spill] sm:$0xff]  ;;  %vm5035_vm6 = vcmp.eq.f32.partialorder %v5034_v41, 8.507059e+37 }
 0xd09   : > { %v13617_v13 = vadd.f32 %v15817_v48, %v15816_v39  ;;  %v13621_v47 = vsel %vm5035_vm6, %v5037_v25, %v5033_v19 }
 0xd0b   : > { %v5228_v9 = vpop.permute.xlu2 %5227  ;;  %v4890_v24 = vadd.f32 %v13568_v16, %v13617_v13 }
 0xd0c   : > { %v5272_v1 = vmul.f32 %v5228_v9, %v13601_v12  ;;  %v4787_v29 = vpop.permute.xlu1 %4786 }
 0xd0d   : > { %9115 = vmatmul.msk.f32.gmra.mxu3 %vm1028_vm0, %v4787_v29  ;;  %v13627_v29 = vadd.f32 %v15819_v5, %v15818_v36 }
 0xd0e   : > { %5307 = vrot.lane.b32.xlu2 %v5272_v1, %s10236_s17  ;;  %v9121_v1 = vmul.f32 -1.442695, %v4890_v24 }
 0xd0f   : > { %v4891_v51 = vadd.f32 %v13581_v42, %v13627_v29 }
 0xd10   : > { %9801 = vpow2.f32 %v9121_v1  ;;  %v4716_v1 = vpop.f32.mrf.mxu1 }
 0xd13   : > { %v4861_v49 = vpop.f32.mrf.mxu3 }
 0xd14   : > { %v13607_v28 = vadd.f32 %v13525_v56, %v4861_v49  ;;  %v9122_v49 = vmul.f32 -1.442695, %v4891_v51 }
 0xd16   : > { %5237 = vrot.lane.b32.xlu1 %v13607_v28, %s10235_s9  ;;  %v9802_v16 = vpop.eup %9801  ;;  %9803 = vpow2.f32 %v9122_v49 }
 0xd17   : > { %v4954_v50 = vadd.f32 1.0, %v9802_v16 }
 0xd19   : > { %9805 = vrcp.f32 %v4954_v50  ;;  %v5051_v49 = vand.u32 2147483648, %v4954_v50  ;;  %vm5045_vm8 = vweird.f32 %v4954_v50 }
 0xd1b   : > { %v5226_v2 = vpop.permute.xlu1 %5225 }
 0xd1c   : > { %v5271_v63 = vmul.f32 %v5226_v2, %v13611_v0  ;;  %v9123_v2 = vmul.f32 -1.442695, %v4892_v30  ;;  %v9804_v42 = vpop.eup %9803  ;;  %v5049_v30 = vand.u32 2147483647, %v4954_v50 }
 0xd1e   : > { %5305 = vrot.lane.b32.xlu0 %v5271_v63, %s10236_s17  ;;  %9807 = vpow2.f32 %v9123_v2  ;;  %v4955_v63 = vadd.f32 1.0, %v9804_v42  ;;  %vm5050_vm10 = vcmp.eq.f32.partialorder %v5049_v30, 8.507059e+37 }
 0xd1f   : > { %v9806_v22 = vpop.eup %9805 }
 0xd20   : > { %9809 = vrcp.f32 %v4955_v63  ;;  %v5041_v58 = vmul.f32 %v9806_v22, %v4954_v50  ;;  %vm5046_vm7 = vweird.f32 %v9806_v22  ;;  %vm5060_vm12 = vweird.f32 %v4955_v63 }
 0xd21   : > { %vm5047_vm9 = vmor %vm5045_vm8, %vm5046_vm7 }
 0xd22   : > { %v5042_v48 = vsub.f32 1.0, %v5041_v58 }
 0xd24   : > { %v9808_v10 = vpop.eup %9807 }
 0xd25   : > { %v13647_v41 = vadd.f32 1.0, %v9808_v10 }
 0xd26   : > { %v9810_v24 = vpop.eup %9809 }
 0xd27   : > { %9811 = vrcp.f32 %v13647_v41  ;;  %vm5061_vm11 = vweird.f32 %v9810_v24  ;;  %vm5075_vm1 = vweird.f32 %v13647_v41 }
 0xd28   : > { %vm5062_vm13 = vmor %vm5060_vm12, %vm5061_vm11 }
 0xd2b   : > { %v5230_v21 = vpop.permute.xlu0 %5229 }
 0xd2c   : > { %v5273_v9 = vmul.f32 %v5230_v21, %v13621_v47  ;;  %v5043_v21 = vmul.f32 %v9806_v22, %v5042_v48  ;;  %v5052_v48 = vor.u32 1.1754944e-38, %v5051_v49 }
 0xd2d   : > { %v9812_v8 = vpop.eup %9811 }
 0xd2e   : > { %5309 = vrot.lane.b32.xlu1 %v5273_v9, %s10236_s17  ;;  %v5056_v9 = vmul.f32 %v9810_v24, %v4955_v63  ;;  %v5044_v51 = vadd.f32 %v9806_v22, %v5043_v21  ;;  %v5071_v10 = vmul.f32 %v9812_v8, %v13647_v41  ;;  %vm5076_vm15 = vweird.f32 %v9812_v8 }
 0xd2f   : > { %vm5077_vm2 = vmor %vm5075_vm1, %vm5076_vm15 }
 0xd30   : > { %v5057_v16 = vsub.f32 1.0, %v5056_v9 }
 0xd3b   : > { %v4864_v59 = vpop.f32.mrf.mxu3 }
 0xd3c   : > { %v13638_v18 = vadd.f32 %v13525_v56, %v4864_v59  ;;  %v15822_v59 = vld [vmem:[#allocation30_spill] sm:$0xff] }
 0xd3d   : > { %v13656_v2 = vadd.f32 %v4716_v1, %v15822_v59  ;;  %v5072_v59 = vsub.f32 1.0, %v5071_v10 }
 0xd3e   : > { %5239 = vrot.lane.b32.xlu0 %v13638_v18, %s10235_s9 }
 0xd3f   : > { %v4893_v58 = vadd.f32 %v13607_v28, %v13656_v2  ;;  %v5064_v28 = vand.u32 2147483647, %v4955_v63 }
 0xd41   : > { %v9124_v1 = vmul.f32 -1.442695, %v4893_v58  ;;  %vm5065_vm14 = vcmp.eq.f32.partialorder %v5064_v28, 8.507059e+37 }
 0xd42   : > { %v5302_v5 = vpop.permute.xlu2 %5301 }
 0xd43   : > { %v4867_v43 = vpop.f32.mrf.mxu3  ;;  %v5349_v42 = vadd.f32 %v5302_v5, %v13543_v14  ;;  %v5066_v14 = vand.u32 2147483648, %v4955_v63  ;;  %v5073_v5 = vmul.f32 %v9812_v8, %v5072_v59 }
 0xd44   : > { %v13643_v34 = vadd.f32 %v13525_v56, %v4867_v43  ;;  %v5048_v43 = vsel %vm5047_vm9, %v9806_v22, %v5044_v51 }
 0xd45   : > { %9813 = vtanh.f32 %v5349_v42  ;;  %v13662_v21 = vsel %vm5050_vm10, %v5052_v48, %v5048_v43  ;;  %v5067_v49 = vor.u32 1.1754944e-38, %v5066_v14  ;;  %v5074_v10 = vadd.f32 %v9812_v8, %v5073_v5 }
 0xd46   : > { %5241 = vrot.lane.b32.xlu2 %v13643_v34, %s10235_s9  ;;  %9815 = vpow2.f32 %v9124_v1  ;;  %v5081_v48 = vand.u32 2147483648, %v13647_v41 }
 0xd4b   : > { %v4870_v19 = vpop.f32.mrf.mxu3  ;;  %v13666_v22 = vpop.eup %9813 }
 0xd4c   : > { %v13650_v25 = vadd.f32 %v13525_v56, %v4870_v19  ;;  %v5058_v19 = vmul.f32 %v9810_v24, %v5057_v16  ;;  %v5381_v58 = vsub.f32 %v13408_v15, %v13666_v22  ;;  %v5078_v15 = vsel %vm5077_vm2, %v9812_v8, %v5074_v10  ;;  %v15823_v10 = vld [vmem:[#allocation34_spill] sm:$0xff] }
 0xd4e   : > { %5243 = vrot.lane.b32.xlu1 %v13650_v25, %s10235_s9  ;;  %v5059_v62 = vadd.f32 %v9810_v24, %v5058_v19  ;;  %v5082_v19 = vor.u32 1.1754944e-38, %v5081_v48 }
 0xd50   : > { %v5063_v51 = vsel %vm5062_vm13, %v9810_v24, %v5059_v62  ;;  %v9816_v62 = vpop.eup %9815  ;;  %v5079_v24 = vand.u32 2147483647, %v13647_v41 }
 0xd51   : > { %v13671_v42 = vsel %vm5065_vm14, %v5067_v49, %v5063_v51  ;;  %v4957_v59 = vadd.f32 1.0, %v9816_v62  ;;  %v4719_v49 = vpop.f32.mrf.mxu1 }
 0xd52   : > { %vm5080_vm3 = vcmp.eq.f32.partialorder %v5079_v24, 8.507059e+37 }
 0xd53   : > { %v13683_v1 = vsel %vm5080_vm3, %v5082_v19, %v5078_v15  ;;  %9817 = vrcp.f32 %v4957_v59  ;;  %vm5090_vm5 = vweird.f32 %v4957_v59 }
 0xd59   : > { %v9818_v8 = vpop.eup %9817  ;;  %v4722_v19 = vpop.f32.mrf.mxu1 }
 0xd5a   : > { %v5232_v9 = vpop.permute.xlu1 %5231  ;;  %v5086_v51 = vmul.f32 %v9818_v8, %v4957_v59  ;;  %vm5091_vm4 = vweird.f32 %v9818_v8 }
 0xd5b   : > { %v5274_v50 = vmul.f32 %v5232_v9, %v13662_v21  ;;  %v5236_v9 = vpop.permute.xlu2 %5235  ;;  %vm5092_vm6 = vmor %vm5090_vm5, %vm5091_vm4 }
 0xd5c   : > { %v5276_v28 = vmul.f32 %v5236_v9, %v13683_v1  ;;  %v5096_v9 = vand.u32 2147483648, %v4957_v59 }
 0xd5d   : > { %5311 = vrot.lane.b32.xlu0 %v5274_v50, %s10236_s17 }
 0xd62   : > { %v4873_v16 = vpop.f32.mrf.mxu3 }
 0xd63   : > { %v13669_v30 = vadd.f32 %v13525_v56, %v4873_v16  ;;  %v5234_v43 = vpop.permute.xlu0 %5233 }
 0xd64   : > { %v5275_v63 = vmul.f32 %v5234_v43, %v13671_v42  ;;  %v5087_v43 = vsub.f32 1.0, %v5086_v51 }
 0xd65   : > { %5413 = vrot.lane.b32.xlu0 %v5381_v58, %s10237_s18  ;;  %5245 = vrot.lane.b32.xlu1 %v13669_v30, %s10235_s9 }
 0xd66   : > { %5313 = vrot.lane.b32.xlu2 %v5275_v63, %s10236_s17  ;;  %v13699_v63 = vadd.f32 %v4719_v49, %v15823_v10  ;;  %v5088_v48 = vmul.f32 %v9818_v8, %v5087_v43 }
 0xd68   : > { %v4894_v62 = vadd.f32 %v13638_v18, %v13699_v63  ;;  %v5089_v24 = vadd.f32 %v9818_v8, %v5088_v48  ;;  %v5097_v18 = vor.u32 1.1754944e-38, %v5096_v9 }
 0xd6a   : > { %v4876_v50 = vpop.f32.mrf.mxu3  ;;  %v5093_v49 = vsel %vm5092_vm6, %v9818_v8, %v5089_v24 }
 0xd6b   : > { %v13686_v14 = vadd.f32 %v13525_v56, %v4876_v50  ;;  %v9125_v50 = vmul.f32 -1.442695, %v4894_v62 }
 0xd6d   : > { %5247 = vrot.lane.b32.xlu1 %v13686_v14, %s10235_s9 }
 0xd6e   : > { %5315 = vrot.lane.b32.xlu2 %v5276_v28, %s10236_s17 }
 0xd72   : > { %v4879_v41 = vpop.f32.mrf.mxu3 }
 0xd73   : > { %v13693_v5 = vadd.f32 %v13525_v56, %v4879_v41  ;;  %v15824_v41 = vld [vmem:[#allocation38_spill] sm:$0xff] }
 0xd74   : > { %v13708_v51 = vadd.f32 %v4722_v19, %v15824_v41  ;;  %v15825_v19 = vld [vmem:[#allocation26_spill] sm:$0xff] }
 0xd75   : > { %5249 = vrot.lane.b32.xlu1 %v13693_v5, %s10235_s9 }
 0xd7a   : > { %v5304_v16 = vpop.permute.xlu1 %5303 }
 0xd7b   : > { %v5350_v58 = vadd.f32 %v5304_v16, %v13556_v55  ;;  %v5094_v55 = vand.u32 2147483647, %v4957_v59  ;;  %v4895_v16 = vadd.f32 %v13643_v34, %v13708_v51  ;;  %v4725_v59 = vpop.f32.mrf.mxu1 }
 0xd7c   : > { %v13718_v41 = vadd.f32 %v4725_v59, %v15825_v19 }
 0xd7d   : > { %9819 = vtanh.f32 %v5350_v58  ;;  %vm5095_vm7 = vcmp.eq.f32.partialorder %v5094_v55, 8.507059e+37  ;;  %v9126_v48 = vmul.f32 -1.442695, %v4895_v16 }
 0xd7e   : > { %9821 = vpow2.f32 %v9125_v50  ;;  %v13713_v43 = vsel %vm5095_vm7, %v5097_v18, %v5093_v49  ;;  %v4896_v8 = vadd.f32 %v13650_v25, %v13718_v41 }
 0xd7f   : > { %9823 = vpow2.f32 %v9126_v48 }
 0xd80   : > { %v9127_v49 = vmul.f32 -1.442695, %v4896_v8 }
 0xd83   : > { %v13703_v15 = vpop.eup %9819 }
 0xd84   : > { %v5382_v28 = vsub.f32 %v13419_v6, %v13703_v15  ;;  %v9822_v62 = vpop.eup %9821 }
 0xd85   : > { %v4958_v34 = vadd.f32 1.0, %v9822_v62  ;;  %v9824_v16 = vpop.eup %9823 }
 0xd86   : > { %5415 = vrot.lane.b32.xlu0 %v5382_v28, %s10237_s18  ;;  %v5308_v28 = vpop.permute.xlu2 %5307 }
 0xd87   : > { %v5352_v18 = vadd.f32 %v5308_v28, %v13561_v32  ;;  %v15826_v28 = vld [vmem:[#allocation31_spill] sm:$0xff]  ;;  %v5111_v19 = vand.u32 2147483648, %v4958_v34  ;;  %vm5105_vm9 = vweird.f32 %v4958_v34 }
 0xd88   : > { %v5238_v58 = vpop.permute.xlu1 %5237 }
 0xd89   : > { %v5277_v6 = vmul.f32 %v5238_v58, %v13713_v43  ;;  %v13731_v58 = vadd.f32 1.0, %v9824_v16 }
 0xd8b   : > { %5317 = vrot.lane.b32.xlu2 %v5277_v6, %s10236_s17  ;;  %v4728_v6 = vpop.f32.mrf.mxu1  ;;  %vm5120_vm13 = vweird.f32 %v13731_v58 }
 0xd90   : > { %v5306_v24 = vpop.permute.xlu0 %5305  ;;  %v4882_v50 = vpop.f32.mrf.mxu3 }
 0xd91   : > { %v5351_v9 = vadd.f32 %v5306_v24, %v13574_v7  ;;  %v13724_v55 = vadd.f32 %v13525_v56, %v4882_v50 }
 0xd93   : > { %9825 = vtanh.f32 %v5351_v9  ;;  %5251 = vrot.lane.b32.xlu1 %v13724_v55, %s10235_s9 }
 0xd94   : > { %9827 = vrcp.f32 %v4958_v34 }
 0xd95   : > { %9829 = vpow2.f32 %v9127_v49  ;;  %v13745_v49 = vadd.f32 %v4728_v6, %v15826_v28 }
 0xd96   : > { %9831 = vtanh.f32 %v5352_v18 }
 0xd97   : > { %9833 = vrcp.f32 %v13731_v58  ;;  %v4897_v18 = vadd.f32 %v13669_v30, %v13745_v49  ;;  %v5109_v30 = vand.u32 2147483647, %v4958_v34 }
 0xd99   : > { %v13729_v25 = vpop.eup %9825  ;;  %vm5110_vm11 = vcmp.eq.f32.partialorder %v5109_v30, 8.507059e+37 }
 0xd9a   : > { %v5383_v7 = vsub.f32 %v13436_v52, %v13729_v25  ;;  %v9828_v56 = vpop.eup %9827 }
 0xd9b   : > { %v9830_v48 = vpop.eup %9829  ;;  %v5101_v59 = vmul.f32 %v9828_v56, %v4958_v34  ;;  %vm5106_vm8 = vweird.f32 %v9828_v56 }
 0xd9c   : > { %5417 = vrot.lane.b32.xlu0 %v5383_v7, %s10237_s18  ;;  %v13737_v62 = vpop.eup %9831  ;;  %v13739_v8 = vadd.f32 1.0, %v9830_v48  ;;  %vm5107_vm10 = vmor %vm5105_vm9, %vm5106_vm8 }
 0xd9d   : > { %v5384_v9 = vsub.f32 %v13441_v3, %v13737_v62  ;;  %v5102_v50 = vsub.f32 1.0, %v5101_v59  ;;  %v9834_v52 = vpop.eup %9833  ;;  %v9128_v3 = vmul.f32 -1.442695, %v4897_v18 }
 0xd9e   : > { %v5116_v16 = vmul.f32 %v9834_v52, %v13731_v58  ;;  %vm5121_vm12 = vweird.f32 %v9834_v52  ;;  %vm5135_vm2 = vweird.f32 %v13739_v8 }
 0xd9f   : > { %v5103_v7 = vmul.f32 %v9828_v56, %v5102_v50  ;;  %vm5122_vm14 = vmor %vm5120_vm13, %vm5121_vm12 }
 0xda0   : > { %v5310_v32 = vpop.permute.xlu1 %5309  ;;  %v5117_v59 = vsub.f32 1.0, %v5116_v16  ;;  %v5242_v30 = vpop.permute.xlu2 %5241 }
 0xda1   : > { %v5353_v24 = vadd.f32 %v5310_v32, %v13591_v27  ;;  %v4731_v27 = vpop.f32.mrf.mxu1  ;;  %v5104_v32 = vadd.f32 %v9828_v56, %v5103_v7 }
 0xda2   : > { %v5118_v18 = vmul.f32 %v9834_v52, %v5117_v59 }
 0xda3   : > { %9835 = vtanh.f32 %v5353_v24  ;;  %v5108_v16 = vsel %vm5107_vm10, %v9828_v56, %v5104_v32 }
 0xda4   : > { %5419 = vrot.lane.b32.xlu0 %v5384_v9, %s10237_s18  ;;  %9837 = vrcp.f32 %v13739_v8  ;;  %v15827_v9 = vld [vmem:[#allocation35_spill] sm:$0xff]  ;;  %v5119_v39 = vadd.f32 %v9834_v52, %v5118_v18 }
 0xda5   : > { %v13757_v28 = vadd.f32 %v4731_v27, %v15827_v9  ;;  %9839 = vpow2.f32 %v9128_v3  ;;  %v15828_v3 = vld [vmem:[#allocation39_spill] sm:$0xff] }
 0xda6   : > { %v5123_v32 = vsel %vm5122_vm14, %v9834_v52, %v5119_v39 }
 0xda7   : > { %v4898_v50 = vadd.f32 %v13686_v14, %v13757_v28  ;;  %v5126_v14 = vand.u32 2147483648, %v13731_v58 }
 0xda9   : > { %v13752_v48 = vpop.eup %9835  ;;  %v4734_v7 = vpop.f32.mrf.mxu1  ;;  %v9129_v36 = vmul.f32 -1.442695, %v4898_v50  ;;  %v5127_v50 = vor.u32 1.1754944e-38, %v5126_v14 }
 0xdaa   : > { %v5385_v6 = vsub.f32 %v13446_v33, %v13752_v48  ;;  %v9838_v24 = vpop.eup %9837  ;;  %v5112_v33 = vor.u32 1.1754944e-38, %v5111_v19  ;;  %v13768_v59 = vadd.f32 %v4734_v7, %v15828_v3  ;;  %v5124_v19 = vand.u32 2147483647, %v13731_v58 }
 0xdab   : > { %v5131_v10 = vmul.f32 %v9838_v24, %v13739_v8  ;;  %v9840_v53 = vpop.eup %9839  ;;  %9841 = vpow2.f32 %v9129_v36  ;;  %vm5136_vm1 = vweird.f32 %v9838_v24  ;;  %v5141_v36 = vand.u32 2147483648, %v13739_v8 }
 0xdac   : > { %5421 = vrot.lane.b32.xlu0 %v5385_v6, %s10237_s18  ;;  %v13763_v27 = vsel %vm5110_vm11, %v5112_v33, %v5108_v16  ;;  %v4899_v56 = vadd.f32 %v13693_v5, %v13768_v59  ;;  %vm5125_vm15 = vcmp.eq.f32.partialorder %v5124_v19, 8.507059e+37  ;;  %vm5137_vm3 = vmor %vm5135_vm2, %vm5136_vm1 }
 0xdad   : > { %v5132_v6 = vsub.f32 1.0, %v5131_v10  ;;  %v4961_v10 = vadd.f32 1.0, %v9840_v53  ;;  %v13775_v18 = vsel %vm5125_vm15, %v5127_v50, %v5123_v32  ;;  %v5139_v53 = vand.u32 2147483647, %v13739_v8 }
 0xdae   : > { %v9130_v16 = vmul.f32 -1.442695, %v4899_v56  ;;  %v5279_v33 = vmul.f32 %v5242_v30, %v13775_v18  ;;  %v5142_v52 = vor.u32 1.1754944e-38, %v5141_v36 }
 0xdaf   : > { %9843 = vrcp.f32 %v4961_v10  ;;  %vm5140_vm4 = vcmp.eq.f32.partialorder %v5139_v53, 8.507059e+37  ;;  %vm5150_vm6 = vweird.f32 %v4961_v10 }
 0xdb0   : > { %v5240_v9 = vpop.permute.xlu0 %5239  ;;  %9845 = vpow2.f32 %v9130_v16 }
 0xdb1   : > { %v5278_v34 = vmul.f32 %v5240_v9, %v13763_v27  ;;  %v5133_v9 = vmul.f32 %v9838_v24, %v5132_v6  ;;  %v9842_v58 = vpop.eup %9841 }
 0xdb2   : > { %v13782_v39 = vadd.f32 1.0, %v9842_v58  ;;  %v4737_v58 = vpop.f32.mrf.mxu1 }
 0xdb3   : > { %5319 = vrot.lane.b32.xlu2 %v5278_v34, %s10236_s17  ;;  %v5134_v7 = vadd.f32 %v9838_v24, %v5133_v9 }
 0xdb4   : > { %9847 = vrcp.f32 %v13782_v39  ;;  %vm5165_vm10 = vweird.f32 %v13782_v39 }
 0xdb5   : > { %v5138_v5 = vsel %vm5137_vm3, %v9838_v24, %v5134_v7  ;;  %v9844_v34 = vpop.eup %9843 }
 0xdb6   : > { %v13784_v6 = vsel %vm5140_vm4, %v5142_v52, %v5138_v5  ;;  %v9846_v56 = vpop.eup %9845  ;;  %v5146_v32 = vmul.f32 %v9844_v34, %v4961_v10  ;;  %vm5151_vm5 = vweird.f32 %v9844_v34  ;;  %v5156_v52 = vand.u32 2147483648, %v4961_v10 }
 0xdb7   : > { %v13789_v8 = vadd.f32 1.0, %v9846_v56  ;;  %vm5152_vm7 = vmor %vm5150_vm6, %vm5151_vm5 }
 0xdb8   : > { %v5147_v30 = vsub.f32 1.0, %v5146_v32 }
 0xdb9   : > { %9849 = vrcp.f32 %v13789_v8  ;;  %vm5180_vm14 = vweird.f32 %v13789_v8 }
 0xdba   : > { %v9848_v9 = vpop.eup %9847  ;;  %v5148_v50 = vmul.f32 %v9844_v34, %v5147_v30 }
 0xdbb   : > { %5321 = vrot.lane.b32.xlu2 %v5279_v33, %s10236_s17  ;;  %v5161_v24 = vmul.f32 %v9848_v9, %v13782_v39  ;;  %vm5166_vm9 = vweird.f32 %v9848_v9 }
 0xdbc   : > { %v5149_v53 = vadd.f32 %v9844_v34, %v5148_v50  ;;  %v5157_v50 = vor.u32 1.1754944e-38, %v5156_v52  ;;  %v5169_v52 = vand.u32 2147483647, %v13782_v39  ;;  %vm5167_vm11 = vmor %vm5165_vm10, %vm5166_vm9 }
 0xdbd   : > { %v5162_v7 = vsub.f32 1.0, %v5161_v24 }
 0xdbe   : > { %v5153_v3 = vsel %vm5152_vm7, %v9844_v34, %v5149_v53  ;;  %vm5170_vm12 = vcmp.eq.f32.partialorder %v5169_v52, 8.507059e+37 }
 0xdbf   : > { %v13794_v5 = vpop.eup %9849  ;;  %v5163_v32 = vmul.f32 %v9848_v9, %v5162_v7 }
 0xdc0   : > { %v5244_v14 = vpop.permute.xlu1 %5243  ;;  %v5314_v16 = vpop.permute.xlu2 %5313  ;;  %v5176_v24 = vmul.f32 %v13794_v5, %v13789_v8  ;;  %vm5181_vm13 = vweird.f32 %v13794_v5 }
 0xdc1   : > { %v5280_v19 = vmul.f32 %v5244_v14, %v13784_v6  ;;  %v5154_v14 = vand.u32 2147483647, %v4961_v10  ;;  %v5355_v30 = vadd.f32 %v5314_v16, %v13627_v29  ;;  %v5164_v45 = vadd.f32 %v9848_v9, %v5163_v32  ;;  %vm5182_vm15 = vmor %vm5180_vm14, %vm5181_vm13 }
 0xdc2   : > { %v5177_v16 = vsub.f32 1.0, %v5176_v24 }
 0xdc3   : > { %5323 = vrot.lane.b32.xlu1 %v5280_v19, %s10236_s17  ;;  %v15829_v19 = vld [vmem:[#allocation42_spill] sm:$0xff]  ;;  %vm5155_vm8 = vcmp.eq.f32.partialorder %v5154_v14, 8.507059e+37  ;;  %v5168_v14 = vsel %vm5167_vm11, %v9848_v9, %v5164_v45  ;;  %v5184_v9 = vand.u32 2147483647, %v13789_v8 }
 0xdc4   : > { %v13797_v56 = vadd.f32 %v4737_v58, %v15829_v19  ;;  %v5178_v32 = vmul.f32 %v13794_v5, %v5177_v16 }
 0xdc5   : > { %vm5185_vm1 = vcmp.eq.f32.partialorder %v5184_v9, 8.507059e+37 }
 0xdc8   : > { %v5316_v53 = vpop.permute.xlu2 %5315 }
 0xdcf   : > { %v5312_v33 = vpop.permute.xlu0 %5311 }
 0xdd0   : > { %v5354_v36 = vadd.f32 %v5312_v33, %v13617_v13  ;;  %v4900_v13 = vadd.f32 %v13724_v55, %v13797_v56  ;;  %v13804_v33 = vsel %vm5155_vm8, %v5157_v50, %v5153_v3  ;;  %v5171_v3 = vand.u32 2147483648, %v13782_v39 }
 0xdd1   : > { %v5179_v50 = vadd.f32 %v13794_v5, %v5178_v32 }
 0xdd2   : > { %9851 = vtanh.f32 %v5354_v36  ;;  %v9131_v7 = vmul.f32 -1.442695, %v4900_v13 }
 0xdd3   : > { %9853 = vtanh.f32 %v5355_v30 }
 0xdd4   : > { %9855 = vpow2.f32 %v9131_v7 }
 0xdd7   : > { %v5246_v36 = vpop.permute.xlu1 %5245  ;;  %v5414_v10 = vpop.permute.xlu0 %5413 }
 0xdd8   : > { %v13806_v58 = vpop.eup %9851  ;;  %v5281_v29 = vmul.f32 %v5246_v36, %v13804_v33  ;;  %v5461_v34 = vmul.f32 %v5414_v10, %v13565_v54  ;;  %v5356_v54 = vadd.f32 %v5316_v53, %v13633_v20  ;;  %v5186_v20 = vand.u32 2147483648, %v13789_v8 }
 0xdd9   : > { %v5386_v55 = vsub.f32 %v13457_v23, %v13806_v58  ;;  %v5172_v23 = vor.u32 1.1754944e-38, %v5171_v3  ;;  %v13821_v30 = vpop.eup %9853  ;;  %v5183_v10 = vsel %vm5182_vm15, %v13794_v5, %v5179_v50 }
 0xdda   : > { %5325 = vrot.lane.b32.xlu1 %v5281_v29, %s10236_s17  ;;  %5493 = vrot.lane.b32.xlu0 %v5461_v34, %s10238_s19  ;;  %9857 = vtanh.f32 %v5356_v54  ;;  %v5387_v45 = vsub.f32 %v13463_v57, %v13821_v30  ;;  %v9856_v36 = vpop.eup %9855  ;;  %v5187_v29 = vor.u32 1.1754944e-38, %v5186_v20 }
 0xddb   : > { %5423 = vrot.lane.b32.xlu2 %v5386_v55, %s10237_s18  ;;  %v13823_v24 = vsel %vm5170_vm12, %v5172_v23, %v5168_v14  ;;  %v4964_v16 = vadd.f32 1.0, %v9856_v36 }
 0xddc   : > { %v13839_v53 = vsel %vm5185_vm1, %v5187_v29, %v5183_v10 }
 0xddd   : > { %vm5195_vm3 = vweird.f32 %v4964_v16  ;;  %v5199_v50 = vand.u32 2147483647, %v4964_v16 }
 0xddf   : > { %v5248_v13 = vpop.permute.xlu1 %5247  ;;  %vm5200_vm5 = vcmp.eq.f32.partialorder %v5199_v50, 8.507059e+37 }
 0xde0   : > { %v5282_v39 = vmul.f32 %v5248_v13, %v13823_v24  ;;  %v13836_v34 = vpop.eup %9857 }
 0xde1   : > { %v5388_v8 = vsub.f32 %v13473_v61, %v13836_v34 }
 0xde2   : > { %5327 = vrot.lane.b32.xlu1 %v5282_v39, %s10236_s17  ;;  %v5201_v39 = vand.u32 2147483648, %v4964_v16 }
 0xde3   : > { %5425 = vrot.lane.b32.xlu2 %v5387_v45, %s10237_s18 }
 0xde4   : > { %v5202_v20 = vor.u32 1.1754944e-38, %v5201_v39 }
 0xde5   : > { %v5318_v7 = vpop.permute.xlu2 %5317 }
 0xde6   : > { %v5357_v57 = vadd.f32 %v5318_v7, %v13656_v2 }
 0xde7   : > { %v5250_v55 = vpop.permute.xlu1 %5249 }
 0xde8   : > { %v5283_v3 = vmul.f32 %v5250_v55, %v13839_v53  ;;  %9859 = vtanh.f32 %v5357_v57 }
 0xde9   : > { %9861 = vrcp.f32 %v4964_v16 }
 0xdea   : > { %5329 = vrot.lane.b32.xlu1 %v5283_v3, %s10236_s17 }
 0xdeb   : > { %5427 = vrot.lane.b32.xlu2 %v5388_v8, %s10237_s18 }
 0xdee   : > { %v13846_v5 = vpop.eup %9859 }
 0xdef   : > { %v9862_v52 = vpop.eup %9861  ;;  %v5389_v2 = vsub.f32 %v13479_v37, %v13846_v5 }
 0xdf0   : > { %v5191_v54 = vmul.f32 %v9862_v52, %v4964_v16  ;;  %vm5196_vm2 = vweird.f32 %v9862_v52 }
 0xdf1   : > { %vm5197_vm4 = vmor %vm5195_vm3, %vm5196_vm2 }
 0xdf2   : > { %v5192_v14 = vsub.f32 1.0, %v5191_v54 }
 0xdf3   : > { %5429 = vrot.lane.b32.xlu2 %v5389_v2, %s10237_s18 }
 0xdf4   : > { %v5193_v61 = vmul.f32 %v9862_v52, %v5192_v14 }
 0xdf6   : > { %v5194_v13 = vadd.f32 %v9862_v52, %v5193_v61 }
 0xdf8   : > { %v5416_v32 = vpop.permute.xlu0 %5415  ;;  %v5198_v45 = vsel %vm5197_vm4, %v9862_v52, %v5194_v13 }
 0xdf9   : > { %v5462_v23 = vmul.f32 %v5416_v32, %v13597_v44  ;;  %v13853_v37 = vsel %vm5200_vm5, %v5202_v20, %v5198_v45 }
 0xdfb   : > { %5495 = vrot.lane.b32.xlu0 %v5462_v23, %s10238_s19 }
 0xe05   : > { %v5252_v9 = vpop.permute.xlu1 %5251 }
 0xe06   : > { %v5284_v36 = vmul.f32 %v5252_v9, %v13853_v37 }
 0xe08   : > { %5331 = vrot.lane.b32.xlu1 %v5284_v36, %s10236_s17 }
 0xe0d   : > { %v5320_v44 = vpop.permute.xlu2 %5319 }
 0xe0e   : > { %v5418_v10 = vpop.permute.xlu0 %5417  ;;  %v5358_v29 = vadd.f32 %v5320_v44, %v13699_v63 }
 0xe0f   : > { %v5463_v7 = vmul.f32 %v5418_v10, %v13611_v0 }
 0xe10   : > { %9863 = vtanh.f32 %v5358_v29 }
 0xe11   : > { %5497 = vrot.lane.b32.xlu0 %v5463_v7, %s10238_s19 }
 0xe15   : > { %v5322_v16 = vpop.permute.xlu2 %5321 }
 0xe16   : > { %v5420_v57 = vpop.permute.xlu0 %5419  ;;  %v13860_v55 = vpop.eup %9863  ;;  %v5359_v3 = vadd.f32 %v5322_v16, %v13708_v51 }
 0xe17   : > { %v5464_v8 = vmul.f32 %v5420_v57, %v13601_v12  ;;  %v5390_v52 = vsub.f32 %v13490_v31, %v13860_v55 }
 0xe18   : > { %9865 = vtanh.f32 %v5359_v3 }
 0xe19   : > { %5499 = vrot.lane.b32.xlu0 %v5464_v8, %s10238_s19  ;;  %5431 = vrot.lane.b32.xlu2 %v5390_v52, %s10237_s18 }
 0xe1e   : > { %v5422_v0 = vpop.permute.xlu0 %5421  ;;  %v13868_v63 = vpop.eup %9865 }
 0xe1f   : > { %v5465_v2 = vmul.f32 %v5422_v0, %v13621_v47  ;;  %v5391_v54 = vsub.f32 %v13498_v40, %v13868_v63 }
 0xe21   : > { %5501 = vrot.lane.b32.xlu0 %v5465_v2, %s10238_s19  ;;  %5433 = vrot.lane.b32.xlu1 %v5391_v54, %s10237_s18 }
 0xe35   : > { %v5424_v12 = vpop.permute.xlu2 %5423  ;;  %v5324_v51 = vpop.permute.xlu1 %5323 }
 0xe36   : > { %v5466_v31 = vmul.f32 %v5424_v12, %v13662_v21  ;;  %v5360_v14 = vadd.f32 %v5324_v51, %v13718_v41 }
 0xe38   : > { %5503 = vrot.lane.b32.xlu2 %v5466_v31, %s10238_s19  ;;  %9867 = vtanh.f32 %v5360_v14 }
 0xe3d   : > { %v5426_v32 = vpop.permute.xlu2 %5425 }
 0xe3e   : > { %v5467_v23 = vmul.f32 %v5426_v32, %v13671_v42  ;;  %v13879_v47 = vpop.eup %9867 }
 0xe3f   : > { %v5392_v40 = vsub.f32 %v13495_v17, %v13879_v47 }
 0xe40   : > { %5505 = vrot.lane.b32.xlu2 %v5467_v23, %s10238_s19 }
 0xe41   : > { %5435 = vrot.lane.b32.xlu1 %v5392_v40, %s10237_s18 }
 0xe45   : > { %v5428_v61 = vpop.permute.xlu2 %5427 }
 0xe46   : > { %v5468_v21 = vmul.f32 %v5428_v61, %v13683_v1 }
 0xe48   : > { %5507 = vrot.lane.b32.xlu2 %v5468_v21, %s10238_s19 }
 0xe4c   : > { %v5326_v41 = vpop.permute.xlu1 %5325  ;;  %v5494_v13 = vpop.permute.xlu0 %5493 }
 0xe4d   : > { %v5361_v39 = vadd.f32 %v5326_v41, %v13745_v49  ;;  %v13889_v42 = vadd.f32 %v13666_v22, %v5494_v13  ;;  %v5430_v50 = vpop.permute.xlu2 %5429 }
 0xe4e   : > { %v5469_v45 = vmul.f32 %v5430_v50, %v13713_v43 }
 0xe4f   : > { %9869 = vtanh.f32 %v5361_v39  ;;  %5703 = vrot.lane.b32.xlu0 %v13889_v42, %s10235_s9 }
 0xe50   : > { %5509 = vrot.lane.b32.xlu2 %v5469_v45, %s10238_s19 }
 0xe54   : > { %v5328_v17 = vpop.permute.xlu1 %5327 }
 0xe55   : > { %v13895_v1 = vpop.eup %9869  ;;  %v5362_v20 = vadd.f32 %v5328_v17, %v13757_v28 }
 0xe56   : > { %v5393_v49 = vsub.f32 %v13506_v46, %v13895_v1 }
 0xe57   : > { %9871 = vtanh.f32 %v5362_v20 }
 0xe58   : > { %5437 = vrot.lane.b32.xlu1 %v5393_v49, %s10237_s18 }
 0xe5c   : > { %v5330_v22 = vpop.permute.xlu1 %5329 }
 0xe5d   : > { %v13901_v9 = vpop.eup %9871  ;;  %v5363_v43 = vadd.f32 %v5330_v22, %v13768_v59 }
 0xe5e   : > { %v5394_v36 = vsub.f32 %v13512_v11, %v13901_v9 }
 0xe5f   : > { %9873 = vtanh.f32 %v5363_v43 }
 0xe60   : > { %5439 = vrot.lane.b32.xlu1 %v5394_v36, %s10237_s18 }
 0xe65   : > { %v13907_v44 = vpop.eup %9873 }
 0xe66   : > { %v5395_v28 = vsub.f32 %v13518_v60, %v13907_v44 }
 0xe68   : > { %5441 = vrot.lane.b32.xlu1 %v5395_v28, %s10237_s18 }
 0xe6d   : > { %v5496_v46 = vpop.permute.xlu0 %5495 }
 0xe6e   : > { %v13913_v10 = vadd.f32 %v13703_v15, %v5496_v46 }
 0xe70   : > { %5705 = vrot.lane.b32.xlu0 %v13913_v10, %s10235_s9 }
 0xe73   : > { %v5432_v59 = vpop.permute.xlu2 %5431 }
 0xe74   : > { %v5470_v11 = vmul.f32 %v5432_v59, %v13763_v27 }
 0xe76   : > { %5511 = vrot.lane.b32.xlu2 %v5470_v11, %s10238_s19 }
 0xe7a   : > { %v5332_v29 = vpop.permute.xlu1 %5331 }
 0xe7b   : > { %v5364_v7 = vadd.f32 %v5332_v29, %v13797_v56 }
 0xe7d   : > { %9875 = vtanh.f32 %v5364_v7 }
 0xe83   : > { %v5498_v16 = vpop.permute.xlu0 %5497  ;;  %v13920_v60 = vpop.eup %9875 }
 0xe84   : > { %v13923_v57 = vadd.f32 %v13729_v25, %v5498_v16  ;;  %v5396_v15 = vsub.f32 %v13533_v38, %v13920_v60 }
 0xe86   : > { %5707 = vrot.lane.b32.xlu0 %v13923_v57, %s10235_s9  ;;  %5443 = vrot.lane.b32.xlu1 %v5396_v15, %s10237_s18 }
 0xe8b   : > { %v5500_v27 = vpop.permute.xlu0 %5499 }
 0xe8c   : > { %v13931_v3 = vadd.f32 %v13737_v62, %v5500_v27 }
 0xe8e   : > { %5709 = vrot.lane.b32.xlu0 %v13931_v3, %s10235_s9 }
 0xe92   : > { %v5504_v56 = vpop.permute.xlu2 %5503 }
 0xe93   : > { %v5502_v8 = vpop.permute.xlu0 %5501  ;;  %v5434_v52 = vpop.permute.xlu1 %5433  ;;  %v13946_v2 = vadd.f32 %v13806_v58, %v5504_v56 }
 0xe94   : > { %v13936_v25 = vadd.f32 %v13752_v48, %v5502_v8  ;;  %v5471_v38 = vmul.f32 %v5434_v52, %v13775_v18  ;;  %v15830_v8 = vld [vmem:[#allocation60_spill] sm:$0xff] }
 0xe95   : > { %v14037_v52 = vadd.f32 %v15830_v8, %v15774_v4 }
 0xe96   : > { %5711 = vrot.lane.b32.xlu0 %v13936_v25, %s10235_s9  ;;  %5513 = vrot.lane.b32.xlu2 %v5471_v38, %s10238_s19 }
 0xe9a   : > { %v5506_v0 = vpop.permute.xlu2 %5505 }
 0xe9b   : > { %v13943_v62 = vadd.f32 %v13821_v30, %v5506_v0 }
 0xe9e   : > { %5713 = vrot.lane.b32.xlu0 %v13946_v2, %s10235_s9  ;;  %5715 = vrot.lane.b32.xlu2 %v13943_v62, %s10235_s9 }
 0xea2   : > { %v5508_v54 = vpop.permute.xlu2 %5507 }
 0xea3   : > { %v13955_v12 = vadd.f32 %v13836_v34, %v5508_v54  ;;  %v15831_v54 = vld [vmem:[#allocation61_spill] sm:$0xff] }
 0xeaa   : > { %v5510_v31 = vpop.permute.xlu2 %5509 }
 0xeb3   : > { %v5436_v48 = vpop.permute.xlu1 %5435 }
 0xeb4   : > { %v5472_v18 = vmul.f32 %v5436_v48, %v13784_v6  ;;  %v13963_v6 = vadd.f32 %v13846_v5, %v5510_v31 }
 0xeb6   : > { %5515 = vrot.lane.b32.xlu1 %v5472_v18, %s10238_s19 }
 0xebe   : > { %5717 = vrot.lane.b32.xlu1 %v13955_v12, %s10235_s9 }
 0xec1   : > { %v5704_v58 = vpop.permute.xlu0 %5703 }
 0xec2   : > { %9164 = vmatmul.msk.f32.vlgmr.msrb.gmra.mxu0 %vm1028_vm0, %v5704_v58  ;;  %v14047_v58 = vadd.f32 %v15831_v54, %v15776_v35 }
 0xeca   : > { %v5438_v30 = vpop.permute.xlu1 %5437 }
 0xecb   : > { %v5473_v51 = vmul.f32 %v5438_v30, %v13804_v33 }
 0xecd   : > { %5517 = vrot.lane.b32.xlu0 %v5473_v51, %s10238_s19 }
 0xed0   : > { %v5512_v34 = vpop.permute.xlu2 %5511 }
 0xed1   : > { %v13970_v40 = vadd.f32 %v13860_v55, %v5512_v34 }
 0xed2   : > { %v5440_v14 = vpop.permute.xlu1 %5439 }
 0xed3   : > { %v5474_v32 = vmul.f32 %v5440_v14, %v13823_v24 }
 0xed5   : > { %5519 = vrot.lane.b32.xlu2 %v5474_v32, %s10238_s19  ;;  %5719 = vrot.lane.b32.xlu0 %v13963_v6, %s10235_s9 }
 0xeda   : > { %v5442_v23 = vpop.permute.xlu1 %5441 }
 0xedb   : > { %v5475_v33 = vmul.f32 %v5442_v23, %v13839_v53 }
 0xedd   : > { %5521 = vrot.lane.b32.xlu1 %v5475_v33, %s10238_s19  ;;  %5721 = vrot.lane.b32.xlu2 %v13970_v40, %s10235_s9 }
 0xee2   : > { %v5706_v5 = vpop.permute.xlu0 %5705 }
 0xee3   : > { %9165 = vmatmul.msk.f32.gmra.mxu0 %vm1028_vm0, %v5706_v5 }
 0xef0   : > { %v5514_v24 = vpop.permute.xlu2 %5513 }
 0xef1   : > { %v13978_v61 = vadd.f32 %v13868_v63, %v5514_v24 }
 0xef3   : > { %5723 = vrot.lane.b32.xlu1 %v13978_v61, %s10235_s9 }
 0xef8   : > { %v5708_v21 = vpop.permute.xlu0 %5707  ;;  %v5444_v55 = vpop.permute.xlu1 %5443 }
 0xef9   : > { %9166 = vmatmul.msk.f32.gmra.mxu0 %vm1028_vm0, %v5708_v21  ;;  %v5476_v53 = vmul.f32 %v5444_v55, %v13853_v37  ;;  %v5716_v63 = vpop.permute.xlu2 %5715 }
 0xefb   : > { %5523 = vrot.lane.b32.xlu0 %v5476_v53, %s10238_s19 }
 0xf00   : > { %v5710_v41 = vpop.permute.xlu0 %5709 }
 0xf01   : > { %9167 = vmatmul.msk.f32.gmra.mxu0 %vm1028_vm0, %v5710_v41 }
 0xf08   : > { %v5712_v13 = vpop.permute.xlu0 %5711 }
 0xf09   : > { %9168 = vmatmul.msk.f32.gmra.mxu0 %vm1028_vm0, %v5712_v13 }
 0xf10   : > { %v5714_v39 = vpop.permute.xlu0 %5713 }
 0xf11   : > { %9169 = vmatmul.msk.f32.gmra.mxu0 %vm1028_vm0, %v5714_v39 }
 0xf19   : > { %9170 = vmatmul.msk.f32.gmra.mxu0 %vm1028_vm0, %v5716_v63 }
 0xf28   : > { %v5516_v50 = vpop.permute.xlu1 %5515 }
 0xf29   : > { %v13990_v45 = vadd.f32 %v13879_v47, %v5516_v50  ;;  %v14003_v47 = vld [vmem:[%s15597_s1 + $0x21] ss:$0 sm:$0xff] }
 0xf2b   : > { %5725 = vrot.lane.b32.xlu2 %v13990_v45, %s10235_s9 }
 0xf2f   : > { %v5520_v37 = vpop.permute.xlu2 %5519 }
 0xf30   : > { %v13995_v17 = vadd.f32 %v13901_v9, %v5520_v37  ;;  %v5718_v20 = vpop.permute.xlu1 %5717 }
 0xf31   : > { %9171 = vmatmul.msk.f32.gmra.mxu0 %vm1028_vm0, %v5718_v20 }
 0xf32   : > { %5729 = vrot.lane.b32.xlu1 %v13995_v17, %s10235_s9 }
 0xf37   : > { %v5722_v28 = vpop.permute.xlu2 %5721 }
 0xf3f   : > { %v5784_v49 = vpop.f32.mrf.mxu0  ;;  %v5518_v22 = vpop.permute.xlu0 %5517 }
 0xf40   : > { %v5785_v43 = vadd.f32 %v14003_v47, %v5784_v49  ;;  %v14007_v36 = vadd.f32 %v13895_v1, %v5518_v22  ;;  %v15832_v22 = vld [vmem:[#allocation64_spill] sm:$0xff] }
 0xf42   : > { %6168 = vrot.lane.b32.xlu1 %v5785_v43, %s10235_s9  ;;  %5727 = vrot.lane.b32.xlu0 %v14007_v36, %s10235_s9 }
 0xf47   : > { %v5720_v9 = vpop.permute.xlu0 %5719 }
 0xf48   : > { %9172 = vmatmul.msk.f32.gmra.mxu0 %vm1028_vm0, %v5720_v9 }
 0xf4f   : > { %v5522_v46 = vpop.permute.xlu1 %5521 }
 0xf50   : > { %v14014_v59 = vadd.f32 %v13907_v44, %v5522_v46  ;;  %9173 = vmatmul.msk.f32.gmra.mxu0 %vm1028_vm0, %v5722_v28 }
 0xf52   : > { %5731 = vrot.lane.b32.xlu2 %v14014_v59, %s10235_s9 }
 0xf60   : > { %v5787_v1 = vpop.f32.mrf.mxu0 }
 0xf61   : > { %v5788_v11 = vadd.f32 %v14003_v47, %v5787_v1 }
 0xf63   : > { %6170 = vrot.lane.b32.xlu2 %v5788_v11, %s10235_s9  ;;  %v5833_v30 = vadd.f32 %v5788_v11, %v14047_v58 }
 0xf65   : > { %v5724_v29 = vpop.permute.xlu1 %5723  ;;  %v9181_v14 = vmul.f32 -1.442695, %v5833_v30 }
 0xf66   : > { %9174 = vmatmul.msk.f32.gmra.mxu0 %vm1028_vm0, %v5724_v29 }
 0xf6d   : > { %v5524_v7 = vpop.permute.xlu0 %5523 }
 0xf6e   : > { %v14023_v16 = vadd.f32 %v13920_v60, %v5524_v7  ;;  %v5832_v60 = vadd.f32 %v5785_v43, %v14037_v52  ;;  %v14062_v43 = vadd.f32 %v15832_v22, %v15814_v26 }
 0xf70   : > { %5733 = vrot.lane.b32.xlu0 %v14023_v16, %s10235_s9  ;;  %v9180_v48 = vmul.f32 -1.442695, %v5832_v60 }
 0xf72   : > { %9877 = vpow2.f32 %v9180_v48  ;;  %v15834_v48 = vld [vmem:[#allocation62_spill] sm:$0xff] }
 0xf73   : > { %9879 = vpow2.f32 %v9181_v14 }
 0xf76   : > { %v5790_v44 = vpop.f32.mrf.mxu0 }
 0xf77   : > { %v14028_v15 = vadd.f32 %v14003_v47, %v5790_v44 }
 0xf78   : > { %v9878_v32 = vpop.eup %9877 }
 0xf79   : > { %6172 = vrot.lane.b32.xlu0 %v14028_v15, %s10235_s9  ;;  %v5896_v34 = vadd.f32 1.0, %v9878_v32  ;;  %v9880_v5 = vpop.eup %9879 }
 0xf7a   : > { %v5897_v24 = vadd.f32 1.0, %v9880_v5 }
 0xf7b   : > { %9881 = vrcp.f32 %v5896_v34  ;;  %v5923_v37 = vand.u32 2147483648, %v5896_v34  ;;  %vm5917_vm7 = vweird.f32 %v5896_v34  ;;  %v5921_v49 = vand.u32 2147483647, %v5896_v34 }
 0xf7c   : > { %9883 = vrcp.f32 %v5897_v24  ;;  %vm5932_vm11 = vweird.f32 %v5897_v24  ;;  %v5936_v54 = vand.u32 2147483647, %v5897_v24 }
 0xf7d   : > { %v5924_v46 = vor.u32 1.1754944e-38, %v5923_v37  ;;  %vm5922_vm9 = vcmp.eq.f32.partialorder %v5921_v49, 8.507059e+37 }
 0xf7e   : > { %v5793_v27 = vpop.f32.mrf.mxu0  ;;  %vm5937_vm13 = vcmp.eq.f32.partialorder %v5936_v54, 8.507059e+37 }
 0xf7f   : > { %v14033_v56 = vadd.f32 %v14003_v47, %v5793_v27 }
 0xf81   : > { %6174 = vrot.lane.b32.xlu1 %v14033_v56, %s10235_s9  ;;  %v9882_v21 = vpop.eup %9881 }
 0xf82   : > { %v5913_v55 = vmul.f32 %v9882_v21, %v5896_v34  ;;  %v9884_v41 = vpop.eup %9883  ;;  %vm5918_vm6 = vweird.f32 %v9882_v21 }
 0xf83   : > { %v5928_v39 = vmul.f32 %v9884_v41, %v5897_v24  ;;  %vm5919_vm8 = vmor %vm5917_vm7, %vm5918_vm6  ;;  %vm5933_vm10 = vweird.f32 %v9884_v41 }
 0xf84   : > { %v5914_v53 = vsub.f32 1.0, %v5913_v55  ;;  %vm5934_vm12 = vmor %vm5932_vm11, %vm5933_vm10  ;;  %v15835_v55 = vld [vmem:[#allocation10_spill] sm:$0xff] }
 0xf85   : > { %v5726_v38 = vpop.permute.xlu2 %5725  ;;  %v5929_v20 = vsub.f32 1.0, %v5928_v39 }
 0xf86   : > { %v5796_v0 = vpop.f32.mrf.mxu0  ;;  %9175 = vmatmul.msk.f32.gmra.mxu0 %vm1028_vm0, %v5726_v38  ;;  %v5915_v13 = vmul.f32 %v9882_v21, %v5914_v53  ;;  %v5938_v38 = vand.u32 2147483648, %v5897_v24  ;;  %v15836_v53 = vld [vmem:[#allocation63_spill] sm:$0xff] }
 0xf87   : > { %v5797_v18 = vadd.f32 %v14003_v47, %v5796_v0  ;;  %v5930_v1 = vmul.f32 %v9884_v41, %v5929_v20  ;;  %v15833_v0 = vld [vmem:[#allocation8_spill] sm:$0xff] }
 0xf88   : > { %v5916_v50 = vadd.f32 %v9882_v21, %v5915_v13  ;;  %v5939_v32 = vor.u32 1.1754944e-38, %v5938_v38 }
 0xf89   : > { %6176 = vrot.lane.b32.xlu2 %v5797_v18, %s10235_s9  ;;  %v5836_v28 = vadd.f32 %v5797_v18, %v14062_v43  ;;  %v5931_v60 = vadd.f32 %v9884_v41, %v5930_v1  ;;  %v14072_v18 = vadd.f32 %v15834_v48, %v15833_v0  ;;  %v15839_v1 = vld [vmem:[#allocation16_spill] sm:$0xff] }
 0xf8a   : > { %v5920_v9 = vsel %vm5919_vm8, %v9882_v21, %v5916_v50 }
 0xf8b   : > { %v14065_v29 = vsel %vm5922_vm9, %v5924_v46, %v5920_v9  ;;  %v9184_v8 = vmul.f32 -1.442695, %v5836_v28  ;;  %v5834_v30 = vadd.f32 %v14028_v15, %v14072_v18  ;;  %v5935_v14 = vsel %vm5934_vm12, %v9884_v41, %v5931_v60  ;;  %v15837_v9 = vld [vmem:[#allocation13_spill] sm:$0xff] }
 0xf8c   : > { %v14079_v5 = vsel %vm5937_vm13, %v5939_v32, %v5935_v14  ;;  %v14087_v41 = vadd.f32 %v15836_v53, %v15835_v55  ;;  %v15838_v28 = vld [vmem:[#allocation65_spill] sm:$0xff] }
 0xf8d   : > { %9885 = vpow2.f32 %v9184_v8  ;;  %v9182_v21 = vmul.f32 -1.442695, %v5834_v30  ;;  %v14100_v46 = vadd.f32 %v15838_v28, %v15837_v9 }
 0xf8e   : > { %v5799_v51 = vpop.f32.mrf.mxu0  ;;  %v5835_v13 = vadd.f32 %v14033_v56, %v14087_v41 }
 0xf8f   : > { %v14051_v31 = vadd.f32 %v14003_v47, %v5799_v51  ;;  %9887 = vpow2.f32 %v9182_v21 }
 0xf91   : > { %6178 = vrot.lane.b32.xlu0 %v14051_v31, %s10235_s9 }
 0xf93   : > { %v9886_v15 = vpop.eup %9885 }
 0xf94   : > { %v5900_v39 = vadd.f32 1.0, %v9886_v15 }
 0xf95   : > { %v9888_v20 = vpop.eup %9887 }
 0xf96   : > { %v5802_v23 = vpop.f32.mrf.mxu0  ;;  %9889 = vrcp.f32 %v5900_v39  ;;  %v5898_v49 = vadd.f32 1.0, %v9888_v20  ;;  %vm5977_vm15 = vweird.f32 %v5900_v39 }
 0xf97   : > { %v14056_v33 = vadd.f32 %v14003_v47, %v5802_v23 }
 0xf98   : > { %vm5947_vm4 = vweird.f32 %v5898_v49 }
 0xf99   : > { %6180 = vrot.lane.b32.xlu2 %v14056_v33, %s10235_s9 }
 0xf9c   : > { %v9890_v22 = vpop.eup %9889 }
 0xf9d   : > { %vm5978_vm14 = vweird.f32 %v9890_v22 }
 0xf9e   : > { %vm5979_vm1 = vmor %vm5977_vm15, %vm5978_vm14 }
 0xfa4   : > { %v5730_v63 = vpop.permute.xlu1 %5729 }
 0xfac   : > { %v5732_v44 = vpop.permute.xlu2 %5731 }
 0xfae   : > { %v5805_v51 = vpop.f32.mrf.mxu0 }
 0xfaf   : > { %v14077_v34 = vadd.f32 %v14003_v47, %v5805_v51 }
 0xfb4   : > { %v6169_v11 = vpop.permute.xlu1 %6168  ;;  %v5728_v7 = vpop.permute.xlu0 %5727 }
 0xfb5   : > { %v6216_v27 = vmul.f32 %v6169_v11, %v14065_v29  ;;  %9176 = vmatmul.msk.f32.gmra.mxu0 %vm1028_vm0, %v5728_v7  ;;  %v15840_v11 = vld [vmem:[#allocation66_spill] sm:$0xff] }
 0xfb6   : > { %v14104_v7 = vadd.f32 %v15840_v11, %v15839_v1 }
 0xfb7   : > { %6248 = vrot.lane.b32.xlu1 %v6216_v27, %s10236_s17  ;;  %v5837_v27 = vadd.f32 %v14051_v31, %v14100_v46  ;;  %v5983_v31 = vand.u32 2147483648, %v5900_v39 }
 0xfb8   : > { %v5838_v8 = vadd.f32 %v14056_v33, %v14104_v7 }
 0xfb9   : > { %v9185_v54 = vmul.f32 -1.442695, %v5837_v27 }
 0xfba   : > { %v9186_v30 = vmul.f32 -1.442695, %v5838_v8  ;;  %v5953_v8 = vand.u32 2147483648, %v5898_v49 }
 0xfbd   : > { %v6171_v23 = vpop.permute.xlu2 %6170  ;;  %9177 = vmatmul.msk.f32.gmra.mxu0 %vm1028_vm0, %v5730_v63  ;;  %v9183_v63 = vmul.f32 -1.442695, %v5835_v13 }
 0xfbe   : > { %v6217_v24 = vmul.f32 %v6171_v23, %v14079_v5 }
 0xfbf   : > { %6182 = vrot.lane.b32.xlu1 %v14077_v34, %s10235_s9  ;;  %9891 = vpow2.f32 %v9183_v63  ;;  %v5984_v63 = vor.u32 1.1754944e-38, %v5983_v31 }
 0xfc0   : > { %6250 = vrot.lane.b32.xlu0 %v6217_v24, %s10236_s17  ;;  %9893 = vrcp.f32 %v5898_v49  ;;  %v5981_v24 = vand.u32 2147483647, %v5900_v39 }
 0xfc2   : > { %vm5982_vm2 = vcmp.eq.f32.partialorder %v5981_v24, 8.507059e+37 }
 0xfc5   : > { %v5808_v50 = vpop.f32.mrf.mxu0  ;;  %9178 = vmatmul.msk.f32.gmra.mxu0 %vm1028_vm0, %v5732_v44  ;;  %v9892_v56 = vpop.eup %9891  ;;  %v5973_v44 = vmul.f32 %v9890_v22, %v5900_v39 }
 0xfc6   : > { %v14094_v37 = vadd.f32 %v14003_v47, %v5808_v50  ;;  %v14110_v60 = vadd.f32 1.0, %v9892_v56  ;;  %v9894_v48 = vpop.eup %9893 }
 0xfc7   : > { %v5974_v38 = vsub.f32 1.0, %v5973_v44  ;;  %v5943_v14 = vmul.f32 %v9894_v48, %v5898_v49  ;;  %vm5948_vm3 = vweird.f32 %v9894_v48 }
 0xfc8   : > { %6184 = vrot.lane.b32.xlu0 %v14094_v37, %s10235_s9  ;;  %9895 = vrcp.f32 %v14110_v60  ;;  %vm5949_vm5 = vmor %vm5947_vm4, %vm5948_vm3  ;;  %vm5962_vm8 = vweird.f32 %v14110_v60 }
 0xfc9   : > { %v5975_v51 = vmul.f32 %v9890_v22, %v5974_v38  ;;  %9897 = vpow2.f32 %v9185_v54  ;;  %v5944_v23 = vsub.f32 1.0, %v5943_v14  ;;  %v5951_v38 = vand.u32 2147483647, %v5898_v49 }
 0xfca   : > { %9899 = vpow2.f32 %v9186_v30  ;;  %v5966_v49 = vand.u32 2147483647, %v14110_v60 }
 0xfcb   : > { %v5976_v32 = vadd.f32 %v9890_v22, %v5975_v51  ;;  %v5945_v13 = vmul.f32 %v9894_v48, %v5944_v23  ;;  %v5954_v51 = vor.u32 1.1754944e-38, %v5953_v8  ;;  %vm5952_vm6 = vcmp.eq.f32.partialorder %v5951_v38, 8.507059e+37 }
 0xfcc   : > { %vm5967_vm10 = vcmp.eq.f32.partialorder %v5966_v49, 8.507059e+37 }
 0xfcd   : > { %v5980_v53 = vsel %vm5979_vm1, %v9890_v22, %v5976_v32  ;;  %v5946_v39 = vadd.f32 %v9894_v48, %v5945_v13 }
 0xfce   : > { %v9896_v21 = vpop.eup %9895  ;;  %v14118_v11 = vsel %vm5982_vm2, %v5984_v63, %v5980_v53 }
 0xfcf   : > { %v9898_v33 = vpop.eup %9897  ;;  %v5958_v50 = vmul.f32 %v9896_v21, %v14110_v60  ;;  %v5950_v54 = vsel %vm5949_vm5, %v9894_v48, %v5946_v39  ;;  %vm5963_vm7 = vweird.f32 %v9896_v21 }
 0xfd0   : > { %v9900_v15 = vpop.eup %9899  ;;  %v14114_v20 = vadd.f32 1.0, %v9898_v33  ;;  %v14125_v14 = vsel %vm5952_vm6, %v5954_v51, %v5950_v54  ;;  %vm5964_vm9 = vmor %vm5962_vm8, %vm5963_vm7 }
 0xfd1   : > { %v14116_v28 = vadd.f32 1.0, %v9900_v15  ;;  %v5959_v22 = vsub.f32 1.0, %v5958_v50  ;;  %v5968_v15 = vand.u32 2147483648, %v14110_v60  ;;  %v5811_v50 = vpop.f32.mrf.mxu0 }
 0xfd2   : > { %9901 = vrcp.f32 %v14114_v20  ;;  %vm5992_vm13 = vweird.f32 %v14114_v20 }
 0xfd3   : > { %9903 = vrcp.f32 %v14116_v28  ;;  %v5960_v30 = vmul.f32 %v9896_v21, %v5959_v22  ;;  %v5969_v63 = vor.u32 1.1754944e-38, %v5968_v15  ;;  %v15842_v15 = vld [vmem:[#allocation67_spill] sm:$0xff]  ;;  %vm6007_vm14 = vweird.f32 %v14116_v28 }
 0xfd5   : > { %v5961_v24 = vadd.f32 %v9896_v21, %v5960_v30 }
 0xfd7   : > { %v5965_v48 = vsel %vm5964_vm9, %v9896_v21, %v5961_v24  ;;  %v15841_v24 = vld [vmem:[#allocation27_spill] sm:$0xff] }
 0xfd8   : > { %v9902_v23 = vpop.eup %9901  ;;  %v14148_v49 = vadd.f32 %v15842_v15, %v15841_v24 }
 0xfd9   : > { %v9904_v33 = vpop.eup %9903  ;;  %v5988_v13 = vmul.f32 %v9902_v23, %v14114_v20  ;;  %vm5993_vm11 = vweird.f32 %v9902_v23 }
 0xfda   : > { %v6003_v53 = vmul.f32 %v9904_v33, %v14116_v28  ;;  %vm6008_vm12 = vweird.f32 %v9904_v33  ;;  %vm5994_vm15 = vmor %vm5992_vm13, %vm5993_vm11 }
 0xfdb   : > { %v5989_v8 = vsub.f32 1.0, %v5988_v13  ;;  %vm6009_vm1 = vmor %vm6007_vm14, %vm6008_vm12  ;;  %v5839_v13 = vadd.f32 %v14077_v34, %v14148_v49 }
 0xfdc   : > { %v6004_v22 = vsub.f32 1.0, %v6003_v53  ;;  %v5996_v53 = vand.u32 2147483647, %v14114_v20 }
 0xfdd   : > { %v5990_v21 = vmul.f32 %v9902_v23, %v5989_v8 }
 0xfde   : > { %v6005_v60 = vmul.f32 %v9904_v33, %v6004_v22  ;;  %vm5997_vm3 = vcmp.eq.f32.partialorder %v5996_v53, 8.507059e+37 }
 0xfdf   : > { %v5991_v51 = vadd.f32 %v9902_v23, %v5990_v21  ;;  %v5663_v21 = vpop.f32.mrf.mxu2 }
 0xfe0   : > { %v6006_v30 = vadd.f32 %v9904_v33, %v6005_v60 }
 0xfe2   : > { %v5734_v44 = vpop.permute.xlu0 %5733 }
 0xfe3   : > { %v6177_v56 = vpop.permute.xlu2 %6176  ;;  %9179 = vmatmul.msk.f32.gmra.mxu0 %vm1028_vm0, %v5734_v44  ;;  %v14134_v44 = vsel %vm5967_vm10, %v5969_v63, %v5965_v48  ;;  %v5814_v38 = vpop.f32.mrf.mxu0  ;;  %v6011_v48 = vand.u32 2147483647, %v14116_v28  ;;  %v5995_v63 = vsel %vm5994_vm15, %v9902_v23, %v5991_v51  ;;  %v15843_v23 = vld [vmem:[#allocation30_spill] sm:$0xff] }
 0xfe4   : > { %v6220_v27 = vmul.f32 %v6177_v56, %v14118_v11  ;;  %v14141_v54 = vadd.f32 %v14003_v47, %v5814_v38  ;;  %v9187_v38 = vmul.f32 -1.442695, %v5839_v13 }
 0xfe5   : > { %vm6012_vm2 = vcmp.eq.f32.partialorder %v6011_v48, 8.507059e+37 }
 0xfe6   : > { %6256 = vrot.lane.b32.xlu0 %v6220_v27, %s10236_s17  ;;  %v5812_v27 = vadd.f32 %v14003_v47, %v5811_v50  ;;  %v6010_v50 = vsel %vm6009_vm1, %v9904_v33, %v6006_v30  ;;  %v14169_v33 = vadd.f32 %v5663_v21, %v15843_v23  ;;  %9905 = vpow2.f32 %v9187_v38 }
 0xfe7   : > { %v5666_v53 = vpop.f32.mrf.mxu2 }
 0xfe8   : > { %v5840_v30 = vadd.f32 %v14094_v37, %v14169_v33 }
 0xfea   : > { %v9188_v51 = vmul.f32 -1.442695, %v5840_v30 }
 0xfeb   : > { %v6173_v32 = vpop.permute.xlu0 %6172 }
 0xfec   : > { %v6218_v31 = vmul.f32 %v6173_v32, %v14125_v14  ;;  %v6013_v32 = vand.u32 2147483648, %v14116_v28  ;;  %9907 = vpow2.f32 %v9188_v51 }
 0xfee   : > { %6252 = vrot.lane.b32.xlu2 %v6218_v31, %s10236_s17  ;;  %v5998_v31 = vand.u32 2147483648, %v14114_v20 }
 0xff0   : > { %v5999_v22 = vor.u32 1.1754944e-38, %v5998_v31 }
 0xff2   : > { %v14159_v28 = vsel %vm5997_vm3, %v5999_v22, %v5995_v63 }
 0xff3   : > { %v6175_v56 = vpop.permute.xlu1 %6174 }
 0xff4   : > { %v6219_v39 = vmul.f32 %v6175_v56, %v14134_v44  ;;  %v6181_v56 = vpop.permute.xlu2 %6180 }
 0xff6   : > { %6254 = vrot.lane.b32.xlu1 %v6219_v39, %s10236_s17  ;;  %6186 = vrot.lane.b32.xlu2 %v5812_v27, %s10235_s9  ;;  %v6014_v39 = vor.u32 1.1754944e-38, %v6013_v32  ;;  %v9906_v32 = vpop.eup %9905 }
 0xff7   : > { %v5903_v31 = vadd.f32 1.0, %v9906_v32  ;;  %v9908_v48 = vpop.eup %9907 }
 0xff8   : > { %v14157_v8 = vsel %vm6012_vm2, %v6014_v39, %v6010_v50  ;;  %v5904_v13 = vadd.f32 1.0, %v9908_v48 }
 0xff9   : > { %v6222_v20 = vmul.f32 %v6181_v56, %v14157_v8  ;;  %9909 = vrcp.f32 %v5903_v31  ;;  %v6028_v51 = vand.u32 2147483648, %v5903_v31  ;;  %vm6022_vm5 = vweird.f32 %v5903_v31 }
 0xffa   : > { %9911 = vrcp.f32 %v5904_v13  ;;  %v6026_v48 = vand.u32 2147483647, %v5903_v31  ;;  %vm6037_vm9 = vweird.f32 %v5904_v13 }
 0xffc   : > { %vm6027_vm7 = vcmp.eq.f32.partialorder %v6026_v48, 8.507059e+37 }
 0xffe   : > { %6188 = vrot.lane.b32.xlu1 %v14141_v54, %s10235_s9 }
 0xfff   : > { %v9910_v50 = vpop.eup %9909 }
0x1000   : > { %v6018_v56 = vmul.f32 %v9910_v50, %v5903_v31  ;;  %v9912_v21 = vpop.eup %9911  ;;  %vm6023_vm4 = vweird.f32 %v9910_v50 }
0x1001   : > { %v6033_v38 = vmul.f32 %v9912_v21, %v5904_v13  ;;  %vm6024_vm6 = vmor %vm6022_vm5, %vm6023_vm4  ;;  %vm6038_vm8 = vweird.f32 %v9912_v21 }
0x1002   : > { %v6019_v22 = vsub.f32 1.0, %v6018_v56  ;;  %vm6039_vm10 = vmor %vm6037_vm9, %vm6038_vm8 }
0x1003   : > { %v6179_v60 = vpop.permute.xlu0 %6178  ;;  %v5817_v15 = vpop.f32.mrf.mxu0  ;;  %v6034_v32 = vsub.f32 1.0, %v6033_v38 }
0x1004   : > { %v6221_v24 = vmul.f32 %v6179_v60, %v14159_v28  ;;  %v14164_v34 = vadd.f32 %v14003_v47, %v5817_v15  ;;  %v6020_v37 = vmul.f32 %v9910_v50, %v6019_v22 }
0x1005   : > { %v6035_v56 = vmul.f32 %v9912_v21, %v6034_v32  ;;  %v5669_v32 = vpop.f32.mrf.mxu2 }
0x1006   : > { %6260 = vrot.lane.b32.xlu1 %v6222_v20, %s10236_s17  ;;  %6258 = vrot.lane.b32.xlu2 %v6221_v24, %s10236_s17  ;;  %v15844_v24 = vld [vmem:[#allocation34_spill] sm:$0xff]  ;;  %v6021_v30 = vadd.f32 %v9910_v50, %v6020_v37 }
0x1007   : > { %6190 = vrot.lane.b32.xlu0 %v14164_v34, %s10235_s9  ;;  %v14176_v63 = vadd.f32 %v5666_v53, %v15844_v24 }
0x1008   : > { %v6025_v24 = vsel %vm6024_vm6, %v9910_v50, %v6021_v30  ;;  %v6041_v30 = vand.u32 2147483647, %v5904_v13 }
0x1009   : > { %v5841_v39 = vadd.f32 %v5812_v27, %v14176_v63  ;;  %v6029_v27 = vor.u32 1.1754944e-38, %v6028_v51 }
0x100a   : > { %vm6042_vm11 = vcmp.eq.f32.partialorder %v6041_v30, 8.507059e+37 }
0x100b   : > { %v9189_v60 = vmul.f32 -1.442695, %v5841_v39 }
0x100d   : > { %9913 = vpow2.f32 %v9189_v60  ;;  %v14182_v60 = vsel %vm6027_vm7, %v6029_v27, %v6025_v24  ;;  %v6043_v24 = vand.u32 2147483648, %v5904_v13 }
0x1013   : > { %v9914_v53 = vpop.eup %9913 }
0x1014   : > { %v14180_v39 = vadd.f32 1.0, %v9914_v53 }
0x1016   : > { %vm6052_vm13 = vweird.f32 %v14180_v39 }
0x1029   : > { %v6249_v20 = vpop.permute.xlu1 %6248 }
0x102a   : > { %v6296_v15 = vadd.f32 %v6249_v20, %v14037_v52 }
0x102c   : > { %9915 = vtanh.f32 %v6296_v15  ;;  %v6036_v15 = vadd.f32 %v9912_v21, %v6035_v56 }
0x102d   : > { %9917 = vrcp.f32 %v14180_v39 }
0x102e   : > { %v6040_v51 = vsel %vm6039_vm10, %v9912_v21, %v6036_v15 }
0x1031   : > { %v6183_v22 = vpop.permute.xlu1 %6182 }
0x1032   : > { %v14184_v23 = vpop.eup %9915  ;;  %v6223_v52 = vmul.f32 %v6183_v22, %v14182_v60  ;;  %v5820_v37 = vpop.f32.mrf.mxu0 }
0x1033   : > { %v6251_v38 = vpop.permute.xlu0 %6250  ;;  %v14188_v31 = vadd.f32 %v14003_v47, %v5820_v37  ;;  %v6328_v20 = vsub.f32 %v13889_v42, %v14184_v23  ;;  %v9918_v42 = vpop.eup %9917  ;;  %v15845_v37 = vld [vmem:[#allocation38_spill] sm:$0xff] }
0x1034   : > { %v6297_v50 = vadd.f32 %v6251_v38, %v14047_v58  ;;  %6262 = vrot.lane.b32.xlu1 %v6223_v52, %s10236_s17  ;;  %v6044_v58 = vor.u32 1.1754944e-38, %v6043_v24  ;;  %v14209_v21 = vadd.f32 %v5669_v32, %v15845_v37  ;;  %v6048_v38 = vmul.f32 %v9918_v42, %v14180_v39  ;;  %v5672_v24 = vpop.f32.mrf.mxu2 }
0x1035   : > { %6192 = vrot.lane.b32.xlu0 %v14188_v31, %s10235_s9  ;;  %6360 = vrot.lane.b32.xlu2 %v6328_v20, %s10237_s18  ;;  %vm6053_vm12 = vweird.f32 %v9918_v42 }
0x1036   : > { %9919 = vtanh.f32 %v6297_v50  ;;  %v14198_v53 = vsel %vm6042_vm11, %v6044_v58, %v6040_v51  ;;  %v5842_v50 = vadd.f32 %v14141_v54, %v14209_v21  ;;  %v6049_v20 = vsub.f32 1.0, %v6048_v38  ;;  %v15846_v58 = vld [vmem:[#allocation26_spill] sm:$0xff]  ;;  %vm6054_vm14 = vmor %vm6052_vm13, %vm6053_vm12 }
0x1037   : > { %v14224_v32 = vadd.f32 %v5672_v24, %v15846_v58  ;;  %v6056_v38 = vand.u32 2147483647, %v14180_v39 }
0x1038   : > { %v9190_v30 = vmul.f32 -1.442695, %v5842_v50  ;;  %v6050_v51 = vmul.f32 %v9918_v42, %v6049_v20 }
0x1039   : > { %vm6057_vm15 = vcmp.eq.f32.partialorder %v6056_v38, 8.507059e+37 }
0x103a   : > { %v5823_v48 = vpop.f32.mrf.mxu0  ;;  %9921 = vpow2.f32 %v9190_v30 }
0x103b   : > { %v6185_v27 = vpop.permute.xlu0 %6184  ;;  %v14203_v22 = vadd.f32 %v14003_v47, %v5823_v48  ;;  %v5843_v48 = vadd.f32 %v14164_v34, %v14224_v32 }
0x103c   : > { %v14200_v56 = vpop.eup %9919  ;;  %v6224_v52 = vmul.f32 %v6185_v27, %v14198_v53 }
0x103d   : > { %v6329_v13 = vsub.f32 %v13913_v10, %v14200_v56  ;;  %6194 = vrot.lane.b32.xlu0 %v14203_v22, %s10235_s9  ;;  %v9191_v50 = vmul.f32 -1.442695, %v5843_v48 }
0x103e   : > { %6264 = vrot.lane.b32.xlu1 %v6224_v52, %s10236_s17  ;;  %v6051_v52 = vadd.f32 %v9918_v42, %v6050_v51 }
0x103f   : > { %6362 = vrot.lane.b32.xlu2 %v6329_v13, %s10237_s18  ;;  %v6058_v13 = vand.u32 2147483648, %v14180_v39 }
0x1040   : > { %v9922_v20 = vpop.eup %9921 }
0x1041   : > { %v6059_v24 = vor.u32 1.1754944e-38, %v6058_v13  ;;  %v5906_v30 = vadd.f32 1.0, %v9922_v20 }
0x1042   : > { %v5826_v15 = vpop.f32.mrf.mxu0 }
0x1043   : > { %v14219_v10 = vadd.f32 %v14003_v47, %v5826_v15  ;;  %v6055_v15 = vsel %vm6054_vm14, %v9918_v42, %v6051_v52  ;;  %v6073_v37 = vand.u32 2147483648, %v5906_v30  ;;  %vm6067_vm2 = vweird.f32 %v5906_v30 }
0x1044   : > { %v14232_v34 = vsel %vm6057_vm15, %v6059_v24, %v6055_v15 }
0x1045   : > { %6196 = vrot.lane.b32.xlu0 %v14219_v10, %s10235_s9  ;;  %v6074_v9 = vor.u32 1.1754944e-38, %v6073_v37  ;;  %v15847_v37 = vld [vmem:[#allocation31_spill] sm:$0xff] }
0x1048   : > { %v6253_v27 = vpop.permute.xlu2 %6252 }
0x1049   : > { %v6298_v54 = vadd.f32 %v6253_v27, %v14072_v18 }
0x104b   : > { %9923 = vtanh.f32 %v6298_v54 }
0x104c   : > { %9925 = vpow2.f32 %v9191_v50 }
0x104d   : > { %9927 = vrcp.f32 %v5906_v30 }
0x1050   : > { %v6187_v18 = vpop.permute.xlu2 %6186 }
0x1051   : > { %v14234_v51 = vpop.eup %9923  ;;  %v6225_v27 = vmul.f32 %v6187_v18, %v14232_v34 }
0x1052   : > { %v6330_v54 = vsub.f32 %v13923_v57, %v14234_v51  ;;  %v9926_v39 = vpop.eup %9925 }
0x1053   : > { %6266 = vrot.lane.b32.xlu1 %v6225_v27, %s10236_s17  ;;  %v5907_v42 = vadd.f32 1.0, %v9926_v39  ;;  %v9928_v48 = vpop.eup %9927 }
0x1054   : > { %6364 = vrot.lane.b32.xlu2 %v6330_v54, %s10237_s18  ;;  %v6063_v52 = vmul.f32 %v9928_v48, %v5906_v30  ;;  %vm6068_vm1 = vweird.f32 %v9928_v48 }
0x1055   : > { %9929 = vrcp.f32 %v5907_v42  ;;  %vm6069_vm3 = vmor %vm6067_vm2, %vm6068_vm1  ;;  %vm6082_vm6 = vweird.f32 %v5907_v42 }
0x1056   : > { %v6064_v38 = vsub.f32 1.0, %v6063_v52  ;;  %v6071_v52 = vand.u32 2147483647, %v5906_v30 }
0x1058   : > { %v6065_v57 = vmul.f32 %v9928_v48, %v6064_v38  ;;  %v6257_v39 = vpop.permute.xlu0 %6256  ;;  %vm6072_vm4 = vcmp.eq.f32.partialorder %v6071_v52, 8.507059e+37 }
0x1059   : > { %v6300_v1 = vadd.f32 %v6257_v39, %v14062_v43  ;;  %v6088_v43 = vand.u32 2147483648, %v5907_v42 }
0x105a   : > { %v6066_v54 = vadd.f32 %v9928_v48, %v6065_v57 }
0x105b   : > { %v9930_v20 = vpop.eup %9929 }
0x105c   : > { %v6078_v15 = vmul.f32 %v9930_v20, %v5907_v42  ;;  %v6070_v38 = vsel %vm6069_vm3, %v9928_v48, %v6066_v54  ;;  %vm6083_vm5 = vweird.f32 %v9930_v20 }
0x105d   : > { %v14249_v57 = vsel %vm6072_vm4, %v6074_v9, %v6070_v38  ;;  %v6086_v9 = vand.u32 2147483647, %v5907_v42  ;;  %vm6084_vm7 = vmor %vm6082_vm6, %vm6083_vm5 }
0x105e   : > { %v6079_v58 = vsub.f32 1.0, %v6078_v15 }
0x105f   : > { %vm6087_vm8 = vcmp.eq.f32.partialorder %v6086_v9, 8.507059e+37 }
0x1060   : > { %v5829_v13 = vpop.f32.mrf.mxu0  ;;  %v6259_v18 = vpop.permute.xlu2 %6258  ;;  %v6080_v26 = vmul.f32 %v9930_v20, %v6079_v58 }
0x1061   : > { %v14242_v50 = vadd.f32 %v14003_v47, %v5829_v13  ;;  %v6301_v47 = vadd.f32 %v6259_v18, %v14100_v46  ;;  %v5675_v13 = vpop.f32.mrf.mxu2 }
0x1062   : > { %v6081_v30 = vadd.f32 %v9930_v20, %v6080_v26  ;;  %v14258_v58 = vadd.f32 %v5675_v13, %v15847_v37 }
0x1063   : > { %6198 = vrot.lane.b32.xlu0 %v14242_v50, %s10235_s9 }
0x1064   : > { %v6085_v18 = vsel %vm6084_vm7, %v9930_v20, %v6081_v30  ;;  %v15848_v20 = vld [vmem:[#allocation35_spill] sm:$0xff] }
0x1068   : > { %v6255_v24 = vpop.permute.xlu1 %6254 }
0x1069   : > { %v6299_v27 = vadd.f32 %v6255_v24, %v14087_v41  ;;  %v5678_v26 = vpop.f32.mrf.mxu2 }
0x106b   : > { %9931 = vtanh.f32 %v6299_v27  ;;  %v6089_v27 = vor.u32 1.1754944e-38, %v6088_v43  ;;  %v15849_v43 = vld [vmem:[#allocation39_spill] sm:$0xff] }
0x106c   : > { %9933 = vtanh.f32 %v6301_v47 }
0x106d   : > { %9935 = vtanh.f32 %v6300_v1  ;;  %v5844_v1 = vadd.f32 %v14188_v31, %v14258_v58  ;;  %v14268_v52 = vsel %vm6087_vm8, %v6089_v27, %v6085_v18 }
0x106f   : > { %v9192_v13 = vmul.f32 -1.442695, %v5844_v1 }
0x1070   : > { %v6189_v41 = vpop.permute.xlu1 %6188 }
0x1071   : > { %v14251_v24 = vpop.eup %9931  ;;  %v6226_v15 = vmul.f32 %v6189_v41, %v14249_v57  ;;  %v14277_v41 = vadd.f32 %v5678_v26, %v15848_v20 }
0x1072   : > { %v6331_v46 = vsub.f32 %v13931_v3, %v14251_v24  ;;  %v14261_v48 = vpop.eup %9933 }
0x1073   : > { %6268 = vrot.lane.b32.xlu1 %v6226_v15, %s10236_s17  ;;  %v14265_v3 = vpop.eup %9935  ;;  %v6333_v42 = vsub.f32 %v13946_v2, %v14261_v48  ;;  %v5845_v2 = vadd.f32 %v14203_v22, %v14277_v41  ;;  %v5681_v15 = vpop.f32.mrf.mxu2 }
0x1074   : > { %6366 = vrot.lane.b32.xlu2 %v6331_v46, %s10237_s18  ;;  %v6332_v31 = vsub.f32 %v13936_v25, %v14265_v3  ;;  %v14288_v9 = vadd.f32 %v5681_v15, %v15849_v43 }
0x1075   : > { %v9193_v46 = vmul.f32 -1.442695, %v5845_v2 }
0x1076   : > { %v5846_v1 = vadd.f32 %v14219_v10, %v14288_v9 }
0x1078   : > { %v6261_v54 = vpop.permute.xlu1 %6260  ;;  %v9194_v26 = vmul.f32 -1.442695, %v5846_v1 }
0x1079   : > { %v6302_v39 = vadd.f32 %v6261_v54, %v14104_v7  ;;  %v6191_v47 = vpop.permute.xlu0 %6190 }
0x107a   : > { %v6227_v38 = vmul.f32 %v6191_v47, %v14268_v52 }
0x107b   : > { %9937 = vtanh.f32 %v6302_v39  ;;  %6370 = vrot.lane.b32.xlu1 %v6333_v42, %s10237_s18 }
0x107c   : > { %6270 = vrot.lane.b32.xlu0 %v6227_v38, %s10236_s17  ;;  %6368 = vrot.lane.b32.xlu2 %v6332_v31, %s10237_s18  ;;  %9939 = vpow2.f32 %v9192_v13 }
0x107d   : > { %9941 = vpow2.f32 %v9193_v46 }
0x1081   : > { %v14283_v7 = vpop.eup %9937 }
0x1082   : > { %v6334_v25 = vsub.f32 %v13943_v62, %v14283_v7  ;;  %v9940_v30 = vpop.eup %9939 }
0x1083   : > { %v5908_v18 = vadd.f32 1.0, %v9940_v30  ;;  %v9942_v22 = vpop.eup %9941 }
0x1084   : > { %6372 = vrot.lane.b32.xlu1 %v6334_v25, %s10237_s18  ;;  %v5909_v27 = vadd.f32 1.0, %v9942_v22 }
0x1085   : > { %9943 = vrcp.f32 %v5908_v18  ;;  %vm6097_vm10 = vweird.f32 %v5908_v18  ;;  %v6101_v22 = vand.u32 2147483647, %v5908_v18 }
0x1086   : > { %9945 = vpow2.f32 %v9194_v26  ;;  %v6103_v26 = vand.u32 2147483648, %v5908_v18  ;;  %vm6112_vm14 = vweird.f32 %v5909_v27 }
0x1087   : > { %9947 = vrcp.f32 %v5909_v27  ;;  %vm6102_vm12 = vcmp.eq.f32.partialorder %v6101_v22, 8.507059e+37 }
0x108b   : > { %v9944_v62 = vpop.eup %9943 }
0x108c   : > { %v9946_v47 = vpop.eup %9945  ;;  %v6093_v42 = vmul.f32 %v9944_v62, %v5908_v18  ;;  %vm6098_vm9 = vweird.f32 %v9944_v62 }
0x108d   : > { %v14295_v13 = vadd.f32 1.0, %v9946_v47  ;;  %v9948_v10 = vpop.eup %9947  ;;  %vm6099_vm11 = vmor %vm6097_vm10, %vm6098_vm9 }
0x108e   : > { %v6094_v31 = vsub.f32 1.0, %v6093_v42  ;;  %v6108_v46 = vmul.f32 %v9948_v10, %v5909_v27  ;;  %vm6113_vm13 = vweird.f32 %v9948_v10 }
0x108f   : > { %v6361_v54 = vpop.permute.xlu2 %6360  ;;  %9949 = vrcp.f32 %v14295_v13  ;;  %vm6114_vm15 = vmor %vm6112_vm14, %vm6113_vm13  ;;  %vm6127_vm3 = vweird.f32 %v14295_v13 }
0x1090   : > { %v6408_v39 = vmul.f32 %v6361_v54, %v14065_v29  ;;  %v6095_v15 = vmul.f32 %v9944_v62, %v6094_v31  ;;  %v5684_v29 = vpop.f32.mrf.mxu2  ;;  %v6109_v30 = vsub.f32 1.0, %v6108_v46 }
0x1091   : > { %v14301_v54 = vadd.f32 %v5684_v29, %v15829_v19 }
0x1092   : > { %6440 = vrot.lane.b32.xlu2 %v6408_v39, %s10238_s19  ;;  %v6096_v25 = vadd.f32 %v9944_v62, %v6095_v15 }
0x1093   : > { %v5847_v42 = vadd.f32 %v14242_v50, %v14301_v54  ;;  %v6116_v50 = vand.u32 2147483647, %v5909_v27 }
0x1094   : > { %v6100_v39 = vsel %vm6099_vm11, %v9944_v62, %v6096_v25  ;;  %v6118_v25 = vand.u32 2147483648, %v5909_v27 }
0x1095   : > { %v9950_v1 = vpop.eup %9949  ;;  %v9195_v62 = vmul.f32 -1.442695, %v5847_v42  ;;  %vm6117_vm1 = vcmp.eq.f32.partialorder %v6116_v50, 8.507059e+37 }
0x1096   : > { %v6123_v47 = vmul.f32 %v9950_v1, %v14295_v13  ;;  %vm6128_vm2 = vweird.f32 %v9950_v1 }
0x1097   : > { %vm6129_vm4 = vmor %vm6127_vm3, %vm6128_vm2 }
0x1098   : > { %v6124_v19 = vsub.f32 1.0, %v6123_v47 }
0x1099   : > { %v6363_v38 = vpop.permute.xlu2 %6362 }
0x109a   : > { %v6409_v2 = vmul.f32 %v6363_v38, %v14079_v5  ;;  %v6110_v5 = vmul.f32 %v9948_v10, %v6109_v30  ;;  %v6104_v38 = vor.u32 1.1754944e-38, %v6103_v26  ;;  %v6125_v26 = vmul.f32 %v9950_v1, %v6124_v19 }
0x109c   : > { %6442 = vrot.lane.b32.xlu2 %v6409_v2, %s10238_s19  ;;  %v14307_v15 = vsel %vm6102_vm12, %v6104_v38, %v6100_v39  ;;  %v6111_v29 = vadd.f32 %v9948_v10, %v6110_v5 }
0x109e   : > { %v6115_v30 = vsel %vm6114_vm15, %v9948_v10, %v6111_v29  ;;  %v6126_v10 = vadd.f32 %v9950_v1, %v6125_v26 }
0x10a6   : > { %v6263_v31 = vpop.permute.xlu1 %6262 }
0x10a7   : > { %v6303_v2 = vadd.f32 %v6263_v31, %v14148_v49  ;;  %v6193_v46 = vpop.permute.xlu0 %6192  ;;  %v6119_v49 = vor.u32 1.1754944e-38, %v6118_v25 }
0x10a8   : > { %v6228_v18 = vmul.f32 %v6193_v46, %v14307_v15  ;;  %v6130_v46 = vsel %vm6129_vm4, %v9950_v1, %v6126_v10 }
0x10a9   : > { %9951 = vtanh.f32 %v6303_v2  ;;  %v14314_v47 = vsel %vm6117_vm1, %v6119_v49, %v6115_v30  ;;  %v6133_v2 = vand.u32 2147483648, %v14295_v13 }
0x10aa   : > { %6272 = vrot.lane.b32.xlu0 %v6228_v18, %s10236_s17  ;;  %9953 = vpow2.f32 %v9195_v62 }
0x10ab   : > { %v6134_v18 = vor.u32 1.1754944e-38, %v6133_v2 }
0x10ae   : > { %v6365_v22 = vpop.permute.xlu2 %6364 }
0x10af   : > { %v14311_v39 = vpop.eup %9951  ;;  %v6410_v5 = vmul.f32 %v6365_v22, %v14125_v14  ;;  %v6195_v42 = vpop.permute.xlu0 %6194  ;;  %v6131_v14 = vand.u32 2147483647, %v14295_v13 }
0x10b0   : > { %v6265_v38 = vpop.permute.xlu1 %6264  ;;  %v6229_v27 = vmul.f32 %v6195_v42, %v14314_v47  ;;  %v6335_v19 = vsub.f32 %v13955_v12, %v14311_v39 }
0x10b1   : > { %v6304_v31 = vadd.f32 %v6265_v38, %v14169_v33  ;;  %6444 = vrot.lane.b32.xlu2 %v6410_v5, %s10238_s19  ;;  %v9954_v33 = vpop.eup %9953  ;;  %vm6132_vm5 = vcmp.eq.f32.partialorder %v6131_v14, 8.507059e+37 }
0x10b2   : > { %6374 = vrot.lane.b32.xlu1 %v6335_v19, %s10237_s18  ;;  %6274 = vrot.lane.b32.xlu0 %v6229_v27, %s10236_s17  ;;  %v5911_v29 = vadd.f32 1.0, %v9954_v33  ;;  %v14326_v12 = vsel %vm6132_vm5, %v6134_v18, %v6130_v46 }
0x10b3   : > { %9955 = vtanh.f32 %v6304_v31 }
0x10b4   : > { %9957 = vrcp.f32 %v5911_v29  ;;  %v6148_v19 = vand.u32 2147483648, %v5911_v29  ;;  %vm6142_vm7 = vweird.f32 %v5911_v29 }
0x10b6   : > { %v6149_v2 = vor.u32 1.1754944e-38, %v6148_v19 }
0x10b7   : > { %v6197_v62 = vpop.permute.xlu0 %6196 }
0x10b8   : > { %v6230_v50 = vmul.f32 %v6197_v62, %v14326_v12 }
0x10b9   : > { %v14328_v25 = vpop.eup %9955 }
0x10ba   : > { %v6336_v30 = vsub.f32 %v13963_v6, %v14328_v25  ;;  %6276 = vrot.lane.b32.xlu0 %v6230_v50, %s10236_s17  ;;  %v9958_v13 = vpop.eup %9957 }
0x10bb   : > { %v6138_v1 = vmul.f32 %v9958_v13, %v5911_v29  ;;  %vm6143_vm6 = vweird.f32 %v9958_v13 }
0x10bc   : > { %6376 = vrot.lane.b32.xlu1 %v6336_v30, %s10237_s18  ;;  %vm6144_vm8 = vmor %vm6142_vm7, %vm6143_vm6 }
0x10bd   : > { %v6139_v22 = vsub.f32 1.0, %v6138_v1 }
0x10bf   : > { %v6140_v5 = vmul.f32 %v9958_v13, %v6139_v22 }
0x10c1   : > { %v6141_v27 = vadd.f32 %v9958_v13, %v6140_v5 }
0x10c3   : > { %v6145_v10 = vsel %vm6144_vm8, %v9958_v13, %v6141_v27 }
0x10c5   : > { %v6267_v26 = vpop.permute.xlu1 %6266 }
0x10c6   : > { %v6305_v49 = vadd.f32 %v6267_v26, %v14176_v63  ;;  %v6146_v63 = vand.u32 2147483647, %v5911_v29 }
0x10c8   : > { %9959 = vtanh.f32 %v6305_v49  ;;  %vm6147_vm9 = vcmp.eq.f32.partialorder %v6146_v63, 8.507059e+37 }
0x10c9   : > { %v14343_v33 = vsel %vm6147_vm9, %v6149_v2, %v6145_v10 }
0x10ce   : > { %v14336_v38 = vpop.eup %9959  ;;  %v6367_v42 = vpop.permute.xlu2 %6366 }
0x10cf   : > { %v6411_v31 = vmul.f32 %v6367_v42, %v14134_v44  ;;  %v6337_v6 = vsub.f32 %v13970_v40, %v14336_v38 }
0x10d1   : > { %6378 = vrot.lane.b32.xlu1 %v6337_v6, %s10237_s18  ;;  %6446 = vrot.lane.b32.xlu2 %v6411_v31, %s10238_s19 }
0x10d5   : > { %v6199_v44 = vpop.permute.xlu0 %6198 }
0x10d6   : > { %v6369_v14 = vpop.permute.xlu2 %6368  ;;  %v6231_v40 = vmul.f32 %v6199_v44, %v14343_v33 }
0x10d7   : > { %v6412_v46 = vmul.f32 %v6369_v14, %v14118_v11 }
0x10d8   : > { %6278 = vrot.lane.b32.xlu0 %v6231_v40, %s10236_s17 }
0x10d9   : > { %6448 = vrot.lane.b32.xlu2 %v6412_v46, %s10238_s19 }
0x10e5   : > { %v6269_v18 = vpop.permute.xlu1 %6268 }
0x10e6   : > { %v6306_v62 = vadd.f32 %v6269_v18, %v14209_v21 }
0x10e8   : > { %9961 = vtanh.f32 %v6306_v62 }
0x10ec   : > { %v6441_v29 = vpop.permute.xlu2 %6440 }
0x10ed   : > { %v14351_v50 = vadd.f32 %v14184_v23, %v6441_v29  ;;  %v6371_v30 = vpop.permute.xlu1 %6370 }
0x10ee   : > { %v14353_v13 = vpop.eup %9961  ;;  %v6413_v1 = vmul.f32 %v6371_v30, %v14159_v28  ;;  %v6271_v11 = vpop.permute.xlu0 %6270 }
0x10ef   : > { %v6307_v26 = vadd.f32 %v6271_v11, %v14224_v32  ;;  %6650 = vrot.lane.b32.xlu2 %v14351_v50, %s10235_s9  ;;  %v6338_v49 = vsub.f32 %v13978_v61, %v14353_v13 }
0x10f0   : > { %6450 = vrot.lane.b32.xlu1 %v6413_v1, %s10238_s19 }
0x10f1   : > { %9963 = vtanh.f32 %v6307_v26  ;;  %6380 = vrot.lane.b32.xlu0 %v6338_v49, %s10237_s18 }
0x10f6   : > { %v6443_v23 = vpop.permute.xlu2 %6442  ;;  %v6373_v22 = vpop.permute.xlu1 %6372 }
0x10f7   : > { %v14364_v21 = vadd.f32 %v14200_v56, %v6443_v23  ;;  %v14366_v28 = vpop.eup %9963  ;;  %v6414_v32 = vmul.f32 %v6373_v22, %v14157_v8 }
0x10f8   : > { %v6339_v61 = vsub.f32 %v13990_v45, %v14366_v28 }
0x10f9   : > { %6652 = vrot.lane.b32.xlu2 %v14364_v21, %s10235_s9  ;;  %6452 = vrot.lane.b32.xlu1 %v6414_v32, %s10238_s19 }
0x10fa   : > { %6382 = vrot.lane.b32.xlu0 %v6339_v61, %s10237_s18 }
0x110b   : > { %v6445_v5 = vpop.permute.xlu2 %6444 }
0x110c   : > { %v14376_v42 = vadd.f32 %v14234_v51, %v6445_v5 }
0x110e   : > { %6654 = vrot.lane.b32.xlu2 %v14376_v42, %s10235_s9 }
0x111c   : > { %v6273_v56 = vpop.permute.xlu0 %6272 }
0x111d   : > { %v6308_v8 = vadd.f32 %v6273_v56, %v14258_v58 }
0x111f   : > { %9965 = vtanh.f32 %v6308_v8 }
0x1124   : > { %v6375_v31 = vpop.permute.xlu1 %6374  ;;  %v6275_v6 = vpop.permute.xlu0 %6274 }
0x1125   : > { %v14381_v27 = vpop.eup %9965  ;;  %v6415_v45 = vmul.f32 %v6375_v31, %v14182_v60  ;;  %v6309_v19 = vadd.f32 %v6275_v6, %v14277_v41 }
0x1126   : > { %v6340_v63 = vsub.f32 %v14007_v36, %v14381_v27 }
0x1127   : > { %9967 = vtanh.f32 %v6309_v19  ;;  %6454 = vrot.lane.b32.xlu1 %v6415_v45, %s10238_s19 }
0x1128   : > { %6384 = vrot.lane.b32.xlu0 %v6340_v63, %s10237_s18 }
0x112b   : > { %v6447_v51 = vpop.permute.xlu2 %6446 }
0x112c   : > { %v14390_v58 = vadd.f32 %v14251_v24, %v6447_v51  ;;  %v6277_v10 = vpop.permute.xlu0 %6276 }
0x112d   : > { %v14392_v2 = vpop.eup %9967  ;;  %v6310_v14 = vadd.f32 %v6277_v10, %v14288_v9 }
0x112e   : > { %v6377_v60 = vpop.permute.xlu1 %6376  ;;  %6656 = vrot.lane.b32.xlu2 %v14390_v58, %s10235_s9  ;;  %v6341_v36 = vsub.f32 %v13995_v17, %v14392_v2 }
0x112f   : > { %v6416_v41 = vmul.f32 %v6377_v60, %v14198_v53  ;;  %9969 = vtanh.f32 %v6310_v14 }
0x1130   : > { %6386 = vrot.lane.b32.xlu0 %v6341_v36, %s10237_s18 }
0x1131   : > { %6456 = vrot.lane.b32.xlu1 %v6416_v41, %s10238_s19 }
0x1133   : > { %v6449_v24 = vpop.permute.xlu2 %6448 }
0x1134   : > { %v14403_v44 = vadd.f32 %v14265_v3, %v6449_v24 }
0x1135   : > { %v14405_v46 = vpop.eup %9969 }
0x1136   : > { %6658 = vrot.lane.b32.xlu2 %v14403_v44, %s10235_s9  ;;  %v6342_v53 = vsub.f32 %v14014_v59, %v14405_v46 }
0x1138   : > { %6388 = vrot.lane.b32.xlu0 %v6342_v53, %s10237_s18  ;;  %v14489_v53 = vld [vmem:[%s15597_s1 + $0x21] ss:$0 sm:$0xff] }
0x1143   : > { %v6379_v17 = vpop.permute.xlu1 %6378 }
0x1144   : > { %v6417_v9 = vmul.f32 %v6379_v17, %v14232_v34 }
0x1146   : > { %6458 = vrot.lane.b32.xlu1 %v6417_v9, %s10238_s19 }
0x1149   : > { %v6651_v40 = vpop.permute.xlu2 %6650 }
0x114a   : > { %9228 = vmatmul.msk.f32.vlgmr.msrb.gmra.mxu3 %vm1028_vm0, %v6651_v40  ;;  %v6279_v3 = vpop.permute.xlu0 %6278 }
0x114b   : > { %v6311_v18 = vadd.f32 %v6279_v3, %v14301_v54 }
0x114d   : > { %9971 = vtanh.f32 %v6311_v18 }
0x1153   : > { %v6653_v62 = vpop.permute.xlu2 %6652  ;;  %v14417_v29 = vpop.eup %9971 }
0x1154   : > { %9229 = vmatmul.msk.f32.gmra.mxu3 %vm1028_vm0, %v6653_v62  ;;  %v6343_v59 = vsub.f32 %v14023_v16, %v14417_v29 }
0x1156   : > { %6390 = vrot.lane.b32.xlu0 %v6343_v59, %s10237_s18 }
0x1162   : > { %v6451_v34 = vpop.permute.xlu1 %6450 }
0x1163   : > { %v14423_v30 = vadd.f32 %v14261_v48, %v6451_v34  ;;  %v6381_v1 = vpop.permute.xlu0 %6380 }
0x1164   : > { %v6418_v11 = vmul.f32 %v6381_v1, %v14249_v57  ;;  %v6586_v1 = vpop.f32.mrf.mxu1 }
0x1165   : > { %6660 = vrot.lane.b32.xlu2 %v14423_v30, %s10235_s9 }
0x1166   : > { %6460 = vrot.lane.b32.xlu1 %v6418_v11, %s10238_s19 }
0x1168   : > { %v6655_v54 = vpop.permute.xlu2 %6654 }
0x1169   : > { %9230 = vmatmul.msk.f32.gmra.mxu3 %vm1028_vm0, %v6655_v54 }
0x116b   : > { %v6453_v26 = vpop.permute.xlu1 %6452 }
0x116c   : > { %v14431_v16 = vadd.f32 %v14283_v7, %v6453_v26  ;;  %v6383_v49 = vpop.permute.xlu0 %6382  ;;  %v6589_v26 = vpop.f32.mrf.mxu1 }
0x116d   : > { %v6419_v23 = vmul.f32 %v6383_v49, %v14268_v52 }
0x116e   : > { %6662 = vrot.lane.b32.xlu1 %v14431_v16, %s10235_s9 }
0x116f   : > { %6462 = vrot.lane.b32.xlu0 %v6419_v23, %s10238_s19 }
0x1174   : > { %v6592_v23 = vpop.f32.mrf.mxu1 }
0x1188   : > { %v6657_v57 = vpop.permute.xlu2 %6656 }
0x1189   : > { %9231 = vmatmul.msk.f32.gmra.mxu3 %vm1028_vm0, %v6657_v57 }
0x1190   : > { %v6659_v48 = vpop.permute.xlu2 %6658 }
0x1191   : > { %9232 = vmatmul.msk.f32.gmra.mxu3 %vm1028_vm0, %v6659_v48  ;;  %v14520_v48 = vadd.f32 %v6592_v23, %v15833_v0 }
0x1199   : > { %v6455_v22 = vpop.permute.xlu1 %6454 }
0x119a   : > { %v14440_v32 = vadd.f32 %v14311_v39, %v6455_v22  ;;  %v6385_v7 = vpop.permute.xlu0 %6384 }
0x119b   : > { %v6420_v61 = vmul.f32 %v6385_v7, %v14307_v15 }
0x119c   : > { %6664 = vrot.lane.b32.xlu0 %v14440_v32, %s10235_s9 }
0x119d   : > { %6464 = vrot.lane.b32.xlu2 %v6420_v61, %s10238_s19 }
0x11a2   : > { %v6387_v5 = vpop.permute.xlu0 %6386 }
0x11a3   : > { %v6457_v52 = vpop.permute.xlu1 %6456  ;;  %v6421_v8 = vmul.f32 %v6387_v5, %v14314_v47 }
0x11a4   : > { %v14447_v56 = vadd.f32 %v14328_v25, %v6457_v52  ;;  %v14525_v52 = vadd.f32 %v6586_v1, %v15774_v4 }
0x11a5   : > { %6466 = vrot.lane.b32.xlu1 %v6421_v8, %s10238_s19 }
0x11a6   : > { %6666 = vrot.lane.b32.xlu2 %v14447_v56, %s10235_s9 }
0x11aa   : > { %v6389_v39 = vpop.permute.xlu0 %6388 }
0x11ab   : > { %v6422_v15 = vmul.f32 %v6389_v39, %v14326_v12 }
0x11ad   : > { %6468 = vrot.lane.b32.xlu0 %v6422_v15, %s10238_s19 }
0x11b8   : > { %v6459_v31 = vpop.permute.xlu1 %6458 }
0x11b9   : > { %v14456_v6 = vadd.f32 %v14336_v38, %v6459_v31 }
0x11bb   : > { %6668 = vrot.lane.b32.xlu1 %v14456_v6, %s10235_s9 }
0x11bf   : > { %v6661_v25 = vpop.permute.xlu2 %6660 }
0x11c0   : > { %9233 = vmatmul.msk.f32.gmra.mxu3 %vm1028_vm0, %v6661_v25  ;;  %v14534_v25 = vadd.f32 %v6589_v26, %v15776_v35 }
0x11c8   : > { %v6391_v47 = vpop.permute.xlu0 %6390 }
0x11c9   : > { %v6423_v45 = vmul.f32 %v6391_v47, %v14343_v33  ;;  %v6595_v47 = vpop.f32.mrf.mxu1 }
0x11cb   : > { %6470 = vrot.lane.b32.xlu2 %v6423_v45, %s10238_s19 }
0x11d8   : > { %v6461_v19 = vpop.permute.xlu1 %6460 }
0x11d9   : > { %v14464_v12 = vadd.f32 %v14353_v13, %v6461_v19  ;;  %v6731_v13 = vpop.f32.mrf.mxu3 }
0x11da   : > { %v6732_v17 = vadd.f32 %v14489_v53, %v6731_v13 }
0x11db   : > { %6670 = vrot.lane.b32.xlu0 %v14464_v12, %s10235_s9 }
0x11dc   : > { %v6779_v5 = vadd.f32 %v6732_v17, %v14525_v52 }
0x11de   : > { %v9244_v15 = vmul.f32 -1.442695, %v6779_v5 }
0x11e0   : > { %v6663_v38 = vpop.permute.xlu1 %6662 }
0x11e1   : > { %v6463_v63 = vpop.permute.xlu0 %6462  ;;  %9234 = vmatmul.msk.f32.gmra.mxu3 %vm1028_vm0, %v6663_v38  ;;  %v6734_v60 = vpop.f32.mrf.mxu3 }
0x11e2   : > { %v14470_v51 = vadd.f32 %v14366_v28, %v6463_v63  ;;  %v6735_v18 = vadd.f32 %v14489_v53, %v6734_v60  ;;  %v14538_v63 = vadd.f32 %v6595_v47, %v15835_v55 }
0x11e4   : > { %6672 = vrot.lane.b32.xlu1 %v14470_v51, %s10235_s9  ;;  %v6780_v45 = vadd.f32 %v6735_v18, %v14534_v25 }
0x11e6   : > { %v9245_v38 = vmul.f32 -1.442695, %v6780_v45 }
0x11f7   : > { %v6465_v33 = vpop.permute.xlu2 %6464 }
0x11f8   : > { %v14475_v10 = vadd.f32 %v14381_v27, %v6465_v33  ;;  %v6737_v27 = vpop.f32.mrf.mxu3 }
0x11f9   : > { %v6738_v34 = vadd.f32 %v14489_v53, %v6737_v27  ;;  %v15850_v27 = vld [vmem:[#allocation11_spill] sm:$0xff] }
0x11fa   : > { %6674 = vrot.lane.b32.xlu2 %v14475_v10, %s10235_s9 }
0x11fb   : > { %v6781_v22 = vadd.f32 %v6738_v34, %v14520_v48 }
0x11fd   : > { %v9246_v7 = vmul.f32 -1.442695, %v6781_v22 }
0x11ff   : > { %9973 = vpow2.f32 %v9246_v7 }
0x1200   : > { %v6667_v41 = vpop.permute.xlu2 %6666  ;;  %9975 = vpow2.f32 %v9244_v15 }
0x1205   : > { %v9974_v31 = vpop.eup %9973 }
0x1206   : > { %v6845_v19 = vadd.f32 1.0, %v9974_v31  ;;  %v9976_v33 = vpop.eup %9975 }
0x1208   : > { %9977 = vrcp.f32 %v6845_v19  ;;  %v6900_v22 = vand.u32 2147483648, %v6845_v19  ;;  %vm6894_vm11 = vweird.f32 %v6845_v19 }
0x1209   : > { %9979 = vpow2.f32 %v9245_v38 }
0x120a   : > { %v6901_v45 = vor.u32 1.1754944e-38, %v6900_v22 }
0x120e   : > { %v6665_v14 = vpop.permute.xlu0 %6664  ;;  %v9978_v60 = vpop.eup %9977 }
0x120f   : > { %9235 = vmatmul.msk.f32.gmra.mxu3 %vm1028_vm0, %v6665_v14  ;;  %v6843_v14 = vadd.f32 1.0, %v9976_v33  ;;  %vm6895_vm10 = vweird.f32 %v9978_v60 }
0x1210   : > { %vm6896_vm12 = vmor %vm6894_vm11, %vm6895_vm10 }
0x1211   : > { %9981 = vrcp.f32 %v6843_v14  ;;  %vm6864_vm15 = vweird.f32 %v6843_v14 }
0x1217   : > { %v6467_v36 = vpop.permute.xlu1 %6466  ;;  %9236 = vmatmul.msk.f32.gmra.mxu3 %vm1028_vm0, %v6667_v41  ;;  %v6598_v41 = vpop.f32.mrf.mxu1 }
0x1218   : > { %v14482_v28 = vadd.f32 %v14392_v2, %v6467_v36  ;;  %v6740_v2 = vpop.f32.mrf.mxu3 }
0x1219   : > { %v6741_v62 = vadd.f32 %v14489_v53, %v6740_v2  ;;  %v9980_v2 = vpop.eup %9979 }
0x121a   : > { %6676 = vrot.lane.b32.xlu0 %v14482_v28, %s10235_s9 }
0x121b   : > { %v6782_v13 = vadd.f32 %v6741_v62, %v14538_v63 }
0x121d   : > { %v9247_v36 = vmul.f32 -1.442695, %v6782_v13 }
0x121f   : > { %v6469_v24 = vpop.permute.xlu0 %6468  ;;  %9983 = vpow2.f32 %v9247_v36  ;;  %v6601_v26 = vpop.f32.mrf.mxu1 }
0x1220   : > { %v14493_v9 = vadd.f32 %v14405_v46, %v6469_v24  ;;  %v6743_v46 = vpop.f32.mrf.mxu3  ;;  %v14542_v24 = vadd.f32 %v6598_v41, %v15850_v27 }
0x1222   : > { %7115 = vrot.lane.b32.xlu0 %v6732_v17, %s10235_s9  ;;  %6678 = vrot.lane.b32.xlu1 %v14493_v9, %s10235_s9  ;;  %v6890_v17 = vmul.f32 %v9978_v60, %v6845_v19 }
0x1225   : > { %v6471_v40 = vpop.permute.xlu2 %6470 }
0x1226   : > { %v14499_v3 = vadd.f32 %v14417_v29, %v6471_v40  ;;  %v6744_v29 = vadd.f32 %v14489_v53, %v6743_v46  ;;  %v6891_v46 = vsub.f32 1.0, %v6890_v17 }
0x1228   : > { %6680 = vrot.lane.b32.xlu2 %v14499_v3, %s10235_s9  ;;  %v6783_v40 = vadd.f32 %v6744_v29, %v14542_v24  ;;  %v6892_v1 = vmul.f32 %v9978_v60, %v6891_v46  ;;  %v6870_v46 = vand.u32 2147483648, %v6843_v14 }
0x122a   : > { %7121 = vrot.lane.b32.xlu0 %v6741_v62, %s10235_s9  ;;  %7117 = vrot.lane.b32.xlu1 %v6735_v18, %s10235_s9  ;;  %v14545_v18 = vadd.f32 1.0, %v9980_v2 }
0x122c   : > { %9985 = vrcp.f32 %v14545_v18  ;;  %vm6879_vm4 = vweird.f32 %v14545_v18 }
0x122d   : > { %v6669_v59 = vpop.permute.xlu1 %6668 }
0x122e   : > { %9237 = vmatmul.msk.f32.gmra.mxu3 %vm1028_vm0, %v6669_v59  ;;  %v9982_v59 = vpop.eup %9981 }
0x122f   : > { %v9984_v62 = vpop.eup %9983  ;;  %vm6865_vm14 = vweird.f32 %v9982_v59 }
0x1230   : > { %7119 = vrot.lane.b32.xlu2 %v6738_v34, %s10235_s9  ;;  %v9248_v34 = vmul.f32 -1.442695, %v6783_v40  ;;  %vm6866_vm1 = vmor %vm6864_vm15, %vm6865_vm14 }
0x1232   : > { %7123 = vrot.lane.b32.xlu1 %v6744_v29, %s10235_s9  ;;  %9987 = vpow2.f32 %v9248_v34  ;;  %v9986_v7 = vpop.eup %9985  ;;  %v6868_v34 = vand.u32 2147483647, %v6843_v14 }
0x1233   : > { %v6875_v33 = vmul.f32 %v9986_v7, %v14545_v18  ;;  %vm6880_vm3 = vweird.f32 %v9986_v7 }
0x1234   : > { %vm6869_vm2 = vcmp.eq.f32.partialorder %v6868_v34, 8.507059e+37  ;;  %vm6881_vm5 = vmor %vm6879_vm4, %vm6880_vm3 }
0x1238   : > { %v9988_v15 = vpop.eup %9987 }
0x1239   : > { %v14559_v13 = vadd.f32 1.0, %v9988_v15 }
0x1243   : > { %v6746_v11 = vpop.f32.mrf.mxu3 }
0x1244   : > { %v14513_v54 = vadd.f32 %v14489_v53, %v6746_v11  ;;  %v6860_v11 = vmul.f32 %v9982_v59, %v6843_v14 }
0x1246   : > { %7125 = vrot.lane.b32.xlu2 %v14513_v54, %s10235_s9  ;;  %v6861_v29 = vsub.f32 1.0, %v6860_v11 }
0x1248   : > { %v6862_v38 = vmul.f32 %v9982_v59, %v6861_v29 }
0x124d   : > { %v6671_v49 = vpop.permute.xlu0 %6670 }
0x124e   : > { %9238 = vmatmul.msk.f32.gmra.mxu3 %vm1028_vm0, %v6671_v49  ;;  %v14548_v49 = vadd.f32 1.0, %v9984_v62 }
0x1250   : > { %9989 = vrcp.f32 %v14548_v49  ;;  %vm6909_vm8 = vweird.f32 %v14548_v49 }
0x1251   : > { %9991 = vrcp.f32 %v14559_v13 }
0x1254   : > { %v6675_v61 = vpop.permute.xlu2 %6674 }
0x1256   : > { %v6673_v57 = vpop.permute.xlu1 %6672  ;;  %v14564_v40 = vpop.eup %9989 }
0x1257   : > { %9239 = vmatmul.msk.f32.gmra.mxu3 %vm1028_vm0, %v6673_v57  ;;  %v6893_v57 = vadd.f32 %v9978_v60, %v6892_v1  ;;  %v6905_v62 = vmul.f32 %v14564_v40, %v14548_v49  ;;  %v14573_v15 = vpop.eup %9991  ;;  %vm6910_vm7 = vweird.f32 %v14564_v40 }
0x1258   : > { %vm6911_vm9 = vmor %vm6909_vm8, %vm6910_vm7  ;;  %vm6925_vm11 = vweird.f32 %v14573_v15 }
0x1259   : > { %v6897_v47 = vsel %vm6896_vm12, %v9978_v60, %v6893_v57  ;;  %v6876_v60 = vsub.f32 1.0, %v6875_v33  ;;  %vm6924_vm12 = vweird.f32 %v14559_v13 }
0x125b   : > { %v6877_v11 = vmul.f32 %v9986_v7, %v6876_v60 }
0x125d   : > { %v6878_v14 = vadd.f32 %v9986_v7, %v6877_v11 }
0x125f   : > { %9240 = vmatmul.msk.f32.gmra.mxu3 %vm1028_vm0, %v6675_v61  ;;  %v15851_v61 = vld [vmem:[#allocation13_spill] sm:$0xff] }
0x1260   : > { %v14553_v5 = vadd.f32 %v6601_v26, %v15851_v61  ;;  %v6871_v26 = vor.u32 1.1754944e-38, %v6870_v46 }
0x1262   : > { %v6784_v31 = vadd.f32 %v14513_v54, %v14553_v5  ;;  %v6863_v54 = vadd.f32 %v9982_v59, %v6862_v38 }
0x1264   : > { %v6749_v8 = vpop.f32.mrf.mxu3  ;;  %v9249_v17 = vmul.f32 -1.442695, %v6784_v31  ;;  %v6867_v1 = vsel %vm6866_vm1, %v9982_v59, %v6863_v54  ;;  %v6883_v59 = vand.u32 2147483647, %v14545_v18 }
0x1265   : > { %v14529_v39 = vadd.f32 %v14489_v53, %v6749_v8  ;;  %v6898_v8 = vand.u32 2147483647, %v6845_v19  ;;  %v14571_v22 = vsel %vm6869_vm2, %v6871_v26, %v6867_v1  ;;  %v6913_v1 = vand.u32 2147483647, %v14548_v49 }
0x1266   : > { %9993 = vpow2.f32 %v9249_v17  ;;  %v6882_v17 = vsel %vm6881_vm5, %v9986_v7, %v6878_v14  ;;  %vm6884_vm6 = vcmp.eq.f32.partialorder %v6883_v59, 8.507059e+37 }
0x1267   : > { %7127 = vrot.lane.b32.xlu1 %v14529_v39, %s10235_s9  ;;  %vm6899_vm13 = vcmp.eq.f32.partialorder %v6898_v8, 8.507059e+37  ;;  %v6906_v8 = vsub.f32 1.0, %v6905_v62  ;;  %v6915_v62 = vand.u32 2147483648, %v14548_v49  ;;  %vm6914_vm10 = vcmp.eq.f32.partialorder %v6913_v1, 8.507059e+37 }
0x1268   : > { %v14561_v41 = vsel %vm6899_vm13, %v6901_v45, %v6897_v47  ;;  %v6885_v45 = vand.u32 2147483648, %v14545_v18  ;;  %vm6926_vm13 = vmor %vm6924_vm12, %vm6925_vm11 }
0x1269   : > { %v6907_v33 = vmul.f32 %v14564_v40, %v6906_v8 }
0x126b   : > { %v6908_v46 = vadd.f32 %v14564_v40, %v6907_v33  ;;  %v6930_v33 = vand.u32 2147483648, %v14559_v13 }
0x126c   : > { %v9994_v47 = vpop.eup %9993 }
0x126d   : > { %v6912_v11 = vsel %vm6911_vm9, %v14564_v40, %v6908_v46  ;;  %v15852_v40 = vld [vmem:[#allocation16_spill] sm:$0xff]  ;;  %v6931_v46 = vor.u32 1.1754944e-38, %v6930_v33 }
0x1282   : > { %v14550_v23 = vpop.permute.xlu2 %6680 }
0x128a   : > { %v7120_v36 = vpop.permute.xlu2 %7119 }
0x128b   : > { %v7165_v19 = vmul.f32 %v7120_v36, %v14561_v41  ;;  %v14582_v36 = vadd.f32 1.0, %v9994_v47 }
0x128c   : > { %v6677_v2 = vpop.permute.xlu0 %6676 }
0x128d   : > { %9241 = vmatmul.msk.f32.gmra.mxu3 %vm1028_vm0, %v6677_v2  ;;  %7199 = vrot.lane.b32.xlu1 %v7165_v19, %s10236_s17  ;;  %v6920_v19 = vmul.f32 %v14573_v15, %v14559_v13  ;;  %v6886_v2 = vor.u32 1.1754944e-38, %v6885_v45  ;;  %9995 = vrcp.f32 %v14582_v36  ;;  %vm6939_vm1 = vweird.f32 %v14582_v36 }
0x128f   : > { %v14586_v54 = vsel %vm6884_vm6, %v6886_v2, %v6882_v17  ;;  %v6921_v7 = vsub.f32 1.0, %v6920_v19  ;;  %v6928_v17 = vand.u32 2147483647, %v14559_v13 }
0x1291   : > { %v6922_v26 = vmul.f32 %v14573_v15, %v6921_v7  ;;  %vm6929_vm14 = vcmp.eq.f32.partialorder %v6928_v17, 8.507059e+37 }
0x1292   : > { %v6752_v38 = vpop.f32.mrf.mxu3 }
0x1293   : > { %v14592_v18 = vadd.f32 %v14489_v53, %v6752_v38  ;;  %v9996_v8 = vpop.eup %9995  ;;  %v6923_v45 = vadd.f32 %v14573_v15, %v6922_v26 }
0x1294   : > { %v6679_v57 = vpop.permute.xlu1 %6678  ;;  %v7116_v29 = vpop.permute.xlu0 %7115  ;;  %v6935_v38 = vmul.f32 %v9996_v8, %v14582_v36  ;;  %vm6940_vm15 = vweird.f32 %v9996_v8 }
0x1295   : > { %v7163_v31 = vmul.f32 %v7116_v29, %v14571_v22  ;;  %9242 = vmatmul.msk.f32.gmra.mxu3 %vm1028_vm0, %v6679_v57  ;;  %v6916_v29 = vor.u32 1.1754944e-38, %v6915_v62  ;;  %v6927_v2 = vsel %vm6926_vm13, %v14573_v15, %v6923_v45  ;;  %v6945_v15 = vand.u32 2147483648, %v14582_v36  ;;  %vm6941_vm2 = vmor %vm6939_vm1, %vm6940_vm15 }
0x1296   : > { %v14626_v62 = vsel %vm6929_vm14, %v6931_v46, %v6927_v2 }
0x1297   : > { %7195 = vrot.lane.b32.xlu0 %v7163_v31, %s10236_s17  ;;  %v6604_v31 = vpop.f32.mrf.mxu1  ;;  %v14605_v14 = vsel %vm6914_vm10, %v6916_v29, %v6912_v11 }
0x1298   : > { %v14614_v59 = vadd.f32 %v6604_v31, %v15852_v40  ;;  %v6946_v31 = vor.u32 1.1754944e-38, %v6945_v15 }
0x129a   : > { %v6755_v57 = vpop.f32.mrf.mxu3  ;;  %v6785_v19 = vadd.f32 %v14529_v39, %v14614_v59 }
0x129b   : > { %v14608_v49 = vadd.f32 %v14489_v53, %v6755_v57  ;;  %v6943_v57 = vand.u32 2147483647, %v14582_v36 }
0x129c   : > { %v7118_v60 = vpop.permute.xlu1 %7117  ;;  %v9250_v7 = vmul.f32 -1.442695, %v6785_v19 }
0x129d   : > { %v7164_v34 = vmul.f32 %v7118_v60, %v14586_v54  ;;  %9243 = vmatmul.msk.f32.gmra.mxu3 %vm1028_vm0, %v14550_v23  ;;  %v7122_v23 = vpop.permute.xlu0 %7121  ;;  %v6936_v60 = vsub.f32 1.0, %v6935_v38  ;;  %vm6944_vm3 = vcmp.eq.f32.partialorder %v6943_v57, 8.507059e+37 }
0x129e   : > { %v7166_v47 = vmul.f32 %v7122_v23, %v14605_v14  ;;  %9997 = vpow2.f32 %v9250_v7 }
0x129f   : > { %7197 = vrot.lane.b32.xlu2 %v7164_v34, %s10236_s17  ;;  %7129 = vrot.lane.b32.xlu0 %v14592_v18, %s10235_s9  ;;  %v6937_v1 = vmul.f32 %v9996_v8, %v6936_v60 }
0x12a1   : > { %v6938_v26 = vadd.f32 %v9996_v8, %v6937_v1 }
0x12a3   : > { %v6942_v23 = vsel %vm6941_vm2, %v9996_v8, %v6938_v26 }
0x12a4   : > { %v7124_v34 = vpop.permute.xlu1 %7123  ;;  %v9998_v29 = vpop.eup %9997  ;;  %v14635_v38 = vsel %vm6944_vm3, %v6946_v31, %v6942_v23  ;;  %v15853_v31 = vld [vmem:[#allocation27_spill] sm:$0xff] }
0x12a5   : > { %v7167_v13 = vmul.f32 %v7124_v34, %v14626_v62  ;;  %v6849_v45 = vadd.f32 1.0, %v9998_v29 }
0x12a7   : > { %7131 = vrot.lane.b32.xlu2 %v14608_v49, %s10235_s9  ;;  %7201 = vrot.lane.b32.xlu0 %v7166_v47, %s10236_s17  ;;  %v7126_v47 = vpop.permute.xlu2 %7125  ;;  %9999 = vrcp.f32 %v6849_v45  ;;  %v6960_v34 = vand.u32 2147483648, %v6849_v45  ;;  %vm6954_vm5 = vweird.f32 %v6849_v45  ;;  %v6958_v7 = vand.u32 2147483647, %v6849_v45 }
0x12a8   : > { %v7168_v33 = vmul.f32 %v7126_v47, %v14635_v38 }
0x12a9   : > { %vm6959_vm7 = vcmp.eq.f32.partialorder %v6958_v7, 8.507059e+37 }
0x12ad   : > { %v10000_v17 = vpop.eup %9999 }
0x12ae   : > { %v6950_v19 = vmul.f32 %v10000_v17, %v6849_v45  ;;  %vm6955_vm4 = vweird.f32 %v10000_v17 }
0x12af   : > { %7203 = vrot.lane.b32.xlu2 %v7167_v13, %s10236_s17  ;;  %vm6956_vm6 = vmor %vm6954_vm5, %vm6955_vm4  ;;  %v6607_v13 = vpop.f32.mrf.mxu1 }
0x12b0   : > { %v6951_v2 = vsub.f32 1.0, %v6950_v19  ;;  %v14651_v47 = vadd.f32 %v6607_v13, %v15853_v31 }
0x12b1   : > { %v6758_v11 = vpop.f32.mrf.mxu3 }
0x12b2   : > { %v6759_v39 = vadd.f32 %v14489_v53, %v6758_v11  ;;  %v6952_v36 = vmul.f32 %v10000_v17, %v6951_v2  ;;  %v6961_v11 = vor.u32 1.1754944e-38, %v6960_v34 }
0x12b4   : > { %7133 = vrot.lane.b32.xlu1 %v6759_v39, %s10235_s9  ;;  %v6953_v8 = vadd.f32 %v10000_v17, %v6952_v36  ;;  %v15854_v36 = vld [vmem:[#allocation30_spill] sm:$0xff] }
0x12b6   : > { %v6957_v1 = vsel %vm6956_vm6, %v10000_v17, %v6953_v8 }
0x12b7   : > { %v14644_v26 = vsel %vm6959_vm7, %v6961_v11, %v6957_v1  ;;  %v6610_v45 = vpop.f32.mrf.mxu1  ;;  %v15855_v11 = vld [vmem:[#allocation34_spill] sm:$0xff] }
0x12bc   : > { %7205 = vrot.lane.b32.xlu1 %v7168_v33, %s10236_s17  ;;  %v6786_v33 = vadd.f32 %v14592_v18, %v14651_v47 }
0x12be   : > { %v9251_v2 = vmul.f32 -1.442695, %v6786_v33 }
0x12bf   : > { %v6613_v34 = vpop.f32.mrf.mxu1 }
0x12c0   : > { %10001 = vpow2.f32 %v9251_v2  ;;  %v14663_v18 = vadd.f32 %v6613_v34, %v15855_v11 }
0x12c6   : > { %v10002_v13 = vpop.eup %10001 }
0x12c7   : > { %v6850_v1 = vadd.f32 1.0, %v10002_v13 }
0x12c9   : > { %vm6969_vm9 = vweird.f32 %v6850_v1  ;;  %v6973_v27 = vand.u32 2147483647, %v6850_v1 }
0x12cb   : > { %vm6974_vm11 = vcmp.eq.f32.partialorder %v6973_v27, 8.507059e+37 }
0x12d1   : > { %v6761_v60 = vpop.f32.mrf.mxu3 }
0x12d2   : > { %v14640_v46 = vadd.f32 %v14489_v53, %v6761_v60  ;;  %v14657_v60 = vadd.f32 %v6610_v45, %v15854_v36 }
0x12d4   : > { %7135 = vrot.lane.b32.xlu0 %v14640_v46, %s10235_s9  ;;  %v6787_v8 = vadd.f32 %v14608_v49, %v14657_v60 }
0x12d6   : > { %v9252_v7 = vmul.f32 -1.442695, %v6787_v8 }
0x12d8   : > { %10003 = vpow2.f32 %v9252_v7  ;;  %v15856_v7 = vld [vmem:[#allocation26_spill] sm:$0xff] }
0x12d9   : > { %v7128_v15 = vpop.permute.xlu1 %7127  ;;  %10005 = vrcp.f32 %v6850_v1 }
0x12da   : > { %v7169_v57 = vmul.f32 %v7128_v15, %v14644_v26  ;;  %v6764_v29 = vpop.f32.mrf.mxu3  ;;  %v6616_v15 = vpop.f32.mrf.mxu1 }
0x12db   : > { %v6765_v23 = vadd.f32 %v14489_v53, %v6764_v29  ;;  %v6788_v29 = vadd.f32 %v6759_v39, %v14663_v18 }
0x12dc   : > { %7207 = vrot.lane.b32.xlu0 %v7169_v57, %s10236_s17 }
0x12dd   : > { %7137 = vrot.lane.b32.xlu2 %v6765_v23, %s10235_s9  ;;  %v9253_v33 = vmul.f32 -1.442695, %v6788_v29 }
0x12de   : > { %v10004_v57 = vpop.eup %10003 }
0x12df   : > { %v14666_v45 = vadd.f32 1.0, %v10004_v57 }
0x12e1   : > { %10007 = vrcp.f32 %v14666_v45  ;;  %v6990_v27 = vand.u32 2147483648, %v14666_v45  ;;  %vm6984_vm13 = vweird.f32 %v14666_v45 }
0x12e2   : > { %v6767_v17 = vpop.f32.mrf.mxu3  ;;  %10009 = vpow2.f32 %v9253_v33  ;;  %v6619_v49 = vpop.f32.mrf.mxu1 }
0x12e3   : > { %v6768_v19 = vadd.f32 %v14489_v53, %v6767_v17  ;;  %v10006_v17 = vpop.eup %10005  ;;  %v14672_v13 = vadd.f32 %v6619_v49, %v15856_v7 }
0x12e4   : > { %v6965_v2 = vmul.f32 %v10006_v17, %v6850_v1  ;;  %vm6970_vm8 = vweird.f32 %v10006_v17 }
0x12e5   : > { %7139 = vrot.lane.b32.xlu2 %v6768_v19, %s10235_s9  ;;  %v6790_v36 = vadd.f32 %v6765_v23, %v14672_v13  ;;  %v6975_v23 = vand.u32 2147483648, %v6850_v1  ;;  %vm6971_vm10 = vmor %vm6969_vm9, %vm6970_vm8 }
0x12e6   : > { %v6966_v34 = vsub.f32 1.0, %v6965_v2 }
0x12e7   : > { %v14669_v8 = vpop.eup %10007  ;;  %v9255_v40 = vmul.f32 -1.442695, %v6790_v36  ;;  %v6976_v35 = vor.u32 1.1754944e-38, %v6975_v23  ;;  %v6988_v23 = vand.u32 2147483647, %v14666_v45 }
0x12e8   : > { %v10010_v11 = vpop.eup %10009  ;;  %v6980_v39 = vmul.f32 %v14669_v8, %v14666_v45  ;;  %v6967_v57 = vmul.f32 %v10006_v17, %v6966_v34  ;;  %vm6985_vm12 = vweird.f32 %v14669_v8 }
0x12e9   : > { %v14675_v31 = vadd.f32 1.0, %v10010_v11  ;;  %vm6986_vm14 = vmor %vm6984_vm13, %vm6985_vm12  ;;  %vm6989_vm15 = vcmp.eq.f32.partialorder %v6988_v23, 8.507059e+37 }
0x12ea   : > { %v6622_v29 = vpop.f32.mrf.mxu1  ;;  %v6981_v61 = vsub.f32 1.0, %v6980_v39  ;;  %v6968_v7 = vadd.f32 %v10006_v17, %v6967_v57 }
0x12eb   : > { %10011 = vrcp.f32 %v14675_v31  ;;  %v14682_v2 = vadd.f32 %v6622_v29, %v15847_v37  ;;  %vm6999_vm2 = vweird.f32 %v14675_v31 }
0x12ec   : > { %10013 = vpow2.f32 %v9255_v40  ;;  %v6982_v36 = vmul.f32 %v14669_v8, %v6981_v61  ;;  %v6972_v0 = vsel %vm6971_vm10, %v10006_v17, %v6968_v7  ;;  %v15857_v17 = vld [vmem:[#allocation38_spill] sm:$0xff] }
0x12ed   : > { %v6791_v34 = vadd.f32 %v6768_v19, %v14682_v2  ;;  %v14700_v7 = vadd.f32 %v6616_v15, %v15857_v17 }
0x12ef   : > { %v9256_v29 = vmul.f32 -1.442695, %v6791_v34 }
0x12f9   : > { %v7198_v11 = vpop.permute.xlu2 %7197 }
0x12fa   : > { %v7244_v39 = vadd.f32 %v7198_v11, %v14534_v25  ;;  %v6789_v11 = vadd.f32 %v14640_v46, %v14700_v7 }
0x12fc   : > { %v9254_v46 = vmul.f32 -1.442695, %v6789_v11 }
0x1309   : > { %v7196_v33 = vpop.permute.xlu0 %7195 }
0x130a   : > { %v7243_v49 = vadd.f32 %v7196_v33, %v14525_v52  ;;  %v14687_v52 = vpop.eup %10011  ;;  %v14692_v33 = vsel %vm6974_vm11, %v6976_v35, %v6972_v0  ;;  %v7200_v0 = vpop.permute.xlu1 %7199 }
0x130b   : > { %v10014_v19 = vpop.eup %10013  ;;  %v6995_v35 = vmul.f32 %v14687_v52, %v14675_v31  ;;  %v7245_v45 = vadd.f32 %v7200_v0, %v14520_v48  ;;  %vm7000_vm1 = vweird.f32 %v14687_v52 }
0x130c   : > { %10015 = vtanh.f32 %v7243_v49  ;;  %v6983_v49 = vadd.f32 %v14669_v8, %v6982_v36  ;;  %v14716_v34 = vadd.f32 1.0, %v10014_v19  ;;  %vm7001_vm3 = vmor %vm6999_vm2, %vm7000_vm1 }
0x130d   : > { %10017 = vtanh.f32 %v7244_v39  ;;  %v6991_v39 = vor.u32 1.1754944e-38, %v6990_v27 }
0x130e   : > { %10019 = vpow2.f32 %v9256_v29  ;;  %v6987_v36 = vsel %vm6986_vm14, %v14669_v8, %v6983_v49  ;;  %vm7029_vm6 = vweird.f32 %v14716_v34 }
0x130f   : > { %v14723_v29 = vsel %vm6989_vm15, %v6991_v39, %v6987_v36  ;;  %10021 = vrcp.f32 %v14716_v34  ;;  %v7005_v36 = vand.u32 2147483648, %v14675_v31 }
0x1310   : > { %v6770_v57 = vpop.f32.mrf.mxu3  ;;  %10023 = vtanh.f32 %v7245_v45 }
0x1311   : > { %v14690_v40 = vadd.f32 %v14489_v53, %v6770_v57  ;;  %v7130_v1 = vpop.permute.xlu0 %7129  ;;  %v7132_v57 = vpop.permute.xlu2 %7131  ;;  %10025 = vpow2.f32 %v9254_v46 }
0x1312   : > { %v7170_v61 = vmul.f32 %v7130_v1, %v14692_v33  ;;  %v14697_v25 = vpop.eup %10015  ;;  %v6996_v1 = vsub.f32 1.0, %v6995_v35  ;;  %v7171_v8 = vmul.f32 %v7132_v57, %v14723_v29 }
0x1313   : > { %7141 = vrot.lane.b32.xlu2 %v14690_v40, %s10235_s9  ;;  %v7275_v15 = vsub.f32 %v14351_v50, %v14697_v25 }
0x1314   : > { %7209 = vrot.lane.b32.xlu0 %v7170_v61, %s10236_s17  ;;  %v14721_v61 = vpop.eup %10017  ;;  %v6997_v48 = vmul.f32 %v14687_v52, %v6996_v1 }
0x1315   : > { %7307 = vrot.lane.b32.xlu1 %v7275_v15, %s10237_s18  ;;  %v10020_v19 = vpop.eup %10019  ;;  %v7276_v27 = vsub.f32 %v14364_v21, %v14721_v61  ;;  %v7003_v21 = vand.u32 2147483647, %v14675_v31 }
0x1316   : > { %v14736_v35 = vadd.f32 1.0, %v10020_v19  ;;  %v6998_v23 = vadd.f32 %v14687_v52, %v6997_v48  ;;  %v10022_v15 = vpop.eup %10021 }
0x1317   : > { %v14743_v45 = vpop.eup %10023  ;;  %v7025_v46 = vmul.f32 %v10022_v15, %v14716_v34  ;;  %vm7004_vm4 = vcmp.eq.f32.partialorder %v7003_v21, 8.507059e+37  ;;  %vm7030_vm5 = vweird.f32 %v10022_v15 }
0x1318   : > { %v6773_v50 = vpop.f32.mrf.mxu3  ;;  %10027 = vrcp.f32 %v14736_v35  ;;  %v7002_v57 = vsel %vm7001_vm3, %v14687_v52, %v6998_v23  ;;  %vm7031_vm7 = vmor %vm7029_vm6, %vm7030_vm5  ;;  %v7050_v17 = vand.u32 2147483648, %v14736_v35  ;;  %vm7044_vm10 = vweird.f32 %v14736_v35 }
0x1319   : > { %v14726_v37 = vadd.f32 %v14489_v53, %v6773_v50  ;;  %v7202_v49 = vpop.permute.xlu0 %7201  ;;  %v7204_v1 = vpop.permute.xlu2 %7203  ;;  %v7277_v50 = vsub.f32 %v14376_v42, %v14743_v45 }
0x131a   : > { %v7246_v0 = vadd.f32 %v7202_v49, %v14538_v63  ;;  %v10026_v63 = vpop.eup %10025  ;;  %v7247_v48 = vadd.f32 %v7204_v1, %v14542_v24  ;;  %v7033_v1 = vand.u32 2147483647, %v14716_v34 }
0x131b   : > { %7143 = vrot.lane.b32.xlu2 %v14726_v37, %s10235_s9 }
0x131c   : > { %7211 = vrot.lane.b32.xlu0 %v7171_v8, %s10236_s17  ;;  %10029 = vtanh.f32 %v7246_v0  ;;  %v14757_v8 = vadd.f32 1.0, %v10026_v63  ;;  %vm7034_vm8 = vcmp.eq.f32.partialorder %v7033_v1, 8.507059e+37  ;;  %v7051_v1 = vor.u32 1.1754944e-38, %v7050_v17 }
0x131d   : > { %7309 = vrot.lane.b32.xlu1 %v7276_v27, %s10237_s18  ;;  %v7026_v27 = vsub.f32 1.0, %v7025_v46 }
0x131e   : > { %v10028_v52 = vpop.eup %10027  ;;  %10031 = vrcp.f32 %v14757_v8  ;;  %vm7014_vm14 = vweird.f32 %v14757_v8 }
0x131f   : > { %10033 = vtanh.f32 %v7247_v48  ;;  %v7027_v23 = vmul.f32 %v10022_v15, %v7026_v27  ;;  %vm7045_vm9 = vweird.f32 %v10028_v52 }
0x1320   : > { %v6776_v11 = vpop.f32.mrf.mxu3  ;;  %vm7046_vm11 = vmor %vm7044_vm10, %vm7045_vm9 }
0x1321   : > { %v14746_v39 = vadd.f32 %v14489_v53, %v6776_v11  ;;  %v7006_v53 = vor.u32 1.1754944e-38, %v7005_v36  ;;  %v7040_v11 = vmul.f32 %v10028_v52, %v14736_v35  ;;  %v7028_v36 = vadd.f32 %v10022_v15, %v7027_v23 }
0x1322   : > { %v14764_v0 = vpop.eup %10029 }
0x1323   : > { %7145 = vrot.lane.b32.xlu2 %v14746_v39, %s10235_s9  ;;  %v14760_v31 = vsel %vm7004_vm4, %v7006_v53, %v7002_v57  ;;  %v7278_v42 = vsub.f32 %v14390_v58, %v14764_v0  ;;  %v7041_v21 = vsub.f32 1.0, %v7040_v11  ;;  %v7035_v57 = vand.u32 2147483648, %v14716_v34 }
0x1324   : > { %v10032_v24 = vpop.eup %10031  ;;  %v7032_v46 = vsel %vm7031_vm7, %v10022_v15, %v7028_v36 }
0x1325   : > { %7311 = vrot.lane.b32.xlu1 %v7277_v50, %s10237_s18  ;;  %v14772_v63 = vpop.eup %10033  ;;  %v6625_v50 = vpop.f32.mrf.mxu1  ;;  %v7010_v58 = vmul.f32 %v10032_v24, %v14757_v8  ;;  %v7036_v48 = vor.u32 1.1754944e-38, %v7035_v57  ;;  %vm7015_vm13 = vweird.f32 %v10032_v24 }
0x1326   : > { %v7134_v19 = vpop.permute.xlu1 %7133  ;;  %v7279_v53 = vsub.f32 %v14403_v44, %v14772_v63  ;;  %v14785_v11 = vadd.f32 %v6625_v50, %v15848_v20  ;;  %v7048_v44 = vand.u32 2147483647, %v14736_v35  ;;  %v7020_v35 = vand.u32 2147483648, %v14757_v8  ;;  %vm7016_vm15 = vmor %vm7014_vm14, %vm7015_vm13 }
0x1327   : > { %v7172_v49 = vmul.f32 %v7134_v19, %v14760_v31  ;;  %v7042_v19 = vmul.f32 %v10028_v52, %v7041_v21  ;;  %v14781_v27 = vsel %vm7034_vm8, %v7036_v48, %v7032_v46 }
0x1328   : > { %v6792_v15 = vadd.f32 %v14690_v40, %v14785_v11  ;;  %vm7049_vm12 = vcmp.eq.f32.partialorder %v7048_v44, 8.507059e+37  ;;  %v7018_v40 = vand.u32 2147483647, %v14757_v8 }
0x1329   : > { %7213 = vrot.lane.b32.xlu0 %v7172_v49, %s10236_s17  ;;  %v7043_v34 = vadd.f32 %v10028_v52, %v7042_v19 }
0x132a   : > { %vm7019_vm1 = vcmp.eq.f32.partialorder %v7018_v40, 8.507059e+37 }
0x132b   : > { %v7047_v21 = vsel %vm7046_vm11, %v10028_v52, %v7043_v34 }
0x132d   : > { %7313 = vrot.lane.b32.xlu1 %v7278_v42, %s10237_s18  ;;  %v7011_v42 = vsub.f32 1.0, %v7010_v58  ;;  %v6628_v57 = vpop.f32.mrf.mxu1  ;;  %v9257_v58 = vmul.f32 -1.442695, %v6792_v15 }
0x132e   : > { %v7206_v50 = vpop.permute.xlu1 %7205  ;;  %v14800_v52 = vadd.f32 %v6628_v57, %v15849_v43 }
0x132f   : > { %v7012_v36 = vmul.f32 %v10032_v24, %v7011_v42  ;;  %v7248_v17 = vadd.f32 %v7206_v50, %v14553_v5  ;;  %10035 = vpow2.f32 %v9257_v58  ;;  %v15858_v5 = vld [vmem:[#allocation42_spill] sm:$0xff] }
0x1330   : > { %v6793_v42 = vadd.f32 %v14726_v37, %v14800_v52 }
0x1331   : > { %v7013_v19 = vadd.f32 %v10032_v24, %v7012_v36  ;;  %10037 = vtanh.f32 %v7248_v17 }
0x1332   : > { %v9258_v36 = vmul.f32 -1.442695, %v6793_v42 }
0x1334   : > { %10039 = vpow2.f32 %v9258_v36 }
0x1335   : > { %7315 = vrot.lane.b32.xlu1 %v7279_v53, %s10237_s18  ;;  %v14793_v53 = vsel %vm7049_vm12, %v7051_v1, %v7047_v21  ;;  %v6631_v8 = vpop.f32.mrf.mxu1  ;;  %v10036_v21 = vpop.eup %10035 }
0x1336   : > { %v14811_v57 = vadd.f32 %v6631_v8, %v15858_v5  ;;  %v6856_v1 = vadd.f32 1.0, %v10036_v21 }
0x1337   : > { %v7138_v49 = vpop.permute.xlu2 %7137 }
0x1338   : > { %v7174_v23 = vmul.f32 %v7138_v49, %v14781_v27  ;;  %v7017_v49 = vsel %vm7016_vm15, %v10032_v24, %v7013_v19  ;;  %v14813_v24 = vpop.eup %10037  ;;  %v6794_v37 = vadd.f32 %v14746_v39, %v14811_v57  ;;  %10041 = vrcp.f32 %v6856_v1 }
0x1339   : > { %vm7059_vm3 = vweird.f32 %v6856_v1 }
0x133a   : > { %7217 = vrot.lane.b32.xlu2 %v7174_v23, %s10236_s17  ;;  %v7021_v23 = vor.u32 1.1754944e-38, %v7020_v35  ;;  %v9259_v19 = vmul.f32 -1.442695, %v6794_v37  ;;  %v7065_v37 = vand.u32 2147483648, %v6856_v1 }
0x133c   : > { %v14806_v34 = vsel %vm7019_vm1, %v7021_v23, %v7017_v49 }
0x133f   : > { %v7140_v46 = vpop.permute.xlu2 %7139 }
0x1340   : > { %v7175_v48 = vmul.f32 %v7140_v46, %v14793_v53  ;;  %v7280_v46 = vsub.f32 %v14423_v30, %v14813_v24 }
0x1342   : > { %7219 = vrot.lane.b32.xlu2 %v7175_v48, %s10236_s17  ;;  %v10040_v48 = vpop.eup %10039 }
0x1343   : > { %v6857_v35 = vadd.f32 1.0, %v10040_v48  ;;  %v10042_v40 = vpop.eup %10041 }
0x1344   : > { %vm7060_vm2 = vweird.f32 %v10042_v40 }
0x1345   : > { %vm7061_vm4 = vmor %vm7059_vm3, %vm7060_vm2  ;;  %vm7074_vm7 = vweird.f32 %v6857_v35 }
0x1346   : > { %v7136_v44 = vpop.permute.xlu0 %7135 }
0x1347   : > { %v7173_v15 = vmul.f32 %v7136_v44, %v14806_v34 }
0x1349   : > { %7215 = vrot.lane.b32.xlu0 %v7173_v15, %s10236_s17 }
0x134e   : > { %v7208_v58 = vpop.permute.xlu0 %7207 }
0x134f   : > { %v7249_v50 = vadd.f32 %v7208_v58, %v14614_v59  ;;  %v7055_v59 = vmul.f32 %v10042_v40, %v6856_v1  ;;  %v7063_v58 = vand.u32 2147483647, %v6856_v1 }
0x1351   : > { %10043 = vtanh.f32 %v7249_v50  ;;  %7317 = vrot.lane.b32.xlu0 %v7280_v46, %s10237_s18  ;;  %v7056_v42 = vsub.f32 1.0, %v7055_v59  ;;  %vm7064_vm5 = vcmp.eq.f32.partialorder %v7063_v58, 8.507059e+37 }
0x1352   : > { %10045 = vpow2.f32 %v9259_v19  ;;  %v7066_v19 = vor.u32 1.1754944e-38, %v7065_v37 }
0x1353   : > { %10047 = vrcp.f32 %v6857_v35  ;;  %v7057_v44 = vmul.f32 %v10042_v40, %v7056_v42 }
0x1355   : > { %v7058_v15 = vadd.f32 %v10042_v40, %v7057_v44  ;;  %v7080_v44 = vand.u32 2147483648, %v6857_v35 }
0x1357   : > { %v14821_v17 = vpop.eup %10043 }
0x1358   : > { %v7281_v39 = vsub.f32 %v14431_v16, %v14821_v17  ;;  %v10046_v49 = vpop.eup %10045  ;;  %v7062_v16 = vsel %vm7061_vm4, %v10042_v40, %v7058_v15  ;;  %v7081_v15 = vor.u32 1.1754944e-38, %v7080_v44 }
0x1359   : > { %v6858_v30 = vadd.f32 1.0, %v10046_v49  ;;  %v10048_v23 = vpop.eup %10047 }
0x135a   : > { %7319 = vrot.lane.b32.xlu0 %v7281_v39, %s10237_s18  ;;  %v7070_v8 = vmul.f32 %v10048_v23, %v6857_v35  ;;  %v14826_v39 = vsel %vm7064_vm5, %v7066_v19, %v7062_v16  ;;  %vm7075_vm6 = vweird.f32 %v10048_v23 }
0x135b   : > { %10049 = vrcp.f32 %v6858_v30  ;;  %vm7076_vm8 = vmor %vm7074_vm7, %vm7075_vm6  ;;  %vm7089_vm11 = vweird.f32 %v6858_v30 }
0x135c   : > { %v7071_v36 = vsub.f32 1.0, %v7070_v8  ;;  %v7078_v8 = vand.u32 2147483647, %v6857_v35 }
0x135e   : > { %v7072_v50 = vmul.f32 %v10048_v23, %v7071_v36  ;;  %vm7079_vm9 = vcmp.eq.f32.partialorder %v7078_v8, 8.507059e+37 }
0x1360   : > { %v7073_v59 = vadd.f32 %v10048_v23, %v7072_v50  ;;  %v7095_v50 = vand.u32 2147483648, %v6858_v30 }
0x1361   : > { %v10050_v21 = vpop.eup %10049 }
0x1362   : > { %v7085_v46 = vmul.f32 %v10050_v21, %v6858_v30  ;;  %v7077_v1 = vsel %vm7076_vm8, %v10048_v23, %v7073_v59  ;;  %vm7090_vm10 = vweird.f32 %v10050_v21  ;;  %v7096_v35 = vor.u32 1.1754944e-38, %v7095_v50 }
0x1363   : > { %v14830_v36 = vsel %vm7079_vm9, %v7081_v15, %v7077_v1  ;;  %vm7091_vm12 = vmor %vm7089_vm11, %vm7090_vm10 }
0x1364   : > { %v7086_v42 = vsub.f32 1.0, %v7085_v46  ;;  %v7093_v46 = vand.u32 2147483647, %v6858_v30 }
0x1366   : > { %v7087_v40 = vmul.f32 %v10050_v21, %v7086_v42  ;;  %vm7094_vm13 = vcmp.eq.f32.partialorder %v7093_v46, 8.507059e+37 }
0x1368   : > { %v7088_v16 = vadd.f32 %v10050_v21, %v7087_v40 }
0x136a   : > { %v7092_v19 = vsel %vm7091_vm12, %v10050_v21, %v7088_v16 }
0x136b   : > { %v14834_v23 = vsel %vm7094_vm13, %v7096_v35, %v7092_v19 }
0x136d   : > { %v7142_v48 = vpop.permute.xlu2 %7141 }
0x136e   : > { %v7176_v49 = vmul.f32 %v7142_v48, %v14826_v39 }
0x1370   : > { %7221 = vrot.lane.b32.xlu2 %v7176_v49, %s10236_s17 }
0x1375   : > { %v7144_v37 = vpop.permute.xlu2 %7143 }
0x1376   : > { %v7177_v58 = vmul.f32 %v7144_v37, %v14830_v36 }
0x1378   : > { %7223 = vrot.lane.b32.xlu2 %v7177_v58, %s10236_s17 }
0x137d   : > { %v7146_v48 = vpop.permute.xlu2 %7145 }
0x137e   : > { %v7178_v49 = vmul.f32 %v7146_v48, %v14834_v23 }
0x1380   : > { %7225 = vrot.lane.b32.xlu2 %v7178_v49, %s10236_s17 }
0x1386   : > { %v7210_v59 = vpop.permute.xlu0 %7209 }
0x1387   : > { %v7250_v42 = vadd.f32 %v7210_v59, %v14651_v47  ;;  %v7308_v44 = vpop.permute.xlu1 %7307 }
0x1388   : > { %v7355_v8 = vmul.f32 %v7308_v44, %v14571_v22 }
0x1389   : > { %10051 = vtanh.f32 %v7250_v42 }
0x138a   : > { %7387 = vrot.lane.b32.xlu1 %v7355_v8, %s10238_s19 }
0x138e   : > { %v7212_v30 = vpop.permute.xlu0 %7211 }
0x138f   : > { %v14841_v21 = vpop.eup %10051  ;;  %v7251_v1 = vadd.f32 %v7212_v30, %v14657_v60  ;;  %v7310_v40 = vpop.permute.xlu1 %7309 }
0x1390   : > { %v7282_v15 = vsub.f32 %v14440_v32, %v14841_v21  ;;  %v7356_v37 = vmul.f32 %v7310_v40, %v14586_v54 }
0x1391   : > { %10053 = vtanh.f32 %v7251_v1 }
0x1392   : > { %7321 = vrot.lane.b32.xlu0 %v7282_v15, %s10237_s18  ;;  %7389 = vrot.lane.b32.xlu1 %v7356_v37, %s10238_s19 }
0x1394   : > { %v7218_v35 = vpop.permute.xlu2 %7217 }
0x1397   : > { %v14849_v47 = vpop.eup %10053  ;;  %v7312_v22 = vpop.permute.xlu1 %7311 }
0x1398   : > { %v7283_v58 = vsub.f32 %v14447_v56, %v14849_v47  ;;  %v7357_v16 = vmul.f32 %v7312_v22, %v14561_v41 }
0x139a   : > { %7323 = vrot.lane.b32.xlu0 %v7283_v58, %s10237_s18  ;;  %7391 = vrot.lane.b32.xlu1 %v7357_v16, %s10238_s19 }
0x139b   : > { %v7214_v32 = vpop.permute.xlu0 %7213 }
0x139c   : > { %v7252_v60 = vadd.f32 %v7214_v32, %v14663_v18  ;;  %v7220_v49 = vpop.permute.xlu2 %7219 }
0x139e   : > { %10055 = vtanh.f32 %v7252_v60 }
0x139f   : > { %v7314_v54 = vpop.permute.xlu1 %7313 }
0x13a0   : > { %v7358_v50 = vmul.f32 %v7314_v54, %v14605_v14  ;;  %v7254_v14 = vadd.f32 %v7218_v35, %v14672_v13 }
0x13a2   : > { %7393 = vrot.lane.b32.xlu1 %v7358_v50, %s10238_s19 }
0x13a4   : > { %v14859_v46 = vpop.eup %10055 }
0x13a5   : > { %v7284_v56 = vsub.f32 %v14456_v6, %v14859_v46 }
0x13a7   : > { %7325 = vrot.lane.b32.xlu0 %v7284_v56, %s10237_s18  ;;  %v7316_v41 = vpop.permute.xlu1 %7315 }
0x13a8   : > { %v7359_v19 = vmul.f32 %v7316_v41, %v14626_v62  ;;  %v7255_v62 = vadd.f32 %v7220_v49, %v14682_v2 }
0x13aa   : > { %7395 = vrot.lane.b32.xlu1 %v7359_v19, %s10238_s19 }
0x13bb   : > { %v7216_v18 = vpop.permute.xlu0 %7215 }
0x13bc   : > { %v7253_v48 = vadd.f32 %v7216_v18, %v14700_v7 }
0x13be   : > { %10057 = vtanh.f32 %v7253_v48 }
0x13bf   : > { %10059 = vtanh.f32 %v7254_v14 }
0x13c0   : > { %10061 = vtanh.f32 %v7255_v62 }
0x13c3   : > { %v7318_v59 = vpop.permute.xlu0 %7317 }
0x13c4   : > { %v14868_v42 = vpop.eup %10057  ;;  %v7360_v6 = vmul.f32 %v7318_v59, %v14635_v38 }
0x13c5   : > { %v7285_v44 = vsub.f32 %v14464_v12, %v14868_v42  ;;  %v14876_v7 = vpop.eup %10059 }
0x13c6   : > { %7397 = vrot.lane.b32.xlu0 %v7360_v6, %s10238_s19  ;;  %v7286_v1 = vsub.f32 %v14470_v51, %v14876_v7  ;;  %v14884_v38 = vpop.eup %10061 }
0x13c7   : > { %7327 = vrot.lane.b32.xlu2 %v7285_v44, %s10237_s18  ;;  %v7287_v2 = vsub.f32 %v14475_v10, %v14884_v38 }
0x13ca   : > { %v7222_v8 = vpop.permute.xlu2 %7221 }
0x13cb   : > { %v7256_v12 = vadd.f32 %v7222_v8, %v14785_v11 }
0x13cc   : > { %v7320_v13 = vpop.permute.xlu0 %7319 }
0x13cd   : > { %v7361_v30 = vmul.f32 %v7320_v13, %v14644_v26  ;;  %10063 = vtanh.f32 %v7256_v12 }
0x13cf   : > { %7329 = vrot.lane.b32.xlu2 %v7286_v1, %s10237_s18  ;;  %7399 = vrot.lane.b32.xlu0 %v7361_v30, %s10238_s19 }
0x13d2   : > { %v7224_v40 = vpop.permute.xlu2 %7223 }
0x13d3   : > { %v7257_v26 = vadd.f32 %v7224_v40, %v14800_v52  ;;  %v14890_v15 = vpop.eup %10063 }
0x13d4   : > { %v7288_v37 = vsub.f32 %v14482_v28, %v14890_v15 }
0x13d5   : > { %10065 = vtanh.f32 %v7257_v26 }
0x13d7   : > { %7331 = vrot.lane.b32.xlu2 %v7287_v2, %s10237_s18 }
0x13da   : > { %v7226_v51 = vpop.permute.xlu2 %7225 }
0x13db   : > { %v7258_v11 = vadd.f32 %v7226_v51, %v14811_v57  ;;  %v14896_v22 = vpop.eup %10065 }
0x13dc   : > { %v7289_v10 = vsub.f32 %v14493_v9, %v14896_v22 }
0x13dd   : > { %10067 = vtanh.f32 %v7258_v11 }
0x13df   : > { %7333 = vrot.lane.b32.xlu2 %v7288_v37, %s10237_s18 }
0x13e3   : > { %v14901_v52 = vpop.eup %10067 }
0x13e4   : > { %v7290_v58 = vsub.f32 %v14499_v3, %v14901_v52 }
0x13e7   : > { %7335 = vrot.lane.b32.xlu2 %v7289_v10, %s10237_s18 }
0x13ef   : > { %7337 = vrot.lane.b32.xlu2 %v7290_v58, %s10237_s18 }
0x13fc   : > { %v7388_v28 = vpop.permute.xlu1 %7387 }
0x13fd   : > { %v14907_v16 = vadd.f32 %v14697_v25, %v7388_v28 }
0x13ff   : > { %7597 = vrot.lane.b32.xlu1 %v14907_v16, %s10235_s9 }
0x1404   : > { %v7322_v57 = vpop.permute.xlu0 %7321  ;;  %v7390_v32 = vpop.permute.xlu1 %7389 }
0x1405   : > { %v7362_v9 = vmul.f32 %v7322_v57, %v14692_v33  ;;  %v14913_v60 = vadd.f32 %v14721_v61, %v7390_v32  ;;  %v15010_v57 = vld [vmem:[%s15597_s1 + $0x21] ss:$0 sm:$0xff] }
0x1407   : > { %7401 = vrot.lane.b32.xlu0 %v7362_v9, %s10238_s19  ;;  %7599 = vrot.lane.b32.xlu1 %v14913_v60, %s10235_s9 }
0x140c   : > { %v7324_v3 = vpop.permute.xlu0 %7323  ;;  %v7392_v54 = vpop.permute.xlu1 %7391 }
0x140d   : > { %v7363_v25 = vmul.f32 %v7324_v3, %v14723_v29  ;;  %v14920_v50 = vadd.f32 %v14743_v45, %v7392_v54 }
0x140f   : > { %7403 = vrot.lane.b32.xlu0 %v7363_v25, %s10238_s19  ;;  %7601 = vrot.lane.b32.xlu1 %v14920_v50, %s10235_s9 }
0x1414   : > { %v7394_v33 = vpop.permute.xlu1 %7393 }
0x1415   : > { %v14926_v61 = vadd.f32 %v14764_v0, %v7394_v33 }
0x1417   : > { %7603 = vrot.lane.b32.xlu1 %v14926_v61, %s10235_s9 }
0x1419   : > { %v7326_v56 = vpop.permute.xlu0 %7325 }
0x141a   : > { %v7364_v41 = vmul.f32 %v7326_v56, %v14760_v31 }
0x141c   : > { %7405 = vrot.lane.b32.xlu0 %v7364_v41, %s10238_s19  ;;  %v7396_v29 = vpop.permute.xlu1 %7395 }
0x141d   : > { %v14933_v45 = vadd.f32 %v14772_v63, %v7396_v29 }
0x141f   : > { %7605 = vrot.lane.b32.xlu1 %v14933_v45, %s10235_s9 }
0x1421   : > { %v7328_v19 = vpop.permute.xlu2 %7327 }
0x1422   : > { %v7365_v35 = vmul.f32 %v7328_v19, %v14806_v34 }
0x1424   : > { %7407 = vrot.lane.b32.xlu0 %v7365_v35, %s10238_s19  ;;  %v7533_v35 = vpop.f32.mrf.mxu2 }
0x1429   : > { %v7330_v0 = vpop.permute.xlu2 %7329 }
0x142a   : > { %v7366_v18 = vmul.f32 %v7330_v0, %v14781_v27 }
0x142c   : > { %7409 = vrot.lane.b32.xlu2 %v7366_v18, %s10238_s19 }
0x1431   : > { %v7332_v63 = vpop.permute.xlu2 %7331 }
0x1432   : > { %v7367_v14 = vmul.f32 %v7332_v63, %v14793_v53  ;;  %v7536_v63 = vpop.f32.mrf.mxu2 }
0x1438   : > { %v7398_v31 = vpop.permute.xlu0 %7397 }
0x1439   : > { %v14942_v48 = vadd.f32 %v14813_v24, %v7398_v31  ;;  %v7334_v27 = vpop.permute.xlu2 %7333  ;;  %v15035_v31 = vadd.f32 %v7533_v35, %v15774_v4 }
0x143a   : > { %v7368_v59 = vmul.f32 %v7334_v27, %v14826_v39  ;;  %v7539_v27 = vpop.f32.mrf.mxu2 }
0x143b   : > { %7607 = vrot.lane.b32.xlu1 %v14942_v48, %s10235_s9 }
0x1441   : > { %v7400_v49 = vpop.permute.xlu0 %7399 }
0x1442   : > { %v14948_v34 = vadd.f32 %v14821_v17, %v7400_v49  ;;  %v7336_v17 = vpop.permute.xlu2 %7335  ;;  %v7542_v4 = vpop.f32.mrf.mxu2 }
0x1443   : > { %7411 = vrot.lane.b32.xlu1 %v7367_v14, %s10238_s19  ;;  %v7369_v8 = vmul.f32 %v7336_v17, %v14830_v36 }
0x1444   : > { %7609 = vrot.lane.b32.xlu0 %v14948_v34, %s10235_s9 }
0x144c   : > { %7413 = vrot.lane.b32.xlu0 %v7368_v59, %s10238_s19 }
0x1471   : > { %v7598_v24 = vpop.permute.xlu1 %7597 }
0x1472   : > { %9292 = vmatmul.msk.f32.vlgmr.msra.gmra.mxu0 %vm1028_vm0, %v7598_v24 }
0x1479   : > { %v7402_v6 = vpop.permute.xlu0 %7401  ;;  %v7600_v44 = vpop.permute.xlu1 %7599 }
0x147a   : > { %v14957_v53 = vadd.f32 %v14841_v21, %v7402_v6  ;;  %9293 = vmatmul.msk.f32.gmra.mxu0 %vm1028_vm0, %v7600_v44  ;;  %v7338_v21 = vpop.permute.xlu2 %7337 }
0x147b   : > { %v7370_v30 = vmul.f32 %v7338_v21, %v14834_v23 }
0x147c   : > { %7611 = vrot.lane.b32.xlu2 %v14957_v53, %s10235_s9 }
0x1481   : > { %v7404_v62 = vpop.permute.xlu0 %7403  ;;  %v7602_v39 = vpop.permute.xlu1 %7601 }
0x1482   : > { %v14964_v13 = vadd.f32 %v14849_v47, %v7404_v62  ;;  %9294 = vmatmul.msk.f32.gmra.mxu0 %vm1028_vm0, %v7602_v39  ;;  %v15045_v62 = vadd.f32 %v7542_v4, %v15835_v55 }
0x1484   : > { %7415 = vrot.lane.b32.xlu2 %v7369_v8, %s10238_s19  ;;  %7613 = vrot.lane.b32.xlu1 %v14964_v13, %s10235_s9 }
0x1486   : > { %v7410_v40 = vpop.permute.xlu2 %7409 }
0x1487   : > { %v14980_v26 = vadd.f32 %v14876_v7, %v7410_v40 }
0x1489   : > { %v7604_v1 = vpop.permute.xlu1 %7603 }
0x148a   : > { %9295 = vmatmul.msk.f32.gmra.mxu0 %vm1028_vm0, %v7604_v1 }
0x148c   : > { %7417 = vrot.lane.b32.xlu1 %v7370_v30, %s10238_s19 }
0x148e   : > { %v7406_v36 = vpop.permute.xlu0 %7405 }
0x148f   : > { %v14974_v12 = vadd.f32 %v14859_v46, %v7406_v36 }
0x1491   : > { %7615 = vrot.lane.b32.xlu0 %v14974_v12, %s10235_s9  ;;  %v7606_v47 = vpop.permute.xlu1 %7605 }
0x1492   : > { %9296 = vmatmul.msk.f32.gmra.mxu0 %vm1028_vm0, %v7606_v47  ;;  %v15859_v47 = vld [vmem:[#allocation7_spill] sm:$0xff] }
0x1493   : > { %v15055_v40 = vadd.f32 %v7536_v63, %v15859_v47  ;;  %v7545_v63 = vpop.f32.mrf.mxu2 }
0x1496   : > { %v7408_v2 = vpop.permute.xlu0 %7407 }
0x1497   : > { %v14983_v23 = vadd.f32 %v14868_v42, %v7408_v2 }
0x1499   : > { %7619 = vrot.lane.b32.xlu0 %v14980_v26, %s10235_s9  ;;  %7617 = vrot.lane.b32.xlu2 %v14983_v23, %s10235_s9 }
0x14ad   : > { %v7608_v46 = vpop.permute.xlu1 %7607 }
0x14ae   : > { %9297 = vmatmul.msk.f32.gmra.mxu0 %vm1028_vm0, %v7608_v46 }
0x14b5   : > { %v7412_v51 = vpop.permute.xlu1 %7411 }
0x14b6   : > { %v14991_v37 = vadd.f32 %v14884_v38, %v7412_v51  ;;  %v7610_v11 = vpop.permute.xlu0 %7609 }
0x14b7   : > { %9298 = vmatmul.msk.f32.gmra.mxu0 %vm1028_vm0, %v7610_v11 }
0x14b8   : > { %7621 = vrot.lane.b32.xlu1 %v14991_v37, %s10235_s9 }
0x14be   : > { %v7414_v42 = vpop.permute.xlu0 %7413 }
0x14bf   : > { %v14997_v7 = vadd.f32 %v14890_v15, %v7414_v42 }
0x14c1   : > { %7623 = vrot.lane.b32.xlu2 %v14997_v7, %s10235_s9 }
0x14d6   : > { %v7612_v10 = vpop.permute.xlu2 %7611 }
0x14d7   : > { %9299 = vmatmul.msk.f32.gmra.mxu0 %vm1028_vm0, %v7612_v10 }
0x14de   : > { %v7416_v58 = vpop.permute.xlu2 %7415 }
0x14df   : > { %v15003_v38 = vadd.f32 %v14896_v22, %v7416_v58 }
0x14e1   : > { %7625 = vrot.lane.b32.xlu0 %v15003_v38, %s10235_s9 }
0x14ef   : > { %v7678_v28 = vpop.f32.mrf.mxu0 }
0x14f0   : > { %v7679_v15 = vadd.f32 %v15010_v57, %v7678_v28 }
0x14f2   : > { %8062 = vrot.lane.b32.xlu2 %v7679_v15, %s10235_s9  ;;  %v7726_v14 = vadd.f32 %v7679_v15, %v15035_v31  ;;  %v15860_v15 = vld [vmem:[#allocation8_spill] sm:$0xff] }
0x14f3   : > { %v7618_v19 = vpop.permute.xlu2 %7617 }
0x14f4   : > { %v9308_v49 = vmul.f32 -1.442695, %v7726_v14  ;;  %v15861_v14 = vld [vmem:[#allocation11_spill] sm:$0xff] }
0x14f6   : > { %v7614_v32 = vpop.permute.xlu1 %7613  ;;  %10069 = vpow2.f32 %v9308_v49  ;;  %v15067_v49 = vadd.f32 %v7545_v63, %v15861_v14  ;;  %v15862_v63 = vld [vmem:[#allocation13_spill] sm:$0xff] }
0x14f7   : > { %9300 = vmatmul.msk.f32.gmra.mxu0 %vm1028_vm0, %v7614_v32  ;;  %v7681_v9 = vpop.f32.mrf.mxu0  ;;  %v15059_v32 = vadd.f32 %v7539_v27, %v15860_v15 }
0x14f8   : > { %v7682_v22 = vadd.f32 %v15010_v57, %v7681_v9 }
0x14fa   : > { %8064 = vrot.lane.b32.xlu0 %v7682_v22, %s10235_s9  ;;  %v7727_v55 = vadd.f32 %v7682_v22, %v15055_v40 }
0x14fc   : > { %v10070_v59 = vpop.eup %10069  ;;  %v9309_v51 = vmul.f32 -1.442695, %v7727_v55 }
0x14fd   : > { %v7790_v17 = vadd.f32 1.0, %v10070_v59 }
0x14fe   : > { %v7418_v3 = vpop.permute.xlu1 %7417 }
0x14ff   : > { %v15018_v54 = vadd.f32 %v14901_v52, %v7418_v3  ;;  %v7684_v25 = vpop.f32.mrf.mxu0  ;;  %10071 = vrcp.f32 %v7790_v17  ;;  %v7817_v28 = vand.u32 2147483648, %v7790_v17  ;;  %vm7811_vm15 = vweird.f32 %v7790_v17 }
0x1500   : > { %v7685_v56 = vadd.f32 %v15010_v57, %v7684_v25  ;;  %v7815_v9 = vand.u32 2147483647, %v7790_v17 }
0x1501   : > { %7627 = vrot.lane.b32.xlu1 %v15018_v54, %s10235_s9 }
0x1502   : > { %v7728_v22 = vadd.f32 %v7685_v56, %v15059_v32  ;;  %vm7816_vm2 = vcmp.eq.f32.partialorder %v7815_v9, 8.507059e+37 }
0x1503   : > { %v7616_v33 = vpop.permute.xlu0 %7615 }
0x1504   : > { %9301 = vmatmul.msk.f32.gmra.mxu0 %vm1028_vm0, %v7616_v33  ;;  %v7818_v33 = vor.u32 1.1754944e-38, %v7817_v28 }
0x1505   : > { %v10072_v1 = vpop.eup %10071 }
0x1506   : > { %v7807_v2 = vmul.f32 %v10072_v1, %v7790_v17  ;;  %vm7812_vm14 = vweird.f32 %v10072_v1 }
0x1507   : > { %v7687_v41 = vpop.f32.mrf.mxu0  ;;  %vm7813_vm1 = vmor %vm7811_vm15, %vm7812_vm14 }
0x1508   : > { %v7688_v29 = vadd.f32 %v15010_v57, %v7687_v41  ;;  %v7808_v46 = vsub.f32 1.0, %v7807_v2 }
0x1509   : > { %8066 = vrot.lane.b32.xlu1 %v7685_v56, %s10235_s9 }
0x150a   : > { %8068 = vrot.lane.b32.xlu2 %v7688_v29, %s10235_s9  ;;  %v7729_v39 = vadd.f32 %v7688_v29, %v15045_v62  ;;  %v7809_v42 = vmul.f32 %v10072_v1, %v7808_v46 }
0x150b   : > { %v7620_v18 = vpop.permute.xlu0 %7619 }
0x150c   : > { %9302 = vmatmul.msk.f32.gmra.mxu0 %vm1028_vm0, %v7618_v19  ;;  %v9311_v36 = vmul.f32 -1.442695, %v7729_v39  ;;  %v7810_v58 = vadd.f32 %v10072_v1, %v7809_v42 }
0x150e   : > { %10073 = vpow2.f32 %v9311_v36  ;;  %v7814_v25 = vsel %vm7813_vm1, %v10072_v1, %v7810_v58 }
0x150f   : > { %v7690_v52 = vpop.f32.mrf.mxu0  ;;  %10075 = vpow2.f32 %v9309_v51  ;;  %v15062_v29 = vsel %vm7816_vm2, %v7818_v33, %v7814_v25  ;;  %v7548_v33 = vpop.f32.mrf.mxu2 }
0x1510   : > { %v15029_v0 = vadd.f32 %v15010_v57, %v7690_v52  ;;  %v9310_v52 = vmul.f32 -1.442695, %v7728_v22  ;;  %v15085_v14 = vadd.f32 %v7548_v33, %v15862_v63 }
0x1512   : > { %8070 = vrot.lane.b32.xlu0 %v15029_v0, %s10235_s9  ;;  %v7730_v59 = vadd.f32 %v15029_v0, %v15067_v49 }
0x1514   : > { %9303 = vmatmul.msk.f32.gmra.mxu0 %vm1028_vm0, %v7620_v18  ;;  %v10074_v11 = vpop.eup %10073  ;;  %v9312_v39 = vmul.f32 -1.442695, %v7730_v59 }
0x1515   : > { %v7793_v10 = vadd.f32 1.0, %v10074_v11  ;;  %v10076_v3 = vpop.eup %10075 }
0x1516   : > { %v7791_v41 = vadd.f32 1.0, %v10076_v3 }
0x1517   : > { %10077 = vrcp.f32 %v7793_v10  ;;  %v7862_v2 = vand.u32 2147483648, %v7793_v10  ;;  %vm7856_vm4 = vweird.f32 %v7793_v10  ;;  %v7860_v55 = vand.u32 2147483647, %v7793_v10 }
0x1518   : > { %10079 = vrcp.f32 %v7791_v41  ;;  %v7832_v25 = vand.u32 2147483648, %v7791_v41  ;;  %vm7826_vm8 = vweird.f32 %v7791_v41 }
0x1519   : > { %10081 = vpow2.f32 %v9310_v52  ;;  %v7863_v42 = vor.u32 1.1754944e-38, %v7862_v2  ;;  %vm7861_vm6 = vcmp.eq.f32.partialorder %v7860_v55, 8.507059e+37  ;;  %v15863_v55 = vld [vmem:[#allocation16_spill] sm:$0xff] }
0x151a   : > { %10083 = vpow2.f32 %v9312_v39 }
0x151b   : > { %v7624_v8 = vpop.permute.xlu2 %7623 }
0x151d   : > { %v10078_v18 = vpop.eup %10077 }
0x151e   : > { %v7852_v56 = vmul.f32 %v10078_v18, %v7793_v10  ;;  %v10080_v4 = vpop.eup %10079  ;;  %vm7857_vm3 = vweird.f32 %v10078_v18  ;;  %v7830_v10 = vand.u32 2147483647, %v7791_v41 }
0x151f   : > { %v7822_v1 = vmul.f32 %v10080_v4, %v7791_v41  ;;  %vm7858_vm5 = vmor %vm7856_vm4, %vm7857_vm3  ;;  %vm7827_vm7 = vweird.f32 %v10080_v4 }
0x1520   : > { %v7853_v17 = vsub.f32 1.0, %v7852_v56  ;;  %vm7828_vm9 = vmor %vm7826_vm8, %vm7827_vm7  ;;  %vm7831_vm10 = vcmp.eq.f32.partialorder %v7830_v10, 8.507059e+37 }
0x1521   : > { %v7823_v0 = vsub.f32 1.0, %v7822_v1 }
0x1523   : > { %v7824_v11 = vmul.f32 %v10080_v4, %v7823_v0 }
0x1525   : > { %v7825_v22 = vadd.f32 %v10080_v4, %v7824_v11 }
0x1527   : > { %v7829_v52 = vsel %vm7828_vm9, %v10080_v4, %v7825_v22 }
0x152a   : > { %v7622_v24 = vpop.permute.xlu1 %7621 }
0x152b   : > { %v7693_v6 = vpop.f32.mrf.mxu0  ;;  %9304 = vmatmul.msk.f32.gmra.mxu0 %vm1028_vm0, %v7622_v24 }
0x152c   : > { %v15040_v44 = vadd.f32 %v15010_v57, %v7693_v6 }
0x152e   : > { %8072 = vrot.lane.b32.xlu1 %v15040_v44, %s10235_s9  ;;  %v7731_v41 = vadd.f32 %v15040_v44, %v15085_v14 }
0x1530   : > { %v9313_v39 = vmul.f32 -1.442695, %v7731_v41 }
0x1533   : > { %9305 = vmatmul.msk.f32.gmra.mxu0 %vm1028_vm0, %v7624_v8  ;;  %v10082_v8 = vpop.eup %10081 }
0x1534   : > { %v7696_v21 = vpop.f32.mrf.mxu0  ;;  %v7792_v36 = vadd.f32 1.0, %v10082_v8  ;;  %v10084_v46 = vpop.eup %10083 }
0x1535   : > { %v15050_v30 = vadd.f32 %v15010_v57, %v7696_v21  ;;  %v7854_v21 = vmul.f32 %v10078_v18, %v7853_v17  ;;  %v15077_v28 = vadd.f32 1.0, %v10084_v46  ;;  %v7551_v8 = vpop.f32.mrf.mxu2 }
0x1536   : > { %10085 = vrcp.f32 %v7792_v36  ;;  %v7847_v2 = vand.u32 2147483648, %v7792_v36  ;;  %v15099_v46 = vadd.f32 %v7551_v8, %v15863_v55  ;;  %vm7841_vm12 = vweird.f32 %v7792_v36 }
0x1537   : > { %8074 = vrot.lane.b32.xlu0 %v15050_v30, %s10235_s9  ;;  %v7855_v47 = vadd.f32 %v10078_v18, %v7854_v21  ;;  %10087 = vrcp.f32 %v15077_v28  ;;  %v7845_v44 = vand.u32 2147483647, %v7792_v36  ;;  %vm7871_vm1 = vweird.f32 %v15077_v28 }
0x1538   : > { %10089 = vpow2.f32 %v9313_v39  ;;  %v7732_v11 = vadd.f32 %v15050_v30, %v15099_v46  ;;  %v15864_v30 = vld [vmem:[#allocation27_spill] sm:$0xff]  ;;  %v7875_v63 = vand.u32 2147483647, %v15077_v28 }
0x1539   : > { %v7859_v51 = vsel %vm7858_vm5, %v10078_v18, %v7855_v47  ;;  %vm7846_vm14 = vcmp.eq.f32.partialorder %v7845_v44, 8.507059e+37 }
0x153a   : > { %v15079_v15 = vsel %vm7861_vm6, %v7863_v42, %v7859_v51  ;;  %v9314_v10 = vmul.f32 -1.442695, %v7732_v11  ;;  %vm7876_vm3 = vcmp.eq.f32.partialorder %v7875_v63, 8.507059e+37 }
0x153c   : > { %v10086_v58 = vpop.eup %10085  ;;  %10091 = vpow2.f32 %v9314_v10 }
0x153d   : > { %vm7842_vm11 = vweird.f32 %v10086_v58  ;;  %v7554_v33 = vpop.f32.mrf.mxu2 }
0x153e   : > { %vm7843_vm13 = vmor %vm7841_vm12, %vm7842_vm11 }
0x154c   : > { %v8063_v19 = vpop.permute.xlu2 %8062 }
0x154d   : > { %v8110_v35 = vmul.f32 %v8063_v19, %v15062_v29  ;;  %v7837_v19 = vmul.f32 %v10086_v58, %v7792_v36 }
0x154f   : > { %8142 = vrot.lane.b32.xlu2 %v8110_v35, %s10236_s17  ;;  %v7833_v35 = vor.u32 1.1754944e-38, %v7832_v25  ;;  %v7838_v18 = vsub.f32 1.0, %v7837_v19 }
0x1551   : > { %v15087_v56 = vsel %vm7831_vm10, %v7833_v35, %v7829_v52  ;;  %v7839_v17 = vmul.f32 %v10086_v58, %v7838_v18  ;;  %v15110_v35 = vadd.f32 %v7554_v33, %v15864_v30 }
0x1553   : > { %v7626_v27 = vpop.permute.xlu0 %7625  ;;  %v7840_v47 = vadd.f32 %v10086_v58, %v7839_v17 }
0x1554   : > { %v7699_v24 = vpop.f32.mrf.mxu0  ;;  %9306 = vmatmul.msk.f32.gmra.mxu0 %vm1028_vm0, %v7626_v27 }
0x1555   : > { %v15073_v6 = vadd.f32 %v15010_v57, %v7699_v24  ;;  %v10088_v24 = vpop.eup %10087  ;;  %v7844_v42 = vsel %vm7843_vm13, %v10086_v58, %v7840_v47  ;;  %v7877_v58 = vand.u32 2147483648, %v15077_v28 }
0x1556   : > { %v7867_v4 = vmul.f32 %v10088_v24, %v15077_v28  ;;  %v10090_v19 = vpop.eup %10089  ;;  %vm7872_vm15 = vweird.f32 %v10088_v24 }
0x1557   : > { %8076 = vrot.lane.b32.xlu2 %v15073_v6, %s10235_s9  ;;  %v7795_v18 = vadd.f32 1.0, %v10090_v19  ;;  %vm7873_vm2 = vmor %vm7871_vm1, %vm7872_vm15  ;;  %v7878_v17 = vor.u32 1.1754944e-38, %v7877_v58 }
0x1558   : > { %v7868_v51 = vsub.f32 1.0, %v7867_v4 }
0x1559   : > { %10093 = vrcp.f32 %v7795_v18  ;;  %vm7886_vm5 = vweird.f32 %v7795_v18 }
0x1564   : > { %v8069_v9 = vpop.permute.xlu2 %8068 }
0x1565   : > { %v8113_v3 = vmul.f32 %v8069_v9, %v15079_v15  ;;  %v7848_v9 = vor.u32 1.1754944e-38, %v7847_v2 }
0x1567   : > { %8148 = vrot.lane.b32.xlu2 %v8113_v3, %s10236_s17  ;;  %v7869_v3 = vmul.f32 %v10088_v24, %v7868_v51  ;;  %v15105_v22 = vsel %vm7846_vm14, %v7848_v9, %v7844_v42 }
0x1569   : > { %v7870_v52 = vadd.f32 %v10088_v24, %v7869_v3 }
0x156b   : > { %v7874_v41 = vsel %vm7873_vm2, %v10088_v24, %v7870_v52  ;;  %v7890_v52 = vand.u32 2147483647, %v7795_v18 }
0x156c   : > { %v8065_v27 = vpop.permute.xlu0 %8064  ;;  %v15120_v39 = vsel %vm7876_vm3, %v7878_v17, %v7874_v41 }
0x156d   : > { %v8111_v59 = vmul.f32 %v8065_v27, %v15087_v56  ;;  %v7733_v27 = vadd.f32 %v15073_v6, %v15110_v35  ;;  %vm7891_vm7 = vcmp.eq.f32.partialorder %v7890_v52, 8.507059e+37 }
0x156f   : > { %8144 = vrot.lane.b32.xlu1 %v8111_v59, %s10236_s17  ;;  %v9315_v4 = vmul.f32 -1.442695, %v7733_v27 }
0x1571   : > { %10095 = vpow2.f32 %v9315_v4 }
0x1573   : > { %v7628_v21 = vpop.permute.xlu1 %7627 }
0x1574   : > { %v7702_v1 = vpop.f32.mrf.mxu0  ;;  %9307 = vmatmul.msk.f32.gmra.mxu0 %vm1028_vm0, %v7628_v21 }
0x1575   : > { %v15096_v0 = vadd.f32 %v15010_v57, %v7702_v1  ;;  %v10092_v1 = vpop.eup %10091 }
0x1576   : > { %v7796_v6 = vadd.f32 1.0, %v10092_v1  ;;  %v10094_v24 = vpop.eup %10093 }
0x1577   : > { %8078 = vrot.lane.b32.xlu1 %v15096_v0, %s10235_s9  ;;  %v7882_v55 = vmul.f32 %v10094_v24, %v7795_v18  ;;  %v10096_v44 = vpop.eup %10095  ;;  %vm7887_vm4 = vweird.f32 %v10094_v24 }
0x1578   : > { %10097 = vrcp.f32 %v7796_v6  ;;  %v7797_v42 = vadd.f32 1.0, %v10096_v44  ;;  %vm7888_vm6 = vmor %vm7886_vm5, %vm7887_vm4  ;;  %v7907_v1 = vand.u32 2147483648, %v7796_v6  ;;  %vm7901_vm9 = vweird.f32 %v7796_v6 }
0x1579   : > { %v7883_v11 = vsub.f32 1.0, %v7882_v55 }
0x157a   : > { %10099 = vrcp.f32 %v7797_v42  ;;  %vm7916_vm13 = vweird.f32 %v7797_v42 }
0x157b   : > { %v8067_v25 = vpop.permute.xlu1 %8066 }
0x157c   : > { %v8112_v36 = vmul.f32 %v8067_v25, %v15105_v22  ;;  %v7884_v25 = vmul.f32 %v10094_v24, %v7883_v11 }
0x157e   : > { %8146 = vrot.lane.b32.xlu0 %v8112_v36, %s10236_s17  ;;  %v10098_v3 = vpop.eup %10097  ;;  %v7885_v10 = vadd.f32 %v10094_v24, %v7884_v25  ;;  %v7892_v36 = vand.u32 2147483648, %v7795_v18  ;;  %v7905_v18 = vand.u32 2147483647, %v7796_v6 }
0x157f   : > { %v7897_v33 = vmul.f32 %v10098_v3, %v7796_v6  ;;  %vm7902_vm8 = vweird.f32 %v10098_v3 }
0x1580   : > { %v10100_v30 = vpop.eup %10099  ;;  %v7889_v58 = vsel %vm7888_vm6, %v10094_v24, %v7885_v10  ;;  %v7893_v63 = vor.u32 1.1754944e-38, %v7892_v36  ;;  %vm7903_vm10 = vmor %vm7901_vm9, %vm7902_vm8  ;;  %v7908_v24 = vor.u32 1.1754944e-38, %v7907_v1  ;;  %vm7906_vm11 = vcmp.eq.f32.partialorder %v7905_v18, 8.507059e+37 }
0x1581   : > { %v7705_v59 = vpop.f32.mrf.mxu0  ;;  %v7898_v19 = vsub.f32 1.0, %v7897_v33  ;;  %vm7917_vm12 = vweird.f32 %v10100_v30 }
0x1582   : > { %v15118_v8 = vadd.f32 %v15010_v57, %v7705_v59  ;;  %v7912_v59 = vmul.f32 %v10100_v30, %v7797_v42  ;;  %v15136_v41 = vsel %vm7891_vm7, %v7893_v63, %v7889_v58  ;;  %vm7918_vm14 = vmor %vm7916_vm13, %vm7917_vm12 }
0x1583   : > { %v7899_v27 = vmul.f32 %v10098_v3, %v7898_v19  ;;  %v7920_v19 = vand.u32 2147483647, %v7797_v42 }
0x1584   : > { %v8071_v21 = vpop.permute.xlu0 %8070 }
0x1585   : > { %v8114_v47 = vmul.f32 %v8071_v21, %v15120_v39  ;;  %v7900_v21 = vadd.f32 %v10098_v3, %v7899_v27  ;;  %vm7921_vm15 = vcmp.eq.f32.partialorder %v7920_v19, 8.507059e+37 }
0x1586   : > { %8080 = vrot.lane.b32.xlu0 %v15118_v8, %s10235_s9 }
0x1587   : > { %8150 = vrot.lane.b32.xlu1 %v8114_v47, %s10236_s17  ;;  %v7913_v47 = vsub.f32 1.0, %v7912_v59 }
0x1589   : > { %v7708_v28 = vpop.f32.mrf.mxu0  ;;  %v7914_v55 = vmul.f32 %v10100_v30, %v7913_v47 }
0x158a   : > { %v15127_v2 = vadd.f32 %v15010_v57, %v7708_v28  ;;  %v7904_v28 = vsel %vm7903_vm10, %v10098_v3, %v7900_v21  ;;  %v7922_v3 = vand.u32 2147483648, %v7797_v42 }
0x158b   : > { %v15143_v11 = vsel %vm7906_vm11, %v7908_v24, %v7904_v28  ;;  %v7915_v6 = vadd.f32 %v10100_v30, %v7914_v55  ;;  %v15866_v24 = vld [vmem:[#allocation34_spill] sm:$0xff] }
0x158c   : > { %8082 = vrot.lane.b32.xlu2 %v15127_v2, %s10235_s9  ;;  %v7923_v63 = vor.u32 1.1754944e-38, %v7922_v3 }
0x158d   : > { %v7919_v52 = vsel %vm7918_vm14, %v10100_v30, %v7915_v6  ;;  %v15865_v30 = vld [vmem:[#allocation30_spill] sm:$0xff] }
0x158e   : > { %v15153_v59 = vsel %vm7921_vm15, %v7923_v63, %v7919_v52 }
0x1591   : > { %v7711_v51 = vpop.f32.mrf.mxu0 }
0x1592   : > { %v15132_v9 = vadd.f32 %v15010_v57, %v7711_v51 }
0x1594   : > { %8084 = vrot.lane.b32.xlu1 %v15132_v9, %s10235_s9 }
0x15a0   : > { %v8073_v17 = vpop.permute.xlu1 %8072 }
0x15a1   : > { %v8115_v4 = vmul.f32 %v8073_v17, %v15136_v41 }
0x15a3   : > { %8152 = vrot.lane.b32.xlu0 %v8115_v4, %s10236_s17 }
0x15a8   : > { %v7714_v44 = vpop.f32.mrf.mxu0 }
0x15a9   : > { %v15141_v51 = vadd.f32 %v15010_v57, %v7714_v44  ;;  %v8075_v25 = vpop.permute.xlu0 %8074  ;;  %v8143_v33 = vpop.permute.xlu2 %8142 }
0x15aa   : > { %v8116_v10 = vmul.f32 %v8075_v25, %v15143_v11  ;;  %v8190_v36 = vadd.f32 %v8143_v33, %v15035_v31  ;;  %v7557_v31 = vpop.f32.mrf.mxu2 }
0x15ab   : > { %8086 = vrot.lane.b32.xlu1 %v15141_v51, %s10235_s9  ;;  %v15165_v1 = vadd.f32 %v7557_v31, %v15865_v30 }
0x15ac   : > { %8154 = vrot.lane.b32.xlu2 %v8116_v10, %s10236_s17  ;;  %10101 = vtanh.f32 %v8190_v36  ;;  %v15867_v36 = vld [vmem:[#allocation38_spill] sm:$0xff] }
0x15ad   : > { %v7734_v47 = vadd.f32 %v15096_v0, %v15165_v1 }
0x15af   : > { %v9316_v28 = vmul.f32 -1.442695, %v7734_v47 }
0x15b0   : > { %v7717_v58 = vpop.f32.mrf.mxu0 }
0x15b1   : > { %v15151_v27 = vadd.f32 %v15010_v57, %v7717_v58  ;;  %v8077_v17 = vpop.permute.xlu2 %8076  ;;  %10103 = vpow2.f32 %v9316_v28  ;;  %v15868_v58 = vld [vmem:[#allocation26_spill] sm:$0xff] }
0x15b2   : > { %v15155_v4 = vpop.eup %10101  ;;  %v8117_v21 = vmul.f32 %v8077_v17, %v15153_v59  ;;  %v7560_v18 = vpop.f32.mrf.mxu2 }
0x15b3   : > { %8088 = vrot.lane.b32.xlu1 %v15151_v27, %s10235_s9  ;;  %v8222_v42 = vsub.f32 %v14907_v16, %v15155_v4  ;;  %v15170_v55 = vadd.f32 %v7560_v18, %v15866_v24 }
0x15b4   : > { %8156 = vrot.lane.b32.xlu2 %v8117_v21, %s10236_s17 }
0x15b5   : > { %8254 = vrot.lane.b32.xlu0 %v8222_v42, %s10237_s18  ;;  %v7735_v16 = vadd.f32 %v15118_v8, %v15170_v55 }
0x15b7   : > { %v10104_v25 = vpop.eup %10103  ;;  %v9317_v10 = vmul.f32 -1.442695, %v7735_v16 }
0x15b8   : > { %v7798_v33 = vadd.f32 1.0, %v10104_v25 }
0x15ba   : > { %v7563_v44 = vpop.f32.mrf.mxu2  ;;  %10105 = vrcp.f32 %v7798_v33  ;;  %vm7931_vm2 = vweird.f32 %v7798_v33 }
0x15bb   : > { %v15175_v6 = vadd.f32 %v7563_v44, %v15867_v36  ;;  %10107 = vpow2.f32 %v9317_v10  ;;  %v7937_v36 = vand.u32 2147483648, %v7798_v33 }
0x15bd   : > { %v7736_v0 = vadd.f32 %v15127_v2, %v15175_v6 }
0x15bf   : > { %v9318_v31 = vmul.f32 -1.442695, %v7736_v0 }
0x15c0   : > { %v10106_v8 = vpop.eup %10105 }
0x15c1   : > { %v10108_v17 = vpop.eup %10107  ;;  %10109 = vpow2.f32 %v9318_v31  ;;  %v7927_v42 = vmul.f32 %v10106_v8, %v7798_v33  ;;  %vm7932_vm1 = vweird.f32 %v10106_v8 }
0x15c2   : > { %v7566_v3 = vpop.f32.mrf.mxu2  ;;  %v15189_v2 = vadd.f32 1.0, %v10108_v17  ;;  %vm7933_vm3 = vmor %vm7931_vm2, %vm7932_vm1  ;;  %v15869_v17 = vld [vmem:[#allocation31_spill] sm:$0xff] }
0x15c3   : > { %v15183_v63 = vadd.f32 %v7566_v3, %v15868_v58  ;;  %v7928_v47 = vsub.f32 1.0, %v7927_v42  ;;  %v7935_v3 = vand.u32 2147483647, %v7798_v33 }
0x15c4   : > { %10111 = vrcp.f32 %v15189_v2  ;;  %vm7946_vm6 = vweird.f32 %v15189_v2 }
0x15c5   : > { %v7737_v21 = vadd.f32 %v15132_v9, %v15183_v63  ;;  %v7929_v28 = vmul.f32 %v10106_v8, %v7928_v47  ;;  %vm7936_vm4 = vcmp.eq.f32.partialorder %v7935_v3, 8.507059e+37 }
0x15c7   : > { %v9319_v30 = vmul.f32 -1.442695, %v7737_v21  ;;  %v10110_v18 = vpop.eup %10109  ;;  %v7930_v9 = vadd.f32 %v10106_v8, %v7929_v28 }
0x15c8   : > { %v15192_v24 = vadd.f32 1.0, %v10110_v18 }
0x15c9   : > { %10113 = vpow2.f32 %v9319_v30  ;;  %v7934_v31 = vsel %vm7933_vm3, %v10106_v8, %v7930_v9 }
0x15ca   : > { %v15194_v44 = vpop.eup %10111  ;;  %10115 = vrcp.f32 %v15192_v24  ;;  %v7569_v0 = vpop.f32.mrf.mxu2  ;;  %vm7961_vm10 = vweird.f32 %v15192_v24 }
0x15cb   : > { %v15203_v21 = vadd.f32 %v7569_v0, %v15869_v17  ;;  %vm7947_vm5 = vweird.f32 %v15194_v44 }
0x15cc   : > { %vm7948_vm7 = vmor %vm7946_vm6, %vm7947_vm5 }
0x15cd   : > { %v7738_v33 = vadd.f32 %v15141_v51, %v15203_v21 }
0x15cf   : > { %v10114_v16 = vpop.eup %10113  ;;  %v9320_v9 = vmul.f32 -1.442695, %v7738_v33  ;;  %v7952_v33 = vand.u32 2147483648, %v15189_v2 }
0x15d0   : > { %v15200_v58 = vadd.f32 1.0, %v10114_v16  ;;  %v15205_v30 = vpop.eup %10115 }
0x15d1   : > { %v7720_v19 = vpop.f32.mrf.mxu0  ;;  %v7957_v16 = vmul.f32 %v15205_v30, %v15192_v24  ;;  %vm7962_vm9 = vweird.f32 %v15205_v30 }
0x15d2   : > { %v15180_v52 = vadd.f32 %v15010_v57, %v7720_v19  ;;  %v7942_v19 = vmul.f32 %v15194_v44, %v15189_v2  ;;  %v7572_v51 = vpop.f32.mrf.mxu2  ;;  %vm7963_vm11 = vmor %vm7961_vm10, %vm7962_vm9  ;;  %vm7976_vm14 = vweird.f32 %v15200_v58 }
0x15d3   : > { %v7958_v3 = vsub.f32 1.0, %v7957_v16  ;;  %v15228_v17 = vadd.f32 %v7572_v51, %v15848_v20  ;;  %v7953_v16 = vor.u32 1.1754944e-38, %v7952_v33 }
0x15d4   : > { %8090 = vrot.lane.b32.xlu1 %v15180_v52, %s10235_s9  ;;  %v7943_v42 = vsub.f32 1.0, %v7942_v19 }
0x15e1   : > { %v8145_v25 = vpop.permute.xlu1 %8144 }
0x15e2   : > { %v8191_v10 = vadd.f32 %v8145_v25, %v15055_v40  ;;  %v7938_v40 = vor.u32 1.1754944e-38, %v7937_v36 }
0x15e4   : > { %10117 = vtanh.f32 %v8191_v10  ;;  %v15210_v47 = vsel %vm7936_vm4, %v7938_v40, %v7934_v31  ;;  %v7944_v10 = vmul.f32 %v15194_v44, %v7943_v42  ;;  %v8149_v40 = vpop.permute.xlu2 %8148 }
0x15e5   : > { %10119 = vrcp.f32 %v15200_v58  ;;  %v8193_v20 = vadd.f32 %v8149_v40, %v15045_v62 }
0x15e6   : > { %10121 = vpow2.f32 %v9320_v9 }
0x15e9   : > { %v8079_v18 = vpop.permute.xlu1 %8078 }
0x15ea   : > { %v15212_v28 = vpop.eup %10117  ;;  %v8118_v8 = vmul.f32 %v8079_v18, %v15210_v47 }
0x15eb   : > { %v8223_v25 = vsub.f32 %v14913_v60, %v15212_v28  ;;  %v15222_v36 = vpop.eup %10119  ;;  %v7945_v60 = vadd.f32 %v15194_v44, %v7944_v10 }
0x15ec   : > { %8158 = vrot.lane.b32.xlu2 %v8118_v8, %s10236_s17  ;;  %v7972_v18 = vmul.f32 %v15222_v36, %v15200_v58  ;;  %v7739_v8 = vadd.f32 %v15151_v27, %v15228_v17  ;;  %vm7977_vm13 = vweird.f32 %v15222_v36 }
0x15ed   : > { %8256 = vrot.lane.b32.xlu0 %v8223_v25, %s10237_s18  ;;  %v7949_v25 = vsel %vm7948_vm7, %v15194_v44, %v7945_v60  ;;  %v7965_v60 = vand.u32 2147483647, %v15192_v24  ;;  %vm7978_vm15 = vmor %vm7976_vm14, %vm7977_vm13 }
0x15ee   : > { %v7973_v10 = vsub.f32 1.0, %v7972_v18  ;;  %v9321_v9 = vmul.f32 -1.442695, %v7739_v8  ;;  %v8083_v8 = vpop.permute.xlu2 %8082 }
0x15ef   : > { %vm7966_vm12 = vcmp.eq.f32.partialorder %v7965_v60, 8.507059e+37 }
0x15f0   : > { %v8147_v0 = vpop.permute.xlu0 %8146  ;;  %v7974_v40 = vmul.f32 %v15222_v36, %v7973_v10 }
0x15f1   : > { %v8192_v19 = vadd.f32 %v8147_v0, %v15059_v32  ;;  %v7723_v31 = vpop.f32.mrf.mxu0  ;;  %v7950_v32 = vand.u32 2147483647, %v15189_v2  ;;  %v10122_v2 = vpop.eup %10121 }
0x15f2   : > { %v15231_v42 = vadd.f32 %v15010_v57, %v7723_v31  ;;  %v7959_v57 = vmul.f32 %v15205_v30, %v7958_v3  ;;  %v7967_v3 = vand.u32 2147483648, %v15192_v24  ;;  %v7802_v33 = vadd.f32 1.0, %v10122_v2 }
0x15f3   : > { %10123 = vtanh.f32 %v8192_v19  ;;  %vm7951_vm8 = vcmp.eq.f32.partialorder %v7950_v32, 8.507059e+37  ;;  %v7975_v24 = vadd.f32 %v15222_v36, %v7974_v40  ;;  %v7575_v40 = vpop.f32.mrf.mxu2 }
0x15f4   : > { %8092 = vrot.lane.b32.xlu1 %v15231_v42, %s10235_s9  ;;  %v15245_v51 = vsel %vm7951_vm8, %v7953_v16, %v7949_v25  ;;  %10125 = vtanh.f32 %v8193_v20  ;;  %v7960_v27 = vadd.f32 %v15205_v30, %v7959_v57  ;;  %v7968_v20 = vor.u32 1.1754944e-38, %v7967_v3 }
0x15f5   : > { %10127 = vpow2.f32 %v9321_v9  ;;  %v7982_v25 = vand.u32 2147483648, %v15200_v58  ;;  %v7979_v2 = vsel %vm7978_vm15, %v15222_v36, %v7975_v24  ;;  %vm7991_vm3 = vweird.f32 %v7802_v33 }
0x15f6   : > { %v7964_v32 = vsel %vm7963_vm11, %v15205_v30, %v7960_v27  ;;  %10129 = vrcp.f32 %v7802_v33 }
0x15f7   : > { %v15266_v57 = vsel %vm7966_vm12, %v7968_v20, %v7964_v32  ;;  %v7983_v9 = vor.u32 1.1754944e-38, %v7982_v25 }
0x15f8   : > { %v8081_v0 = vpop.permute.xlu0 %8080  ;;  %v8120_v16 = vmul.f32 %v8083_v8, %v15266_v57  ;;  %v15287_v8 = vadd.f32 %v7575_v40, %v15849_v43 }
0x15f9   : > { %v15247_v19 = vpop.eup %10123  ;;  %v8119_v62 = vmul.f32 %v8081_v0, %v15245_v51  ;;  %v8151_v44 = vpop.permute.xlu1 %8150 }
0x15fa   : > { %v8224_v31 = vsub.f32 %v14920_v50, %v15247_v19  ;;  %v8194_v18 = vadd.f32 %v8151_v44, %v15067_v49  ;;  %v15262_v50 = vpop.eup %10125  ;;  %v7980_v49 = vand.u32 2147483647, %v15200_v58  ;;  %v7740_v20 = vadd.f32 %v15180_v52, %v15287_v8 }
0x15fb   : > { %8160 = vrot.lane.b32.xlu2 %v8119_v62, %s10236_s17  ;;  %v10128_v30 = vpop.eup %10127  ;;  %v8225_v10 = vsub.f32 %v14926_v61, %v15262_v50 }
0x15fc   : > { %8258 = vrot.lane.b32.xlu0 %v8224_v31, %s10237_s18  ;;  %10131 = vtanh.f32 %v8194_v18  ;;  %v7803_v0 = vadd.f32 1.0, %v10128_v30  ;;  %vm7981_vm1 = vcmp.eq.f32.partialorder %v7980_v49, 8.507059e+37  ;;  %v10130_v27 = vpop.eup %10129  ;;  %v7997_v30 = vand.u32 2147483648, %v7802_v33 }
0x15fd   : > { %v15277_v62 = vsel %vm7981_vm1, %v7983_v9, %v7979_v2  ;;  %v7987_v36 = vmul.f32 %v10130_v27, %v7802_v33  ;;  %vm7992_vm2 = vweird.f32 %v10130_v27  ;;  %v9322_v2 = vmul.f32 -1.442695, %v7740_v20 }
0x15fe   : > { %10133 = vrcp.f32 %v7803_v0  ;;  %vm7993_vm4 = vmor %vm7991_vm3, %vm7992_vm2  ;;  %vm8006_vm7 = vweird.f32 %v7803_v0 }
0x15ff   : > { %v7988_v31 = vsub.f32 1.0, %v7987_v36 }
0x1601   : > { %v7989_v32 = vmul.f32 %v10130_v27, %v7988_v31 }
0x1602   : > { %v15279_v44 = vpop.eup %10131 }
0x1603   : > { %8162 = vrot.lane.b32.xlu2 %v8120_v16, %s10236_s17  ;;  %v8226_v61 = vsub.f32 %v14933_v45, %v15279_v44  ;;  %v7990_v49 = vadd.f32 %v10130_v27, %v7989_v32 }
0x1604   : > { %8260 = vrot.lane.b32.xlu0 %v8225_v10, %s10237_s18  ;;  %v10134_v60 = vpop.eup %10133  ;;  %v7995_v10 = vand.u32 2147483647, %v7802_v33 }
0x1605   : > { %v8002_v18 = vmul.f32 %v10134_v60, %v7803_v0  ;;  %v7994_v43 = vsel %vm7993_vm4, %v10130_v27, %v7990_v49  ;;  %vm8007_vm6 = vweird.f32 %v10134_v60  ;;  %v8010_v27 = vand.u32 2147483647, %v7803_v0 }
0x1606   : > { %v8085_v3 = vpop.permute.xlu1 %8084  ;;  %v8155_v24 = vpop.permute.xlu2 %8154  ;;  %vm7996_vm5 = vcmp.eq.f32.partialorder %v7995_v10, 8.507059e+37  ;;  %vm8008_vm8 = vmor %vm8006_vm7, %vm8007_vm6 }
0x1607   : > { %v8121_v58 = vmul.f32 %v8085_v3, %v15277_v62  ;;  %v8003_v45 = vsub.f32 1.0, %v8002_v18  ;;  %v8196_v9 = vadd.f32 %v8155_v24, %v15099_v46  ;;  %v8012_v46 = vand.u32 2147483648, %v7803_v0  ;;  %v7578_v10 = vpop.f32.mrf.mxu2 }
0x1608   : > { %vm8011_vm9 = vcmp.eq.f32.partialorder %v8010_v27, 8.507059e+37 }
0x1609   : > { %8164 = vrot.lane.b32.xlu1 %v8121_v58, %s10236_s17  ;;  %v8004_v3 = vmul.f32 %v10134_v60, %v8003_v45  ;;  %v7998_v58 = vor.u32 1.1754944e-38, %v7997_v30  ;;  %v8013_v24 = vor.u32 1.1754944e-38, %v8012_v46 }
0x160b   : > { %v15293_v52 = vsel %vm7996_vm5, %v7998_v58, %v7994_v43  ;;  %v8005_v31 = vadd.f32 %v10134_v60, %v8004_v3 }
0x160c   : > { %8262 = vrot.lane.b32.xlu0 %v8226_v61, %s10237_s18 }
0x160d   : > { %v8009_v18 = vsel %vm8008_vm8, %v10134_v60, %v8005_v31 }
0x160e   : > { %v8157_v33 = vpop.permute.xlu2 %8156 }
0x160f   : > { %v8197_v32 = vadd.f32 %v8157_v33, %v15110_v35 }
0x1615   : > { %v8153_v25 = vpop.permute.xlu0 %8152 }
0x1616   : > { %v8195_v16 = vadd.f32 %v8153_v25, %v15085_v14 }
0x1618   : > { %10135 = vtanh.f32 %v8195_v16  ;;  %v15305_v16 = vsel %vm8011_vm9, %v8013_v24, %v8009_v18 }
0x1619   : > { %10137 = vpow2.f32 %v9322_v2 }
0x161a   : > { %10139 = vtanh.f32 %v8196_v9 }
0x161b   : > { %10141 = vtanh.f32 %v8197_v32 }
0x161d   : > { %v8087_v61 = vpop.permute.xlu1 %8086 }
0x161e   : > { %v15295_v14 = vpop.eup %10135  ;;  %v8122_v36 = vmul.f32 %v8087_v61, %v15293_v52 }
0x161f   : > { %v8227_v40 = vsub.f32 %v14942_v48, %v15295_v14  ;;  %v10138_v20 = vpop.eup %10137 }
0x1620   : > { %8166 = vrot.lane.b32.xlu1 %v8122_v36, %s10236_s17  ;;  %v15303_v25 = vpop.eup %10139  ;;  %v7804_v48 = vadd.f32 1.0, %v10138_v20 }
0x1621   : > { %8264 = vrot.lane.b32.xlu2 %v8227_v40, %s10237_s18  ;;  %v8228_v0 = vsub.f32 %v14948_v34, %v15303_v25  ;;  %v15314_v60 = vpop.eup %10141  ;;  %v15320_v34 = vadd.f32 %v7578_v10, %v15858_v5 }
0x1622   : > { %10143 = vrcp.f32 %v7804_v48  ;;  %v8229_v2 = vsub.f32 %v14957_v53, %v15314_v60  ;;  %v8027_v31 = vand.u32 2147483648, %v7804_v48  ;;  %vm8021_vm11 = vweird.f32 %v7804_v48 }
0x1623   : > { %v8025_v33 = vand.u32 2147483647, %v7804_v48 }
0x1624   : > { %v8028_v46 = vor.u32 1.1754944e-38, %v8027_v31 }
0x1625   : > { %v8089_v49 = vpop.permute.xlu1 %8088  ;;  %vm8026_vm13 = vcmp.eq.f32.partialorder %v8025_v33, 8.507059e+37 }
0x1626   : > { %v8123_v45 = vmul.f32 %v8089_v49, %v15305_v16 }
0x1627   : > { %v8255_v30 = vpop.permute.xlu0 %8254 }
0x1628   : > { %8168 = vrot.lane.b32.xlu1 %v8123_v45, %s10236_s17  ;;  %v8302_v35 = vmul.f32 %v8255_v30, %v15062_v29  ;;  %v10144_v9 = vpop.eup %10143  ;;  %v7741_v29 = vadd.f32 %v15231_v42, %v15320_v34 }
0x1629   : > { %8266 = vrot.lane.b32.xlu2 %v8228_v0, %s10237_s18  ;;  %v8017_v43 = vmul.f32 %v10144_v9, %v7804_v48  ;;  %vm8022_vm10 = vweird.f32 %v10144_v9 }
0x162a   : > { %8334 = vrot.lane.b32.xlu0 %v8302_v35, %s10238_s19  ;;  %v9323_v58 = vmul.f32 -1.442695, %v7741_v29  ;;  %vm8023_vm12 = vmor %vm8021_vm11, %vm8022_vm10 }
0x162b   : > { %v8018_v3 = vsub.f32 1.0, %v8017_v43 }
0x162c   : > { %10145 = vpow2.f32 %v9323_v58 }
0x162d   : > { %v8019_v61 = vmul.f32 %v10144_v9, %v8018_v3 }
0x162f   : > { %v8020_v36 = vadd.f32 %v10144_v9, %v8019_v61 }
0x1631   : > { %8268 = vrot.lane.b32.xlu2 %v8229_v2, %s10237_s18  ;;  %v8024_v40 = vsel %vm8023_vm12, %v10144_v9, %v8020_v36 }
0x1632   : > { %v10146_v53 = vpop.eup %10145  ;;  %v15324_v5 = vsel %vm8026_vm13, %v8028_v46, %v8024_v40 }
0x1633   : > { %v7805_v27 = vadd.f32 1.0, %v10146_v53 }
0x1635   : > { %10147 = vrcp.f32 %v7805_v27  ;;  %v8042_v3 = vand.u32 2147483648, %v7805_v27  ;;  %vm8036_vm15 = vweird.f32 %v7805_v27  ;;  %v8040_v58 = vand.u32 2147483647, %v7805_v27 }
0x1637   : > { %v8043_v36 = vor.u32 1.1754944e-38, %v8042_v3  ;;  %vm8041_vm2 = vcmp.eq.f32.partialorder %v8040_v58, 8.507059e+37 }
0x163b   : > { %v10148_v24 = vpop.eup %10147 }
0x163c   : > { %v8032_v45 = vmul.f32 %v10148_v24, %v7805_v27  ;;  %vm8037_vm14 = vweird.f32 %v10148_v24 }
0x163d   : > { %vm8038_vm1 = vmor %vm8036_vm15, %vm8037_vm14 }
0x163e   : > { %v8033_v35 = vsub.f32 1.0, %v8032_v45 }
0x1640   : > { %v8034_v10 = vmul.f32 %v10148_v24, %v8033_v35 }
0x1642   : > { %v8035_v43 = vadd.f32 %v10148_v24, %v8034_v10 }
0x1644   : > { %v8039_v61 = vsel %vm8038_vm1, %v10148_v24, %v8035_v43 }
0x1646   : > { %v8091_v32 = vpop.permute.xlu1 %8090  ;;  %v8159_v18 = vpop.permute.xlu2 %8158 }
0x1647   : > { %v8124_v42 = vmul.f32 %v8091_v32, %v15324_v5  ;;  %v8198_v20 = vadd.f32 %v8159_v18, %v15165_v1 }
0x1649   : > { %8170 = vrot.lane.b32.xlu1 %v8124_v42, %s10236_s17  ;;  %10149 = vtanh.f32 %v8198_v20 }
0x164f   : > { %v15329_v49 = vpop.eup %10149 }
0x1650   : > { %v8230_v48 = vsub.f32 %v14964_v13, %v15329_v49 }
0x1652   : > { %8270 = vrot.lane.b32.xlu2 %v8230_v48, %s10237_s18 }
0x1655   : > { %v8161_v0 = vpop.permute.xlu2 %8160 }
0x1656   : > { %v8199_v30 = vadd.f32 %v8161_v0, %v15170_v55 }
0x1658   : > { %10151 = vtanh.f32 %v8199_v30 }
0x165d   : > { %v8163_v2 = vpop.permute.xlu2 %8162 }
0x165e   : > { %v15335_v1 = vpop.eup %10151  ;;  %v8200_v55 = vadd.f32 %v8163_v2, %v15175_v6 }
0x165f   : > { %v8231_v9 = vsub.f32 %v14974_v12, %v15335_v1  ;;  %v8257_v29 = vpop.permute.xlu0 %8256  ;;  %v15343_v12 = vsel %vm8041_vm2, %v8043_v36, %v8039_v61 }
0x1660   : > { %v8303_v13 = vmul.f32 %v8257_v29, %v15087_v56  ;;  %10153 = vtanh.f32 %v8200_v55 }
0x1661   : > { %8272 = vrot.lane.b32.xlu2 %v8231_v9, %s10237_s18 }
0x1662   : > { %8336 = vrot.lane.b32.xlu0 %v8303_v13, %s10238_s19 }
0x1666   : > { %v8093_v31 = vpop.permute.xlu1 %8092  ;;  %v15347_v56 = vpop.eup %10153 }
0x1667   : > { %v8125_v33 = vmul.f32 %v8093_v31, %v15343_v12  ;;  %v8232_v6 = vsub.f32 %v14983_v23, %v15347_v56 }
0x1669   : > { %8172 = vrot.lane.b32.xlu1 %v8125_v33, %s10236_s17 }
0x166e   : > { %v8259_v53 = vpop.permute.xlu0 %8258 }
0x166f   : > { %v8304_v40 = vmul.f32 %v8259_v53, %v15105_v22  ;;  %v763_v53 = vld [vmem:[%s15597_s1 + $0x30] sm:$0xff] }
0x1670   : > { %8493 = vmatpush.msra.mxu1 %v763_v53 }
0x1671   : > { %8274 = vrot.lane.b32.xlu1 %v8232_v6, %s10237_s18  ;;  %8338 = vrot.lane.b32.xlu0 %v8304_v40, %s10238_s19 }
0x1676   : > { %v8261_v46 = vpop.permute.xlu0 %8260 }
0x1677   : > { %v8305_v27 = vmul.f32 %v8261_v46, %v15079_v15 }
0x1679   : > { %8340 = vrot.lane.b32.xlu0 %v8305_v27, %s10238_s19 }
0x167b   : > { %v8165_v32 = vpop.permute.xlu1 %8164  ;;  %v8265_v42 = vpop.permute.xlu2 %8264 }
0x167c   : > { %v8201_v18 = vadd.f32 %v8165_v32, %v15183_v63  ;;  %v8307_v20 = vmul.f32 %v8265_v42, %v15136_v41 }
0x167e   : > { %10155 = vtanh.f32 %v8201_v18  ;;  %8344 = vrot.lane.b32.xlu2 %v8307_v20, %s10238_s19  ;;  %v8263_v22 = vpop.permute.xlu0 %8262 }
0x167f   : > { %v8306_v23 = vmul.f32 %v8263_v22, %v15120_v39 }
0x1681   : > { %8342 = vrot.lane.b32.xlu0 %v8306_v23, %s10238_s19 }
0x1683   : > { %v8267_v24 = vpop.permute.xlu2 %8266 }
0x1684   : > { %v15361_v48 = vpop.eup %10155  ;;  %v8308_v15 = vmul.f32 %v8267_v24, %v15143_v11 }
0x1685   : > { %v8233_v45 = vsub.f32 %v14980_v26, %v15361_v48 }
0x1686   : > { %8346 = vrot.lane.b32.xlu2 %v8308_v15, %s10238_s19 }
0x1687   : > { %8276 = vrot.lane.b32.xlu1 %v8233_v45, %s10237_s18 }
0x168b   : > { %v8269_v41 = vpop.permute.xlu2 %8268 }
0x168c   : > { %v8309_v63 = vmul.f32 %v8269_v41, %v15153_v59 }
0x168e   : > { %8348 = vrot.lane.b32.xlu2 %v8309_v63, %s10238_s19 }
0x1692   : > { %v8167_v39 = vpop.permute.xlu1 %8166 }
0x1693   : > { %v8202_v0 = vadd.f32 %v8167_v39, %v15203_v21 }
0x1695   : > { %10157 = vtanh.f32 %v8202_v0 }
0x169a   : > { %v8169_v30 = vpop.permute.xlu1 %8168 }
0x169b   : > { %v15371_v35 = vpop.eup %10157  ;;  %v8203_v11 = vadd.f32 %v8169_v30, %v15228_v17 }
0x169c   : > { %v8234_v26 = vsub.f32 %v14991_v37, %v15371_v35  ;;  %v8335_v10 = vpop.permute.xlu0 %8334 }
0x169d   : > { %10159 = vtanh.f32 %v8203_v11  ;;  %v8382_v2 = vadd.f32 %v15155_v4, %v8335_v10  ;;  %v764_v11 = vld [vmem:[%s15597_s1 + $0x38] sm:$0xff] }
0x169e   : > { %8278 = vrot.lane.b32.xlu1 %v8234_v26, %s10237_s18 }
0x169f   : > { %8415 = vrot.lane.b32.xlu0 %v8382_v2, %s10235_s9 }
0x16a3   : > { %v15379_v59 = vpop.eup %10159 }
0x16a4   : > { %v8235_v21 = vsub.f32 %v14997_v7, %v15379_v59 }
0x16a6   : > { %8280 = vrot.lane.b32.xlu1 %v8235_v21, %s10237_s18 }
0x16ac   : > { %v8271_v9 = vpop.permute.xlu2 %8270 }
0x16ad   : > { %v8310_v17 = vmul.f32 %v8271_v9, %v15210_v47 }
0x16af   : > { %8350 = vrot.lane.b32.xlu2 %v8310_v17, %s10238_s19  ;;  %v15461_v17 = vld [vmem:[%s15597_s1 + $0x22] ss:$0 sm:$0xff] }
0x16bb   : > { %v8171_v37 = vpop.permute.xlu1 %8170  ;;  %v8273_v43 = vpop.permute.xlu2 %8272 }
0x16bc   : > { %v8204_v4 = vadd.f32 %v8171_v37, %v15287_v8  ;;  %v8311_v29 = vmul.f32 %v8273_v43, %v15245_v51 }
0x16be   : > { %10161 = vtanh.f32 %v8204_v4  ;;  %8352 = vrot.lane.b32.xlu2 %v8311_v29, %s10238_s19 }
0x16c4   : > { %v15389_v3 = vpop.eup %10161 }
0x16c5   : > { %v8236_v7 = vsub.f32 %v15003_v38, %v15389_v3 }
0x16c7   : > { %8282 = vrot.lane.b32.xlu1 %v8236_v7, %s10237_s18 }
0x16d4   : > { %v8337_v13 = vpop.permute.xlu0 %8336 }
0x16d5   : > { %v8383_v47 = vadd.f32 %v15212_v28, %v8337_v13 }
0x16d7   : > { %8417 = vrot.lane.b32.xlu0 %v8383_v47, %s10235_s9 }
0x16d8   : > { %v8345_v51 = vpop.permute.xlu2 %8344 }
0x16db   : > { %v8173_v58 = vpop.permute.xlu1 %8172 }
0x16dc   : > { %v8205_v8 = vadd.f32 %v8173_v58, %v15320_v34 }
0x16de   : > { %10163 = vtanh.f32 %v8205_v8 }
0x16e0   : > { %v8347_v28 = vpop.permute.xlu2 %8346 }
0x16e1   : > { %v8388_v40 = vadd.f32 %v15303_v25, %v8347_v28 }
0x16e3   : > { %v8275_v55 = vpop.permute.xlu1 %8274  ;;  %v8339_v61 = vpop.permute.xlu0 %8338 }
0x16e4   : > { %v15397_v36 = vpop.eup %10163  ;;  %v8312_v31 = vmul.f32 %v8275_v55, %v15266_v57  ;;  %v8384_v38 = vadd.f32 %v15247_v19, %v8339_v61 }
0x16e5   : > { %v8237_v33 = vsub.f32 %v15018_v54, %v15397_v36  ;;  %v762_v54 = vld [vmem:[%s15597_s1 + $0x28] sm:$0xff] }
0x16e6   : > { %8354 = vrot.lane.b32.xlu2 %v8312_v31, %s10238_s19  ;;  %8419 = vrot.lane.b32.xlu0 %v8384_v38, %s10235_s9 }
0x16e7   : > { %8284 = vrot.lane.b32.xlu1 %v8237_v33, %s10237_s18  ;;  %8494 = vmatpush.msra.mxu1 %v762_v54 }
0x16e8   : > { %v8349_v27 = vpop.permute.xlu2 %8348 }
0x16e9   : > { %v8389_v32 = vadd.f32 %v15314_v60, %v8349_v27 }
0x16eb   : > { %v8341_v34 = vpop.permute.xlu0 %8340 }
0x16ec   : > { %v8385_v57 = vadd.f32 %v15262_v50, %v8341_v34  ;;  %v8387_v50 = vadd.f32 %v15295_v14, %v8345_v51 }
0x16ee   : > { %8427 = vrot.lane.b32.xlu2 %v8388_v40, %s10235_s9  ;;  %8421 = vrot.lane.b32.xlu0 %v8385_v57, %s10235_s9 }
0x16f3   : > { %v8343_v19 = vpop.permute.xlu0 %8342 }
0x16f4   : > { %v8386_v6 = vadd.f32 %v15279_v44, %v8343_v19 }
0x16f6   : > { %8423 = vrot.lane.b32.xlu0 %v8386_v6, %s10235_s9 }
0x16f9   : > { %v8277_v46 = vpop.permute.xlu1 %8276 }
0x16fa   : > { %v8313_v25 = vmul.f32 %v8277_v46, %v15277_v62 }
0x16fc   : > { %8356 = vrot.lane.b32.xlu1 %v8313_v25, %s10238_s19 }
0x16fe   : > { %8425 = vrot.lane.b32.xlu0 %v8387_v50, %s10235_s9 }
0x1704   : > { %8429 = vrot.lane.b32.xlu1 %v8389_v32, %s10235_s9 }
0x1709   : > { %v8351_v62 = vpop.permute.xlu2 %8350 }
0x170a   : > { %v8390_v14 = vadd.f32 %v15329_v49, %v8351_v62 }
0x1710   : > { %v8279_v42 = vpop.permute.xlu1 %8278 }
0x1711   : > { %v8314_v18 = vmul.f32 %v8279_v42, %v15293_v52  ;;  %v8416_v44 = vpop.permute.xlu0 %8415 }
0x1712   : > { %9324 = vmatmul.msk.f32.vlgmr.msra.gmra.mxu1 %vm1028_vm0, %v8416_v44 }
0x1713   : > { %8358 = vrot.lane.b32.xlu0 %v8314_v18, %s10238_s19 }
0x1718   : > { %v8281_v20 = vpop.permute.xlu1 %8280  ;;  %v8353_v60 = vpop.permute.xlu2 %8352 }
0x1719   : > { %v8315_v22 = vmul.f32 %v8281_v20, %v15305_v16  ;;  %v8391_v23 = vadd.f32 %v15335_v1, %v8353_v60  ;;  %v15498_v60 = vld [vmem:[%s15597_s1 + $0x23] ss:$0 sm:$0xff] }
0x171b   : > { %8360 = vrot.lane.b32.xlu2 %v8315_v22, %s10238_s19  ;;  %8431 = vrot.lane.b32.xlu0 %v8390_v14, %s10235_s9 }
0x1723   : > { %8433 = vrot.lane.b32.xlu2 %v8391_v23, %s10235_s9 }
0x1739   : > { %v8283_v52 = vpop.permute.xlu1 %8282 }
0x173a   : > { %v8316_v24 = vmul.f32 %v8283_v52, %v15324_v5 }
0x173c   : > { %8362 = vrot.lane.b32.xlu1 %v8316_v24, %s10238_s19 }
0x1740   : > { %v8355_v15 = vpop.permute.xlu2 %8354 }
0x1741   : > { %v8392_v45 = vadd.f32 %v15347_v56, %v8355_v15  ;;  %v8674_v15 = vlaneseq }
0x1744   : > { %8435 = vrot.lane.b32.xlu1 %v8392_v45, %s10235_s9 }
0x1748   : > { %v8428_v56 = vpop.permute.xlu2 %8427 }
0x1749   : > { %v8418_v16 = vpop.permute.xlu0 %8417 }
0x174a   : > { %9325 = vmatmul.msk.f32.gmra.mxu1 %vm1028_vm0, %v8418_v16  ;;  %v15502_v16 = vand.u32 127, %v8674_v15 }
0x174c   : > { %vm8676_vm3 = vcmp.eq.s32.totalorder %v15502_v16, 1 }
0x1758   : > { %v8420_v49 = vpop.permute.xlu0 %8419 }
0x1759   : > { %v8285_v41 = vpop.permute.xlu1 %8284  ;;  %9326 = vmatmul.msk.f32.gmra.mxu1 %vm1028_vm0, %v8420_v49 }
0x175a   : > { %v8317_v1 = vmul.f32 %v8285_v41, %v15343_v12  ;;  %v765_v12 = vld [vmem:[%s15597_s1 + $0x40] sm:$0xff] }
0x175b   : > { %8623 = vmatpush.msra.mxu3 %v765_v12 }
0x175c   : > { %8364 = vrot.lane.b32.xlu0 %v8317_v1, %s10238_s19 }
0x175d   : > { %8624 = vmatpush.msra.mxu3 %v764_v11 }
0x1760   : > { %v8422_v63 = vpop.permute.xlu0 %8421 }
0x1761   : > { %9327 = vmatmul.msk.f32.gmra.mxu1 %vm1028_vm0, %v8422_v63 }
0x1768   : > { %v8424_v5 = vpop.permute.xlu0 %8423 }
0x1769   : > { %9328 = vmatmul.msk.f32.gmra.mxu1 %vm1028_vm0, %v8424_v5 }
0x176e   : > { %v8357_v39 = vpop.permute.xlu1 %8356 }
0x176f   : > { %v8393_v0 = vadd.f32 %v15361_v48, %v8357_v39 }
0x1770   : > { %v8426_v30 = vpop.permute.xlu0 %8425 }
0x1771   : > { %8437 = vrot.lane.b32.xlu2 %v8393_v0, %s10235_s9  ;;  %9329 = vmatmul.msk.f32.gmra.mxu1 %vm1028_vm0, %v8426_v30 }
0x1775   : > { %v8361_v26 = vpop.permute.xlu2 %8360 }
0x1776   : > { %v8395_v10 = vadd.f32 %v15379_v59, %v8361_v26  ;;  %v8430_v48 = vpop.permute.xlu1 %8429 }
0x1778   : > { %8441 = vrot.lane.b32.xlu1 %v8395_v10, %s10235_s9 }
0x1779   : > { %9330 = vmatmul.msk.f32.gmra.mxu1 %vm1028_vm0, %v8428_v56 }
0x177d   : > { %v8434_v4 = vpop.permute.xlu2 %8433 }
0x1781   : > { %9331 = vmatmul.msk.f32.gmra.mxu1 %vm1028_vm0, %v8430_v48 }
0x1785   : > { %v8359_v2 = vpop.permute.xlu0 %8358 }
0x1786   : > { %v8394_v21 = vadd.f32 %v15371_v35, %v8359_v2 }
0x1788   : > { %8439 = vrot.lane.b32.xlu0 %v8394_v21, %s10235_s9 }
0x178d   : > { %v8432_v9 = vpop.permute.xlu0 %8431 }
0x178e   : > { %9332 = vmatmul.msk.f32.gmra.mxu1 %vm1028_vm0, %v8432_v9 }
0x178f   : > { %v8496_v59 = vpop.f32.mrf.mxu1 }
0x1790   : > { %v8497_v37 = vadd.f32 %v15461_v17, %v8496_v59 }
0x1792   : > { %v8544_v43 = vmax.f32 %v8497_v37, 0.0 }
0x1794   : > { %9340 = vmatmul.msk.f32.vlgmr.msra.gmra.mxu3 %vm1028_vm0, %v8544_v43 }
0x1796   : > { %9333 = vmatmul.msk.f32.gmra.mxu1 %vm1028_vm0, %v8434_v4 }
0x17ae   : > { %v8363_v35 = vpop.permute.xlu1 %8362 }
0x17af   : > { %v8396_v29 = vadd.f32 %v15389_v3, %v8363_v35 }
0x17b1   : > { %8443 = vrot.lane.b32.xlu2 %v8396_v29, %s10235_s9 }
0x17b6   : > { %v8436_v7 = vpop.permute.xlu1 %8435 }
0x17b7   : > { %9334 = vmatmul.msk.f32.gmra.mxu1 %vm1028_vm0, %v8436_v7 }
0x17c7   : > { %v8499_v13 = vpop.f32.mrf.mxu1 }
0x17c8   : > { %v8500_v47 = vadd.f32 %v15461_v17, %v8499_v13 }
0x17ca   : > { %v8545_v58 = vmax.f32 %v8500_v47, 0.0 }
0x17cb   : > { %v8438_v8 = vpop.permute.xlu2 %8437 }
0x17cc   : > { %9335 = vmatmul.msk.f32.gmra.mxu1 %vm1028_vm0, %v8438_v8  ;;  %9341 = vmatmul.msk.f32.gmra.mxu3 %vm1028_vm0, %v8545_v58 }
0x17ce   : > { %v8365_v51 = vpop.permute.xlu0 %8364 }
0x17cf   : > { %v8397_v55 = vadd.f32 %v15397_v36, %v8365_v51 }
0x17d1   : > { %8445 = vrot.lane.b32.xlu0 %v8397_v55, %s10235_s9  ;;  %s8810_s9 = sshll.u32 %s8803_s12, 4 }
0x17d2   : > { %p749_p8 = scmp.lt.s32.totalorder %s8810_s9, 31 }
0x17d4   : > { %s15874_s9 = smov (!%p749_p8, %s8810_s9), 31 }
0x17d5   : > { %s8811_s11 = sshll.u32 %s15874_s9, 3 }
0x17d6   : > { %v8502_v3 = vpop.f32.mrf.mxu1  ;;  %s15508_s14 = scalar_lea.vmem %s15598_s2, %s8811_s11 }
0x17d7   : > { %v8503_v61 = vadd.f32 %v15461_v17, %v8502_v3 }
0x17d9   : > { %v8546_v31 = vmax.f32 %v8503_v61, 0.0 }
0x17db   : > { %9342 = vmatmul.msk.f32.gmra.mxu3 %vm1028_vm0, %v8546_v31 }
0x17de   : > { %v8505_v38 = vpop.f32.mrf.mxu1 }
0x17df   : > { %v8506_v33 = vadd.f32 %v15461_v17, %v8505_v38 }
0x17e1   : > { %v8547_v28 = vmax.f32 %v8506_v33, 0.0 }
0x17e3   : > { %9343 = vmatmul.msk.f32.gmra.mxu3 %vm1028_vm0, %v8547_v28 }
0x17e6   : > { %v8508_v34 = vpop.f32.mrf.mxu1 }
0x17e7   : > { %v8509_v53 = vadd.f32 %v15461_v17, %v8508_v34 }
0x17e9   : > { %v8548_v40 = vmax.f32 %v8509_v53, 0.0 }
0x17ea   : > { %v8442_v42 = vpop.permute.xlu1 %8441 }
0x17eb   : > { %9344 = vmatmul.msk.f32.gmra.mxu3 %vm1028_vm0, %v8548_v40 }
0x17ee   : > { %v8511_v36 = vpop.f32.mrf.mxu1 }
0x17ef   : > { %v8512_v57 = vadd.f32 %v15461_v17, %v8511_v36 }
0x17f1   : > { %v8549_v54 = vmax.f32 %v8512_v57, 0.0 }
0x17f3   : > { %9345 = vmatmul.msk.f32.gmra.mxu3 %vm1028_vm0, %v8549_v54 }
0x17f6   : > { %v8514_v19 = vpop.f32.mrf.mxu1 }
0x17f7   : > { %v8515_v6 = vadd.f32 %v15461_v17, %v8514_v19 }
0x17f9   : > { %v8550_v46 = vmax.f32 %v8515_v6, 0.0 }
0x17fa   : > { %v8440_v25 = vpop.permute.xlu0 %8439 }
0x17fb   : > { %9336 = vmatmul.msk.f32.gmra.mxu1 %vm1028_vm0, %v8440_v25  ;;  %9346 = vmatmul.msk.f32.gmra.mxu3 %vm1028_vm0, %v8550_v46 }
0x17fe   : > { %v8517_v50 = vpop.f32.mrf.mxu1 }
0x17ff   : > { %v8518_v27 = vadd.f32 %v15461_v17, %v8517_v50 }
0x1801   : > { %v8551_v32 = vmax.f32 %v8518_v27, 0.0 }
0x1803   : > { %9337 = vmatmul.msk.f32.gmra.mxu1 %vm1028_vm0, %v8442_v42  ;;  %9347 = vmatmul.msk.f32.gmra.mxu3 %vm1028_vm0, %v8551_v32 }
0x180b   : > { %v8444_v18 = vpop.permute.xlu2 %8443  ;;  %v8520_v44 = vpop.f32.mrf.mxu1 }
0x180c   : > { %v8521_v62 = vadd.f32 %v15461_v17, %v8520_v44  ;;  %9338 = vmatmul.msk.f32.gmra.mxu1 %vm1028_vm0, %v8444_v18 }
0x180e   : > { %v8552_v20 = vmax.f32 %v8521_v62, 0.0 }
0x1810   : > { %9348 = vmatmul.msk.f32.gmra.mxu3 %vm1028_vm0, %v8552_v20 }
0x1813   : > { %v8523_v14 = vpop.f32.mrf.mxu1 }
0x1814   : > { %v8524_v22 = vadd.f32 %v15461_v17, %v8523_v14 }
0x1816   : > { %v8553_v23 = vmax.f32 %v8524_v22, 0.0 }
0x1817   : > { %v8626_v52 = vpop.f32.mrf.mxu3 }
0x1818   : > { %9349 = vmatmul.msk.f32.gmra.mxu3 %vm1028_vm0, %v8553_v23  ;;  %v8627_v24 = vadd.f32 %v15498_v60, %v8626_v52 }
0x181a   : > { %v8677_v45 = vmul.f32 1.442695, %v8627_v24 }
0x181c   : > { %10165 = vpow2.f32 %v8677_v45 }
0x1822   : > { %v10166_v49 = vpop.eup %10165 }
0x1823   : > { %v8709_v41 = vsel %vm8676_vm3, %v10166_v49, %v8627_v24 }
0x1824   : > { %8725 = vst [vmem:[%s15508_s14] sm:$0xff] %v8709_v41 }
0x1834   : > { %v8526_v1 = vpop.f32.mrf.mxu1 }
0x1835   : > { %v8527_v63 = vadd.f32 %v15461_v17, %v8526_v1 }
0x1837   : > { %v8554_v5 = vmax.f32 %v8527_v63, 0.0 }
0x1839   : > { %9350 = vmatmul.msk.f32.gmra.mxu3 %vm1028_vm0, %v8554_v5 }
0x1843   : > { %v8446_v56 = vpop.permute.xlu0 %8445 }
0x1844   : > { %9339 = vmatmul.msk.f32.gmra.mxu1 %vm1028_vm0, %v8446_v56 }
0x1849   : > { %v8529_v39 = vpop.f32.mrf.mxu1 }
0x184a   : > { %v8530_v0 = vadd.f32 %v15461_v17, %v8529_v39 }
0x184c   : > { %v8555_v30 = vmax.f32 %v8530_v0, 0.0 }
0x184e   : > { %9351 = vmatmul.msk.f32.gmra.mxu3 %vm1028_vm0, %v8555_v30 }
0x184f   : > { %v8629_v12 = vpop.f32.mrf.mxu3 }
0x1850   : > { %v8630_v11 = vadd.f32 %v15498_v60, %v8629_v12 }
0x1852   : > { %v8679_v26 = vmul.f32 1.442695, %v8630_v11 }
0x1854   : > { %10167 = vpow2.f32 %v8679_v26 }
0x185a   : > { %v10168_v10 = vpop.eup %10167 }
0x185b   : > { %v8710_v48 = vsel %vm8676_vm3, %v10168_v10, %v8630_v11 }
0x185c   : > { %8726 = vst [vmem:[%s15508_s14 + $0x8] sm:$0xff] %v8710_v48 }
0x185e   : > { %v8632_v2 = vpop.f32.mrf.mxu3 }
0x185f   : > { %v8633_v21 = vadd.f32 %v15498_v60, %v8632_v2 }
0x1861   : > { %v8681_v9 = vmul.f32 1.442695, %v8633_v21 }
0x1863   : > { %10169 = vpow2.f32 %v8681_v9 }
0x1866   : > { %v8635_v59 = vpop.f32.mrf.mxu3 }
0x1867   : > { %v8636_v37 = vadd.f32 %v15498_v60, %v8635_v59 }
0x1869   : > { %v10170_v43 = vpop.eup %10169  ;;  %v8683_v4 = vmul.f32 1.442695, %v8636_v37 }
0x186a   : > { %v8711_v35 = vsel %vm8676_vm3, %v10170_v43, %v8633_v21 }
0x186b   : > { %8727 = vst [vmem:[%s15508_s14 + $0x10] sm:$0xff] %v8711_v35  ;;  %10171 = vpow2.f32 %v8683_v4 }
0x186e   : > { %v8638_v29 = vpop.f32.mrf.mxu3 }
0x186f   : > { %v8639_v7 = vadd.f32 %v15498_v60, %v8638_v29 }
0x1871   : > { %v10172_v13 = vpop.eup %10171  ;;  %v8685_v47 = vmul.f32 1.442695, %v8639_v7 }
0x1872   : > { %v8712_v58 = vsel %vm8676_vm3, %v10172_v13, %v8636_v37 }
0x1873   : > { %8728 = vst [vmem:[%s15508_s14 + $0x18] sm:$0xff] %v8712_v58  ;;  %10173 = vpow2.f32 %v8685_v47 }
0x1876   : > { %v8641_v8 = vpop.f32.mrf.mxu3 }
0x1877   : > { %v8642_v51 = vadd.f32 %v15498_v60, %v8641_v8 }
0x1878   : > { %v8532_v55 = vpop.f32.mrf.mxu1 }
0x1879   : > { %v10174_v3 = vpop.eup %10173  ;;  %v8687_v61 = vmul.f32 1.442695, %v8642_v51  ;;  %v8533_v31 = vadd.f32 %v15461_v17, %v8532_v55 }
0x187a   : > { %v8713_v38 = vsel %vm8676_vm3, %v10174_v3, %v8639_v7 }
0x187b   : > { %8729 = vst [vmem:[%s15508_s14 + $0x20] sm:$0xff] %v8713_v38  ;;  %10175 = vpow2.f32 %v8687_v61  ;;  %v8556_v33 = vmax.f32 %v8533_v31, 0.0 }
0x187d   : > { %9352 = vmatmul.msk.f32.gmra.mxu3 %vm1028_vm0, %v8556_v33 }
0x187e   : > { %v8644_v28 = vpop.f32.mrf.mxu3 }
0x187f   : > { %v8645_v34 = vadd.f32 %v15498_v60, %v8644_v28 }
0x1880   : > { %v8535_v53 = vpop.f32.mrf.mxu1 }
0x1881   : > { %v10176_v40 = vpop.eup %10175  ;;  %v8689_v36 = vmul.f32 1.442695, %v8645_v34  ;;  %v8536_v57 = vadd.f32 %v15461_v17, %v8535_v53 }
0x1882   : > { %v8714_v54 = vsel %vm8676_vm3, %v10176_v40, %v8642_v51 }
0x1883   : > { %8730 = vst [vmem:[%s15508_s14 + $0x28] sm:$0xff] %v8714_v54  ;;  %10177 = vpow2.f32 %v8689_v36  ;;  %v8557_v19 = vmax.f32 %v8536_v57, 0.0 }
0x1885   : > { %9353 = vmatmul.msk.f32.gmra.mxu3 %vm1028_vm0, %v8557_v19 }
0x1886   : > { %v8647_v6 = vpop.f32.mrf.mxu3 }
0x1887   : > { %v8648_v46 = vadd.f32 %v15498_v60, %v8647_v6 }
0x1889   : > { %v10178_v25 = vpop.eup %10177  ;;  %v8691_v50 = vmul.f32 1.442695, %v8648_v46  ;;  %v8538_v27 = vpop.f32.mrf.mxu1 }
0x188a   : > { %v8715_v32 = vsel %vm8676_vm3, %v10178_v25, %v8645_v34  ;;  %v8539_v42 = vadd.f32 %v15461_v17, %v8538_v27 }
0x188b   : > { %8731 = vst [vmem:[%s15508_s14 + $0x30] sm:$0xff] %v8715_v32  ;;  %10179 = vpow2.f32 %v8691_v50 }
0x188c   : > { %v8558_v18 = vmax.f32 %v8539_v42, 0.0 }
0x188e   : > { %9354 = vmatmul.msk.f32.gmra.mxu3 %vm1028_vm0, %v8558_v18 }
0x1891   : > { %v10180_v44 = vpop.eup %10179 }
0x1892   : > { %v8716_v62 = vsel %vm8676_vm3, %v10180_v44, %v8648_v46 }
0x1893   : > { %8732 = vst [vmem:[%s15508_s14 + $0x38] sm:$0xff] %v8716_v62  ;;  %v8650_v20 = vpop.f32.mrf.mxu3 }
0x1894   : > { %v8651_v14 = vadd.f32 %v15498_v60, %v8650_v20 }
0x1896   : > { %v8693_v22 = vmul.f32 1.442695, %v8651_v14 }
0x1898   : > { %10181 = vpow2.f32 %v8693_v22 }
0x189b   : > { %v8653_v23 = vpop.f32.mrf.mxu3 }
0x189c   : > { %v8654_v52 = vadd.f32 %v15498_v60, %v8653_v23 }
0x189e   : > { %v10182_v24 = vpop.eup %10181  ;;  %v8695_v15 = vmul.f32 1.442695, %v8654_v52 }
0x189f   : > { %v8717_v45 = vsel %vm8676_vm3, %v10182_v24, %v8651_v14 }
0x18a0   : > { %8733 = vst [vmem:[%s15508_s14 + $0x40] sm:$0xff] %v8717_v45  ;;  %10183 = vpow2.f32 %v8695_v15 }
0x18a6   : > { %v10184_v49 = vpop.eup %10183 }
0x18a7   : > { %v8718_v41 = vsel %vm8676_vm3, %v10184_v49, %v8654_v52 }
0x18a8   : > { %8734 = vst [vmem:[%s15508_s14 + $0x48] sm:$0xff] %v8718_v41 }
0x18bc   : > { %v8656_v1 = vpop.f32.mrf.mxu3 }
0x18bd   : > { %v8657_v63 = vadd.f32 %v15498_v60, %v8656_v1 }
0x18bf   : > { %v8697_v5 = vmul.f32 1.442695, %v8657_v63 }
0x18c1   : > { %10185 = vpow2.f32 %v8697_v5  ;;  %v8541_v56 = vpop.f32.mrf.mxu1 }
0x18c2   : > { %v8542_v39 = vadd.f32 %v15461_v17, %v8541_v56 }
0x18c4   : > { %v8559_v0 = vmax.f32 %v8542_v39, 0.0 }
0x18c6   : > { %9355 = vmatmul.msk.f32.gmra.mxu3 %vm1028_vm0, %v8559_v0 }
0x18c7   : > { %v10186_v30 = vpop.eup %10185 }
0x18c8   : > { %v8719_v12 = vsel %vm8676_vm3, %v10186_v30, %v8657_v63 }
0x18c9   : > { %8735 = vst [vmem:[%s15508_s14 + $0x50] sm:$0xff] %v8719_v12 }
0x18d1   : > { %v8659_v11 = vpop.f32.mrf.mxu3 }
0x18d2   : > { %v8660_v26 = vadd.f32 %v15498_v60, %v8659_v11 }
0x18d4   : > { %v8699_v10 = vmul.f32 1.442695, %v8660_v26 }
0x18d6   : > { %10187 = vpow2.f32 %v8699_v10 }
0x18dc   : > { %v10188_v48 = vpop.eup %10187 }
0x18dd   : > { %v8720_v2 = vsel %vm8676_vm3, %v10188_v48, %v8660_v26 }
0x18de   : > { %8736 = vst [vmem:[%s15508_s14 + $0x58] sm:$0xff] %v8720_v2 }
0x1900   : > { %v8662_v17 = vpop.f32.mrf.mxu3 }
0x1901   : > { %v8663_v21 = vadd.f32 %v15498_v60, %v8662_v17 }
0x1903   : > { %v8701_v9 = vmul.f32 1.442695, %v8663_v21 }
0x1905   : > { %10189 = vpow2.f32 %v8701_v9 }
0x1908   : > { %v8665_v59 = vpop.f32.mrf.mxu3 }
0x1909   : > { %v8666_v37 = vadd.f32 %v15498_v60, %v8665_v59 }
0x190b   : > { %v10190_v43 = vpop.eup %10189  ;;  %v8703_v4 = vmul.f32 1.442695, %v8666_v37 }
0x190c   : > { %v8721_v35 = vsel %vm8676_vm3, %v10190_v43, %v8663_v21 }
0x190d   : > { %8737 = vst [vmem:[%s15508_s14 + $0x60] sm:$0xff] %v8721_v35  ;;  %10191 = vpow2.f32 %v8703_v4 }
0x1911   : > { %v8668_v29 = vpop.f32.mrf.mxu3 }
0x1912   : > { %v8669_v7 = vadd.f32 %v15498_v60, %v8668_v29 }
0x1913   : > { %v10192_v13 = vpop.eup %10191 }
0x1914   : > { %v8722_v47 = vsel %vm8676_vm3, %v10192_v13, %v8666_v37  ;;  %v8705_v58 = vmul.f32 1.442695, %v8669_v7 }
0x1915   : > { %8738 = vst [vmem:[%s15508_s14 + $0x68] sm:$0xff] %v8722_v47 }
0x1916   : > { %10193 = vpow2.f32 %v8705_v58 }
0x191c   : > { %v10194_v8 = vpop.eup %10193 }
0x191d   : > { %v8723_v51 = vsel %vm8676_vm3, %v10194_v8, %v8669_v7 }
0x191e   : > { %8739 = vst [vmem:[%s15508_s14 + $0x70] sm:$0xff] %v8723_v51 }
0x1949   : > { %v8671_v55 = vpop.f32.mrf.mxu3 }
0x194a   : > { %v8672_v3 = vadd.f32 %v15498_v60, %v8671_v55 }
0x194c   : > { %v8707_v61 = vmul.f32 1.442695, %v8672_v3 }
0x194e   : > { %10195 = vpow2.f32 %v8707_v61 }
0x1954   : > { %v10196_v31 = vpop.eup %10195 }
0x1955   : > { %v8724_v38 = vsel %vm8676_vm3, %v10196_v31, %v8672_v3 }
0x1956   : > { %8740 = vst [vmem:[%s15508_s14 + $0x78] sm:$0xff] %v8724_v38 }
0x1957 PF: > { %p9_p9 = scmp.ge.s32.totalorder %s10271_s13, 4   ;;  %s15870_s9 = smov %s10228_s10 }
0x1958   : > { %s15871_s10 = smov %s10280_s16  ;;  %s15872_s11 = smov %s10271_s13 }
0x1959   :  { %11 = sbr.rel (!%p9_p9) target bundleno = 2 (0x2), region = 109 }

</bundles_post_ra>
